<compile_context>
chip_gen: v6e
topology: v6e:2x2x1
jax: 0.10.0
libtpu: 0.0.40
codegen_flags: <defaults>
</compile_context>

<pallas_src>
import functools

import jax
import jax.numpy as jnp
from jax.experimental import pallas as pl
from jax.experimental.pallas import tpu as pltpu


# ----------------------------------------------------------------------------
# Conv GEMM (single K step): out = LeakyReLU(BN?(a @ w + bias)), stored bf16.
# ----------------------------------------------------------------------------
def _conv_gemm_kernel(a_ref, w_ref, bias_ref, o_ref, *, batch_norm):
    # n_k == 1 fast path: no zero-init / read-modify-write accumulator.
    r = jnp.dot(a_ref[...], w_ref[...],
                preferred_element_type=jnp.float32) + bias_ref[...]
    if batch_norm:
        # BatchNorm2d over (N, H, W) per channel == per-column stats over the
        # rows of this full-M block (training-mode stats, gamma=1, beta=0).
        mean = jnp.mean(r, axis=0, keepdims=True)
        var = jnp.mean((r - mean) ** 2, axis=0, keepdims=True)
        r = (r - mean) * jax.lax.rsqrt(var + 1e-5)
    r = jnp.where(r >= 0, r, 0.2 * r)                      # LeakyReLU(0.2)
    o_ref[...] = r.astype(o_ref.dtype)


def _pick_m_tile(M, prefer=512):
    if M <= prefer:
        return M
    for t in (prefer, 256, 128, 64, 32, 16, 8):
        if M % t == 0:
            return t
    return M


def conv_gemm(a, w, bias, *, batch_norm, out_dtype=jnp.bfloat16):
    """out = LeakyReLU(BN?(a @ w + bias)); a:(M,K), w:(K,N) bf16, bias:(1,N) f32."""
    M, K = a.shape
    K2, N = w.shape
    assert K == K2
    # TODO(synk): BN keeps the full M block resident (stats need every row);
    # switch to a two-pass BN if batch ever grows large enough to stress VMEM.
    tm = M if batch_norm else _pick_m_tile(M)
    assert M % tm == 0
    kernel = functools.partial(_conv_gemm_kernel, batch_norm=batch_norm)
    return pl.pallas_call(
        kernel,
        out_shape=jax.ShapeDtypeStruct((M, N), out_dtype),
        grid_spec=pltpu.PrefetchScalarGridSpec(
            num_scalar_prefetch=0,
            grid=(M // tm,),
            in_specs=[
                pl.BlockSpec((tm, K), lambda m: (m, 0)),
                pl.BlockSpec((K, N), lambda m: (0, 0)),
                pl.BlockSpec((1, N), lambda m: (0, 0)),
            ],
            out_specs=pl.BlockSpec((tm, N), lambda m: (m, 0)),
        ),
        compiler_params=pltpu.CompilerParams(
            dimension_semantics=("parallel",)),
    )(a.astype(jnp.bfloat16), w, bias)


# ----------------------------------------------------------------------------
# fc1 (Linear 8192->1024) + BatchNorm1d + LeakyReLU + fc2 (1024->512 padded)
# + ln (500->1) + sigmoid, all fused in one GEMM with a last-K-step epilogue.
# ----------------------------------------------------------------------------
def _fc1_head_kernel(a_ref, w3_ref, b3_ref, w4_ref, b4_ref, w5_ref, b5_ref,
                     feats_ref, out_ref, acc_ref, *, n_k):
    k = pl.program_id(0)

    @pl.when(k == 0)
    def _():
        acc_ref[...] = jnp.zeros_like(acc_ref)

    acc_ref[...] += jnp.dot(a_ref[...], w3_ref[...],
                            preferred_element_type=jnp.float32)

    @pl.when(k == n_k - 1)
    def _():
        # fc1 epilogue: bias + BatchNorm1d(1024) (training-mode batch stats,
        # gamma=1, beta=0, eps=1e-5) + LeakyReLU(0.2), all in f32.
        r = acc_ref[...] + b3_ref[...]
        mean = jnp.mean(r, axis=0, keepdims=True)
        var = jnp.mean((r - mean) ** 2, axis=0, keepdims=True)
        r = (r - mean) * jax.lax.rsqrt(var + 1e-5)
        r = jnp.where(r >= 0, r, 0.2 * r)
        # fc2: Linear(1024 -> 500), columns zero-padded to 512 (lane aligned).
        feats = jnp.dot(r.astype(jnp.bfloat16), w4_ref[...],
                        preferred_element_type=jnp.float32) + b4_ref[...]
        feats_ref[...] = feats
        # ln: Linear(500 -> 1) as broadcast multiply + lane reduction (an N=1
        # MXU dot would be wasteful); padded w5 columns are zero.
        logit = jnp.sum(feats * w5_ref[...], axis=-1, keepdims=True) + b5_ref[...]
        # overflow-safe sigmoid
        z = jnp.exp(-jnp.abs(logit))
        out_ref[...] = jnp.where(logit >= 0, 1.0 / (1.0 + z), z / (1.0 + z))


def fc1_head(h_flat, w3, b3, w4, b4, w5, b5, *, tk=1024):
    M, K = h_flat.shape
    K2, N = w3.shape                     # N = 1024
    NP = w4.shape[1]                     # 512 (padded from 500)
    assert K == K2 and K % tk == 0
    n_k = K // tk
    kernel = functools.partial(_fc1_head_kernel, n_k=n_k)
    cost = pl.CostEstimate(
        flops=2 * M * K * N + 2 * M * N * NP + 2 * M * NP,
        transcendentals=M + N + NP,
        bytes_accessed=(K * N + N * NP) * 2 + M * K * 2
                       + (M * NP + M + N + NP + 1) * 4,
    )
    feats, out = pl.pallas_call(
        kernel,
        out_shape=(jax.ShapeDtypeStruct((M, NP), jnp.float32),
                   jax.ShapeDtypeStruct((M, 1), jnp.float32)),
        grid_spec=pltpu.PrefetchScalarGridSpec(
            num_scalar_prefetch=0,
            grid=(n_k,),
            in_specs=[
                pl.BlockSpec((M, tk), lambda k: (0, k)),      # activations
                pl.BlockSpec((tk, N), lambda k: (k, 0)),      # w3 tiles (streamed)
                pl.BlockSpec((1, N), lambda k: (0, 0)),       # b3
                pl.BlockSpec((N, NP), lambda k: (0, 0)),      # w4 (resident, ~1 MiB)
                pl.BlockSpec((1, NP), lambda k: (0, 0)),      # b4
                pl.BlockSpec((1, NP), lambda k: (0, 0)),      # w5 row
                pl.BlockSpec((1, 1), lambda k: (0, 0)),       # b5
            ],
            out_specs=(pl.BlockSpec((M, NP), lambda k: (0, 0)),
                       pl.BlockSpec((M, 1), lambda k: (0, 0))),
            scratch_shapes=[pltpu.VMEM((M, N), jnp.float32)],
        ),
        compiler_params=pltpu.CompilerParams(
            dimension_semantics=("arbitrary",)),
        cost_estimate=cost,
    )(h_flat.astype(jnp.bfloat16), w3, b3, w4, b4, w5, b5)
    return feats, out


# ----------------------------------------------------------------------------
# Glue: im2col for conv (kernel=4, stride=2, pad=1)
# TODO(synk): the stride-2 window gather cannot be expressed by a BlockSpec
#             index_map, so patch extraction stays plain-JAX glue feeding the
#             conv GEMM instead of being fused into the kernel.
# ----------------------------------------------------------------------------
def im2col(x, k=4, s=2, p=1):
    # x: (B, H, W, C)  ->  (B*OH*OW, k*k*C), plus (B, OH, OW)
    B, H, W, C = x.shape
    xp = jnp.pad(x, ((0, 0), (p, p), (p, p), (0, 0)))
    OH = (H + 2 * p - k) // s + 1
    OW = (W + 2 * p - k) // s + 1
    patches = []
    for kh in range(k):
        for kw in range(k):
            patches.append(xp[:, kh:kh + s * OH:s, kw:kw + s * OW:s, :])
    pat = jnp.stack(patches, axis=3)               # (B, OH, OW, k*k, C)
    return pat.reshape(B * OH * OW, k * k * C), (B, OH, OW)


# ----------------------------------------------------------------------------
# Discriminator (input_dim=1, output_dim=1, input_size=32)
# ----------------------------------------------------------------------------
def init_params(key):
    ks = jax.random.split(key, 5)
    std = 0.02

    def nrm(k, shape):
        return std * jax.random.normal(k, shape, jnp.float32)

    p = {}
    # conv1: Conv2d(1, 64, 4, 2, 1) -> weight stored as (kh*kw*Cin, Cout) bf16
    p["w1"] = nrm(ks[0], (4 * 4 * 1, 64)).astype(jnp.bfloat16)
    p["b1"] = jnp.zeros((1, 64), jnp.float32)
    # conv2: Conv2d(64, 128, 4, 2, 1)
    p["w2"] = nrm(ks[1], (4 * 4 * 64, 128)).astype(jnp.bfloat16)
    p["b2"] = jnp.zeros((1, 128), jnp.float32)
    # fc1: Linear(128*8*8, 1024).  PyTorch's view(-1, 128*8*8) flattens the
    # conv output in NCHW order (row index c*64 + h*8 + w); we feed fc1 the
    # NHWC-flattened activation directly, so permute the weight rows ONCE at
    # init to NHWC order (row index (h*8 + w)*128 + c) — removes the runtime
    # flatten transpose.
    w3_nchw = nrm(ks[2], (128 * 8 * 8, 1024))
    hh, ww, cc = jnp.meshgrid(jnp.arange(8), jnp.arange(8), jnp.arange(128),
                              indexing="ij")
    perm = (cc * 64 + hh * 8 + ww).reshape(-1)     # NHWC row -> NCHW source row
    p["w3"] = w3_nchw[perm].astype(jnp.bfloat16)
    p["b3"] = jnp.zeros((1, 1024), jnp.float32)
    # fc2: Linear(1024, 500) — output columns zero-padded 500 -> 512
    w4 = nrm(ks[3], (1024, 500))
    p["w4"] = jnp.pad(w4, ((0, 0), (0, 12))).astype(jnp.bfloat16)
    p["b4"] = jnp.zeros((1, 512), jnp.float32)
    # ln: Linear(500, 1) stored as a zero-padded (1, 512) f32 row
    w5 = nrm(ks[4], (500, 1)).reshape(1, 500)
    p["w5"] = jnp.pad(w5, ((0, 0), (0, 12)))
    p["b5"] = jnp.zeros((1, 1), jnp.float32)
    return p


def discriminator_forward(params, x_nchw):
    # x_nchw: (B, 1, 32, 32) -> NHWC
    x = jnp.transpose(x_nchw, (0, 2, 3, 1)).astype(jnp.float32)

    # conv1 + LeakyReLU(0.2)   (fused GEMM epilogue, bf16 output)
    cols, (B, OH, OW) = im2col(x)                                   # (B*256, 16)
    h = conv_gemm(cols, params["w1"], params["b1"], batch_norm=False)
    h = h.reshape(B, OH, OW, 64)                                    # bf16

    # conv2 + bias + BatchNorm2d(128) + LeakyReLU(0.2)  (BN fused, bf16 output)
    cols2, (B, OH2, OW2) = im2col(h)                                # (B*64, 1024) bf16
    h2 = conv_gemm(cols2, params["w2"], params["b2"], batch_norm=True)

    # NHWC flatten (w3 rows were permuted at init to match) — plain reshape.
    h2 = h2.reshape(B, OH2 * OW2 * 128)                             # (B, 8192) bf16

    # fc1 + BN1d + LeakyReLU + fc2 + ln + sigmoid, all in ONE fused kernel.
    feats_pad, out = fc1_head(h2, params["w3"], params["b3"],
                              params["w4"], params["b4"],
                              params["w5"], params["b5"])
    feats = feats_pad[:, :500]                                      # drop padding
    return out, feats


if __name__ == "__main__":
    key = jax.random.PRNGKey(0)
    pkey, xkey = jax.random.split(key)
    params = init_params(pkey)
    # input implied by the module: (batch, input_dim=1, input_size=32, input_size=32)
    x = jax.random.normal(xkey, (2, 1, 32, 32), jnp.float32)

    fwd = jax.jit(discriminator_forward)
    out, feats = fwd(params, x)
    out = jax.block_until_ready(out)
    feats = jax.block_until_ready(feats)

    assert out.shape == (2, 1) and feats.shape == (2, 500)
    assert bool(jnp.all(jnp.isfinite(out)))
    assert bool(jnp.all(jnp.isfinite(feats)))
    assert bool(jnp.all((out >= 0.0) & (out <= 1.0)))
    print("KERNEL_OK")
</pallas_src>

<mosaic_0001>
module attributes {stable_mosaic.version = 11 : i64} {
  func.func @_conv_gemm_kernel(%arg0: i32, %arg1: memref<512x16xbf16, #tpu.memory_space<vmem>>, %arg2: memref<16x64xbf16, #tpu.memory_space<vmem>>, %arg3: memref<1x64xf32, #tpu.memory_space<vmem>>, %arg4: memref<512x64xbf16, #tpu.memory_space<vmem>>) attributes {dimension_semantics = [#tpu.dimension_semantics<parallel>], iteration_bounds = array<i64: 1>, scalar_prefetch = 0 : i64, scratch_operands = 0 : i64, tpu.core_type = #tpu.core_type<tc>, window_params = [{transform_indices = @transform_0, window_bounds = array<i64: 512, 16>}, {pipeline_mode = #tpu.pipeline_mode<synchronous>, transform_indices = @transform_1, window_bounds = array<i64: 16, 64>}, {pipeline_mode = #tpu.pipeline_mode<synchronous>, transform_indices = @transform_2, window_bounds = array<i64: 1, 64>}, {transform_indices = @transform_3, window_bounds = array<i64: 512, 64>}]} {
    %c0 = arith.constant 0 : index
    %c0_0 = arith.constant 0 : index
    %0 = vector.load %arg1[%c0, %c0_0] : memref<512x16xbf16, #tpu.memory_space<vmem>>, vector<512x16xbf16>
    %c0_1 = arith.constant 0 : index
    %c0_2 = arith.constant 0 : index
    %1 = vector.load %arg2[%c0_1, %c0_2] : memref<16x64xbf16, #tpu.memory_space<vmem>>, vector<16x64xbf16>
    %cst = arith.constant dense<0.000000e+00> : vector<512x64xf32>
    %2 = tpu.matmul %0, %1, %cst {dimension_numbers = #tpu.dot_dimension_numbers<[1], [0], [0], [1], [0, 0, 1, 1], [], []>} : vector<512x16xbf16>, vector<16x64xbf16>, vector<512x64xf32> -> vector<512x64xf32>
    %c0_3 = arith.constant 0 : index
    %c0_4 = arith.constant 0 : index
    %3 = vector.load %arg3[%c0_3, %c0_4] : memref<1x64xf32, #tpu.memory_space<vmem>>, vector<1x64xf32>
    %4 = vector.broadcast %3 : vector<1x64xf32> to vector<512x64xf32>
    %5 = arith.addf %2, %4 : vector<512x64xf32>
    %cst_5 = arith.constant 0.000000e+00 : f32
    %6 = vector.broadcast %cst_5 : f32 to vector<512x64xf32>
    %7 = arith.cmpf oge, %5, %6 : vector<512x64xf32>
    %cst_6 = arith.constant 2.000000e-01 : f32
    %8 = vector.broadcast %cst_6 : f32 to vector<512x64xf32>
    %9 = arith.mulf %8, %5 : vector<512x64xf32>
    %10 = arith.select %7, %5, %9 : vector<512x64xi1>, vector<512x64xf32>
    %11 = arith.truncf %10 : vector<512x64xf32> to vector<512x64xbf16>
    %c0_7 = arith.constant 0 : index
    %c0_8 = arith.constant 0 : index
    %12 = vector.load %arg4[%c0_7, %c0_8] : memref<512x64xbf16, #tpu.memory_space<vmem>>, vector<512x64xbf16>
    tpu.vector_store %arg4[%c0_7, %c0_8], %11 {strides = array<i32>} : memref<512x64xbf16, #tpu.memory_space<vmem>>, vector<512x64xbf16>,
    return
  }
  func.func @transform_0(%arg0: i32) -> (i32, i32) {
    %c0_i32 = arith.constant 0 : i32
    %c0_i32_0 = arith.constant 0 : i32
    return %arg0, %c0_i32 : i32, i32
  }
  func.func @transform_1(%arg0: i32) -> (i32, i32) {
    %c0_i32 = arith.constant 0 : i32
    %c0_i32_0 = arith.constant 0 : i32
    %c0_i32_1 = arith.constant 0 : i32
    return %c0_i32, %c0_i32_0 : i32, i32
  }
  func.func @transform_2(%arg0: i32) -> (i32, i32) {
    %c0_i32 = arith.constant 0 : i32
    %c0_i32_0 = arith.constant 0 : i32
    %c0_i32_1 = arith.constant 0 : i32
    return %c0_i32, %c0_i32_0 : i32, i32
  }
  func.func @transform_3(%arg0: i32) -> (i32, i32) {
    %c0_i32 = arith.constant 0 : i32
    %c0_i32_0 = arith.constant 0 : i32
    return %arg0, %c0_i32 : i32, i32
  }
}

module attributes {stable_mosaic.version = 11 : i64} {
  func.func @_fc1_head_kernel(%arg0: i32, %arg1: memref<2x1024xbf16, #tpu.memory_space<vmem>>, %arg2: memref<1024x1024xbf16, #tpu.memory_space<vmem>>, %arg3: memref<1x1024xf32, #tpu.memory_space<vmem>>, %arg4: memref<1024x512xbf16, #tpu.memory_space<vmem>>, %arg5: memref<1x512xf32, #tpu.memory_space<vmem>>, %arg6: memref<1x512xf32, #tpu.memory_space<vmem>>, %arg7: memref<1x1xf32, #tpu.memory_space<vmem>>, %arg8: memref<2x512xf32, #tpu.memory_space<vmem>>, %arg9: memref<2x1xf32, #tpu.memory_space<vmem>>, %arg10: memref<2x1024xf32, #tpu.memory_space<vmem>>) attributes {dimension_semantics = [#tpu.dimension_semantics<arbitrary>], iteration_bounds = array<i64: 8>, scalar_prefetch = 0 : i64, scratch_operands = 1 : i64, tpu.core_type = #tpu.core_type<tc>, window_params = [{transform_indices = @transform_0, window_bounds = array<i64: 2, 1024>}, {transform_indices = @transform_1, window_bounds = array<i64: 1024, 1024>}, {pipeline_mode = #tpu.pipeline_mode<synchronous>, transform_indices = @transform_2, window_bounds = array<i64: 1, 1024>}, {pipeline_mode = #tpu.pipeline_mode<synchronous>, transform_indices = @transform_3, window_bounds = array<i64: 1024, 512>}, {pipeline_mode = #tpu.pipeline_mode<synchronous>, transform_indices = @transform_4, window_bounds = array<i64: 1, 512>}, {pipeline_mode = #tpu.pipeline_mode<synchronous>, transform_indices = @transform_5, window_bounds = array<i64: 1, 512>}, {pipeline_mode = #tpu.pipeline_mode<synchronous>, transform_indices = @transform_6, window_bounds = array<i64: 1, 1>}, {pipeline_mode = #tpu.pipeline_mode<synchronous>, transform_indices = @transform_7, window_bounds = array<i64: 2, 512>}, {pipeline_mode = #tpu.pipeline_mode<synchronous>, transform_indices = @transform_8, window_bounds = array<i64: 2, 1>}]} {
    %c0_i32 = arith.constant 0 : i32
    %0 = arith.cmpi eq, %arg0, %c0_i32 : i32
    %1 = arith.extui %0 : i1 to i32
    %c0_i32_0 = arith.constant 0 : i32
    %2 = arith.cmpi ne, %1, %c0_i32_0 : i32
    scf.if %2 {
      %cst_9 = arith.constant 0.000000e+00 : f32
      %12 = vector.broadcast %cst_9 : f32 to vector<2x1024xf32>
      %c0_10 = arith.constant 0 : index
      %c0_11 = arith.constant 0 : index
      %13 = vector.load %arg10[%c0_10, %c0_11] : memref<2x1024xf32, #tpu.memory_space<vmem>>, vector<2x1024xf32>
      tpu.vector_store %arg10[%c0_10, %c0_11], %12 {strides = array<i32>} : memref<2x1024xf32, #tpu.memory_space<vmem>>, vector<2x1024xf32>,
    } else {
    }
    %c0 = arith.constant 0 : index
    %c0_1 = arith.constant 0 : index
    %3 = vector.load %arg10[%c0, %c0_1] : memref<2x1024xf32, #tpu.memory_space<vmem>>, vector<2x1024xf32>
    %c0_2 = arith.constant 0 : index
    %c0_3 = arith.constant 0 : index
    %4 = vector.load %arg1[%c0_2, %c0_3] : memref<2x1024xbf16, #tpu.memory_space<vmem>>, vector<2x1024xbf16>
    %c0_4 = arith.constant 0 : index
    %c0_5 = arith.constant 0 : index
    %5 = vector.load %arg2[%c0_4, %c0_5] : memref<1024x1024xbf16, #tpu.memory_space<vmem>>, vector<1024x1024xbf16>
    %cst = arith.constant dense<0.000000e+00> : vector<2x1024xf32>
    %6 = tpu.matmul %4, %5, %cst {dimension_numbers = #tpu.dot_dimension_numbers<[1], [0], [0], [1], [0, 0, 1, 1], [], []>} : vector<2x1024xbf16>, vector<1024x1024xbf16>, vector<2x1024xf32> -> vector<2x1024xf32>
    %7 = arith.addf %3, %6 : vector<2x1024xf32>
    %c0_6 = arith.constant 0 : index
    %c0_7 = arith.constant 0 : index
    %8 = vector.load %arg10[%c0_6, %c0_7] : memref<2x1024xf32, #tpu.memory_space<vmem>>, vector<2x1024xf32>
    tpu.vector_store %arg10[%c0_6, %c0_7], %7 {strides = array<i32>} : memref<2x1024xf32, #tpu.memory_space<vmem>>, vector<2x1024xf32>,
    %c7_i32 = arith.constant 7 : i32
    %9 = arith.cmpi eq, %arg0, %c7_i32 : i32
    %10 = arith.extui %9 : i1 to i32
    %c0_i32_8 = arith.constant 0 : i32
    %11 = arith.cmpi ne, %10, %c0_i32_8 : i32
    scf.if %11 {
      %c0_9 = arith.constant 0 : index
      %c0_10 = arith.constant 0 : index
      %12 = vector.load %arg10[%c0_9, %c0_10] : memref<2x1024xf32, #tpu.memory_space<vmem>>, vector<2x1024xf32>
      %c0_11 = arith.constant 0 : index
      %c0_12 = arith.constant 0 : index
      %13 = vector.load %arg3[%c0_11, %c0_12] : memref<1x1024xf32, #tpu.memory_space<vmem>>, vector<1x1024xf32>
      %14 = vector.broadcast %13 : vector<1x1024xf32> to vector<2x1024xf32>
      %15 = arith.addf %12, %14 : vector<2x1024xf32>
      %cst_13 = arith.constant dense<0.000000e+00> : vector<1024xf32>
      %16 = vector.multi_reduction <add>, %15, %cst_13 [0] : vector<2x1024xf32> to vector<1024xf32>
      %17 = vector.shape_cast %16 : vector<1024xf32> to vector<1x1024xf32>
      %cst_14 = arith.constant 2.000000e+00 : f32
      %18 = vector.broadcast %cst_14 : f32 to vector<1x1024xf32>
      %19 = arith.divf %17, %18 : vector<1x1024xf32>
      %20 = vector.broadcast %19 : vector<1x1024xf32> to vector<2x1024xf32>
      %21 = arith.subf %15, %20 : vector<2x1024xf32>
      %22 = arith.mulf %21, %21 : vector<2x1024xf32>
      %cst_15 = arith.constant dense<0.000000e+00> : vector<1024xf32>
      %23 = vector.multi_reduction <add>, %22, %cst_15 [0] : vector<2x1024xf32> to vector<1024xf32>
      %24 = vector.shape_cast %23 : vector<1024xf32> to vector<1x1024xf32>
      %cst_16 = arith.constant 2.000000e+00 : f32
      %25 = vector.broadcast %cst_16 : f32 to vector<1x1024xf32>
      %26 = arith.divf %24, %25 : vector<1x1024xf32>
      %27 = vector.broadcast %19 : vector<1x1024xf32> to vector<2x1024xf32>
      %28 = arith.subf %15, %27 : vector<2x1024xf32>
      %cst_17 = arith.constant 9.99999974E-6 : f32
      %29 = vector.broadcast %cst_17 : f32 to vector<1x1024xf32>
      %30 = arith.addf %26, %29 : vector<1x1024xf32>
      %31 = math.rsqrt %30 : vector<1x1024xf32>
      %32 = vector.broadcast %31 : vector<1x1024xf32> to vector<2x1024xf32>
      %33 = arith.mulf %28, %32 : vector<2x1024xf32>
      %cst_18 = arith.constant 0.000000e+00 : f32
      %34 = vector.broadcast %cst_18 : f32 to vector<2x1024xf32>
      %35 = arith.cmpf oge, %33, %34 : vector<2x1024xf32>
      %cst_19 = arith.constant 2.000000e-01 : f32
      %36 = vector.broadcast %cst_19 : f32 to vector<2x1024xf32>
      %37 = arith.mulf %36, %33 : vector<2x1024xf32>
      %38 = arith.select %35, %33, %37 : vector<2x1024xi1>, vector<2x1024xf32>
      %39 = arith.truncf %38 : vector<2x1024xf32> to vector<2x1024xbf16>
      %c0_20 = arith.constant 0 : index
      %c0_21 = arith.constant 0 : index
      %40 = vector.load %arg4[%c0_20, %c0_21] : memref<1024x512xbf16, #tpu.memory_space<vmem>>, vector<1024x512xbf16>
      %cst_22 = arith.constant dense<0.000000e+00> : vector<2x512xf32>
      %41 = tpu.matmul %39, %40, %cst_22 {dimension_numbers = #tpu.dot_dimension_numbers<[1], [0], [0], [1], [0, 0, 1, 1], [], []>} : vector<2x1024xbf16>, vector<1024x512xbf16>, vector<2x512xf32> -> vector<2x512xf32>
      %c0_23 = arith.constant 0 : index
      %c0_24 = arith.constant 0 : index
      %42 = vector.load %arg5[%c0_23, %c0_24] : memref<1x512xf32, #tpu.memory_space<vmem>>, vector<1x512xf32>
      %43 = vector.broadcast %42 : vector<1x512xf32> to vector<2x512xf32>
      %44 = arith.addf %41, %43 : vector<2x512xf32>
      %c0_25 = arith.constant 0 : index
      %c0_26 = arith.constant 0 : index
      %45 = vector.load %arg8[%c0_25, %c0_26] : memref<2x512xf32, #tpu.memory_space<vmem>>, vector<2x512xf32>
      tpu.vector_store %arg8[%c0_25, %c0_26], %44 {strides = array<i32>} : memref<2x512xf32, #tpu.memory_space<vmem>>, vector<2x512xf32>,
      %c0_27 = arith.constant 0 : index
      %c0_28 = arith.constant 0 : index
      %46 = vector.load %arg6[%c0_27, %c0_28] : memref<1x512xf32, #tpu.memory_space<vmem>>, vector<1x512xf32>
      %47 = vector.broadcast %46 : vector<1x512xf32> to vector<2x512xf32>
      %48 = arith.mulf %44, %47 : vector<2x512xf32>
      %cst_29 = arith.constant dense<0.000000e+00> : vector<2xf32>
      %49 = vector.multi_reduction <add>, %48, %cst_29 [1] : vector<2x512xf32> to vector<2xf32>
      %50 = vector.shape_cast %49 : vector<2xf32> to vector<2x1xf32>
      %c0_30 = arith.constant 0 : index
      %c0_31 = arith.constant 0 : index
      %51 = vector.load %arg7[%c0_30, %c0_31] : memref<1x1xf32, #tpu.memory_space<vmem>>, vector<1x1xf32>
      %52 = vector.broadcast %51 : vector<1x1xf32> to vector<2x1xf32>
      %53 = arith.addf %50, %52 : vector<2x1xf32>
      %54 = math.absf %53 : vector<2x1xf32>
      %cst_32 = arith.constant 0.000000e+00 : f32
      %55 = vector.broadcast %cst_32 : f32 to vector<2x1xf32>
      %56 = arith.subf %55, %54 : vector<2x1xf32>
      %57 = math.exp %56 : vector<2x1xf32>
      %cst_33 = arith.constant 0.000000e+00 : f32
      %58 = vector.broadcast %cst_33 : f32 to vector<2x1xf32>
      %59 = arith.cmpf oge, %53, %58 : vector<2x1xf32>
      %cst_34 = arith.constant 1.000000e+00 : f32
      %60 = vector.broadcast %cst_34 : f32 to vector<2x1xf32>
      %61 = arith.addf %60, %57 : vector<2x1xf32>
      %cst_35 = arith.constant 1.000000e+00 : f32
      %62 = vector.broadcast %cst_35 : f32 to vector<2x1xf32>
      %63 = arith.divf %62, %61 : vector<2x1xf32>
      %cst_36 = arith.constant 1.000000e+00 : f32
      %64 = vector.broadcast %cst_36 : f32 to vector<2x1xf32>
      %65 = arith.addf %64, %57 : vector<2x1xf32>
      %66 = arith.divf %57, %65 : vector<2x1xf32>
      %67 = arith.select %59, %63, %66 : vector<2x1xi1>, vector<2x1xf32>
      %c0_37 = arith.constant 0 : index
      %c0_38 = arith.constant 0 : index
      %68 = vector.load %arg9[%c0_37, %c0_38] : memref<2x1xf32, #tpu.memory_space<vmem>>, vector<2x1xf32>
      tpu.vector_store %arg9[%c0_37, %c0_38], %67 {strides = array<i32>} : memref<2x1xf32, #tpu.memory_space<vmem>>, vector<2x1xf32>,
    } else {
    }
    return
  }
  func.func @transform_0(%arg0: i32) -> (i32, i32) {
    %c0_i32 = arith.constant 0 : i32
    %c0_i32_0 = arith.constant 0 : i32
    return %c0_i32, %arg0 : i32, i32
  }
  func.func @transform_1(%arg0: i32) -> (i32, i32) {
    %c0_i32 = arith.constant 0 : i32
    %c0_i32_0 = arith.constant 0 : i32
    return %arg0, %c0_i32 : i32, i32
  }
  func.func @transform_2(%arg0: i32) -> (i32, i32) {
    %c0_i32 = arith.constant 0 : i32
    %c0_i32_0 = arith.constant 0 : i32
    %c0_i32_1 = arith.constant 0 : i32
    return %c0_i32, %c0_i32_0 : i32, i32
  }
  func.func @transform_3(%arg0: i32) -> (i32, i32) {
    %c0_i32 = arith.constant 0 : i32
    %c0_i32_0 = arith.constant 0 : i32
    %c0_i32_1 = arith.constant 0 : i32
    return %c0_i32, %c0_i32_0 : i32, i32
  }
  func.func @transform_4(%arg0: i32) -> (i32, i32) {
    %c0_i32 = arith.constant 0 : i32
    %c0_i32_0 = arith.constant 0 : i32
    %c0_i32_1 = arith.constant 0 : i32
    return %c0_i32, %c0_i32_0 : i32, i32
  }
  func.func @transform_5(%arg0: i32) -> (i32, i32) {
    %c0_i32 = arith.constant 0 : i32
    %c0_i32_0 = arith.constant 0 : i32
    %c0_i32_1 = arith.constant 0 : i32
    return %c0_i32, %c0_i32_0 : i32, i32
  }
  func.func @transform_6(%arg0: i32) -> (i32, i32) {
    %c0_i32 = arith.constant 0 : i32
    %c0_i32_0 = arith.constant 0 : i32
    %c0_i32_1 = arith.constant 0 : i32
    return %c0_i32, %c0_i32_0 : i32, i32
  }
  func.func @transform_7(%arg0: i32) -> (i32, i32) {
    %c0_i32 = arith.constant 0 : i32
    %c0_i32_0 = arith.constant 0 : i32
    %c0_i32_1 = arith.constant 0 : i32
    return %c0_i32, %c0_i32_0 : i32, i32
  }
  func.func @transform_8(%arg0: i32) -> (i32, i32) {
    %c0_i32 = arith.constant 0 : i32
    %c0_i32_0 = arith.constant 0 : i32
    %c0_i32_1 = arith.constant 0 : i32
    return %c0_i32, %c0_i32_0 : i32, i32
  }
}

module attributes {stable_mosaic.version = 11 : i64} {
  func.func @_conv_gemm_kernel(%arg0: i32, %arg1: memref<128x1024xbf16, #tpu.memory_space<vmem>>, %arg2: memref<1024x128xbf16, #tpu.memory_space<vmem>>, %arg3: memref<1x128xf32, #tpu.memory_space<vmem>>, %arg4: memref<128x128xbf16, #tpu.memory_space<vmem>>) attributes {dimension_semantics = [#tpu.dimension_semantics<parallel>], iteration_bounds = array<i64: 1>, scalar_prefetch = 0 : i64, scratch_operands = 0 : i64, tpu.core_type = #tpu.core_type<tc>, window_params = [{transform_indices = @transform_0, window_bounds = array<i64: 128, 1024>}, {pipeline_mode = #tpu.pipeline_mode<synchronous>, transform_indices = @transform_1, window_bounds = array<i64: 1024, 128>}, {pipeline_mode = #tpu.pipeline_mode<synchronous>, transform_indices = @transform_2, window_bounds = array<i64: 1, 128>}, {transform_indices = @transform_3, window_bounds = array<i64: 128, 128>}]} {
    %c0 = arith.constant 0 : index
    %c0_0 = arith.constant 0 : index
    %0 = vector.load %arg1[%c0, %c0_0] : memref<128x1024xbf16, #tpu.memory_space<vmem>>, vector<128x1024xbf16>
    %c0_1 = arith.constant 0 : index
    %c0_2 = arith.constant 0 : index
    %1 = vector.load %arg2[%c0_1, %c0_2] : memref<1024x128xbf16, #tpu.memory_space<vmem>>, vector<1024x128xbf16>
    %cst = arith.constant dense<0.000000e+00> : vector<128x128xf32>
    %2 = tpu.matmul %0, %1, %cst {dimension_numbers = #tpu.dot_dimension_numbers<[1], [0], [0], [1], [0, 0, 1, 1], [], []>} : vector<128x1024xbf16>, vector<1024x128xbf16>, vector<128x128xf32> -> vector<128x128xf32>
    %c0_3 = arith.constant 0 : index
    %c0_4 = arith.constant 0 : index
    %3 = vector.load %arg3[%c0_3, %c0_4] : memref<1x128xf32, #tpu.memory_space<vmem>>, vector<1x128xf32>
    %4 = vector.broadcast %3 : vector<1x128xf32> to vector<128x128xf32>
    %5 = arith.addf %2, %4 : vector<128x128xf32>
    %cst_5 = arith.constant dense<0.000000e+00> : vector<128xf32>
    %6 = vector.multi_reduction <add>, %5, %cst_5 [0] : vector<128x128xf32> to vector<128xf32>
    %7 = vector.shape_cast %6 : vector<128xf32> to vector<1x128xf32>
    %cst_6 = arith.constant 1.280000e+02 : f32
    %8 = vector.broadcast %cst_6 : f32 to vector<1x128xf32>
    %9 = arith.divf %7, %8 : vector<1x128xf32>
    %10 = vector.broadcast %9 : vector<1x128xf32> to vector<128x128xf32>
    %11 = arith.subf %5, %10 : vector<128x128xf32>
    %12 = arith.mulf %11, %11 : vector<128x128xf32>
    %cst_7 = arith.constant dense<0.000000e+00> : vector<128xf32>
    %13 = vector.multi_reduction <add>, %12, %cst_7 [0] : vector<128x128xf32> to vector<128xf32>
    %14 = vector.shape_cast %13 : vector<128xf32> to vector<1x128xf32>
    %cst_8 = arith.constant 1.280000e+02 : f32
    %15 = vector.broadcast %cst_8 : f32 to vector<1x128xf32>
    %16 = arith.divf %14, %15 : vector<1x128xf32>
    %17 = vector.broadcast %9 : vector<1x128xf32> to vector<128x128xf32>
    %18 = arith.subf %5, %17 : vector<128x128xf32>
    %cst_9 = arith.constant 9.99999974E-6 : f32
    %19 = vector.broadcast %cst_9 : f32 to vector<1x128xf32>
    %20 = arith.addf %16, %19 : vector<1x128xf32>
    %21 = math.rsqrt %20 : vector<1x128xf32>
    %22 = vector.broadcast %21 : vector<1x128xf32> to vector<128x128xf32>
    %23 = arith.mulf %18, %22 : vector<128x128xf32>
    %cst_10 = arith.constant 0.000000e+00 : f32
    %24 = vector.broadcast %cst_10 : f32 to vector<128x128xf32>
    %25 = arith.cmpf oge, %23, %24 : vector<128x128xf32>
    %cst_11 = arith.constant 2.000000e-01 : f32
    %26 = vector.broadcast %cst_11 : f32 to vector<128x128xf32>
    %27 = arith.mulf %26, %23 : vector<128x128xf32>
    %28 = arith.select %25, %23, %27 : vector<128x128xi1>, vector<128x128xf32>
    %29 = arith.truncf %28 : vector<128x128xf32> to vector<128x128xbf16>
    %c0_12 = arith.constant 0 : index
    %c0_13 = arith.constant 0 : index
    %30 = vector.load %arg4[%c0_12, %c0_13] : memref<128x128xbf16, #tpu.memory_space<vmem>>, vector<128x128xbf16>
    tpu.vector_store %arg4[%c0_12, %c0_13], %29 {strides = array<i32>} : memref<128x128xbf16, #tpu.memory_space<vmem>>, vector<128x128xbf16>,
    return
  }
  func.func @transform_0(%arg0: i32) -> (i32, i32) {
    %c0_i32 = arith.constant 0 : i32
    %c0_i32_0 = arith.constant 0 : i32
    return %arg0, %c0_i32 : i32, i32
  }
  func.func @transform_1(%arg0: i32) -> (i32, i32) {
    %c0_i32 = arith.constant 0 : i32
    %c0_i32_0 = arith.constant 0 : i32
    %c0_i32_1 = arith.constant 0 : i32
    return %c0_i32, %c0_i32_0 : i32, i32
  }
  func.func @transform_2(%arg0: i32) -> (i32, i32) {
    %c0_i32 = arith.constant 0 : i32
    %c0_i32_0 = arith.constant 0 : i32
    %c0_i32_1 = arith.constant 0 : i32
    return %c0_i32, %c0_i32_0 : i32, i32
  }
  func.func @transform_3(%arg0: i32) -> (i32, i32) {
    %c0_i32 = arith.constant 0 : i32
    %c0_i32_0 = arith.constant 0 : i32
    return %arg0, %c0_i32 : i32, i32
  }
}

</mosaic_0001>

<bundles_post_ra>
// kernel: discriminator_forward.3
= control target key start
LH: loop header
LB: loop body
LE: loop exit
PB: predicated region body
PF: predicated region fallthrough
CT: control target
= control target key end

     0   :  { %8 = vsyncpa [#allocation3], 0  ;;  %s2068_s0 = inlined_call_operand.vmem [shape: bf16[512,16], index: 0, kind: input, shape index: {}]   ;;  %s2069_s1 = inlined_call_operand.hbm [shape: bf16[16,64], index: 1, kind: input, shape index: {}]   ;;  %s2070_s2 = inlined_call_operand.hbm [shape: f32[1,64], index: 2, kind: input, shape index: {}]   ;;  %s2071_s3 = inlined_call_operand.vmem [shape: bf16[512,64], index: 3, kind: output, shape index: {}]  }
   0x1   :  { %9 = vsyncpa [#allocation5], 0  ;;  %s1561_s12 = smov [#allocation2]  }
   0x2   :  { %s17_s13 = sshll.u32 %s1561_s12, 4  ;;  %s18_s13 = int_to_ptr.vmem [resolvable:$true] %s17_s13 }
   0x3   :  { %s1525_s14 = scalar_lea.vmem %s18_s13, 128  ;;  %p1530_p1 = scmp.lt.s32.totalorder %s18_s13, %s18_s13 }
   0x4   :  { %p1526_p0 = scmp.ne.s32.totalorder %s18_s13, %s1525_s14  ;;  %p1531_p2 = scmp.lt.s32.totalorder %s1525_s14, %s1525_s14 }
   0x6   :  { %p1532_p3 = por %p1531_p2, %p1530_p1 }
   0x8   :  { %p1533_p4 = pnand %p1532_p3, %p1526_p0 }
   0xa   :  { %1536 = shalt.err (!%p1533_p4)
}
   0xb   :  { %s1562_s15 = smov 64   ;;  %s1563_s16 = smov 4  }
   0xc   :  { %23 = dma.hbm_to_vmem [thread:$0]  %s2069_s1, 128, %s18_s13, [#allocation3], %s1562_s15, %s1562_s15, %s1563_s16  }
   0xd   :  { %s1564_s19 = smov [#allocation4]  }
   0xe   :  { %s30_s20 = sshll.u32 %s1564_s19, 4  ;;  %s31_s20 = int_to_ptr.vmem [resolvable:$true] %s30_s20 }
   0xf   :  { %s1545_s21 = scalar_lea.vmem %s31_s20, 16  ;;  %s1549_s22 = scalar_lea.vmem %s31_s20, 32 }
  0x10   :  { %p1546_p5 = scmp.ne.s32.totalorder %s31_s20, %s1545_s21  ;;  %p1550_p6 = scmp.lt.s32.totalorder %s31_s20, %s31_s20 }
  0x11   :  { %p1551_p7 = scmp.lt.s32.totalorder %s1549_s22, %s1545_s21 }
  0x13   :  { %p1552_p8 = por %p1551_p7, %p1550_p6 }
  0x15   :  { %p1553_p9 = pnand %p1552_p8, %p1546_p5 }
  0x17   :  { %1556 = shalt.err (!%p1553_p9)
}
  0x18   :  { %33 = dma.hbm_to_vmem [thread:$0]  %s2070_s2, 16, %s31_s20, [#allocation5]  }
  0x19   :  { %1557 = dma.done.wait [#allocation3], 128  }
  0x1a   :  { %1558 = vsyncadd [#allocation3], 4294967168 }
  0x1b   :  { %1559 = dma.done.wait [#allocation5], 16  }
  0x1c   :  { %1560 = vsyncadd [#allocation5], 4294967280  ;;  %v1484_v0 = vld [vmem:[#allocation2] sm:$0xff]   ;;  %vm280_vm0 = vcmask 130048   ;;  %v1487_v3 = vld [vmem:[%s2068_s0 + $0x8] sm:$0xff]   ;;  %vm1114_vm3 = vcmask 519168  }
  0x1d   :  { %v1485_v1 = vld [vmem:[%s2068_s0] sm:$0xff]   ;;  %1412 = vmatprep.subr.bf16.mxu0 %v1484_v0  ;;  %1478 = vmatprep.subr.bf16.mxu1 %v1484_v0  ;;  %v1488_v4 = vld [vmem:[%s2068_s0 + $0x88] sm:$0xff]   ;;  %v1489_v5 = vld [vmem:[%s2068_s0 + $0x10] sm:$0xff]  }
  0x1e   :  { %v1486_v2 = vld [vmem:[%s2068_s0 + $0x80] sm:$0xff]   ;;  %1413 = vmatpush3.bf16.msra.mxu0 %v1484_v0  ;;  %1479 = vmatpush3.bf16.msra.mxu1 %v1484_v0  ;;  %v1490_v6 = vld [vmem:[%s2068_s0 + $0x90] sm:$0xff]   ;;  %v1491_v7 = vld [vmem:[%s2068_s0 + $0x18] sm:$0xff]  }
  0x1f   :  { %1414 = vmatprep.mubr.msk.bf16.mxu0 %vm280_vm0, %v1485_v1  ;;  %1446 = vmatprep.mubr.msk.bf16.mxu1 %vm280_vm0, %v1486_v2  ;;  %v1492_v8 = vld [vmem:[%s2068_s0 + $0x98] sm:$0xff]   ;;  %v1493_v9 = vld [vmem:[%s2068_s0 + $0x20] sm:$0xff]   ;;  %v1495_v11 = vld [vmem:[%s2068_s0 + $0x28] sm:$0xff]  }
  0x20   :  { %v1494_v10 = vld [vmem:[%s2068_s0 + $0xa0] sm:$0xff]   ;;  %v1496_v12 = vld [vmem:[%s2068_s0 + $0xa8] sm:$0xff]   ;;  %v1497_v13 = vld [vmem:[%s2068_s0 + $0x30] sm:$0xff]  }
  0x21   :  { %1415 = vmatmul.mubr.msk.bf16.vlgmr.msra.gmra.mxu0 %vm280_vm0, %v1487_v3  ;;  %1447 = vmatmul.mubr.msk.bf16.vlgmr.msra.gmra.mxu1 %vm280_vm0, %v1488_v4  ;;  %v1498_v14 = vld [vmem:[%s2068_s0 + $0xb0] sm:$0xff]   ;;  %v1499_v15 = vld [vmem:[%s2068_s0 + $0x38] sm:$0xff]   ;;  %v1501_v17 = vld [vmem:[%s2068_s0 + $0x40] sm:$0xff]  }
  0x22   :  { %1418 = vmatprep.mubr.msk.bf16.mxu0 %vm280_vm0, %v1489_v5  ;;  %1450 = vmatprep.mubr.msk.bf16.mxu1 %vm280_vm0, %v1490_v6  ;;  %v1500_v16 = vld [vmem:[%s2068_s0 + $0xb8] sm:$0xff]   ;;  %v1502_v18 = vld [vmem:[%s2068_s0 + $0xc0] sm:$0xff]   ;;  %v1503_v19 = vld [vmem:[%s2068_s0 + $0x48] sm:$0xff]  }
  0x23   :  { %v1504_v20 = vld [vmem:[%s2068_s0 + $0xc8] sm:$0xff]   ;;  %v1505_v21 = vld [vmem:[%s2068_s0 + $0x50] sm:$0xff]   ;;  %v1507_v23 = vld [vmem:[%s2068_s0 + $0x58] sm:$0xff]  }
  0x24   :  { %v1506_v22 = vld [vmem:[%s2068_s0 + $0xd0] sm:$0xff]   ;;  %v1508_v24 = vld [vmem:[%s2068_s0 + $0xd8] sm:$0xff]   ;;  %v1509_v25 = vld [vmem:[%s2068_s0 + $0x60] sm:$0xff]  }
  0x25   :  { %v1510_v26 = vld [vmem:[%s2068_s0 + $0xe0] sm:$0xff]   ;;  %v1511_v27 = vld [vmem:[%s2068_s0 + $0x68] sm:$0xff]   ;;  %v1513_v29 = vld [vmem:[%s2068_s0 + $0x70] sm:$0xff]  }
  0x26   :  { %v1512_v28 = vld [vmem:[%s2068_s0 + $0xe8] sm:$0xff]   ;;  %v1514_v30 = vld [vmem:[%s2068_s0 + $0xf0] sm:$0xff]   ;;  %v1515_v31 = vld [vmem:[%s2068_s0 + $0x78] sm:$0xff]  }
  0x27   :  { %v1516_v32 = vld [vmem:[%s2068_s0 + $0xf8] sm:$0xff]   ;;  %v1719_v33 = vld [vmem:[#allocation4] ss:$0 sm:$0xff] }
  0x29   :  { %1419 = vmatmul.mubr.msk.bf16.gmra.mxu0 %vm280_vm0, %v1491_v7  ;;  %1451 = vmatmul.mubr.msk.bf16.gmra.mxu1 %vm280_vm0, %v1492_v8 }
  0x2a   :  { %1422 = vmatprep.mubr.msk.bf16.mxu0 %vm280_vm0, %v1493_v9  ;;  %1454 = vmatprep.mubr.msk.bf16.mxu1 %vm280_vm0, %v1494_v10 }
  0x31   :  { %1423 = vmatmul.mubr.msk.bf16.gmra.mxu0 %vm280_vm0, %v1495_v11  ;;  %1455 = vmatmul.mubr.msk.bf16.gmra.mxu1 %vm280_vm0, %v1496_v12 }
  0x32   :  { %1426 = vmatprep.mubr.msk.bf16.mxu0 %vm280_vm0, %v1497_v13  ;;  %1458 = vmatprep.mubr.msk.bf16.mxu1 %vm280_vm0, %v1498_v14 }
  0x39   :  { %1427 = vmatmul.mubr.msk.bf16.gmra.mxu0 %vm280_vm0, %v1499_v15  ;;  %1459 = vmatmul.mubr.msk.bf16.gmra.mxu1 %vm280_vm0, %v1500_v16 }
  0x3a   :  { %1430 = vmatprep.mubr.msk.bf16.mxu0 %vm280_vm0, %v1501_v17  ;;  %1462 = vmatprep.mubr.msk.bf16.mxu1 %vm280_vm0, %v1502_v18 }
  0x41   :  { %1431 = vmatmul.mubr.msk.bf16.gmra.mxu0 %vm280_vm0, %v1503_v19  ;;  %1463 = vmatmul.mubr.msk.bf16.gmra.mxu1 %vm280_vm0, %v1504_v20 }
  0x42   :  { %1434 = vmatprep.mubr.msk.bf16.mxu0 %vm280_vm0, %v1505_v21  ;;  %1466 = vmatprep.mubr.msk.bf16.mxu1 %vm280_vm0, %v1506_v22 }
  0x49   :  { %1435 = vmatmul.mubr.msk.bf16.gmra.mxu0 %vm280_vm0, %v1507_v23  ;;  %1467 = vmatmul.mubr.msk.bf16.gmra.mxu1 %vm280_vm0, %v1508_v24 }
  0x4a   :  { %1438 = vmatprep.mubr.msk.bf16.mxu0 %vm280_vm0, %v1509_v25  ;;  %1470 = vmatprep.mubr.msk.bf16.mxu1 %vm280_vm0, %v1510_v26 }
  0x51   :  { %1439 = vmatmul.mubr.msk.bf16.gmra.mxu0 %vm280_vm0, %v1511_v27  ;;  %1471 = vmatmul.mubr.msk.bf16.gmra.mxu1 %vm280_vm0, %v1512_v28 }
  0x52   :  { %1442 = vmatprep.mubr.msk.bf16.mxu0 %vm280_vm0, %v1513_v29  ;;  %1474 = vmatprep.mubr.msk.bf16.mxu1 %vm280_vm0, %v1514_v30 }
  0x59   :  { %1443 = vmatmul.mubr.msk.bf16.gmra.mxu0 %vm280_vm0, %v1515_v31  ;;  %1475 = vmatmul.mubr.msk.bf16.gmra.mxu1 %vm280_vm0, %v1516_v32 }
  0xe1   :  { %v1416_v34 = vpop.f32.mrf.mxu0  ;;  %v1448_v35 = vpop.f32.mrf.mxu1 }
  0xe2   :  { %v420_v36 = vadd.f32 %v1416_v34, %v1719_v33  ;;  %v548_v37 = vadd.f32 %v1448_v35, %v1719_v33 }
  0xe3   :  { %v411_v38 = vpop.f32.mrf.mxu0  ;;  %v539_v39 = vpop.f32.mrf.mxu1 }
  0xe4   :  { %vm668_vm1 = vcmp.ge.f32.partialorder %v420_v36, 0.0  ;;  %v732_v40 = vmul.f32 0.2, %v420_v36  ;;  %vm700_vm2 = vcmp.ge.f32.partialorder %v548_v37, 0.0  ;;  %v764_v41 = vmul.f32 0.2, %v548_v37 }
  0xe5   :  { %v412_v42 = vadd.f32 %v1719_v33, %v411_v38  ;;  %v540_v43 = vadd.f32 %v1719_v33, %v539_v39  ;;  %v1417_v44 = vpop.f32.mrf.mxu0  ;;  %v1449_v45 = vpop.f32.mrf.mxu1 }
  0xe6   :  { %v796_v46 = vsel %vm668_vm1, %v420_v36, %v732_v40  ;;  %v828_v47 = vsel %vm700_vm2, %v548_v37, %v764_v41  ;;  %v423_v48 = vadd.f32 %v1417_v44, %v1719_v33  ;;  %v551_v49 = vadd.f32 %v1449_v45, %v1719_v33 }
  0xe7   :  { %v1317_v50 = vpack.c.bf16 %v796_v46, %v796_v46  ;;  %v1349_v51 = vpack.c.bf16 %v828_v47, %v828_v47  ;;  %vm666_vm4 = vcmp.ge.f32.partialorder %v412_v42, 0.0  ;;  %v730_v52 = vmul.f32 0.2, %v412_v42  ;;  %v414_v53 = vpop.f32.mrf.mxu0  ;;  %v542_v54 = vpop.f32.mrf.mxu1 }
  0xe8   :  { %vm698_vm5 = vcmp.ge.f32.partialorder %v540_v43, 0.0  ;;  %v762_v55 = vmul.f32 0.2, %v540_v43  ;;  %vm669_vm6 = vcmp.ge.f32.partialorder %v423_v48, 0.0  ;;  %v733_v56 = vmul.f32 0.2, %v423_v48 }
  0xe9   :  { %1117 = vst.msk [vmem:[%s2071_s3 + $0x8] sm:$0xf] %vm1114_vm3, %v1317_v50  ;;  %1149 = vst.msk [vmem:[%s2071_s3 + $0x88] sm:$0xf] %vm1114_vm3, %v1349_v51  ;;  %v794_v57 = vsel %vm666_vm4, %v412_v42, %v730_v52  ;;  %vm701_vm7 = vcmp.ge.f32.partialorder %v551_v49, 0.0  ;;  %v415_v59 = vadd.f32 %v1719_v33, %v414_v53  ;;  %v1420_v60 = vpop.f32.mrf.mxu0  ;;  %v1452_v61 = vpop.f32.mrf.mxu1  ;;  %v543_v1 = vadd.f32 %v1719_v33, %v542_v54 }
  0xea   :  { %v765_v58 = vmul.f32 0.2, %v551_v49  ;;  %v1315_v62 = vpack.c.bf16 %v794_v57, %v794_v57  ;;  %v826_v63 = vsel %vm698_vm5, %v540_v43, %v762_v55  ;;  %v797_v0 = vsel %vm669_vm6, %v423_v48, %v733_v56 }
  0xeb   :  { %v1347_v2 = vpack.c.bf16 %v826_v63, %v826_v63  ;;  %v1318_v3 = vpack.c.bf16 %v797_v0, %v797_v0  ;;  %vm667_vm8 = vcmp.ge.f32.partialorder %v415_v59, 0.0  ;;  %v427_v5 = vpop.f32.mrf.mxu0  ;;  %v555_v6 = vpop.f32.mrf.mxu1  ;;  %v731_v8 = vmul.f32 0.2, %v415_v59 }
  0xec   :  { %v829_v4 = vsel %vm701_vm7, %v551_v49, %v765_v58  ;;  %1115 = vst.msk [vmem:[%s2071_s3] sm:$0xf] %vm1114_vm3, %v1315_v62  ;;  %vm699_vm9 = vcmp.ge.f32.partialorder %v543_v1, 0.0  ;;  %v763_v9 = vmul.f32 0.2, %v543_v1  ;;  %v436_v10 = vadd.f32 %v1420_v60, %v1719_v33 }
  0xed   :  { %v1350_v7 = vpack.c.bf16 %v829_v4, %v829_v4  ;;  %1147 = vst.msk [vmem:[%s2071_s3 + $0x80] sm:$0xf] %vm1114_vm3, %v1347_v2  ;;  %1118 = vst.msk [vmem:[%s2071_s3 + $0xc] sm:$0xf] %vm1114_vm3, %v1318_v3  ;;  %v564_v11 = vadd.f32 %v1452_v61, %v1719_v33  ;;  %v428_v12 = vadd.f32 %v1719_v33, %v427_v5  ;;  %v1421_v14 = vpop.f32.mrf.mxu0  ;;  %v1453_v15 = vpop.f32.mrf.mxu1 }
  0xee   :  { %v556_v13 = vadd.f32 %v1719_v33, %v555_v6  ;;  %v795_v16 = vsel %vm667_vm8, %v415_v59, %v731_v8  ;;  %v827_v17 = vsel %vm699_vm9, %v543_v1, %v763_v9  ;;  %v439_v18 = vadd.f32 %v1421_v14, %v1719_v33 }
  0xef   :  { %1150 = vst.msk [vmem:[%s2071_s3 + $0x8c] sm:$0xf] %vm1114_vm3, %v1350_v7  ;;  %v567_v19 = vadd.f32 %v1453_v15, %v1719_v33  ;;  %v1316_v20 = vpack.c.bf16 %v795_v16, %v795_v16  ;;  %v1348_v21 = vpack.c.bf16 %v827_v17, %v827_v17  ;;  %vm672_vm10 = vcmp.ge.f32.partialorder %v436_v10, 0.0  ;;  %v430_v23 = vpop.f32.mrf.mxu0  ;;  %v558_v24 = vpop.f32.mrf.mxu1 }
  0xf0   :  { %v736_v22 = vmul.f32 0.2, %v436_v10  ;;  %vm704_vm11 = vcmp.ge.f32.partialorder %v564_v11, 0.0  ;;  %v768_v25 = vmul.f32 0.2, %v564_v11  ;;  %vm670_vm12 = vcmp.ge.f32.partialorder %v428_v12, 0.0 }
  0xf1   :  { %v734_v26 = vmul.f32 0.2, %v428_v12  ;;  %1116 = vst.msk [vmem:[%s2071_s3 + $0x4] sm:$0xf] %vm1114_vm3, %v1316_v20  ;;  %1148 = vst.msk [vmem:[%s2071_s3 + $0x84] sm:$0xf] %vm1114_vm3, %v1348_v21  ;;  %v1424_v29 = vpop.f32.mrf.mxu0  ;;  %v1456_v30 = vpop.f32.mrf.mxu1  ;;  %v431_v44 = vadd.f32 %v1719_v33, %v430_v23  ;;  %v559_v46 = vadd.f32 %v1719_v33, %v558_v24 }
  0xf2   :  { %v800_v27 = vsel %vm672_vm10, %v436_v10, %v736_v22  ;;  %vm702_vm13 = vcmp.ge.f32.partialorder %v556_v13, 0.0  ;;  %v766_v28 = vmul.f32 0.2, %v556_v13  ;;  %vm673_vm14 = vcmp.ge.f32.partialorder %v439_v18, 0.0 }
  0xf3   :  { %v1321_v31 = vpack.c.bf16 %v800_v27, %v800_v27  ;;  %v832_v32 = vsel %vm704_vm11, %v564_v11, %v768_v25  ;;  %v798_v34 = vsel %vm670_vm12, %v428_v12, %v734_v26  ;;  %v737_v35 = vmul.f32 0.2, %v439_v18  ;;  %v443_v39 = vpop.f32.mrf.mxu0  ;;  %v571_v40 = vpop.f32.mrf.mxu1 }
  0xf4   :  { %v1353_v36 = vpack.c.bf16 %v832_v32, %v832_v32  ;;  %v1319_v37 = vpack.c.bf16 %v798_v34, %v798_v34  ;;  %v830_v38 = vsel %vm702_vm13, %v556_v13, %v766_v28  ;;  %vm705_vm15 = vcmp.ge.f32.partialorder %v567_v19, 0.0 }
  0xf5   :  { %1121 = vst.msk [vmem:[%s2071_s3 + $0x18] sm:$0xf] %vm1114_vm3, %v1321_v31  ;;  %v1351_v41 = vpack.c.bf16 %v830_v38, %v830_v38  ;;  %v801_v42 = vsel %vm673_vm14, %v439_v18, %v737_v35  ;;  %v769_v43 = vmul.f32 0.2, %v567_v19  ;;  %v452_v47 = vadd.f32 %v1424_v29, %v1719_v33  ;;  %v1425_v49 = vpop.f32.mrf.mxu0  ;;  %v1457_v50 = vpop.f32.mrf.mxu1 }
  0xf6   :  { %1153 = vst.msk [vmem:[%s2071_s3 + $0x98] sm:$0xf] %vm1114_vm3, %v1353_v36  ;;  %1119 = vst.msk [vmem:[%s2071_s3 + $0x10] sm:$0xf] %vm1114_vm3, %v1319_v37  ;;  %v1322_v45 = vpack.c.bf16 %v801_v42, %v801_v42  ;;  %v580_v48 = vadd.f32 %v1456_v30, %v1719_v33  ;;  %vm671_vm0 = vcmp.ge.f32.partialorder %v431_v44, 0.0  ;;  %v444_v53 = vadd.f32 %v1719_v33, %v443_v39 }
  0xf7   :  { %1151 = vst.msk [vmem:[%s2071_s3 + $0x90] sm:$0xf] %vm1114_vm3, %v1351_v41  ;;  %v833_v51 = vsel %vm705_vm15, %v567_v19, %v769_v43  ;;  %v735_v52 = vmul.f32 0.2, %v431_v44  ;;  %vm703_vm1 = vcmp.ge.f32.partialorder %v559_v46, 0.0  ;;  %vm676_vm2 = vcmp.ge.f32.partialorder %v452_v47, 0.0  ;;  %v446_v56 = vpop.f32.mrf.mxu0  ;;  %v574_v57 = vpop.f32.mrf.mxu1 }
  0xf8   :  { %1122 = vst.msk [vmem:[%s2071_s3 + $0x1c] sm:$0xf] %vm1114_vm3, %v1322_v45  ;;  %v1354_v54 = vpack.c.bf16 %v833_v51, %v833_v51  ;;  %v767_v55 = vmul.f32 0.2, %v559_v46  ;;  %v740_v59 = vmul.f32 0.2, %v452_v47  ;;  %v572_v5 = vadd.f32 %v1719_v33, %v571_v40 }
  0xf9   :  { %v799_v58 = vsel %vm671_vm0, %v431_v44, %v735_v52  ;;  %vm708_vm4 = vcmp.ge.f32.partialorder %v580_v48, 0.0  ;;  %v772_v60 = vmul.f32 0.2, %v580_v48  ;;  %vm674_vm5 = vcmp.ge.f32.partialorder %v444_v53, 0.0  ;;  %v1428_v0 = vpop.f32.mrf.mxu0  ;;  %v1460_v1 = vpop.f32.mrf.mxu1 }
  0xfa   :  { %1154 = vst.msk [vmem:[%s2071_s3 + $0x9c] sm:$0xf] %vm1114_vm3, %v1354_v54  ;;  %v1320_v61 = vpack.c.bf16 %v799_v58, %v799_v58  ;;  %v831_v62 = vsel %vm703_vm1, %v559_v46, %v767_v55  ;;  %v738_v63 = vmul.f32 0.2, %v444_v53  ;;  %v804_v3 = vsel %vm676_vm2, %v452_v47, %v740_v59 }
  0xfb   :  { %v1352_v2 = vpack.c.bf16 %v831_v62, %v831_v62  ;;  %v836_v4 = vsel %vm708_vm4, %v580_v48, %v772_v60  ;;  %v1325_v6 = vpack.c.bf16 %v804_v3, %v804_v3  ;;  %v455_v9 = vadd.f32 %v1425_v49, %v1719_v33  ;;  %v459_v10 = vpop.f32.mrf.mxu0  ;;  %v587_v11 = vpop.f32.mrf.mxu1 }
  0xfc   :  { %1120 = vst.msk [vmem:[%s2071_s3 + $0x14] sm:$0xf] %vm1114_vm3, %v1320_v61  ;;  %v1357_v7 = vpack.c.bf16 %v836_v4, %v836_v4  ;;  %v802_v8 = vsel %vm674_vm5, %v444_v53, %v738_v63  ;;  %vm706_vm6 = vcmp.ge.f32.partialorder %v572_v5, 0.0  ;;  %v770_v13 = vmul.f32 0.2, %v572_v5 }
  0xfd   :  { %1152 = vst.msk [vmem:[%s2071_s3 + $0x94] sm:$0xf] %vm1114_vm3, %v1352_v2  ;;  %v1323_v12 = vpack.c.bf16 %v802_v8, %v802_v8  ;;  %v583_v14 = vadd.f32 %v1457_v50, %v1719_v33  ;;  %1125 = vst.msk [vmem:[%s2071_s3 + $0x28] sm:$0xf] %vm1114_vm3, %v1325_v6  ;;  %vm677_vm7 = vcmp.ge.f32.partialorder %v455_v9, 0.0  ;;  %v447_v16 = vadd.f32 %v1719_v33, %v446_v56  ;;  %v1429_v18 = vpop.f32.mrf.mxu0  ;;  %v1461_v19 = vpop.f32.mrf.mxu1 }
  0xfe   :  { %1157 = vst.msk [vmem:[%s2071_s3 + $0xa8] sm:$0xf] %vm1114_vm3, %v1357_v7  ;;  %v741_v15 = vmul.f32 0.2, %v455_v9  ;;  %v575_v17 = vadd.f32 %v1719_v33, %v574_v57  ;;  %v834_v20 = vsel %vm706_vm6, %v572_v5, %v770_v13  ;;  %v468_v22 = vadd.f32 %v1428_v0, %v1719_v33 }
  0xff   :  { %1123 = vst.msk [vmem:[%s2071_s3 + $0x20] sm:$0xf] %vm1114_vm3, %v1323_v12  ;;  %vm709_vm8 = vcmp.ge.f32.partialorder %v583_v14, 0.0  ;;  %v773_v21 = vmul.f32 0.2, %v583_v14  ;;  %v1355_v23 = vpack.c.bf16 %v834_v20, %v834_v20  ;;  %vm675_vm9 = vcmp.ge.f32.partialorder %v447_v16, 0.0  ;;  %v462_v26 = vpop.f32.mrf.mxu0  ;;  %v590_v27 = vpop.f32.mrf.mxu1 }
 0x100   :  { %v805_v24 = vsel %vm677_vm7, %v455_v9, %v741_v15  ;;  %v739_v25 = vmul.f32 0.2, %v447_v16  ;;  %vm707_vm10 = vcmp.ge.f32.partialorder %v575_v17, 0.0  ;;  %v771_v30 = vmul.f32 0.2, %v575_v17 }
 0x101   :  { %v1326_v28 = vpack.c.bf16 %v805_v24, %v805_v24  ;;  %v837_v29 = vsel %vm709_vm8, %v583_v14, %v773_v21  ;;  %1155 = vst.msk [vmem:[%s2071_s3 + $0xa0] sm:$0xf] %vm1114_vm3, %v1355_v23  ;;  %vm680_vm11 = vcmp.ge.f32.partialorder %v468_v22, 0.0  ;;  %v744_v34 = vmul.f32 0.2, %v468_v22  ;;  %v1432_v35 = vpop.f32.mrf.mxu0  ;;  %v1464_v36 = vpop.f32.mrf.mxu1 }
 0x102   :  { %v1358_v31 = vpack.c.bf16 %v837_v29, %v837_v29  ;;  %v803_v32 = vsel %vm675_vm9, %v447_v16, %v739_v25  ;;  %v835_v38 = vsel %vm707_vm10, %v575_v17, %v771_v30  ;;  %v596_v39 = vadd.f32 %v1460_v1, %v1719_v33 }
 0x103   :  { %1126 = vst.msk [vmem:[%s2071_s3 + $0x2c] sm:$0xf] %vm1114_vm3, %v1326_v28  ;;  %v1324_v37 = vpack.c.bf16 %v803_v32, %v803_v32  ;;  %v460_v40 = vadd.f32 %v1719_v33, %v459_v10  ;;  %v1356_v41 = vpack.c.bf16 %v835_v38, %v835_v38  ;;  %v808_v42 = vsel %vm680_vm11, %v468_v22, %v744_v34  ;;  %v475_v45 = vpop.f32.mrf.mxu0  ;;  %v603_v46 = vpop.f32.mrf.mxu1 }
 0x104   :  { %1158 = vst.msk [vmem:[%s2071_s3 + $0xac] sm:$0xf] %vm1114_vm3, %v1358_v31  ;;  %v588_v43 = vadd.f32 %v1719_v33, %v587_v11  ;;  %v471_v44 = vadd.f32 %v1429_v18, %v1719_v33  ;;  %v1329_v47 = vpack.c.bf16 %v808_v42, %v808_v42  ;;  %vm712_vm12 = vcmp.ge.f32.partialorder %v596_v39, 0.0 }
 0x105   :  { %1124 = vst.msk [vmem:[%s2071_s3 + $0x24] sm:$0xf] %vm1114_vm3, %v1324_v37  ;;  %v776_v48 = vmul.f32 0.2, %v596_v39  ;;  %vm678_vm13 = vcmp.ge.f32.partialorder %v460_v40, 0.0  ;;  %v1433_v51 = vpop.f32.mrf.mxu0  ;;  %v1465_v52 = vpop.f32.mrf.mxu1  ;;  %v599_v55 = vadd.f32 %v1461_v19, %v1719_v33  ;;  %v463_v56 = vadd.f32 %v1719_v33, %v462_v26 }
 0x106   :  { %1156 = vst.msk [vmem:[%s2071_s3 + $0xa4] sm:$0xf] %vm1114_vm3, %v1356_v41  ;;  %v742_v49 = vmul.f32 0.2, %v460_v40  ;;  %vm710_vm14 = vcmp.ge.f32.partialorder %v588_v43, 0.0  ;;  %vm681_vm15 = vcmp.ge.f32.partialorder %v471_v44, 0.0  ;;  %v591_v60 = vadd.f32 %v1719_v33, %v590_v27 }
 0x107   :  { %v774_v50 = vmul.f32 0.2, %v588_v43  ;;  %1129 = vst.msk [vmem:[%s2071_s3 + $0x38] sm:$0xf] %vm1114_vm3, %v1329_v47  ;;  %v840_v53 = vsel %vm712_vm12, %v596_v39, %v776_v48  ;;  %v745_v54 = vmul.f32 0.2, %v471_v44  ;;  %v1855_v61 = vpop.f32.mrf.mxu0  ;;  %v1857_v62 = vpop.f32.mrf.mxu1  ;;  %v484_v8 = vadd.f32 %v1432_v35, %v1719_v33 }
 0x108   :  { %v1361_v57 = vpack.c.bf16 %v840_v53, %v840_v53  ;;  %v806_v58 = vsel %vm678_vm13, %v460_v40, %v742_v49  ;;  %vm713_vm0 = vcmp.ge.f32.partialorder %v599_v55, 0.0  ;;  %v777_v3 = vmul.f32 0.2, %v599_v55 }
 0x109   :  { %v838_v59 = vsel %vm710_vm14, %v588_v43, %v774_v50  ;;  %v1327_v63 = vpack.c.bf16 %v806_v58, %v806_v58  ;;  %v809_v1 = vsel %vm681_vm15, %v471_v44, %v745_v54  ;;  %vm679_vm1 = vcmp.ge.f32.partialorder %v463_v56, 0.0  ;;  %v1436_v5 = vpop.f32.mrf.mxu0  ;;  %v1468_v6 = vpop.f32.mrf.mxu1 }
 0x10a   :  { %v1359_v0 = vpack.c.bf16 %v838_v59, %v838_v59  ;;  %1161 = vst.msk [vmem:[%s2071_s3 + $0xb8] sm:$0xf] %vm1114_vm3, %v1361_v57  ;;  %v1330_v2 = vpack.c.bf16 %v809_v1, %v809_v1  ;;  %v743_v4 = vmul.f32 0.2, %v463_v56  ;;  %vm711_vm2 = vcmp.ge.f32.partialorder %v591_v60, 0.0 }
 0x10b   :  { %1127 = vst.msk [vmem:[%s2071_s3 + $0x30] sm:$0xf] %vm1114_vm3, %v1327_v63  ;;  %v775_v7 = vmul.f32 0.2, %v591_v60  ;;  %v612_v9 = vadd.f32 %v1464_v36, %v1719_v33  ;;  %v841_v10 = vsel %vm713_vm0, %v599_v55, %v777_v3  ;;  %v476_v12 = vadd.f32 %v1719_v33, %v475_v45  ;;  %v491_v14 = vpop.f32.mrf.mxu0  ;;  %v1880_v15 = vpop.f32.mrf.mxu1 }
 0x10c   :  { %1159 = vst.msk [vmem:[%s2071_s3 + $0xb0] sm:$0xf] %vm1114_vm3, %v1359_v0  ;;  %1130 = vst.msk [vmem:[%s2071_s3 + $0x3c] sm:$0xf] %vm1114_vm3, %v1330_v2  ;;  %v807_v11 = vsel %vm679_vm1, %v463_v56, %v743_v4  ;;  %v604_v13 = vadd.f32 %v1719_v33, %v603_v46  ;;  %v1362_v16 = vpack.c.bf16 %v841_v10, %v841_v10  ;;  %vm684_vm4 = vcmp.ge.f32.partialorder %v484_v8, 0.0 }
 0x10d   :  { %v1328_v17 = vpack.c.bf16 %v807_v11, %v807_v11  ;;  %v839_v18 = vsel %vm711_vm2, %v591_v60, %v775_v7  ;;  %v748_v20 = vmul.f32 0.2, %v484_v8  ;;  %vm716_vm5 = vcmp.ge.f32.partialorder %v612_v9, 0.0  ;;  %v1882_v22 = vpop.f32.mrf.mxu0  ;;  %v1884_v23 = vpop.f32.mrf.mxu1 }
 0x10e   :  { %v1360_v19 = vpack.c.bf16 %v839_v18, %v839_v18  ;;  %v780_v21 = vmul.f32 0.2, %v612_v9  ;;  %1162 = vst.msk [vmem:[%s2071_s3 + $0xbc] sm:$0xf] %vm1114_vm3, %v1362_v16  ;;  %vm682_vm6 = vcmp.ge.f32.partialorder %v476_v12, 0.0  ;;  %vm714_vm7 = vcmp.ge.f32.partialorder %v604_v13, 0.0 }
 0x10f   :  { %1128 = vst.msk [vmem:[%s2071_s3 + $0x34] sm:$0xf] %vm1114_vm3, %v1328_v17  ;;  %v746_v24 = vmul.f32 0.2, %v476_v12  ;;  %v778_v25 = vmul.f32 0.2, %v604_v13  ;;  %v812_v26 = vsel %vm684_vm4, %v484_v8, %v748_v20  ;;  %v487_v28 = vadd.f32 %v1433_v51, %v1719_v33  ;;  %v1900_v30 = vpop.f32.mrf.mxu0  ;;  %v1902_v31 = vpop.f32.mrf.mxu1 }
 0x110   :  { %1160 = vst.msk [vmem:[%s2071_s3 + $0xb4] sm:$0xf] %vm1114_vm3, %v1360_v19  ;;  %v844_v27 = vsel %vm716_vm5, %v612_v9, %v780_v21  ;;  %v615_v29 = vadd.f32 %v1465_v52, %v1719_v33  ;;  %v1333_v32 = vpack.c.bf16 %v812_v26, %v812_v26  ;;  %v479_v43 = vadd.f32 %v1719_v33, %v1855_v61 }
 0x111   :  { %v1365_v34 = vpack.c.bf16 %v844_v27, %v844_v27  ;;  %v810_v35 = vsel %vm682_vm6, %v476_v12, %v746_v24  ;;  %v842_v36 = vsel %vm714_vm7, %v604_v13, %v778_v25  ;;  %vm685_vm8 = vcmp.ge.f32.partialorder %v487_v28, 0.0  ;;  %v1440_v40 = vpop.f32.mrf.mxu0  ;;  %v1904_v41 = vpop.f32.mrf.mxu1 }
 0x112   :  { %v1331_v37 = vpack.c.bf16 %v810_v35, %v810_v35  ;;  %v1363_v38 = vpack.c.bf16 %v842_v36, %v842_v36  ;;  %v749_v39 = vmul.f32 0.2, %v487_v28  ;;  %1133 = vst.msk [vmem:[%s2071_s3 + $0x48] sm:$0xf] %vm1114_vm3, %v1333_v32  ;;  %vm717_vm9 = vcmp.ge.f32.partialorder %v615_v29, 0.0 }
 0x113   :  { %1165 = vst.msk [vmem:[%s2071_s3 + $0xc8] sm:$0xf] %vm1114_vm3, %v1365_v34  ;;  %v781_v42 = vmul.f32 0.2, %v615_v29  ;;  %v607_v44 = vadd.f32 %v1719_v33, %v1857_v62  ;;  %v500_v46 = vadd.f32 %v1436_v5, %v1719_v33  ;;  %v628_v47 = vadd.f32 %v1468_v6, %v1719_v33  ;;  %v507_v54 = vpop.f32.mrf.mxu0  ;;  %v635_v55 = vpop.f32.mrf.mxu1 }
 0x114   :  { %1131 = vst.msk [vmem:[%s2071_s3 + $0x40] sm:$0xf] %vm1114_vm3, %v1331_v37  ;;  %1163 = vst.msk [vmem:[%s2071_s3 + $0xc0] sm:$0xf] %vm1114_vm3, %v1363_v38  ;;  %v813_v45 = vsel %vm685_vm8, %v487_v28, %v749_v39  ;;  %v492_v48 = vadd.f32 %v1719_v33, %v491_v14  ;;  %vm683_vm10 = vcmp.ge.f32.partialorder %v479_v43, 0.0  ;;  %v620_v1 = vadd.f32 %v1719_v33, %v1880_v15 }
 0x115   :  { %v1334_v49 = vpack.c.bf16 %v813_v45, %v813_v45  ;;  %v845_v50 = vsel %vm717_vm9, %v615_v29, %v781_v42  ;;  %v747_v51 = vmul.f32 0.2, %v479_v43  ;;  %vm715_vm11 = vcmp.ge.f32.partialorder %v607_v44, 0.0  ;;  %v1441_v6 = vpop.f32.mrf.mxu0  ;;  %v1473_v7 = vpop.f32.mrf.mxu1 }
 0x116   :  { %v1366_v52 = vpack.c.bf16 %v845_v50, %v845_v50  ;;  %v779_v53 = vmul.f32 0.2, %v607_v44  ;;  %vm688_vm12 = vcmp.ge.f32.partialorder %v500_v46, 0.0  ;;  %v752_v57 = vmul.f32 0.2, %v500_v46 }
 0x117   :  { %1134 = vst.msk [vmem:[%s2071_s3 + $0x4c] sm:$0xf] %vm1114_vm3, %v1334_v49  ;;  %v811_v56 = vsel %vm683_vm10, %v479_v43, %v747_v51  ;;  %vm720_vm13 = vcmp.ge.f32.partialorder %v628_v47, 0.0  ;;  %v784_v58 = vmul.f32 0.2, %v628_v47  ;;  %vm686_vm14 = vcmp.ge.f32.partialorder %v492_v48, 0.0  ;;  %v510_v20 = vpop.f32.mrf.mxu0  ;;  %v638_v21 = vpop.f32.mrf.mxu1 }
 0x118   :  { %1166 = vst.msk [vmem:[%s2071_s3 + $0xcc] sm:$0xf] %vm1114_vm3, %v1366_v52  ;;  %v1332_v59 = vpack.c.bf16 %v811_v56, %v811_v56  ;;  %v843_v60 = vsel %vm715_vm11, %v607_v44, %v779_v53  ;;  %v750_v61 = vmul.f32 0.2, %v492_v48  ;;  %v816_v63 = vsel %vm688_vm12, %v500_v46, %v752_v57 }
 0x119   :  { %v1364_v62 = vpack.c.bf16 %v843_v60, %v843_v60  ;;  %v848_v0 = vsel %vm720_vm13, %v628_v47, %v784_v58  ;;  %v1337_v2 = vpack.c.bf16 %v816_v63, %v816_v63  ;;  %v503_v5 = vadd.f32 %v1882_v22, %v1719_v33  ;;  %v1444_v37 = vpop.f32.mrf.mxu0  ;;  %v1476_v38 = vpop.f32.mrf.mxu1 }
 0x11a   :  { %1132 = vst.msk [vmem:[%s2071_s3 + $0x44] sm:$0xf] %vm1114_vm3, %v1332_v59  ;;  %v1369_v3 = vpack.c.bf16 %v848_v0, %v848_v0  ;;  %v814_v4 = vsel %vm686_vm14, %v492_v48, %v750_v61  ;;  %vm718_vm15 = vcmp.ge.f32.partialorder %v620_v1, 0.0  ;;  %v782_v9 = vmul.f32 0.2, %v620_v1 }
 0x11b   :  { %1164 = vst.msk [vmem:[%s2071_s3 + $0xc4] sm:$0xf] %vm1114_vm3, %v1364_v62  ;;  %v1335_v8 = vpack.c.bf16 %v814_v4, %v814_v4  ;;  %v631_v10 = vadd.f32 %v1884_v23, %v1719_v33  ;;  %1137 = vst.msk [vmem:[%s2071_s3 + $0x58] sm:$0xf] %vm1114_vm3, %v1337_v2  ;;  %vm689_vm0 = vcmp.ge.f32.partialorder %v503_v5, 0.0  ;;  %v495_v12 = vadd.f32 %v1719_v33, %v1900_v30  ;;  %v523_v51 = vpop.f32.mrf.mxu0  ;;  %v651_v52 = vpop.f32.mrf.mxu1 }
 0x11c   :  { %1169 = vst.msk [vmem:[%s2071_s3 + $0xd8] sm:$0xf] %vm1114_vm3, %v1369_v3  ;;  %v753_v11 = vmul.f32 0.2, %v503_v5  ;;  %v623_v13 = vadd.f32 %v1719_v33, %v1902_v31  ;;  %v846_v14 = vsel %vm718_vm15, %v620_v1, %v782_v9  ;;  %v516_v16 = vadd.f32 %v1440_v40, %v1719_v33 }
 0x11d   :  { %1135 = vst.msk [vmem:[%s2071_s3 + $0x50] sm:$0xf] %vm1114_vm3, %v1335_v8  ;;  %vm721_vm1 = vcmp.ge.f32.partialorder %v631_v10, 0.0  ;;  %v785_v15 = vmul.f32 0.2, %v631_v10  ;;  %v1367_v17 = vpack.c.bf16 %v846_v14, %v846_v14  ;;  %vm687_vm2 = vcmp.ge.f32.partialorder %v495_v12, 0.0  ;;  %v1445_v2 = vpop.f32.mrf.mxu0  ;;  %v1477_v3 = vpop.f32.mrf.mxu1 }
 0x11e   :  { %v817_v18 = vsel %vm689_vm0, %v503_v5, %v753_v11  ;;  %v751_v19 = vmul.f32 0.2, %v495_v12  ;;  %vm719_vm4 = vcmp.ge.f32.partialorder %v623_v13, 0.0  ;;  %v783_v24 = vmul.f32 0.2, %v623_v13 }
 0x11f   :  { %v1338_v22 = vpack.c.bf16 %v817_v18, %v817_v18  ;;  %v849_v23 = vsel %vm721_vm1, %v631_v10, %v785_v15  ;;  %1167 = vst.msk [vmem:[%s2071_s3 + $0xd0] sm:$0xf] %vm1114_vm3, %v1367_v17  ;;  %vm692_vm5 = vcmp.ge.f32.partialorder %v516_v16, 0.0  ;;  %v756_v27 = vmul.f32 0.2, %v516_v16  ;;  %v654_v17 = vpop.f32.mrf.mxu1 }
 0x120   :  { %v1370_v25 = vpack.c.bf16 %v849_v23, %v849_v23  ;;  %v815_v26 = vsel %vm687_vm2, %v495_v12, %v751_v19  ;;  %v847_v29 = vsel %vm719_vm4, %v623_v13, %v783_v24  ;;  %v644_v30 = vadd.f32 %v1904_v41, %v1719_v33 }
 0x121   :  { %1138 = vst.msk [vmem:[%s2071_s3 + $0x5c] sm:$0xf] %vm1114_vm3, %v1338_v22  ;;  %v1336_v28 = vpack.c.bf16 %v815_v26, %v815_v26  ;;  %v508_v31 = vadd.f32 %v1719_v33, %v507_v54  ;;  %v1368_v32 = vpack.c.bf16 %v847_v29, %v847_v29  ;;  %v820_v34 = vsel %vm692_vm5, %v516_v16, %v756_v27  ;;  %v526_v16 = vpop.f32.mrf.mxu0 }
 0x122   :  { %1170 = vst.msk [vmem:[%s2071_s3 + $0xdc] sm:$0xf] %vm1114_vm3, %v1370_v25  ;;  %v636_v35 = vadd.f32 %v1719_v33, %v635_v55  ;;  %v519_v36 = vadd.f32 %v1441_v6, %v1719_v33  ;;  %v1341_v39 = vpack.c.bf16 %v820_v34, %v820_v34  ;;  %vm724_vm6 = vcmp.ge.f32.partialorder %v644_v30, 0.0 }
 0x123   :  { %1136 = vst.msk [vmem:[%s2071_s3 + $0x54] sm:$0xf] %vm1114_vm3, %v1336_v28  ;;  %v788_v40 = vmul.f32 0.2, %v644_v30  ;;  %vm690_vm7 = vcmp.ge.f32.partialorder %v508_v31, 0.0  ;;  %v647_v45 = vadd.f32 %v1473_v7, %v1719_v33  ;;  %v511_v46 = vadd.f32 %v1719_v33, %v510_v20 }
 0x124   :  { %1168 = vst.msk [vmem:[%s2071_s3 + $0xd4] sm:$0xf] %vm1114_vm3, %v1368_v32  ;;  %v754_v41 = vmul.f32 0.2, %v508_v31  ;;  %vm722_vm8 = vcmp.ge.f32.partialorder %v636_v35, 0.0  ;;  %vm693_vm9 = vcmp.ge.f32.partialorder %v519_v36, 0.0  ;;  %v639_v50 = vadd.f32 %v1719_v33, %v638_v21 }
 0x125   :  { %v786_v42 = vmul.f32 0.2, %v636_v35  ;;  %1141 = vst.msk [vmem:[%s2071_s3 + $0x68] sm:$0xf] %vm1114_vm3, %v1341_v39  ;;  %v852_v43 = vsel %vm724_vm6, %v644_v30, %v788_v40  ;;  %v757_v44 = vmul.f32 0.2, %v519_v36  ;;  %v532_v60 = vadd.f32 %v1444_v37, %v1719_v33 }
 0x126   :  { %v1373_v47 = vpack.c.bf16 %v852_v43, %v852_v43  ;;  %v818_v48 = vsel %vm690_vm7, %v508_v31, %v754_v41  ;;  %vm725_vm10 = vcmp.ge.f32.partialorder %v647_v45, 0.0  ;;  %v789_v57 = vmul.f32 0.2, %v647_v45 }
 0x127   :  { %v850_v49 = vsel %vm722_vm8, %v636_v35, %v786_v42  ;;  %v1339_v53 = vpack.c.bf16 %v818_v48, %v818_v48  ;;  %v821_v55 = vsel %vm693_vm9, %v519_v36, %v757_v44  ;;  %vm691_vm11 = vcmp.ge.f32.partialorder %v511_v46, 0.0 }
 0x128   :  { %v1371_v54 = vpack.c.bf16 %v850_v49, %v850_v49  ;;  %1173 = vst.msk [vmem:[%s2071_s3 + $0xe8] sm:$0xf] %vm1114_vm3, %v1373_v47  ;;  %v1342_v56 = vpack.c.bf16 %v821_v55, %v821_v55  ;;  %v755_v58 = vmul.f32 0.2, %v511_v46  ;;  %vm723_vm12 = vcmp.ge.f32.partialorder %v639_v50, 0.0 }
 0x129   :  { %1139 = vst.msk [vmem:[%s2071_s3 + $0x60] sm:$0xf] %vm1114_vm3, %v1339_v53  ;;  %v787_v59 = vmul.f32 0.2, %v639_v50  ;;  %v660_v61 = vadd.f32 %v1476_v38, %v1719_v33  ;;  %v853_v62 = vsel %vm725_vm10, %v647_v45, %v789_v57  ;;  %v524_v0 = vadd.f32 %v1719_v33, %v523_v51 }
 0x12a   :  { %1171 = vst.msk [vmem:[%s2071_s3 + $0xe0] sm:$0xf] %vm1114_vm3, %v1371_v54  ;;  %1142 = vst.msk [vmem:[%s2071_s3 + $0x6c] sm:$0xf] %vm1114_vm3, %v1342_v56  ;;  %v819_v63 = vsel %vm691_vm11, %v511_v46, %v755_v58  ;;  %v652_v1 = vadd.f32 %v1719_v33, %v651_v52  ;;  %v1374_v4 = vpack.c.bf16 %v853_v62, %v853_v62  ;;  %vm696_vm13 = vcmp.ge.f32.partialorder %v532_v60, 0.0 }
 0x12b   :  { %v1340_v5 = vpack.c.bf16 %v819_v63, %v819_v63  ;;  %v851_v6 = vsel %vm723_vm12, %v639_v50, %v787_v59  ;;  %v760_v8 = vmul.f32 0.2, %v532_v60  ;;  %vm728_vm14 = vcmp.ge.f32.partialorder %v660_v61, 0.0 }
 0x12c   :  { %v1372_v7 = vpack.c.bf16 %v851_v6, %v851_v6  ;;  %v792_v9 = vmul.f32 0.2, %v660_v61  ;;  %1174 = vst.msk [vmem:[%s2071_s3 + $0xec] sm:$0xf] %vm1114_vm3, %v1374_v4  ;;  %vm694_vm15 = vcmp.ge.f32.partialorder %v524_v0, 0.0  ;;  %vm726_vm0 = vcmp.ge.f32.partialorder %v652_v1, 0.0 }
 0x12d   :  { %1140 = vst.msk [vmem:[%s2071_s3 + $0x64] sm:$0xf] %vm1114_vm3, %v1340_v5  ;;  %v758_v10 = vmul.f32 0.2, %v524_v0  ;;  %v790_v11 = vmul.f32 0.2, %v652_v1  ;;  %v824_v12 = vsel %vm696_vm13, %v532_v60, %v760_v8  ;;  %v535_v14 = vadd.f32 %v1445_v2, %v1719_v33 }
 0x12e   :  { %1172 = vst.msk [vmem:[%s2071_s3 + $0xe4] sm:$0xf] %vm1114_vm3, %v1372_v7  ;;  %v856_v13 = vsel %vm728_vm14, %v660_v61, %v792_v9  ;;  %v663_v15 = vadd.f32 %v1477_v3, %v1719_v33  ;;  %v1345_v18 = vpack.c.bf16 %v824_v12, %v824_v12  ;;  %v527_v26 = vadd.f32 %v1719_v33, %v526_v16 }
 0x12f   :  { %v1377_v19 = vpack.c.bf16 %v856_v13, %v856_v13  ;;  %v822_v20 = vsel %vm694_vm15, %v524_v0, %v758_v10  ;;  %v854_v21 = vsel %vm726_vm0, %v652_v1, %v790_v11  ;;  %vm697_vm1 = vcmp.ge.f32.partialorder %v535_v14, 0.0 }
 0x130   :  { %v1343_v22 = vpack.c.bf16 %v822_v20, %v822_v20  ;;  %v1375_v23 = vpack.c.bf16 %v854_v21, %v854_v21  ;;  %v761_v24 = vmul.f32 0.2, %v535_v14  ;;  %1145 = vst.msk [vmem:[%s2071_s3 + $0x78] sm:$0xf] %vm1114_vm3, %v1345_v18  ;;  %vm729_vm2 = vcmp.ge.f32.partialorder %v663_v15, 0.0 }
 0x131   :  { %1177 = vst.msk [vmem:[%s2071_s3 + $0xf8] sm:$0xf] %vm1114_vm3, %v1377_v19  ;;  %v793_v25 = vmul.f32 0.2, %v663_v15  ;;  %v655_v27 = vadd.f32 %v1719_v33, %v654_v17  ;;  %vm695_vm4 = vcmp.ge.f32.partialorder %v527_v26, 0.0 }
 0x132   :  { %1143 = vst.msk [vmem:[%s2071_s3 + $0x70] sm:$0xf] %vm1114_vm3, %v1343_v22  ;;  %1175 = vst.msk [vmem:[%s2071_s3 + $0xf0] sm:$0xf] %vm1114_vm3, %v1375_v23  ;;  %v825_v28 = vsel %vm697_vm1, %v535_v14, %v761_v24  ;;  %v759_v31 = vmul.f32 0.2, %v527_v26 }
 0x133   :  { %v1346_v29 = vpack.c.bf16 %v825_v28, %v825_v28  ;;  %v857_v30 = vsel %vm729_vm2, %v663_v15, %v793_v25  ;;  %vm727_vm5 = vcmp.ge.f32.partialorder %v655_v27, 0.0  ;;  %v791_v34 = vmul.f32 0.2, %v655_v27 }
 0x134   :  { %v1378_v32 = vpack.c.bf16 %v857_v30, %v857_v30  ;;  %v823_v33 = vsel %vm695_vm4, %v527_v26, %v759_v31 }
 0x135   :  { %1146 = vst.msk [vmem:[%s2071_s3 + $0x7c] sm:$0xf] %vm1114_vm3, %v1346_v29  ;;  %v1344_v35 = vpack.c.bf16 %v823_v33, %v823_v33  ;;  %v855_v36 = vsel %vm727_vm5, %v655_v27, %v791_v34 }
 0x136   :  { %1178 = vst.msk [vmem:[%s2071_s3 + $0xfc] sm:$0xf] %vm1114_vm3, %v1378_v32  ;;  %v1376_v37 = vpack.c.bf16 %v855_v36, %v855_v36 }
 0x137   :  { %1144 = vst.msk [vmem:[%s2071_s3 + $0x74] sm:$0xf] %vm1114_vm3, %v1344_v35 }
 0x138   :  { %1176 = vst.msk [vmem:[%s2071_s3 + $0xf4] sm:$0xf] %vm1114_vm3, %v1376_v37 }
 0x139   :  { %1183 = vsyncpa [#allocation3], 1 }
 0x13a   :  { %1184 = vsyncpa [#allocation5], 1 }

// kernel: discriminator_forward.4
= control target key start
LH: loop header
LB: loop body
LE: loop exit
PB: predicated region body
PF: predicated region fallthrough
CT: control target
= control target key end

     0   :  { %8 = vsyncpa [#allocation3], 0  ;;  %s2520_s0 = inlined_call_operand.vmem [shape: bf16[128,1024], index: 0, kind: input, shape index: {}]   ;;  %s2521_s1 = inlined_call_operand.hbm [shape: bf16[1024,128], index: 1, kind: input, shape index: {}]   ;;  %s2522_s2 = inlined_call_operand.hbm [shape: f32[1,128], index: 2, kind: input, shape index: {}]   ;;  %s2523_s3 = inlined_call_operand.vmem [shape: bf16[128,128], index: 3, kind: output, shape index: {}]  }
   0x1   :  { %9 = vsyncpa [#allocation5], 0  ;;  %s2139_s12 = smov [#allocation2]  }
   0x2   :  { %s17_s13 = sshll.u32 %s2139_s12, 4  ;;  %s18_s13 = int_to_ptr.vmem [resolvable:$true] %s17_s13 }
   0x3   :  { %s2103_s14 = scalar_lea.vmem %s18_s13, 8192  ;;  %p2108_p1 = scmp.lt.s32.totalorder %s18_s13, %s18_s13 }
   0x4   :  { %p2104_p0 = scmp.ne.s32.totalorder %s18_s13, %s2103_s14  ;;  %p2109_p2 = scmp.lt.s32.totalorder %s2103_s14, %s2103_s14 }
   0x6   :  { %p2110_p3 = por %p2109_p2, %p2108_p1 }
   0x8   :  { %p2111_p4 = pnand %p2110_p3, %p2104_p0 }
   0xa   :  { %2114 = shalt.err (!%p2111_p4)
}
   0xb   :  { %s2140_s15 = smov 64   ;;  %s2141_s16 = smov 4  }
   0xc   :  { %23 = dma.hbm_to_vmem [thread:$0]  %s2521_s1, 8192, %s18_s13, [#allocation3], %s2140_s15, %s2140_s15, %s2141_s16  }
   0xd   :  { %s2142_s19 = smov [#allocation4]  }
   0xe   :  { %s30_s20 = sshll.u32 %s2142_s19, 4  ;;  %s31_s20 = int_to_ptr.vmem [resolvable:$true] %s30_s20 }
   0xf   :  { %s2123_s21 = scalar_lea.vmem %s31_s20, 16  ;;  %s2127_s22 = scalar_lea.vmem %s31_s20, 32 }
  0x10   :  { %p2124_p5 = scmp.ne.s32.totalorder %s31_s20, %s2123_s21  ;;  %p2128_p6 = scmp.lt.s32.totalorder %s31_s20, %s31_s20 }
  0x11   :  { %p2129_p7 = scmp.lt.s32.totalorder %s2127_s22, %s2123_s21 }
  0x13   :  { %p2130_p8 = por %p2129_p7, %p2128_p6 }
  0x15   :  { %p2131_p9 = pnand %p2130_p8, %p2124_p5 }
  0x17   :  { %2134 = shalt.err (!%p2131_p9)
}
  0x18   :  { %33 = dma.hbm_to_vmem [thread:$0]  %s2522_s2, 16, %s31_s20, [#allocation5]  }
  0x19   :  { %2135 = dma.done.wait [#allocation3], 8192  }
  0x1a   :  { %2136 = vsyncadd [#allocation3], 4294959104 }
  0x1b   :  { %2137 = dma.done.wait [#allocation5], 16  }
  0x1c   :  { %2138 = vsyncadd [#allocation5], 4294967280  ;;  %v2029_v0 = vld [vmem:[#allocation2 + $0x78] sm:$0xff]   ;;  %v2033_v4 = vld [vmem:[#allocation2 + $0x70] sm:$0xff]  }
  0x1d   :  { %v2030_v1 = vld [vmem:[#allocation2 + $0xf8] sm:$0xff]   ;;  %1769 = vmatprep.subr.bf16.mxu0 %v2029_v0  ;;  %v2034_v5 = vld [vmem:[#allocation2 + $0xf0] sm:$0xff]   ;;  %v2037_v8 = vld [vmem:[#allocation2 + $0x68] sm:$0xff]  }
  0x1e   :  { %v2031_v2 = vld [vmem:[#allocation2 + $0x38] sm:$0xff]   ;;  %1833 = vmatprep.subr.bf16.mxu1 %v2030_v1  ;;  %v2035_v6 = vld [vmem:[#allocation2 + $0x30] sm:$0xff]   ;;  %v2038_v9 = vld [vmem:[#allocation2 + $0xe8] sm:$0xff]  }
  0x1f   :  { %v2032_v3 = vld [vmem:[#allocation2 + $0xb8] sm:$0xff]   ;;  %1770 = vmatpush3.bf16.msra.mxu0 %v2031_v2  ;;  %v2036_v7 = vld [vmem:[#allocation2 + $0xb0] sm:$0xff]   ;;  %v2039_v10 = vld [vmem:[#allocation2 + $0x28] sm:$0xff]  }
  0x20   :  { %1834 = vmatpush3.bf16.msra.mxu1 %v2032_v3  ;;  %1771 = vmatprep.subr.bf16.mxu0 %v2033_v4  ;;  %v2040_v11 = vld [vmem:[#allocation2 + $0xa8] sm:$0xff]   ;;  %v2041_v12 = vld [vmem:[#allocation2 + $0x60] sm:$0xff]   ;;  %v2045_v16 = vld [vmem:[#allocation2 + $0x58] sm:$0xff]  }
  0x21   :  { %1835 = vmatprep.subr.bf16.mxu1 %v2034_v5  ;;  %v2042_v13 = vld [vmem:[#allocation2 + $0xe0] sm:$0xff]   ;;  %v2046_v17 = vld [vmem:[#allocation2 + $0xd8] sm:$0xff]   ;;  %v2049_v20 = vld [vmem:[#allocation2 + $0x50] sm:$0xff]  }
  0x22   :  { %v2043_v14 = vld [vmem:[#allocation2 + $0x20] sm:$0xff]   ;;  %v2047_v18 = vld [vmem:[#allocation2 + $0x18] sm:$0xff]   ;;  %v2050_v21 = vld [vmem:[#allocation2 + $0xd0] sm:$0xff]  }
  0x23   :  { %1772 = vmatpush3.bf16.msra.mxu0 %v2035_v6  ;;  %v2044_v15 = vld [vmem:[#allocation2 + $0xa0] sm:$0xff]   ;;  %v2048_v19 = vld [vmem:[#allocation2 + $0x98] sm:$0xff]   ;;  %v2051_v22 = vld [vmem:[#allocation2 + $0x10] sm:$0xff]  }
  0x24   :  { %1836 = vmatpush3.bf16.msra.mxu1 %v2036_v7  ;;  %1773 = vmatprep.subr.bf16.mxu0 %v2037_v8  ;;  %v2052_v23 = vld [vmem:[#allocation2 + $0x90] sm:$0xff]   ;;  %v2053_v24 = vld [vmem:[#allocation2 + $0x48] sm:$0xff]   ;;  %v2057_v28 = vld [vmem:[#allocation2 + $0x40] sm:$0xff]  }
  0x25   :  { %1837 = vmatprep.subr.bf16.mxu1 %v2038_v9  ;;  %v2054_v25 = vld [vmem:[#allocation2 + $0xc8] sm:$0xff]   ;;  %v2058_v29 = vld [vmem:[#allocation2 + $0xc0] sm:$0xff]   ;;  %v2061_v40 = vld [vmem:[#allocation2 + $0x178] sm:$0xff]  }
  0x26   :  { %v2055_v26 = vld [vmem:[#allocation2 + $0x8] sm:$0xff]   ;;  %v2059_v30 = vld [vmem:[#allocation2] sm:$0xff]   ;;  %v2062_v41 = vld [vmem:[#allocation2 + $0x138] sm:$0xff]  }
  0x27   :  { %1774 = vmatpush3.bf16.msra.mxu0 %v2039_v10  ;;  %v2056_v27 = vld [vmem:[#allocation2 + $0x88] sm:$0xff]   ;;  %v2060_v31 = vld [vmem:[#allocation2 + $0x80] sm:$0xff]   ;;  %v2063_v42 = vld [vmem:[#allocation2 + $0x1f8] sm:$0xff]  }
  0x28   :  { %1838 = vmatpush3.bf16.msra.mxu1 %v2040_v11  ;;  %1775 = vmatprep.subr.bf16.mxu0 %v2041_v12  ;;  %v41_v32 = vld [vmem:[%s2520_s0] sm:$0xff]  ;;  %v42_v34 = vld [vmem:[%s2520_s0 + $0x8] sm:$0xff]  ;;  %v2064_v43 = vld [vmem:[#allocation2 + $0x1b8] sm:$0xff]  }
  0x29   :  { %1839 = vmatprep.subr.bf16.mxu1 %v2042_v13  ;;  %v45_v33 = vld [vmem:[%s2520_s0 + $0x20] sm:$0xff]  ;;  %v46_v37 = vld [vmem:[%s2520_s0 + $0x28] sm:$0xff]  ;;  %v2065_v50 = vld [vmem:[#allocation2 + $0x170] sm:$0xff]  }
  0x2a   :  { %v1562_v35 = vcombine.low %v41_v32, %v45_v33  ;;  %v1563_v36 = vcombine.high %v41_v32, %v45_v33  ;;  %v1564_v38 = vcombine.low %v42_v34, %v46_v37  ;;  %v1565_v39 = vcombine.high %v42_v34, %v46_v37  ;;  %v49_v44 = vld [vmem:[%s2520_s0 + $0x40] sm:$0xff]  ;;  %v50_v47 = vld [vmem:[%s2520_s0 + $0x48] sm:$0xff]  ;;  %v2066_v52 = vld [vmem:[#allocation2 + $0x130] sm:$0xff]  }
  0x2b   :  { %1776 = vmatpush3.bf16.msra.mxu0 %v2043_v14  ;;  %v53_v45 = vld [vmem:[%s2520_s0 + $0x60] sm:$0xff]  ;;  %v54_v48 = vld [vmem:[%s2520_s0 + $0x68] sm:$0xff]  ;;  %v2067_v54 = vld [vmem:[#allocation2 + $0x1f0] sm:$0xff]  }
  0x2c   :  { %1840 = vmatpush3.bf16.msra.mxu1 %v2044_v15  ;;  %1777 = vmatprep.subr.bf16.mxu0 %v2045_v16  ;;  %v1571_v46 = vcombine.high %v49_v44, %v53_v45  ;;  %v1573_v49 = vcombine.high %v50_v47, %v54_v48  ;;  %v1570_v51 = vcombine.low %v49_v44, %v53_v45  ;;  %v2068_v55 = vld [vmem:[#allocation2 + $0x1b0] sm:$0xff]   ;;  %v57_v56 = vld [vmem:[%s2520_s0 + $0x80] sm:$0xff]  ;;  %v58_v58 = vld [vmem:[%s2520_s0 + $0x88] sm:$0xff] }
  0x2d   :  { %1841 = vmatprep.subr.bf16.mxu1 %v2046_v17  ;;  %976 = vmatprep.mubr.bf16.mxu0 %v1563_v36  ;;  %v1572_v53 = vcombine.low %v50_v47, %v54_v48  ;;  %v61_v57 = vld [vmem:[%s2520_s0 + $0xa0] sm:$0xff]  ;;  %v62_v59 = vld [vmem:[%s2520_s0 + $0xa8] sm:$0xff]  ;;  %v2083_v32 = vld [vmem:[#allocation2 + $0x1d0] sm:$0xff]  }
  0x2e   :  { %1073 = vmatprep.mubr.bf16.mxu1 %v1565_v39  ;;  %v1579_v60 = vcombine.high %v57_v56, %v61_v57  ;;  %v1581_v61 = vcombine.high %v58_v58, %v62_v59  ;;  %v2069_v62 = vld [vmem:[#allocation2 + $0x168] sm:$0xff]   ;;  %v1578_v2 = vcombine.low %v57_v56, %v61_v57  ;;  %v65_v3 = vld [vmem:[%s2520_s0 + $0xc0] sm:$0xff]  ;;  %v1580_v6 = vcombine.low %v58_v58, %v62_v59  ;;  %v2084_v33 = vld [vmem:[#allocation2 + $0x190] sm:$0xff]  }
  0x2f   :  { %1778 = vmatpush3.bf16.msra.mxu0 %v2047_v18  ;;  %v2070_v63 = vld [vmem:[#allocation2 + $0x128] sm:$0xff]   ;;  %v69_v4 = vld [vmem:[%s2520_s0 + $0xe0] sm:$0xff]  ;;  %v2077_v18 = vld [vmem:[#allocation2 + $0x158] sm:$0xff]  }
  0x30   :  { %1842 = vmatpush3.bf16.msra.mxu1 %v2048_v19  ;;  %1779 = vmatprep.subr.bf16.mxu0 %v2049_v20  ;;  %v2071_v0 = vld [vmem:[#allocation2 + $0x1e8] sm:$0xff]   ;;  %v1587_v7 = vcombine.high %v65_v3, %v69_v4  ;;  %v2073_v10 = vld [vmem:[#allocation2 + $0x160] sm:$0xff]   ;;  %v1586_v19 = vcombine.low %v65_v3, %v69_v4  ;;  %v2078_v20 = vld [vmem:[#allocation2 + $0x118] sm:$0xff]  }
  0x31   :  { %1843 = vmatprep.subr.bf16.mxu1 %v2050_v21  ;;  %v2072_v1 = vld [vmem:[#allocation2 + $0x1a8] sm:$0xff]   ;;  %v2074_v11 = vld [vmem:[#allocation2 + $0x120] sm:$0xff]  }
  0x32   :  { %v66_v5 = vld [vmem:[%s2520_s0 + $0xc8] sm:$0xff]  ;;  %v2075_v12 = vld [vmem:[#allocation2 + $0x1e0] sm:$0xff]  }
  0x33   :  { %1780 = vmatpush3.bf16.msra.mxu0 %v2051_v22  ;;  %v70_v8 = vld [vmem:[%s2520_s0 + $0xe8] sm:$0xff]  ;;  %v2076_v13 = vld [vmem:[#allocation2 + $0x1a0] sm:$0xff]  }
  0x34   :  { %1844 = vmatpush3.bf16.msra.mxu1 %v2052_v23  ;;  %1781 = vmatprep.subr.bf16.mxu0 %v2053_v24  ;;  %v1589_v9 = vcombine.high %v66_v5, %v70_v8  ;;  %v73_v14 = vld [vmem:[%s2520_s0 + $0x100] sm:$0xff]  ;;  %v74_v16 = vld [vmem:[%s2520_s0 + $0x108] sm:$0xff]  ;;  %v1588_v21 = vcombine.low %v66_v5, %v70_v8  ;;  %v2079_v23 = vld [vmem:[#allocation2 + $0x1d8] sm:$0xff]  }
  0x35   :  { %1845 = vmatprep.subr.bf16.mxu1 %v2054_v25  ;;  %v77_v15 = vld [vmem:[%s2520_s0 + $0x120] sm:$0xff]  ;;  %v78_v17 = vld [vmem:[%s2520_s0 + $0x128] sm:$0xff]  ;;  %v2080_v25 = vld [vmem:[#allocation2 + $0x198] sm:$0xff]  }
  0x36   :  { %v1595_v22 = vcombine.high %v73_v14, %v77_v15  ;;  %v1597_v24 = vcombine.high %v74_v16, %v78_v17  ;;  %v1594_v34 = vcombine.low %v73_v14, %v77_v15  ;;  %v2086_v39 = vld [vmem:[#allocation2 + $0x108] sm:$0xff]   ;;  %v2090_v48 = vld [vmem:[#allocation2 + $0x100] sm:$0xff]   ;;  %v52_v8 = vld [vmem:[%s2520_s0 + $0x58] sm:$0xff] }
  0x37   :  { %1782 = vmatpush3.bf16.msra.mxu0 %v2055_v26  ;;  %v81_v26 = vld [vmem:[%s2520_s0 + $0x140] sm:$0xff]  ;;  %v90_v44 = vld [vmem:[%s2520_s0 + $0x188] sm:$0xff]  ;;  %v59_v14 = vld [vmem:[%s2520_s0 + $0x90] sm:$0xff] }
  0x38   :  { %1846 = vmatpush3.bf16.msra.mxu1 %v2056_v27  ;;  %1783 = vmatprep.subr.bf16.mxu0 %v2057_v28  ;;  %v85_v27 = vld [vmem:[%s2520_s0 + $0x160] sm:$0xff]  ;;  %v2081_v28 = vld [vmem:[#allocation2 + $0x150] sm:$0xff]   ;;  %v94_v45 = vld [vmem:[%s2520_s0 + $0x1a8] sm:$0xff] }
  0x39   :  { %1847 = vmatprep.subr.bf16.mxu1 %v2058_v29  ;;  %v82_v29 = vld [vmem:[%s2520_s0 + $0x148] sm:$0xff]  ;;  %v1603_v36 = vcombine.high %v81_v26, %v85_v27  ;;  %v1602_v47 = vcombine.low %v81_v26, %v85_v27  ;;  %v1612_v59 = vcombine.low %v90_v44, %v94_v45  ;;  %v63_v15 = vld [vmem:[%s2520_s0 + $0xb0] sm:$0xff] }
  0x3a   :  { %v98_v56 = vld [vmem:[%s2520_s0 + $0x1c8] sm:$0xff]  ;;  %v1582_v26 = vcombine.low %v59_v14, %v63_v15 }
  0x3b   :  { %1784 = vmatpush3.bf16.msra.mxu0 %v2059_v30  ;;  %v86_v30 = vld [vmem:[%s2520_s0 + $0x168] sm:$0xff] }
  0x3c   :  { %1848 = vmatpush3.bf16.msra.mxu1 %v2060_v31  ;;  %1897 = vmatprep.subr.bf16.mxu0 %v2061_v40  ;;  %v2082_v31 = vld [vmem:[#allocation2 + $0x110] sm:$0xff]   ;;  %v1605_v37 = vcombine.high %v82_v29, %v86_v30  ;;  %v2087_v40 = vld [vmem:[#allocation2 + $0x1c8] sm:$0xff]  }
  0x3d   :  { %1961 = vmatprep.subr.bf16.mxu1 %v2063_v42  ;;  %v93_v42 = vld [vmem:[%s2520_s0 + $0x1a0] sm:$0xff]  ;;  %v102_v57 = vld [vmem:[%s2520_s0 + $0x1e8] sm:$0xff] }
  0x3e   :  { %977 = vmatmul.mubr.bf16.vlgmr.msra.gmra.mxu0 %v1562_v35  ;;  %v1596_v35 = vcombine.low %v74_v16, %v78_v17  ;;  %v1620_v3 = vcombine.low %v98_v56, %v102_v57  ;;  %v60_v16 = vld [vmem:[%s2520_s0 + $0x98] sm:$0xff] }
  0x3f   :  { %1074 = vmatmul.mubr.bf16.vlgmr.msra.gmra.mxu1 %v1564_v38  ;;  %1898 = vmatpush3.bf16.msra.mxu0 %v2062_v41  ;;  %v2085_v38 = vld [vmem:[#allocation2 + $0x148] sm:$0xff]   ;;  %v89_v41 = vld [vmem:[%s2520_s0 + $0x180] sm:$0xff]  ;;  %v64_v17 = vld [vmem:[%s2520_s0 + $0xb8] sm:$0xff] }
  0x40   :  { %1962 = vmatpush3.bf16.msra.mxu1 %v2064_v43  ;;  %984 = vmatprep.mubr.bf16.mxu0 %v1571_v46  ;;  %v2088_v43 = vld [vmem:[#allocation2 + $0x188] sm:$0xff]   ;;  %v2089_v46 = vld [vmem:[#allocation2 + $0x140] sm:$0xff]   ;;  %v1610_v58 = vcombine.low %v89_v41, %v93_v42  ;;  %v1584_v27 = vcombine.low %v60_v16, %v64_v17 }
  0x41   :  { %1081 = vmatprep.mubr.bf16.mxu1 %v1573_v49  ;;  %1899 = vmatprep.subr.bf16.mxu0 %v2065_v50  ;;  %v1604_v49 = vcombine.low %v82_v29, %v86_v30  ;;  %v1611_v50 = vcombine.high %v89_v41, %v93_v42  ;;  %v75_v30 = vld [vmem:[%s2520_s0 + $0x110] sm:$0xff]  ;;  %v88_v41 = vld [vmem:[%s2520_s0 + $0x178] sm:$0xff] }
  0x42   :  { %1963 = vmatprep.subr.bf16.mxu1 %v2067_v54  ;;  %v97_v54 = vld [vmem:[%s2520_s0 + $0x1c0] sm:$0xff] }
  0x43   :  { %1900 = vmatpush3.bf16.msra.mxu0 %v2066_v52  ;;  %v1613_v52 = vcombine.high %v90_v44, %v94_v45 }
  0x44   :  { %1964 = vmatpush3.bf16.msra.mxu1 %v2068_v55  ;;  %1901 = vmatprep.subr.bf16.mxu0 %v2069_v62  ;;  %v101_v55 = vld [vmem:[%s2520_s0 + $0x1e0] sm:$0xff]  ;;  %v43_v62 = vld [vmem:[%s2520_s0 + $0x10] sm:$0xff] }
  0x45   :  { %1965 = vmatprep.subr.bf16.mxu1 %v2071_v0  ;;  %v44_v0 = vld [vmem:[%s2520_s0 + $0x18] sm:$0xff] }
  0x46   :  { %985 = vmatmul.mubr.bf16.gmra.mxu0 %v1570_v51  ;;  %v2091_v51 = vld [vmem:[#allocation2 + $0x1c0] sm:$0xff]  }
  0x47   :  { %1082 = vmatmul.mubr.bf16.gmra.mxu1 %v1572_v53  ;;  %992 = vmatprep.mubr.bf16.mxu0 %v1579_v60  ;;  %v2092_v53 = vld [vmem:[#allocation2 + $0x180] sm:$0xff]   ;;  %v1619_v60 = vcombine.high %v97_v54, %v101_v55 }
  0x48   :  { %1089 = vmatprep.mubr.bf16.mxu1 %v1581_v61  ;;  %1902 = vmatpush3.bf16.msra.mxu0 %v2070_v63  ;;  %v1621_v61 = vcombine.high %v98_v56, %v102_v57  ;;  %v47_v63 = vld [vmem:[%s2520_s0 + $0x30] sm:$0xff]  ;;  %v100_v56 = vld [vmem:[%s2520_s0 + $0x1d8] sm:$0xff] }
  0x49   :  { %1966 = vmatpush3.bf16.msra.mxu1 %v2072_v1  ;;  %1903 = vmatprep.subr.bf16.mxu0 %v2073_v10  ;;  %v48_v1 = vld [vmem:[%s2520_s0 + $0x38] sm:$0xff]  ;;  %v1567_v4 = vcombine.high %v43_v62, %v47_v63  ;;  %v1566_v10 = vcombine.low %v43_v62, %v47_v63 }
  0x4a   :  { %1967 = vmatprep.subr.bf16.mxu1 %v2075_v12  ;;  %v1569_v5 = vcombine.high %v44_v0, %v48_v1  ;;  %v104_v57 = vld [vmem:[%s2520_s0 + $0x1f8] sm:$0xff] }
  0x4b   :  { %v1624_v63 = vcombine.low %v100_v56, %v104_v57 }
  0x4c   :  { %1904 = vmatpush3.bf16.msra.mxu0 %v2074_v11  ;;  %v1568_v11 = vcombine.low %v44_v0, %v48_v1 }
  0x4d   :  { %1968 = vmatpush3.bf16.msra.mxu1 %v2076_v13  ;;  %1905 = vmatprep.subr.bf16.mxu0 %v2077_v18 }
  0x4e   :  { %993 = vmatmul.mubr.bf16.gmra.mxu0 %v1578_v2  ;;  %1969 = vmatprep.subr.bf16.mxu1 %v2079_v23  ;;  %v1618_v2 = vcombine.low %v97_v54, %v101_v55  ;;  %v71_v23 = vld [vmem:[%s2520_s0 + $0xf0] sm:$0xff] }
  0x4f   :  { %1090 = vmatmul.mubr.bf16.gmra.mxu1 %v1580_v6  ;;  %1000 = vmatprep.mubr.bf16.mxu0 %v1587_v7  ;;  %v51_v6 = vld [vmem:[%s2520_s0 + $0x50] sm:$0xff] }
  0x50   :  { %1097 = vmatprep.mubr.bf16.mxu1 %v1589_v9  ;;  %1906 = vmatpush3.bf16.msra.mxu0 %v2078_v20  ;;  %v55_v7 = vld [vmem:[%s2520_s0 + $0x70] sm:$0xff]  ;;  %v56_v9 = vld [vmem:[%s2520_s0 + $0x78] sm:$0xff]  ;;  %v1583_v20 = vcombine.high %v59_v14, %v63_v15 }
  0x51   :  { %1970 = vmatpush3.bf16.msra.mxu1 %v2080_v25  ;;  %1907 = vmatprep.subr.bf16.mxu0 %v2081_v28  ;;  %v1575_v12 = vcombine.high %v51_v6, %v55_v7  ;;  %v1577_v13 = vcombine.high %v52_v8, %v56_v9  ;;  %v1574_v18 = vcombine.low %v51_v6, %v55_v7  ;;  %v72_v25 = vld [vmem:[%s2520_s0 + $0xf8] sm:$0xff]  ;;  %v99_v54 = vld [vmem:[%s2520_s0 + $0x1d0] sm:$0xff] }
  0x52   :  { %1971 = vmatprep.subr.bf16.mxu1 %v2083_v32  ;;  %v76_v32 = vld [vmem:[%s2520_s0 + $0x118] sm:$0xff]  ;;  %v103_v55 = vld [vmem:[%s2520_s0 + $0x1f0] sm:$0xff] }
  0x53   :  { %v1622_v62 = vcombine.low %v99_v54, %v103_v55 }
  0x54   :  { %1908 = vmatpush3.bf16.msra.mxu0 %v2082_v31  ;;  %v79_v31 = vld [vmem:[%s2520_s0 + $0x130] sm:$0xff] }
  0x55   :  { %1972 = vmatpush3.bf16.msra.mxu1 %v2084_v33  ;;  %1909 = vmatprep.subr.bf16.mxu0 %v2085_v38  ;;  %v80_v33 = vld [vmem:[%s2520_s0 + $0x138] sm:$0xff]  ;;  %v83_v38 = vld [vmem:[%s2520_s0 + $0x150] sm:$0xff]  ;;  %v1598_v42 = vcombine.low %v75_v30, %v79_v31 }
  0x56   :  { %1001 = vmatmul.mubr.bf16.gmra.mxu0 %v1586_v19  ;;  %1973 = vmatprep.subr.bf16.mxu1 %v2087_v40  ;;  %v1576_v19 = vcombine.low %v52_v8, %v56_v9  ;;  %v84_v40 = vld [vmem:[%s2520_s0 + $0x158] sm:$0xff] }
  0x57   :  { %1098 = vmatmul.mubr.bf16.gmra.mxu1 %v1588_v21  ;;  %1008 = vmatprep.mubr.bf16.mxu0 %v1595_v22  ;;  %v1585_v21 = vcombine.high %v60_v16, %v64_v17  ;;  %v67_v22 = vld [vmem:[%s2520_s0 + $0xd0] sm:$0xff]  ;;  %v1609_v45 = vcombine.high %v84_v40, %v88_v41 }
  0x58   :  { %1105 = vmatprep.mubr.bf16.mxu1 %v1597_v24  ;;  %1910 = vmatpush3.bf16.msra.mxu0 %v2086_v39  ;;  %v68_v24 = vld [vmem:[%s2520_s0 + $0xd8] sm:$0xff]  ;;  %v1591_v28 = vcombine.high %v67_v22, %v71_v23  ;;  %v87_v39 = vld [vmem:[%s2520_s0 + $0x170] sm:$0xff] }
  0x59   :  { %1974 = vmatpush3.bf16.msra.mxu1 %v2088_v43  ;;  %1911 = vmatprep.subr.bf16.mxu0 %v2089_v46  ;;  %v1593_v29 = vcombine.high %v68_v24, %v72_v25  ;;  %v1600_v43 = vcombine.low %v76_v32, %v80_v33  ;;  %v1607_v44 = vcombine.high %v83_v38, %v87_v39  ;;  %v91_v46 = vld [vmem:[%s2520_s0 + $0x190] sm:$0xff] }
  0x5a   :  { %1975 = vmatprep.subr.bf16.mxu1 %v2091_v51  ;;  %v1608_v51 = vcombine.low %v84_v40, %v88_v41 }
  0x5c   :  { %1912 = vmatpush3.bf16.msra.mxu0 %v2090_v48  ;;  %v92_v48 = vld [vmem:[%s2520_s0 + $0x198] sm:$0xff] }
  0x5d   :  { %1976 = vmatpush3.bf16.msra.mxu1 %v2092_v53 }
  0x5e   :  { %1009 = vmatmul.mubr.bf16.gmra.mxu0 %v1594_v34  ;;  %v1590_v34 = vcombine.low %v67_v22, %v71_v23 }
  0x5f   :  { %1106 = vmatmul.mubr.bf16.gmra.mxu1 %v1596_v35  ;;  %1016 = vmatprep.mubr.bf16.mxu0 %v1603_v36  ;;  %v1592_v35 = vcombine.low %v68_v24, %v72_v25  ;;  %v1599_v36 = vcombine.high %v75_v30, %v79_v31 }
  0x60   :  { %1113 = vmatprep.mubr.bf16.mxu1 %v1605_v37  ;;  %v1601_v37 = vcombine.high %v76_v32, %v80_v33 }
  0x66   :  { %1017 = vmatmul.mubr.bf16.gmra.mxu0 %v1602_v47  ;;  %v95_v47 = vld [vmem:[%s2520_s0 + $0x1b0] sm:$0xff] }
  0x67   :  { %1114 = vmatmul.mubr.bf16.gmra.mxu1 %v1604_v49  ;;  %1024 = vmatprep.mubr.bf16.mxu0 %v1611_v50  ;;  %v96_v49 = vld [vmem:[%s2520_s0 + $0x1b8] sm:$0xff]  ;;  %v1606_v50 = vcombine.low %v83_v38, %v87_v39 }
  0x68   :  { %1121 = vmatprep.mubr.bf16.mxu1 %v1613_v52  ;;  %v1615_v52 = vcombine.high %v91_v46, %v95_v47  ;;  %v1617_v53 = vcombine.high %v92_v48, %v96_v49 }
  0x6e   :  { %1025 = vmatmul.mubr.bf16.gmra.mxu0 %v1610_v58  ;;  %v1614_v58 = vcombine.low %v91_v46, %v95_v47 }
  0x6f   :  { %1122 = vmatmul.mubr.bf16.gmra.mxu1 %v1612_v59  ;;  %1032 = vmatprep.mubr.bf16.mxu0 %v1619_v60  ;;  %v1616_v59 = vcombine.low %v92_v48, %v96_v49  ;;  %v1623_v60 = vcombine.high %v99_v54, %v103_v55 }
  0x70   :  { %1129 = vmatprep.mubr.bf16.mxu1 %v1621_v61  ;;  %v1625_v61 = vcombine.high %v100_v56, %v104_v57 }
  0x76   :  { %1033 = vmatmul.mubr.bf16.gmra.mxu0 %v1618_v2  ;;  %v2361_v2 = vld [vmem:[#allocation4] ss:$0 sm:$0xff] }
  0x77   :  { %1130 = vmatmul.mubr.bf16.gmra.mxu1 %v1620_v3  ;;  %1170 = vmatprep.mubr.bf16.mxu0 %v1567_v4 }
  0x78   :  { %1267 = vmatprep.mubr.bf16.mxu1 %v1569_v5 }
  0x7e   :  { %1171 = vmatmul.mubr.bf16.vlgmr.msra.gmra.mxu0 %v1566_v10 }
  0x7f   :  { %1268 = vmatmul.mubr.bf16.vlgmr.msra.gmra.mxu1 %v1568_v11  ;;  %1178 = vmatprep.mubr.bf16.mxu0 %v1575_v12 }
  0x80   :  { %1275 = vmatprep.mubr.bf16.mxu1 %v1577_v13 }
  0x86   :  { %1179 = vmatmul.mubr.bf16.gmra.mxu0 %v1574_v18 }
  0x87   :  { %1276 = vmatmul.mubr.bf16.gmra.mxu1 %v1576_v19  ;;  %1186 = vmatprep.mubr.bf16.mxu0 %v1583_v20 }
  0x88   :  { %1283 = vmatprep.mubr.bf16.mxu1 %v1585_v21 }
  0x8e   :  { %1187 = vmatmul.mubr.bf16.gmra.mxu0 %v1582_v26 }
  0x8f   :  { %1284 = vmatmul.mubr.bf16.gmra.mxu1 %v1584_v27  ;;  %1194 = vmatprep.mubr.bf16.mxu0 %v1591_v28 }
  0x90   :  { %1291 = vmatprep.mubr.bf16.mxu1 %v1593_v29 }
  0x96   :  { %1195 = vmatmul.mubr.bf16.gmra.mxu0 %v1590_v34 }
  0x97   :  { %1292 = vmatmul.mubr.bf16.gmra.mxu1 %v1592_v35  ;;  %1202 = vmatprep.mubr.bf16.mxu0 %v1599_v36 }
  0x98   :  { %1299 = vmatprep.mubr.bf16.mxu1 %v1601_v37 }
  0x9e   :  { %1203 = vmatmul.mubr.bf16.gmra.mxu0 %v1598_v42 }
  0x9f   :  { %1300 = vmatmul.mubr.bf16.gmra.mxu1 %v1600_v43  ;;  %1210 = vmatprep.mubr.bf16.mxu0 %v1607_v44 }
  0xa0   :  { %1307 = vmatprep.mubr.bf16.mxu1 %v1609_v45 }
  0xa6   :  { %1211 = vmatmul.mubr.bf16.gmra.mxu0 %v1606_v50 }
  0xa7   :  { %1308 = vmatmul.mubr.bf16.gmra.mxu1 %v1608_v51  ;;  %1218 = vmatprep.mubr.bf16.mxu0 %v1615_v52 }
  0xa8   :  { %1315 = vmatprep.mubr.bf16.mxu1 %v1617_v53 }
  0xae   :  { %1219 = vmatmul.mubr.bf16.gmra.mxu0 %v1614_v58 }
  0xaf   :  { %1316 = vmatmul.mubr.bf16.gmra.mxu1 %v1616_v59  ;;  %1226 = vmatprep.mubr.bf16.mxu0 %v1623_v60 }
  0xb0   :  { %1323 = vmatprep.mubr.bf16.mxu1 %v1625_v61 }
  0xb6   :  { %1227 = vmatmul.mubr.bf16.gmra.mxu0 %v1622_v62 }
  0xb7   :  { %1324 = vmatmul.mubr.bf16.gmra.mxu1 %v1624_v63 }
  0xfe   :  { %v1785_v0 = vpop.f32.mrf.mxu0 }
  0xff   :  { %v1849_v1 = vpop.f32.mrf.mxu1 }
 0x100   :  { %v1786_v3 = vpop.f32.mrf.mxu0 }
 0x101   :  { %v1787_v4 = vadd.f32 %v1786_v3, %v1785_v0  ;;  %v1850_v5 = vpop.f32.mrf.mxu1 }
 0x102   :  { %v1851_v6 = vadd.f32 %v1850_v5, %v1849_v1  ;;  %v1788_v7 = vpop.f32.mrf.mxu0 }
 0x103   :  { %v979_v8 = vadd.f32 %v1787_v4, %v2361_v2  ;;  %v1852_v9 = vpop.f32.mrf.mxu1 }
 0x104   :  { %v1789_v10 = vpop.f32.mrf.mxu0 }
 0x105   :  { %v2364_v11 = vadd.f32 %v1851_v6, %v979_v8  ;;  %v1790_v12 = vadd.f32 %v1789_v10, %v1788_v7  ;;  %v1853_v13 = vpop.f32.mrf.mxu1 }
 0x106   :  { %v1854_v14 = vadd.f32 %v1853_v13, %v1852_v9  ;;  %v1791_v15 = vpop.f32.mrf.mxu0 }
 0x107   :  { %v982_v16 = vadd.f32 %v1790_v12, %v2361_v2  ;;  %v1855_v17 = vpop.f32.mrf.mxu1 }
 0x108   :  { %v1792_v18 = vpop.f32.mrf.mxu0 }
 0x109   :  { %v2367_v19 = vadd.f32 %v1854_v14, %v982_v16  ;;  %v1793_v20 = vadd.f32 %v1792_v18, %v1791_v15  ;;  %v1856_v21 = vpop.f32.mrf.mxu1 }
 0x10a   :  { %v1857_v22 = vadd.f32 %v1856_v21, %v1855_v17  ;;  %v1794_v23 = vpop.f32.mrf.mxu0 }
 0x10b   :  { %v987_v24 = vadd.f32 %v1793_v20, %v2361_v2  ;;  %v1858_v25 = vpop.f32.mrf.mxu1 }
 0x10c   :  { %v1795_v26 = vpop.f32.mrf.mxu0 }
 0x10d   :  { %v2370_v27 = vadd.f32 %v1857_v22, %v987_v24  ;;  %v1796_v28 = vadd.f32 %v1795_v26, %v1794_v23  ;;  %v1859_v29 = vpop.f32.mrf.mxu1 }
 0x10e   :  { %v1860_v30 = vadd.f32 %v1859_v29, %v1858_v25  ;;  %v1797_v31 = vpop.f32.mrf.mxu0 }
 0x10f   :  { %v990_v32 = vadd.f32 %v1796_v28, %v2361_v2  ;;  %v1861_v33 = vpop.f32.mrf.mxu1 }
 0x110   :  { %v1798_v34 = vpop.f32.mrf.mxu0 }
 0x111   :  { %v2373_v35 = vadd.f32 %v1860_v30, %v990_v32  ;;  %v1799_v36 = vadd.f32 %v1798_v34, %v1797_v31  ;;  %v1862_v37 = vpop.f32.mrf.mxu1 }
 0x112   :  { %v1863_v38 = vadd.f32 %v1862_v37, %v1861_v33  ;;  %v1800_v39 = vpop.f32.mrf.mxu0 }
 0x113   :  { %v995_v40 = vadd.f32 %v1799_v36, %v2361_v2  ;;  %v1864_v41 = vpop.f32.mrf.mxu1 }
 0x114   :  { %v1801_v42 = vpop.f32.mrf.mxu0 }
 0x115   :  { %v2376_v43 = vadd.f32 %v1863_v38, %v995_v40  ;;  %v1802_v44 = vadd.f32 %v1801_v42, %v1800_v39  ;;  %v1865_v45 = vpop.f32.mrf.mxu1 }
 0x116   :  { %v1866_v46 = vadd.f32 %v1865_v45, %v1864_v41  ;;  %v1803_v47 = vpop.f32.mrf.mxu0 }
 0x117   :  { %v998_v48 = vadd.f32 %v1802_v44, %v2361_v2  ;;  %v1867_v49 = vpop.f32.mrf.mxu1 }
 0x118   :  { %v1804_v50 = vpop.f32.mrf.mxu0 }
 0x119   :  { %v2379_v51 = vadd.f32 %v1866_v46, %v998_v48  ;;  %v1805_v52 = vadd.f32 %v1804_v50, %v1803_v47  ;;  %v1868_v53 = vpop.f32.mrf.mxu1 }
 0x11a   :  { %v1869_v54 = vadd.f32 %v1868_v53, %v1867_v49  ;;  %v1806_v55 = vpop.f32.mrf.mxu0 }
 0x11b   :  { %v1003_v56 = vadd.f32 %v1805_v52, %v2361_v2  ;;  %v1870_v57 = vpop.f32.mrf.mxu1 }
 0x11c   :  { %v1807_v58 = vpop.f32.mrf.mxu0 }
 0x11d   :  { %v2382_v59 = vadd.f32 %v1869_v54, %v1003_v56  ;;  %v1808_v60 = vadd.f32 %v1807_v58, %v1806_v55  ;;  %v1871_v61 = vpop.f32.mrf.mxu1 }
 0x11e   :  { %v1872_v62 = vadd.f32 %v1871_v61, %v1870_v57  ;;  %v1809_v63 = vpop.f32.mrf.mxu0 }
 0x11f   :  { %v1006_v0 = vadd.f32 %v1808_v60, %v2361_v2  ;;  %v1873_v1 = vpop.f32.mrf.mxu1 }
 0x120   :  { %v1810_v3 = vpop.f32.mrf.mxu0 }
 0x121   :  { %v2385_v4 = vadd.f32 %v1872_v62, %v1006_v0  ;;  %v1811_v5 = vadd.f32 %v1810_v3, %v1809_v63  ;;  %v1874_v6 = vpop.f32.mrf.mxu1 }
 0x122   :  { %v1875_v7 = vadd.f32 %v1874_v6, %v1873_v1  ;;  %v1812_v8 = vpop.f32.mrf.mxu0 }
 0x123   :  { %v1011_v9 = vadd.f32 %v1811_v5, %v2361_v2  ;;  %v1876_v10 = vpop.f32.mrf.mxu1 }
 0x124   :  { %v1813_v12 = vpop.f32.mrf.mxu0 }
 0x125   :  { %v2388_v13 = vadd.f32 %v1875_v7, %v1011_v9  ;;  %v1814_v14 = vadd.f32 %v1813_v12, %v1812_v8  ;;  %v1877_v15 = vpop.f32.mrf.mxu1 }
 0x126   :  { %v1878_v16 = vadd.f32 %v1877_v15, %v1876_v10  ;;  %v1815_v17 = vpop.f32.mrf.mxu0 }
 0x127   :  { %v1014_v18 = vadd.f32 %v1814_v14, %v2361_v2  ;;  %v1879_v20 = vpop.f32.mrf.mxu1 }
 0x128   :  { %v1816_v21 = vpop.f32.mrf.mxu0 }
 0x129   :  { %v2391_v22 = vadd.f32 %v1878_v16, %v1014_v18  ;;  %v1817_v23 = vadd.f32 %v1816_v21, %v1815_v17  ;;  %v1880_v24 = vpop.f32.mrf.mxu1 }
 0x12a   :  { %v1881_v25 = vadd.f32 %v1880_v24, %v1879_v20  ;;  %v1818_v26 = vpop.f32.mrf.mxu0 }
 0x12b   :  { %v1019_v28 = vadd.f32 %v1817_v23, %v2361_v2  ;;  %v1882_v29 = vpop.f32.mrf.mxu1 }
 0x12c   :  { %v1819_v30 = vpop.f32.mrf.mxu0 }
 0x12d   :  { %v2394_v31 = vadd.f32 %v1881_v25, %v1019_v28  ;;  %v1820_v32 = vadd.f32 %v1819_v30, %v1818_v26  ;;  %v1883_v33 = vpop.f32.mrf.mxu1 }
 0x12e   :  { %v1884_v34 = vadd.f32 %v1883_v33, %v1882_v29  ;;  %v1821_v36 = vpop.f32.mrf.mxu0 }
 0x12f   :  { %v1022_v37 = vadd.f32 %v1820_v32, %v2361_v2  ;;  %v1885_v38 = vpop.f32.mrf.mxu1 }
 0x130   :  { %v1822_v39 = vpop.f32.mrf.mxu0 }
 0x131   :  { %v2397_v40 = vadd.f32 %v1884_v34, %v1022_v37  ;;  %v1823_v41 = vadd.f32 %v1822_v39, %v1821_v36  ;;  %v1886_v42 = vpop.f32.mrf.mxu1 }
 0x132   :  { %v1887_v44 = vadd.f32 %v1886_v42, %v1885_v38  ;;  %v1824_v45 = vpop.f32.mrf.mxu0 }
 0x133   :  { %v1027_v46 = vadd.f32 %v1823_v41, %v2361_v2  ;;  %v1888_v47 = vpop.f32.mrf.mxu1 }
 0x134   :  { %v1825_v48 = vpop.f32.mrf.mxu0 }
 0x135   :  { %v2400_v49 = vadd.f32 %v1887_v44, %v1027_v46  ;;  %v1826_v50 = vadd.f32 %v1825_v48, %v1824_v45  ;;  %v1889_v52 = vpop.f32.mrf.mxu1 }
 0x136   :  { %v1890_v53 = vadd.f32 %v1889_v52, %v1888_v47  ;;  %v1827_v54 = vpop.f32.mrf.mxu0 }
 0x137   :  { %v1030_v55 = vadd.f32 %v1826_v50, %v2361_v2  ;;  %v1891_v56 = vpop.f32.mrf.mxu1 }
 0x138   :  { %v1828_v57 = vpop.f32.mrf.mxu0 }
 0x139   :  { %v2403_v58 = vadd.f32 %v1890_v53, %v1030_v55  ;;  %v1829_v60 = vadd.f32 %v1828_v57, %v1827_v54  ;;  %v1892_v61 = vpop.f32.mrf.mxu1 }
 0x13a   :  { %v2405_v62 = vpop.f32.mrf.mxu0  ;;  %v1893_v0 = vadd.f32 %v1892_v61, %v1891_v56 }
 0x13b   :  { %v1035_v63 = vadd.f32 %v1829_v60, %v2361_v2  ;;  %v2408_v1 = vpop.f32.mrf.mxu1 }
 0x13c   :  { %v2410_v3 = vpop.f32.mrf.mxu0 }
 0x13d   :  { %v2412_v5 = vadd.f32 %v1893_v0, %v1035_v63  ;;  %v2414_v6 = vpop.f32.mrf.mxu1 }
 0x13e   :  { %v1913_v7 = vpop.f32.mrf.mxu0 }
 0x13f   :  { %v1977_v8 = vpop.f32.mrf.mxu1 }
 0x140   :  { %v1914_v9 = vpop.f32.mrf.mxu0 }
 0x141   :  { %v1915_v10 = vadd.f32 %v1914_v9, %v1913_v7  ;;  %v1978_v12 = vpop.f32.mrf.mxu1 }
 0x142   :  { %v1916_v14 = vpop.f32.mrf.mxu0  ;;  %v1979_v23 = vadd.f32 %v1978_v12, %v1977_v8 }
 0x143   :  { %v1980_v15 = vpop.f32.mrf.mxu1  ;;  %v1173_v17 = vadd.f32 %v1915_v10, %v2364_v11 }
 0x144   :  { %v1917_v16 = vpop.f32.mrf.mxu0 }
 0x145   :  { %v1918_v18 = vadd.f32 %v1917_v16, %v1916_v14  ;;  %v1981_v20 = vpop.f32.mrf.mxu1  ;;  %v2418_v29 = vadd.f32 %v1979_v23, %v1173_v17 }
 0x146   :  { %v1919_v21 = vpop.f32.mrf.mxu0  ;;  %v1982_v25 = vadd.f32 %v1981_v20, %v1980_v15 }
 0x147   :  { %v1176_v24 = vadd.f32 %v1918_v18, %v2367_v19  ;;  %v1983_v26 = vpop.f32.mrf.mxu1 }
 0x148   :  { %v1920_v28 = vpop.f32.mrf.mxu0 }
 0x149   :  { %v2420_v30 = vadd.f32 %v1982_v25, %v1176_v24  ;;  %v1921_v32 = vadd.f32 %v1920_v28, %v1919_v21  ;;  %v1984_v33 = vpop.f32.mrf.mxu1 }
 0x14a   :  { %v1922_v34 = vpop.f32.mrf.mxu0  ;;  %v1985_v37 = vadd.f32 %v1984_v33, %v1983_v26 }
 0x14b   :  { %v1332_v36 = vadd.f32 %v2420_v30, %v2418_v29  ;;  %v1181_v11 = vadd.f32 %v1921_v32, %v2370_v27  ;;  %v1986_v38 = vpop.f32.mrf.mxu1 }
 0x14c   :  { %v1923_v39 = vpop.f32.mrf.mxu0 }
 0x14d   :  { %v2425_v41 = vadd.f32 %v1985_v37, %v1181_v11  ;;  %v1924_v19 = vadd.f32 %v1923_v39, %v1922_v34  ;;  %v1987_v42 = vpop.f32.mrf.mxu1 }
 0x14e   :  { %v1925_v44 = vpop.f32.mrf.mxu0  ;;  %v1988_v47 = vadd.f32 %v1987_v42, %v1986_v38 }
 0x14f   :  { %v1333_v45 = vadd.f32 %v1332_v36, %v2425_v41  ;;  %v1184_v46 = vadd.f32 %v1924_v19, %v2373_v35  ;;  %v1989_v48 = vpop.f32.mrf.mxu1 }
 0x150   :  { %v1926_v50 = vpop.f32.mrf.mxu0 }
 0x151   :  { %v2429_v52 = vadd.f32 %v1988_v47, %v1184_v46  ;;  %v1927_v53 = vadd.f32 %v1926_v50, %v1925_v44  ;;  %v1990_v54 = vpop.f32.mrf.mxu1 }
 0x152   :  { %v1928_v27 = vpop.f32.mrf.mxu0  ;;  %v1991_v57 = vadd.f32 %v1990_v54, %v1989_v48 }
 0x153   :  { %v1334_v55 = vadd.f32 %v1333_v45, %v2429_v52  ;;  %v1189_v56 = vadd.f32 %v1927_v53, %v2376_v43  ;;  %v1992_v60 = vpop.f32.mrf.mxu1 }
 0x154   :  { %v1929_v61 = vpop.f32.mrf.mxu0 }
 0x155   :  { %v2433_v63 = vadd.f32 %v1991_v57, %v1189_v56  ;;  %v1930_v0 = vadd.f32 %v1929_v61, %v1928_v27  ;;  %v1993_v7 = vpop.f32.mrf.mxu1 }
 0x156   :  { %v1931_v35 = vpop.f32.mrf.mxu0  ;;  %v1994_v10 = vadd.f32 %v1993_v7, %v1992_v60 }
 0x157   :  { %v1335_v8 = vadd.f32 %v1334_v55, %v2433_v63  ;;  %v1192_v9 = vadd.f32 %v1930_v0, %v2379_v51  ;;  %v1995_v12 = vpop.f32.mrf.mxu1 }
 0x158   :  { %v1932_v14 = vpop.f32.mrf.mxu0 }
 0x159   :  { %v2437_v15 = vadd.f32 %v1994_v10, %v1192_v9  ;;  %v1933_v16 = vadd.f32 %v1932_v14, %v1931_v35  ;;  %v1996_v17 = vpop.f32.mrf.mxu1 }
 0x15a   :  { %v1934_v43 = vpop.f32.mrf.mxu0  ;;  %v1997_v21 = vadd.f32 %v1996_v17, %v1995_v12 }
 0x15b   :  { %v1336_v18 = vadd.f32 %v1335_v8, %v2437_v15  ;;  %v1197_v20 = vadd.f32 %v1933_v16, %v2382_v59  ;;  %v1998_v23 = vpop.f32.mrf.mxu1 }
 0x15c   :  { %v1935_v24 = vpop.f32.mrf.mxu0 }
 0x15d   :  { %v2441_v25 = vadd.f32 %v1997_v21, %v1197_v20  ;;  %v1936_v26 = vadd.f32 %v1935_v24, %v1934_v43  ;;  %v1999_v28 = vpop.f32.mrf.mxu1 }
 0x15e   :  { %v1937_v51 = vpop.f32.mrf.mxu0  ;;  %v2000_v34 = vadd.f32 %v1999_v28, %v1998_v23 }
 0x15f   :  { %v1337_v32 = vadd.f32 %v1336_v18, %v2441_v25  ;;  %v1200_v33 = vadd.f32 %v1936_v26, %v2385_v4  ;;  %v2001_v36 = vpop.f32.mrf.mxu1 }
 0x160   :  { %v1938_v11 = vpop.f32.mrf.mxu0 }
 0x161   :  { %v2445_v37 = vadd.f32 %v2000_v34, %v1200_v33  ;;  %v1939_v38 = vadd.f32 %v1938_v11, %v1937_v51  ;;  %v2002_v39 = vpop.f32.mrf.mxu1  ;;  %v1832_v34 = vadd.f32 %v2410_v3, %v2405_v62 }
 0x162   :  { %v1940_v59 = vpop.f32.mrf.mxu0  ;;  %v2003_v44 = vadd.f32 %v2002_v39, %v2001_v36 }
 0x163   :  { %v1338_v19 = vadd.f32 %v1337_v32, %v2445_v37  ;;  %v1205_v42 = vadd.f32 %v1939_v38, %v2388_v13  ;;  %v2004_v45 = vpop.f32.mrf.mxu1 }
 0x164   :  { %v1941_v46 = vpop.f32.mrf.mxu0 }
 0x165   :  { %v2449_v47 = vadd.f32 %v2003_v44, %v1205_v42  ;;  %v1942_v48 = vadd.f32 %v1941_v46, %v1940_v59  ;;  %v2005_v50 = vpop.f32.mrf.mxu1 }
 0x166   :  { %v1943_v4 = vpop.f32.mrf.mxu0  ;;  %v2006_v27 = vadd.f32 %v2005_v50, %v2004_v45  ;;  %v1038_v45 = vadd.f32 %v1832_v34, %v2361_v2 }
 0x167   :  { %v1339_v53 = vadd.f32 %v1338_v19, %v2449_v47  ;;  %v1208_v54 = vadd.f32 %v1942_v48, %v2391_v22  ;;  %v2007_v55 = vpop.f32.mrf.mxu1 }
 0x168   :  { %v1944_v56 = vpop.f32.mrf.mxu0 }
 0x169   :  { %v2453_v57 = vadd.f32 %v2006_v27, %v1208_v54  ;;  %v1945_v60 = vadd.f32 %v1944_v56, %v1943_v4  ;;  %v2008_v61 = vpop.f32.mrf.mxu1  ;;  %v1896_v4 = vadd.f32 %v2414_v6, %v2408_v1 }
 0x16a   :  { %v1946_v13 = vpop.f32.mrf.mxu0  ;;  %v2009_v35 = vadd.f32 %v2008_v61, %v2007_v55 }
 0x16b   :  { %v1340_v0 = vadd.f32 %v1339_v53, %v2453_v57  ;;  %v1213_v7 = vadd.f32 %v1945_v60, %v2394_v31  ;;  %v2010_v8 = vpop.f32.mrf.mxu1  ;;  %v1135_v55 = vadd.f32 %v1896_v4, %v1038_v45 }
 0x16c   :  { %v1947_v9 = vpop.f32.mrf.mxu0 }
 0x16d   :  { %v2457_v10 = vadd.f32 %v2009_v35, %v1213_v7  ;;  %v1948_v12 = vadd.f32 %v1947_v9, %v1946_v13  ;;  %v2011_v14 = vpop.f32.mrf.mxu1 }
 0x16e   :  { %v1949_v22 = vpop.f32.mrf.mxu0  ;;  %v2012_v43 = vadd.f32 %v2011_v14, %v2010_v8 }
 0x16f   :  { %v1341_v16 = vadd.f32 %v1340_v0, %v2457_v10  ;;  %v1216_v17 = vadd.f32 %v1948_v12, %v2397_v40  ;;  %v2013_v18 = vpop.f32.mrf.mxu1 }
 0x170   :  { %v1950_v20 = vpop.f32.mrf.mxu0 }
 0x171   :  { %v1313_v21 = vadd.f32 %v2012_v43, %v1216_v17  ;;  %v1951_v23 = vadd.f32 %v1950_v20, %v1949_v22  ;;  %v2014_v24 = vpop.f32.mrf.mxu1 }
 0x172   :  { %v1952_v26 = vpop.f32.mrf.mxu0  ;;  %v2015_v51 = vadd.f32 %v2014_v24, %v2013_v18 }
 0x173   :  { %v1342_v31 = vadd.f32 %v1341_v16, %v1313_v21  ;;  %v1221_v28 = vadd.f32 %v1951_v23, %v2400_v49  ;;  %v2016_v32 = vpop.f32.mrf.mxu1 }
 0x174   :  { %v1953_v33 = vpop.f32.mrf.mxu0 }
 0x175   :  { %v1318_v36 = vadd.f32 %v2015_v51, %v1221_v28  ;;  %v1954_v11 = vadd.f32 %v1953_v33, %v1952_v26  ;;  %v2017_v38 = vpop.f32.mrf.mxu1 }
 0x176   :  { %v1955_v40 = vpop.f32.mrf.mxu0  ;;  %v2018_v19 = vadd.f32 %v2017_v38, %v2016_v32 }
 0x177   :  { %v1343_v39 = vadd.f32 %v1342_v31, %v1318_v36  ;;  %v1224_v59 = vadd.f32 %v1954_v11, %v2403_v58  ;;  %v2019_v42 = vpop.f32.mrf.mxu1 }
 0x178   :  { %v1956_v44 = vpop.f32.mrf.mxu0 }
 0x179   :  { %v1321_v46 = vadd.f32 %v2018_v19, %v1224_v59  ;;  %v1957_v49 = vadd.f32 %v1956_v44, %v1955_v40  ;;  %v2020_v48 = vpop.f32.mrf.mxu1 }
 0x17a   :  { %v1958_v50 = vpop.f32.mrf.mxu0  ;;  %v2021_v53 = vadd.f32 %v2020_v48, %v2019_v42 }
 0x17b   :  { %v1344_v62 = vadd.f32 %v1343_v39, %v1321_v46  ;;  %v1229_v3 = vadd.f32 %v1957_v49, %v2412_v5  ;;  %v2022_v54 = vpop.f32.mrf.mxu1 }
 0x17c   :  { %v1959_v27 = vpop.f32.mrf.mxu0 }
 0x17d   :  { %v1326_v58 = vadd.f32 %v2021_v53, %v1229_v3  ;;  %v1960_v56 = vadd.f32 %v1959_v27, %v1958_v50  ;;  %v2023_v60 = vpop.f32.mrf.mxu1 }
 0x17e   :  { %v2024_v2 = vadd.f32 %v2023_v60, %v2022_v54 }
 0x17f   :  { %v1345_v61 = vadd.f32 %v1344_v62, %v1326_v58  ;;  %v1232_v13 = vadd.f32 %v1960_v56, %v1135_v55 }
 0x181   :  { %v1329_v0 = vadd.f32 %v2024_v2, %v1232_v13 }
 0x183   :  { %v1346_v7 = vadd.f32 %v1345_v61, %v1329_v0 }
 0x185   :  { %v1347_v35 = vrot.slane %v1346_v7, 4 }
 0x187   :  { %v1348_v8 = vadd.f32 %v1347_v35, %v1346_v7 }
 0x189   :  { %v1349_v9 = vrot.slane %v1348_v8, 2 }
 0x18b   :  { %v1350_v12 = vadd.f32 %v1349_v9, %v1348_v8 }
 0x18d   :  { %v1351_v1 = vrot.slane %v1350_v12, 1 }
 0x18f   :  { %v1352_v6 = vadd.f32 %v1351_v1, %v1350_v12 }
 0x191   :  { %v1354_v14 = vmul.f32 0.0078125, %v1352_v6 }
 0x193   :  { %v1355_v5 = vsub.f32 %v2418_v29, %v1354_v14  ;;  %v1356_v22 = vsub.f32 %v2420_v30, %v1354_v14  ;;  %v1357_v16 = vsub.f32 %v2425_v41, %v1354_v14  ;;  %v1358_v17 = vsub.f32 %v2429_v52, %v1354_v14 }
 0x194   :  { %v1359_v43 = vsub.f32 %v2433_v63, %v1354_v14  ;;  %v1360_v18 = vsub.f32 %v2437_v15, %v1354_v14  ;;  %v1361_v20 = vsub.f32 %v2441_v25, %v1354_v14  ;;  %v1362_v23 = vsub.f32 %v2445_v37, %v1354_v14 }
 0x195   :  { %v1363_v24 = vsub.f32 %v2449_v47, %v1354_v14  ;;  %v1364_v26 = vsub.f32 %v2453_v57, %v1354_v14  ;;  %v1365_v29 = vsub.f32 %v2457_v10, %v1354_v14  ;;  %v1366_v31 = vsub.f32 %v1313_v21, %v1354_v14 }
 0x196   :  { %v1367_v30 = vsub.f32 %v1318_v36, %v1354_v14  ;;  %v1368_v28 = vsub.f32 %v1321_v46, %v1354_v14  ;;  %v1369_v41 = vsub.f32 %v1326_v58, %v1354_v14  ;;  %v1371_v51 = vmul.f32 %v1355_v5, %v1355_v5 }
 0x197   :  { %v1372_v52 = vmul.f32 %v1356_v22, %v1356_v22  ;;  %v1373_v32 = vmul.f32 %v1357_v16, %v1357_v16  ;;  %v1374_v33 = vmul.f32 %v1358_v17, %v1358_v17  ;;  %v1375_v34 = vmul.f32 %v1359_v43, %v1359_v43 }
 0x198   :  { %v1376_v11 = vmul.f32 %v1360_v18, %v1360_v18  ;;  %v1377_v38 = vmul.f32 %v1361_v20, %v1361_v20  ;;  %v1378_v40 = vmul.f32 %v1362_v23, %v1362_v23  ;;  %v1379_v39 = vmul.f32 %v1363_v24, %v1363_v24 }
 0x199   :  { %v1387_v63 = vadd.f32 %v1372_v52, %v1371_v51  ;;  %v1380_v21 = vmul.f32 %v1364_v26, %v1364_v26  ;;  %v1381_v59 = vmul.f32 %v1365_v29, %v1365_v29  ;;  %v1382_v42 = vmul.f32 %v1366_v31, %v1366_v31 }
 0x19a   :  { %v1383_v45 = vmul.f32 %v1367_v30, %v1367_v30  ;;  %v1370_v49 = vsub.f32 %v1329_v0, %v1354_v14  ;;  %v1384_v48 = vmul.f32 %v1368_v28, %v1368_v28  ;;  %v1385_v4 = vmul.f32 %v1369_v41, %v1369_v41 }
 0x19b   :  { %v1388_v15 = vadd.f32 %v1387_v63, %v1373_v32 }
 0x19c   :  { %v1386_v3 = vmul.f32 %v1370_v49, %v1370_v49 }
 0x19d   :  { %v1389_v25 = vadd.f32 %v1388_v15, %v1374_v33 }
 0x19f   :  { %v1390_v37 = vadd.f32 %v1389_v25, %v1375_v34 }
 0x1a1   :  { %v1391_v47 = vadd.f32 %v1390_v37, %v1376_v11 }
 0x1a3   :  { %v1392_v57 = vadd.f32 %v1391_v47, %v1377_v38 }
 0x1a5   :  { %v1393_v10 = vadd.f32 %v1392_v57, %v1378_v40 }
 0x1a7   :  { %v1394_v36 = vadd.f32 %v1393_v10, %v1379_v39 }
 0x1a9   :  { %v1395_v19 = vadd.f32 %v1394_v36, %v1380_v21 }
 0x1ab   :  { %v1396_v44 = vadd.f32 %v1395_v19, %v1381_v59 }
 0x1ad   :  { %v1397_v46 = vadd.f32 %v1396_v44, %v1382_v42 }
 0x1af   :  { %v1398_v50 = vadd.f32 %v1397_v46, %v1383_v45 }
 0x1b1   :  { %v1399_v62 = vadd.f32 %v1398_v50, %v1384_v48 }
 0x1b3   :  { %v1400_v53 = vadd.f32 %v1399_v62, %v1385_v4 }
 0x1b5   :  { %v1401_v54 = vadd.f32 %v1400_v53, %v1386_v3 }
 0x1b7   :  { %v1402_v27 = vrot.slane %v1401_v54, 4 }
 0x1b9   :  { %v1403_v55 = vadd.f32 %v1402_v27, %v1401_v54 }
 0x1bb   :  { %v1404_v58 = vrot.slane %v1403_v55, 2 }
 0x1bd   :  { %v1405_v56 = vadd.f32 %v1404_v58, %v1403_v55 }
 0x1bf   :  { %v1406_v60 = vrot.slane %v1405_v56, 1 }
 0x1c1   :  { %v1407_v61 = vadd.f32 %v1406_v60, %v1405_v56 }
 0x1c3   :  { %v1408_v13 = vmul.f32 0.0078125, %v1407_v61 }
 0x1c5   :  { %v1409_v2 = vadd.f32 1e-05, %v1408_v13 }
 0x1c7   :  { %2093 = vrsqrt.f32 %v1409_v2 }
 0x1d4   :  { %v2094_v7 = vpop.eup %2093 }
 0x1d5   :  { %v1411_v35 = vmul.f32 %v2094_v7, %v1355_v5  ;;  %v1412_v8 = vmul.f32 %v2094_v7, %v1356_v22  ;;  %v1413_v0 = vmul.f32 %v2094_v7, %v1357_v16  ;;  %v1414_v9 = vmul.f32 %v2094_v7, %v1358_v17 }
 0x1d6   :  { %v1415_v12 = vmul.f32 %v2094_v7, %v1359_v43  ;;  %v1416_v1 = vmul.f32 %v2094_v7, %v1360_v18  ;;  %v1417_v6 = vmul.f32 %v2094_v7, %v1361_v20  ;;  %v1418_v14 = vmul.f32 %v2094_v7, %v1362_v23 }
 0x1d7   :  { %v1419_v51 = vmul.f32 %v2094_v7, %v1363_v24  ;;  %v1420_v52 = vmul.f32 %v2094_v7, %v1364_v26  ;;  %v1421_v32 = vmul.f32 %v2094_v7, %v1365_v29  ;;  %v1422_v63 = vmul.f32 %v2094_v7, %v1366_v31 }
 0x1d8   :  { %v1423_v33 = vmul.f32 %v2094_v7, %v1367_v30  ;;  %v1424_v15 = vmul.f32 %v2094_v7, %v1368_v28  ;;  %v1425_v34 = vmul.f32 %v2094_v7, %v1369_v41  ;;  %v1426_v25 = vmul.f32 %v2094_v7, %v1370_v49 }
 0x1d9   :  { %vm1427_vm0 = vcmp.ge.f32.partialorder %v1411_v35, 0.0  ;;  %vm1428_vm1 = vcmp.ge.f32.partialorder %v1412_v8, 0.0  ;;  %vm1429_vm2 = vcmp.ge.f32.partialorder %v1413_v0, 0.0  ;;  %vm1430_vm3 = vcmp.ge.f32.partialorder %v1414_v9, 0.0 }
 0x1da   :  { %vm1431_vm4 = vcmp.ge.f32.partialorder %v1415_v12, 0.0  ;;  %vm1432_vm5 = vcmp.ge.f32.partialorder %v1416_v1, 0.0  ;;  %vm1433_vm6 = vcmp.ge.f32.partialorder %v1417_v6, 0.0  ;;  %vm1434_vm7 = vcmp.ge.f32.partialorder %v1418_v14, 0.0 }
 0x1db   :  { %vm1435_vm8 = vcmp.ge.f32.partialorder %v1419_v51, 0.0  ;;  %vm1436_vm9 = vcmp.ge.f32.partialorder %v1420_v52, 0.0  ;;  %vm1437_vm10 = vcmp.ge.f32.partialorder %v1421_v32, 0.0  ;;  %vm1438_vm11 = vcmp.ge.f32.partialorder %v1422_v63, 0.0 }
 0x1dc   :  { %vm1439_vm12 = vcmp.ge.f32.partialorder %v1423_v33, 0.0  ;;  %vm1440_vm13 = vcmp.ge.f32.partialorder %v1424_v15, 0.0  ;;  %vm1441_vm14 = vcmp.ge.f32.partialorder %v1425_v34, 0.0  ;;  %vm1442_vm15 = vcmp.ge.f32.partialorder %v1426_v25, 0.0 }
 0x1dd   :  { %v1443_v5 = vmul.f32 0.2, %v1411_v35  ;;  %v1444_v22 = vmul.f32 0.2, %v1412_v8  ;;  %v1445_v16 = vmul.f32 0.2, %v1413_v0 }
 0x1de   :  { %v1446_v17 = vmul.f32 0.2, %v1414_v9  ;;  %v1447_v43 = vmul.f32 0.2, %v1415_v12  ;;  %v1448_v18 = vmul.f32 0.2, %v1416_v1 }
 0x1df   :  { %v1449_v20 = vmul.f32 0.2, %v1417_v6  ;;  %v1450_v23 = vmul.f32 0.2, %v1418_v14  ;;  %v1451_v24 = vmul.f32 0.2, %v1419_v51  ;;  %v1459_v26 = vsel %vm1427_vm0, %v1411_v35, %v1443_v5 }
 0x1e0   :  { %v1452_v29 = vmul.f32 0.2, %v1420_v52  ;;  %v1453_v31 = vmul.f32 0.2, %v1421_v32  ;;  %v1454_v30 = vmul.f32 0.2, %v1422_v63  ;;  %v1460_v28 = vsel %vm1428_vm1, %v1412_v8, %v1444_v22 }
 0x1e1   :  { %v1455_v41 = vmul.f32 0.2, %v1423_v33  ;;  %v1456_v11 = vmul.f32 0.2, %v1424_v15  ;;  %v1457_v37 = vmul.f32 0.2, %v1425_v34  ;;  %v1461_v38 = vsel %vm1429_vm2, %v1413_v0, %v1445_v16 }
 0x1e2   :  { %v1458_v47 = vmul.f32 0.2, %v1426_v25  ;;  %v1462_v40 = vsel %vm1430_vm3, %v1414_v9, %v1446_v17  ;;  %v1463_v57 = vsel %vm1431_vm4, %v1415_v12, %v1447_v43  ;;  %v1464_v39 = vsel %vm1432_vm5, %v1416_v1, %v1448_v18 }
 0x1e3   :  { %v1465_v10 = vsel %vm1433_vm6, %v1417_v6, %v1449_v20  ;;  %v1466_v21 = vsel %vm1434_vm7, %v1418_v14, %v1450_v23  ;;  %v1467_v36 = vsel %vm1435_vm8, %v1419_v51, %v1451_v24  ;;  %v1468_v59 = vsel %vm1436_vm9, %v1420_v52, %v1452_v29 }
 0x1e4   :  { %v1469_v19 = vsel %vm1437_vm10, %v1421_v32, %v1453_v31  ;;  %v1470_v42 = vsel %vm1438_vm11, %v1422_v63, %v1454_v30  ;;  %v1471_v44 = vsel %vm1439_vm12, %v1423_v33, %v1455_v41  ;;  %v1472_v45 = vsel %vm1440_vm13, %v1424_v15, %v1456_v11 }
 0x1e5   :  { %v1473_v46 = vsel %vm1441_vm14, %v1425_v34, %v1457_v37  ;;  %v1474_v49 = vsel %vm1442_vm15, %v1426_v25, %v1458_v47  ;;  %v1725_v48 = vpack.c.bf16 %v1460_v28, %v1459_v26  ;;  %v1730_v50 = vpack.c.bf16 %v1462_v40, %v1461_v38 }
 0x1e6   :  { %v1735_v4 = vpack.c.bf16 %v1464_v39, %v1463_v57  ;;  %v1740_v62 = vpack.c.bf16 %v1466_v21, %v1465_v10  ;;  %v1745_v3 = vpack.c.bf16 %v1468_v59, %v1467_v36  ;;  %v1750_v53 = vpack.c.bf16 %v1470_v42, %v1469_v19 }
 0x1e7   :  { %1726 = vst [vmem:[%s2523_s3] sm:$0xff] %v1725_v48   ;;  %1762 = vst [vmem:[%s2523_s3 + $0x8] sm:$0xff] %v1730_v50   ;;  %v1755_v54 = vpack.c.bf16 %v1472_v45, %v1471_v44  ;;  %v1760_v27 = vpack.c.bf16 %v1474_v49, %v1473_v46 }
 0x1e8   :  { %1763 = vst [vmem:[%s2523_s3 + $0x10] sm:$0xff] %v1735_v4   ;;  %1764 = vst [vmem:[%s2523_s3 + $0x18] sm:$0xff] %v1740_v62  }
 0x1e9   :  { %1765 = vst [vmem:[%s2523_s3 + $0x20] sm:$0xff] %v1745_v3   ;;  %1766 = vst [vmem:[%s2523_s3 + $0x28] sm:$0xff] %v1750_v53  }
 0x1ea   :  { %1767 = vst [vmem:[%s2523_s3 + $0x30] sm:$0xff] %v1755_v54   ;;  %1768 = vst [vmem:[%s2523_s3 + $0x38] sm:$0xff] %v1760_v27  }
 0x1eb   :  { %1559 = vsyncpa [#allocation3], 1 }
 0x1ec   :  { %1560 = vsyncpa [#allocation5], 1 }

// kernel: discriminator_forward.5
= control target key start
LH: loop header
LB: loop body
LE: loop exit
PB: predicated region body
PF: predicated region fallthrough
CT: control target
= control target key end

     0   :  { %s9290_s0 = inlined_call_operand.vmem [shape: bf16[2,8192], index: 0, kind: input, shape index: {}]   ;;  %s9291_s1 = inlined_call_operand.hbm [shape: bf16[8192,1024], index: 1, kind: input, shape index: {}]   ;;  %s9292_s2 = inlined_call_operand.hbm [shape: f32[1,1024], index: 2, kind: input, shape index: {}]   ;;  %s9293_s3 = inlined_call_operand.hbm [shape: bf16[1024,512], index: 3, kind: input, shape index: {}]   ;;  %s9294_s4 = inlined_call_operand.hbm [shape: f32[1,512], index: 4, kind: input, shape index: {}]   ;;  %s9295_s5 = inlined_call_operand.hbm [shape: f32[1,512], index: 5, kind: input, shape index: {}]   ;;  %s9296_s6 = inlined_call_operand.<no memory space> [shape: f32[1,1], index: 6, kind: input, shape index: {}]   ;;  %s9297_s7 = inlined_call_operand.hbm [shape: f32[2,512], index: 7, kind: output, shape index: {0}]   ;;  %s9298_s8 = inlined_call_operand.vmem [shape: f32[2,1], index: 8, kind: output, shape index: {1}]  }
   0x1   :  { %v14_v0 = vstv %s9296_s6 }
   0x2   :  { %15 = vst [vmem:[#allocation3] sm:$0x1] %v14_v0 }
   0x3   :  { %16 = vsyncpa [#allocation5], 0 }
   0x4   :  { %18 = vsyncpa [#allocation5 + $0x1], 0 }
   0x5   :  { %19 = vsyncpa [#allocation8], 0 }
   0x6   :  { %20 = vsyncpa [#allocation11], 0 }
   0x7   :  { %21 = vsyncpa [#allocation6], 0  ;;  %s8325_s29 = smov 0   ;;  %s8327_s30 = smov 0  }
   0x8   :  { %s8329_s9 = smov 0   ;;  %s8331_s10 = smov 0  }
   0x9 LB: > { %s8344_s6 = sadd.s32 4294967295, %s8262_s10   ;;  %p73_p0 = scmp.ne.s32.totalorder %s8254_s30, %s8250_s29  ;;  %s8262_s10 = sphi %s8331_s10, %s9316_s10   ;;  %s8258_s9 = sphi %s8329_s9, %s9315_s9   ;;  %s8254_s30 = sphi %s8327_s30, %s9314_s30   ;;  %s8250_s29 = sphi %s8325_s29, %s9313_s29  }
   0xa   : > { %p9299_p1 = scmp.eq.s32.totalorder %s8344_s6, 0  ;;  %p6767_p2 = scmp.ge.s32.totalorder %s8262_s10, 1 }
   0xb   : > { %p231_p3 = scmp.lt.s32.totalorder %s8262_s10, 9  ;;  %s8264_s13 = smov [#allocation7]  }
   0xc   : > { %p8353_p5 = por %p9299_p1, %p73_p0  ;;  %s244_s14 = sshll.u32 %s8264_s13, 4  ;;  %s245_s14 = int_to_ptr.vmem [resolvable:$true] %s244_s14 }
   0xd   : > { %p8357_p6 = pnand %p6767_p2, %p231_p3  ;;  %s8265_s15 = smov [#allocation10]  }
   0xe   : > { %s9302_s11 = scalar_select %p8353_p5, 1, 0 }
   0xf   : > { %s9303_s12 = scalar_select %p8357_p6, 1, 0 }
  0x10   : > { %p7583_p7 = pneg %p8357_p6  ;;  %s268_s16 = sshll.u32 %s8265_s15, 4  ;;  %s269_s16 = int_to_ptr.vmem [resolvable:$true] %s268_s16 }
  0x11   : > { %s8266_s18 = smov [#allocation9]   ;;  %s8071_s20 = scalar_lea.vmem %s245_s14, 128 }
  0x12   : > { %p8365_p8 = pnand %p7583_p7, %p9299_p1  ;;  %s254_s19 = sshll.u32 %s8266_s18, 4  ;;  %s8369_s19 = int_to_ptr.vmem [resolvable:$true] %s254_s19 }
  0x13   : > { %p8072_p10 = scmp.ne.s32.totalorder %s245_s14, %s8071_s20  ;;  %p8079_p13 = scmp.lt.s32.totalorder %s245_s14, %s245_s14 }
  0x14   : > { %p8062_p9 = pneg %p8365_p8  ;;  %p8080_p0 = scmp.lt.s32.totalorder %s8071_s20, %s8071_s20 }
  0x16   : > { %p8074_p11 = pnand %p8072_p10, %p8062_p9  ;;  %p8081_p2 = por %p8080_p0, %p8079_p13 }
  0x18   : > { %p8075_p12 = pneg %p8074_p11 }
  0x1a   : > { %p8082_p3 = pnand %p8081_p2, %p8075_p12 }
  0x1c   : > { %8085 = shalt.err (!%p8082_p3)
}
  0x1d   : > { %7586 = dma.hbm_to_vmem [thread:$0]  (!%p8365_p8), %s9292_s2, 128, %s245_s14, [#allocation8]  }
  0x1e   : > { %s8097_s23 = scalar_lea.vmem %s269_s16, 64  ;;  %p8105_p10 = scmp.lt.s32.totalorder %s269_s16, %s269_s16 }
  0x1f   : > { %p8098_p7 = scmp.ne.s32.totalorder %s269_s16, %s8097_s23  ;;  %p8106_p11 = scmp.lt.s32.totalorder %s8097_s23, %s8097_s23 }
  0x21   : > { %p8100_p4 = pnand %p8098_p7, %p8062_p9  ;;  %p8107_p5 = por %p8106_p11, %p8105_p10 }
  0x23   : > { %p8101_p1 = pneg %p8100_p4 }
  0x25   : > { %p8108_p6 = pnand %p8107_p5, %p8101_p1 }
  0x27   : > { %8111 = shalt.err (!%p8108_p6)
}
  0x28   : > { %7592 = dma.hbm_to_vmem [thread:$0]  (!%p8365_p8), %s9294_s4, 64, %s269_s16, [#allocation11]  }
  0x29   : > { %s8123_s26 = scalar_lea.vmem %s8369_s19, 32768  ;;  %p8131_p0 = scmp.lt.s32.totalorder %s8369_s19, %s8369_s19 }
  0x2a   : > { %p8124_p12 = scmp.ne.s32.totalorder %s8369_s19, %s8123_s26  ;;  %p8132_p1 = scmp.lt.s32.totalorder %s8123_s26, %s8123_s26 }
  0x2c   : > { %p8126_p4 = pnand %p8124_p12, %p8062_p9  ;;  %p8133_p5 = por %p8132_p1, %p8131_p0 }
  0x2e   : > { %p8127_p13 = pneg %p8126_p4 }
  0x30   : > { %p8134_p6 = pnand %p8133_p5, %p8127_p13 }
  0x32   : > { %8137 = shalt.err (!%p8134_p6)
}
  0x33   : > { %s8267_s27 = smov 256   ;;  %s8268_s28 = smov 16  }
  0x34   : > { %7589 = dma.hbm_to_vmem [thread:$0]  (!%p8365_p8), %s9293_s3, 32768, %s8369_s19, [#allocation8], %s8267_s27, %s8267_s27, %s8268_s28  }
  0x35   : > { %s8269_s14 = smov [#allocation12]  }
  0x36   : > { %s279_s15 = sshll.u32 %s8269_s14, 4  ;;  %s280_s15 = int_to_ptr.vmem [resolvable:$true] %s279_s15 }
  0x37   : > { %s8149_s16 = scalar_lea.vmem %s280_s15, 64  ;;  %p8157_p10 = scmp.lt.s32.totalorder %s280_s15, %s280_s15 }
  0x38   : > { %p8150_p2 = scmp.ne.s32.totalorder %s280_s15, %s8149_s16  ;;  %p8158_p11 = scmp.lt.s32.totalorder %s8149_s16, %s8149_s16 }
  0x3a   : > { %p8152_p3 = pnand %p8150_p2, %p8062_p9  ;;  %p8159_p12 = por %p8158_p11, %p8157_p10 }
  0x3c   : > { %p8153_p7 = pneg %p8152_p3 }
  0x3e   : > { %p8160_p4 = pnand %p8159_p12, %p8153_p7 }
  0x40   : > { %8163 = shalt.err (!%p8160_p4)
}
  0x41   : > { %7595 = dma.hbm_to_vmem [thread:$0]  (!%p8365_p8), %s9295_s5, 64, %s280_s15, [#allocation11]  }
  0x42   : > { %s8411_s19 = sadd.s32 1, %s8262_s10   ;;  %s60_s21 = sadd.s32 1, %s8258_s9 }
  0x43   : > { %s57_s22 = ssub.s32 %s8262_s10, %s8411_s19  ;;  %p67_p9 = scmp.ne.s32.totalorder %s8258_s9, %s8254_s30 }
  0x44   : > { %p58_p13 = scmp.eq.s32.totalorder %s57_s22, 0  ;;  %p68_p0 = scmp.eq.s32.totalorder %s8262_s10, 0 }
  0x45   : > { %p7604_p1 = scmp.lt.s32.totalorder %s8262_s10, 8  ;;  %s301_s17 = sand.u32 1, %s8258_s9  }
  0x46   : > { %s8422_s23 = scalar_select %p58_p13, %s8258_s9, %s60_s21  }
  0x47   : > { %p69_p5 = por %p68_p0, %p67_p9  ;;  %s6773_s24 = sshll.u32 %s301_s17, 12 }
  0x48   : > { %s7560_s25 = sshll.u32 %s8262_s10, 16  ;;  %s305_s29 = scalar_lea.vmem [#allocation4], %s6773_s24 }
  0x49   : > { %s8428_s28 = scalar_lea.hbm %s9291_s1, %s7560_s25  ;;  %s313_s13 = sshll.u32 %s305_s29, 4  ;;  %s8434_s13 = int_to_ptr.vmem [resolvable:$true] %s313_s13 }
  0x4a   : > { %p8430_p8 = pnand %p7604_p1, %p69_p5  ;;  %s8436_s15 = scalar_lea.sflag [#allocation5], %s301_s17 }
  0x4b   : > { %s8164_s10 = scalar_lea.hbm %s8428_s28, 65536  ;;  %s8169_s20 = scalar_lea.hbm %s9291_s1, 524288 }
  0x4c   : > { %p8165_p6 = scmp.ne.s32.totalorder %s8428_s28, %s8164_s10  ;;  %p8166_p2 = pneg %p8430_p8 }
  0x4d   : > { %p8170_p10 = scmp.lt.s32.totalorder %s8428_s28, %s9291_s1  ;;  %p8171_p11 = scmp.lt.s32.totalorder %s8169_s20, %s8164_s10 }
  0x4e   : > { %p8167_p3 = pnand %p8166_p2, %p8165_p6 }
  0x4f   : > { %p8172_p12 = por %p8171_p11, %p8170_p10 }
  0x50   : > { %p8168_p7 = pneg %p8167_p3 }
  0x52   : > { %p8173_p4 = pnand %p8172_p12, %p8168_p7 }
  0x54   : > { %8176 = shalt.err (!%p8173_p4)
}
  0x55   : > { %s8177_s17 = scalar_lea.vmem %s8434_s13, 65536  ;;  %s8270_s24 = smov [#allocation4]  }
  0x56   : > { %p8178_p9 = scmp.ne.s32.totalorder %s8434_s13, %s8177_s17  ;;  %s8182_s25 = sshll.u32 %s8270_s24, 4  ;;  %s8183_s25 = int_to_ptr.vmem [resolvable:$false] %s8182_s25 }
  0x57   : > { %s8184_s26 = scalar_lea.vmem %s8183_s25, 131072  ;;  %p8185_p1 = scmp.lt.s32.totalorder %s8434_s13, %s8183_s25 }
  0x58   : > { %p8180_p13 = pnand %p8178_p9, %p8166_p2  ;;  %p8186_p5 = scmp.lt.s32.totalorder %s8184_s26, %s8177_s17 }
  0x5a   : > { %p8181_p0 = pneg %p8180_p13  ;;  %p8187_p6 = por %p8186_p5, %p8185_p1 }
  0x5c   : > { %p8188_p3 = pnand %p8187_p6, %p8181_p0 }
  0x5e   : > { %8191 = shalt.err (!%p8188_p3)
}
  0x5f   : > { %s8271_s27 = smov 512   ;;  %s8272_s29 = smov 32  }
  0x60   : > { %7599 = dma.hbm_to_vmem [thread:$0]  (!%p8430_p8), %s8428_s28, 65536, %s8434_s13, %s8436_s15, %s8271_s27, %s8271_s27, %s8272_s29  }
  0x61   : > { %p9306_p2 = scmp.ne.s32.totalorder %s9303_s12, 0 }
  0x62   : > { %s327_s10 = sand.u32 (!%p9306_p2), 1, %s8254_s30   ;;  %p9307_p7 = scmp.ne.s32.totalorder (!%p9306_p2), %s9302_s11, 0 }
  0x63   : > { %325 = sbr.rel (%p9306_p2) target bundleno = 1556 (0x614), region = 48  ;;  %s6778_s16 = sshll.u32 (!%p9306_p2), %s327_s10, 12 }
  0x64   : > { %s328_s18 = scalar_lea.sflag (!%p9306_p2), [#allocation5], %s327_s10  ;;  %s8460_s20 = scalar_lea.vmem (!%p9306_p2), [#allocation4], %s6778_s16 }
  0x68   : > { %8233 = dma.done.wait (%p9307_p7), %s328_s18, 65536  }
  0x69   : > { %8235 = vsyncadd (%p9307_p7), %s328_s18, 4294901760  ;;  %p9308_p10 = scmp.eq.s32.totalorder %s8344_s6, 0 }
  0x6b   : > { %8237 = dma.done.wait (%p9308_p10), [#allocation8], 32896   ;;  %p9309_p8 = pmov %p9308_p10 }
  0x6d   : > { %8239 = vsyncadd (%p9309_p8), [#allocation8], 4294934400  ;;  %p9310_p11 = pmov %p9309_p8 }
  0x6e   : > { %p9311_p12 = pmov %p9309_p8 }
  0x6f   : > { %8241 = dma.done.wait (%p9310_p11), [#allocation11], 128  }
  0x70   : > { %8243 = vsyncadd (%p9311_p12), [#allocation11], 4294967168  ;;  %s6783_s12 = sshll.u32 %s8344_s6, 3  ;;  %p9312_p9 = scmp.ne.s32.totalorder %s8344_s6, 0 }
  0x71   : > { %p380_p4 = scmp.lt.s32.totalorder %s6783_s12, 63 }
  0x72   : > { %388 = sbr.rel (%p9312_p9) target bundleno = 121 (0x79), region = 72 }
  0x73   : > { %s9318_s12 = smov (!%p380_p4, %s6783_s12), 63 }
  0x74   : > { %s382_s13 = scalar_lea.vmem %s9290_s0, %s9318_s12 }
  0x77   : > { %v8273_v1 = vmov 0.0  }
  0x78   : > { %389 = vst [vmem:[#allocation2] sm:$0xff] %v8273_v1  ;;  %390 = vst [vmem:[#allocation2 + $0x8] sm:$0xff] %v8273_v1 }
  0x79 PF: > { %v450_v2 = vld [vmem:[%s8460_s20 + $0x1c0] sm:$0xff]  ;;  %v8274_v34 = vmov 1966171168   ;;  %v911_v36 = vlaneseq  ;;  %v393_v61 = vld [vmem:[%s382_s13] sm:$0xff]  ;;  %p7297_p13 = scmp.ne.s32.totalorder %s8344_s6, 7 }
  0x7a   : > { %v454_v3 = vld [vmem:[%s8460_s20 + $0x1e0] sm:$0xff]  ;;  %v909_v35 = vunpack.c.l.s4 %v8274_v34 }
  0x7b   : > { %v578_v4 = vld [vmem:[%s8460_s20 + $0x5c0] sm:$0xff]  ;;  %v6842_v5 = vcombine.high %v450_v2, %v454_v3  ;;  %v6841_v7 = vcombine.low %v450_v2, %v454_v3  ;;  %v8505_v46 = vshrl.u32 %v911_v36, 7 }
  0x7c   : > { %v582_v6 = vld [vmem:[%s8460_s20 + $0x5e0] sm:$0xff]  ;;  %v910_v45 = vunpack.c.0.s8 %v909_v35 }
  0x7d   : > { %v442_v8 = vld [vmem:[%s8460_s20 + $0x180] sm:$0xff]  ;;  %v6970_v10 = vcombine.high %v578_v4, %v582_v6  ;;  %v6969_v11 = vcombine.low %v578_v4, %v582_v6  ;;  %3524 = vmatprep.subr.bf16.mxu0 %v6842_v5 }
  0x7e   : > { %v446_v9 = vld [vmem:[%s8460_s20 + $0x1a0] sm:$0xff]  ;;  %3525 = vmatpush1.bf16.msra.mxu0 %v6841_v7  ;;  %v8512_v55 = vsub.s32 %v910_v45, %v8505_v46 }
  0x7f   : > { %v6834_v12 = vcombine.high %v442_v8, %v446_v9  ;;  %v570_v13 = vld [vmem:[%s8460_s20 + $0x580] sm:$0xff]  ;;  %3565 = vmatprep.subr.bf16.mxu1 %v6970_v10  ;;  %v6833_v20 = vcombine.low %v442_v8, %v446_v9 }
  0x80   : > { %v574_v14 = vld [vmem:[%s8460_s20 + $0x5a0] sm:$0xff]  ;;  %3566 = vmatpush1.bf16.msra.mxu1 %v6969_v11  ;;  %v8524_v1 = vrot.slane %v393_v61, %v8512_v55 }
  0x81   : > { %v434_v15 = vld [vmem:[%s8460_s20 + $0x140] sm:$0xff]  ;;  %v6962_v16 = vcombine.high %v570_v13, %v574_v14  ;;  %3526 = vmatprep.subr.bf16.mxu0 %v6834_v12  ;;  %v6961_v21 = vcombine.low %v570_v13, %v574_v14 }
  0x82   : > { %v438_v17 = vld [vmem:[%s8460_s20 + $0x160] sm:$0xff]  ;;  %3527 = vmatpush1.bf16.msra.mxu0 %v6833_v20  ;;  %v922_v5 = vcombine.high %v8524_v1, %v8524_v1 }
  0x83   : > { %v562_v18 = vld [vmem:[%s8460_s20 + $0x540] sm:$0xff]  ;;  %v6826_v22 = vcombine.high %v434_v15, %v438_v17  ;;  %3567 = vmatprep.subr.bf16.mxu1 %v6962_v16  ;;  %v6825_v28 = vcombine.low %v434_v15, %v438_v17 }
  0x84   : > { %v566_v19 = vld [vmem:[%s8460_s20 + $0x560] sm:$0xff]  ;;  %3568 = vmatpush1.bf16.msra.mxu1 %v6961_v21  ;;  %v8533_v11 = vrot.slane %v922_v5, %v8512_v55  ;;  %v907_v21 = vcombine.high %v393_v61, %v393_v61 }
  0x85   : > { %v6954_v23 = vcombine.high %v562_v18, %v566_v19  ;;  %v426_v24 = vld [vmem:[%s8460_s20 + $0x100] sm:$0xff]  ;;  %3528 = vmatprep.subr.bf16.mxu0 %v6826_v22  ;;  %v6953_v29 = vcombine.low %v562_v18, %v566_v19 }
  0x86   : > { %v430_v25 = vld [vmem:[%s8460_s20 + $0x120] sm:$0xff]  ;;  %3529 = vmatpush1.bf16.msra.mxu0 %v6825_v28  ;;  %3556 = vmatprep.mubr.bf16.mxu0 %v8533_v11  ;;  %v8540_v15 = vcombine.high %v8533_v11, %v8533_v11 }
  0x87   : > { %v554_v26 = vld [vmem:[%s8460_s20 + $0x500] sm:$0xff]  ;;  %v6818_v30 = vcombine.high %v426_v24, %v430_v25  ;;  %3569 = vmatprep.subr.bf16.mxu1 %v6954_v23  ;;  %v6817_v39 = vcombine.low %v426_v24, %v430_v25 }
  0x88   : > { %v558_v27 = vld [vmem:[%s8460_s20 + $0x520] sm:$0xff]  ;;  %3570 = vmatpush1.bf16.msra.mxu1 %v6953_v29  ;;  %3597 = vmatprep.mubr.bf16.mxu1 %v8540_v15 }
  0x89   : > { %v6946_v31 = vcombine.high %v554_v26, %v558_v27  ;;  %v418_v32 = vld [vmem:[%s8460_s20 + $0xc0] sm:$0xff]  ;;  %3530 = vmatprep.subr.bf16.mxu0 %v6818_v30  ;;  %v6945_v40 = vcombine.low %v554_v26, %v558_v27  ;;  %v8550_v30 = vrot.slane %v907_v21, %v8512_v55 }
  0x8a   : > { %v422_v33 = vld [vmem:[%s8460_s20 + $0xe0] sm:$0xff]  ;;  %3531 = vmatpush1.bf16.msra.mxu0 %v6817_v39 }
  0x8b   : > { %v546_v37 = vld [vmem:[%s8460_s20 + $0x4c0] sm:$0xff]  ;;  %v6810_v41 = vcombine.high %v418_v32, %v422_v33  ;;  %3571 = vmatprep.subr.bf16.mxu1 %v6946_v31  ;;  %v6809_v49 = vcombine.low %v418_v32, %v422_v33  ;;  %v8556_v34 = vrot.slane %v8550_v30, %v8512_v55 }
  0x8c   : > { %v550_v38 = vld [vmem:[%s8460_s20 + $0x4e0] sm:$0xff]  ;;  %3572 = vmatpush1.bf16.msra.mxu1 %v6945_v40 }
  0x8d   : > { %v6938_v42 = vcombine.high %v546_v37, %v550_v38  ;;  %v410_v43 = vld [vmem:[%s8460_s20 + $0x80] sm:$0xff]  ;;  %3532 = vmatprep.subr.bf16.mxu0 %v6810_v41  ;;  %v6937_v50 = vcombine.low %v546_v37, %v550_v38 }
  0x8e   : > { %v414_v44 = vld [vmem:[%s8460_s20 + $0xa0] sm:$0xff]  ;;  %3533 = vmatpush1.bf16.msra.mxu0 %v6809_v49 }
  0x8f   : > { %v538_v47 = vld [vmem:[%s8460_s20 + $0x480] sm:$0xff]  ;;  %v6802_v51 = vcombine.high %v410_v43, %v414_v44  ;;  %3573 = vmatprep.subr.bf16.mxu1 %v6938_v42  ;;  %v6801_v58 = vcombine.low %v410_v43, %v414_v44 }
  0x90   : > { %v542_v48 = vld [vmem:[%s8460_s20 + $0x4a0] sm:$0xff]  ;;  %3574 = vmatpush1.bf16.msra.mxu1 %v6937_v50 }
  0x91   : > { %v6930_v52 = vcombine.high %v538_v47, %v542_v48  ;;  %v402_v53 = vld [vmem:[%s8460_s20 + $0x40] sm:$0xff]  ;;  %3534 = vmatprep.subr.bf16.mxu0 %v6802_v51  ;;  %v6929_v59 = vcombine.low %v538_v47, %v542_v48 }
  0x92   : > { %v406_v54 = vld [vmem:[%s8460_s20 + $0x60] sm:$0xff]  ;;  %3535 = vmatpush1.bf16.msra.mxu0 %v6801_v58 }
  0x93   : > { %v530_v56 = vld [vmem:[%s8460_s20 + $0x440] sm:$0xff]  ;;  %v6794_v60 = vcombine.high %v402_v53, %v406_v54  ;;  %3575 = vmatprep.subr.bf16.mxu1 %v6930_v52  ;;  %v6793_v4 = vcombine.low %v402_v53, %v406_v54 }
  0x94   : > { %v534_v57 = vld [vmem:[%s8460_s20 + $0x460] sm:$0xff]  ;;  %3576 = vmatpush1.bf16.msra.mxu1 %v6929_v59 }
  0x95   : > { %v6922_v62 = vcombine.high %v530_v56, %v534_v57  ;;  %v394_v63 = vld [vmem:[%s8460_s20] sm:$0xff]  ;;  %3536 = vmatprep.subr.bf16.mxu0 %v6794_v60  ;;  %v6921_v6 = vcombine.low %v530_v56, %v534_v57 }
  0x96   : > { %v398_v0 = vld [vmem:[%s8460_s20 + $0x20] sm:$0xff]  ;;  %3537 = vmatpush1.bf16.msra.mxu0 %v6793_v4 }
  0x97   : > { %v522_v2 = vld [vmem:[%s8460_s20 + $0x400] sm:$0xff]  ;;  %v6786_v7 = vcombine.high %v394_v63, %v398_v0  ;;  %3577 = vmatprep.subr.bf16.mxu1 %v6922_v62  ;;  %v6785_v14 = vcombine.low %v394_v63, %v398_v0 }
  0x98   : > { %v526_v3 = vld [vmem:[%s8460_s20 + $0x420] sm:$0xff]  ;;  %3578 = vmatpush1.bf16.msra.mxu1 %v6921_v6 }
  0x99   : > { %v6914_v8 = vcombine.high %v522_v2, %v526_v3  ;;  %v514_v9 = vld [vmem:[%s8460_s20 + $0x3c0] sm:$0xff]  ;;  %3538 = vmatprep.subr.bf16.mxu0 %v6786_v7  ;;  %v6913_v16 = vcombine.low %v522_v2, %v526_v3 }
  0x9a   : > { %v518_v10 = vld [vmem:[%s8460_s20 + $0x3e0] sm:$0xff]  ;;  %3539 = vmatpush1.bf16.msra.mxu0 %v6785_v14 }
  0x9b   : > { %v642_v12 = vld [vmem:[%s8460_s20 + $0x7c0] sm:$0xff]  ;;  %v6906_v17 = vcombine.high %v514_v9, %v518_v10  ;;  %3579 = vmatprep.subr.bf16.mxu1 %v6914_v8  ;;  %v6905_v24 = vcombine.low %v514_v9, %v518_v10 }
  0x9c   : > { %v646_v13 = vld [vmem:[%s8460_s20 + $0x7e0] sm:$0xff]  ;;  %3580 = vmatpush1.bf16.msra.mxu1 %v6913_v16 }
  0x9d   : > { %v7034_v18 = vcombine.high %v642_v12, %v646_v13  ;;  %v506_v19 = vld [vmem:[%s8460_s20 + $0x380] sm:$0xff]  ;;  %3540 = vmatprep.subr.bf16.mxu0 %v6906_v17  ;;  %v7033_v25 = vcombine.low %v642_v12, %v646_v13 }
  0x9e   : > { %v510_v20 = vld [vmem:[%s8460_s20 + $0x3a0] sm:$0xff]  ;;  %3541 = vmatpush2.bf16.msra.mxu0 %v6905_v24 }
  0x9f   : > { %v634_v22 = vld [vmem:[%s8460_s20 + $0x780] sm:$0xff]  ;;  %v6898_v26 = vcombine.high %v506_v19, %v510_v20  ;;  %3581 = vmatprep.subr.bf16.mxu1 %v7034_v18  ;;  %v6897_v33 = vcombine.low %v506_v19, %v510_v20 }
  0xa0   : > { %v638_v23 = vld [vmem:[%s8460_s20 + $0x7a0] sm:$0xff]  ;;  %3582 = vmatpush2.bf16.msra.mxu1 %v7033_v25  ;;  %v8586_v25 = vrot.slane %v8524_v1, %v8512_v55 }
  0xa1   : > { %v7026_v27 = vcombine.high %v634_v22, %v638_v23  ;;  %v498_v28 = vld [vmem:[%s8460_s20 + $0x340] sm:$0xff]  ;;  %3542 = vmatprep.subr.bf16.mxu0 %v6898_v26  ;;  %v7025_v35 = vcombine.low %v634_v22, %v638_v23  ;;  %v923_v23 = vcombine.high %v8550_v30, %v8550_v30 }
  0xa2   : > { %v502_v29 = vld [vmem:[%s8460_s20 + $0x360] sm:$0xff]  ;;  %3543 = vmatpush2.bf16.msra.mxu0 %v6897_v33  ;;  %v8597_v1 = vcombine.high %v8586_v25, %v8586_v25 }
  0xa3   : > { %v626_v31 = vld [vmem:[%s8460_s20 + $0x740] sm:$0xff]  ;;  %v6890_v36 = vcombine.high %v498_v28, %v502_v29  ;;  %3583 = vmatprep.subr.bf16.mxu1 %v7026_v27  ;;  %v6889_v42 = vcombine.low %v498_v28, %v502_v29  ;;  %v8593_v33 = vrot.slane %v923_v23, %v8512_v55 }
  0xa4   : > { %v630_v32 = vld [vmem:[%s8460_s20 + $0x760] sm:$0xff]  ;;  %3584 = vmatpush2.bf16.msra.mxu1 %v7025_v35 }
  0xa5   : > { %v7018_v37 = vcombine.high %v626_v31, %v630_v32  ;;  %v490_v38 = vld [vmem:[%s8460_s20 + $0x300] sm:$0xff]  ;;  %3544 = vmatprep.subr.bf16.mxu0 %v6890_v36  ;;  %v7017_v43 = vcombine.low %v626_v31, %v630_v32 }
  0xa6   : > { %v494_v39 = vld [vmem:[%s8460_s20 + $0x320] sm:$0xff]  ;;  %3545 = vmatpush2.bf16.msra.mxu0 %v6889_v42  ;;  %v8606_v42 = vcombine.high %v8593_v33, %v8593_v33 }
  0xa7   : > { %v618_v40 = vld [vmem:[%s8460_s20 + $0x700] sm:$0xff]  ;;  %v6882_v44 = vcombine.high %v490_v38, %v494_v39  ;;  %3585 = vmatprep.subr.bf16.mxu1 %v7018_v37  ;;  %v6881_v51 = vcombine.low %v490_v38, %v494_v39 }
  0xa8   : > { %v622_v41 = vld [vmem:[%s8460_s20 + $0x720] sm:$0xff]  ;;  %3586 = vmatpush2.bf16.msra.mxu1 %v7017_v43 }
  0xa9   : > { %v7010_v45 = vcombine.high %v618_v40, %v622_v41  ;;  %v482_v47 = vld [vmem:[%s8460_s20 + $0x2c0] sm:$0xff]  ;;  %3546 = vmatprep.subr.bf16.mxu0 %v6882_v44  ;;  %v7009_v52 = vcombine.low %v618_v40, %v622_v41 }
  0xaa   : > { %v486_v48 = vld [vmem:[%s8460_s20 + $0x2e0] sm:$0xff]  ;;  %3547 = vmatpush2.bf16.msra.mxu0 %v6881_v51 }
  0xab   : > { %v610_v49 = vld [vmem:[%s8460_s20 + $0x6c0] sm:$0xff]  ;;  %v6874_v53 = vcombine.high %v482_v47, %v486_v48  ;;  %3587 = vmatprep.subr.bf16.mxu1 %v7010_v45  ;;  %v6873_v60 = vcombine.low %v482_v47, %v486_v48 }
  0xac   : > { %v614_v50 = vld [vmem:[%s8460_s20 + $0x6e0] sm:$0xff]  ;;  %3588 = vmatpush2.bf16.msra.mxu1 %v7009_v52 }
  0xad   : > { %v7002_v54 = vcombine.high %v610_v49, %v614_v50  ;;  %v474_v56 = vld [vmem:[%s8460_s20 + $0x280] sm:$0xff]  ;;  %3548 = vmatprep.subr.bf16.mxu0 %v6874_v53  ;;  %v7001_v61 = vcombine.low %v610_v49, %v614_v50 }
  0xae   : > { %v478_v57 = vld [vmem:[%s8460_s20 + $0x2a0] sm:$0xff]  ;;  %3549 = vmatpush2.bf16.msra.mxu0 %v6873_v60 }
  0xaf   : > { %v602_v58 = vld [vmem:[%s8460_s20 + $0x680] sm:$0xff]  ;;  %v6866_v62 = vcombine.high %v474_v56, %v478_v57  ;;  %3589 = vmatprep.subr.bf16.mxu1 %v7002_v54  ;;  %v6865_v5 = vcombine.low %v474_v56, %v478_v57 }
  0xb0   : > { %v606_v59 = vld [vmem:[%s8460_s20 + $0x6a0] sm:$0xff]  ;;  %3590 = vmatpush2.bf16.msra.mxu1 %v7001_v61 }
  0xb1   : > { %v6994_v63 = vcombine.high %v602_v58, %v606_v59  ;;  %v466_v0 = vld [vmem:[%s8460_s20 + $0x240] sm:$0xff]  ;;  %3550 = vmatprep.subr.bf16.mxu0 %v6866_v62  ;;  %v6993_v6 = vcombine.low %v602_v58, %v606_v59 }
  0xb2   : > { %v470_v2 = vld [vmem:[%s8460_s20 + $0x260] sm:$0xff]  ;;  %3551 = vmatpush2.bf16.msra.mxu0 %v6865_v5 }
  0xb3   : > { %v594_v3 = vld [vmem:[%s8460_s20 + $0x640] sm:$0xff]  ;;  %v6858_v7 = vcombine.high %v466_v0, %v470_v2  ;;  %3591 = vmatprep.subr.bf16.mxu1 %v6994_v63  ;;  %v6857_v14 = vcombine.low %v466_v0, %v470_v2 }
  0xb4   : > { %v598_v4 = vld [vmem:[%s8460_s20 + $0x660] sm:$0xff]  ;;  %3592 = vmatpush2.bf16.msra.mxu1 %v6993_v6 }
  0xb5   : > { %v6986_v8 = vcombine.high %v594_v3, %v598_v4  ;;  %v458_v9 = vld [vmem:[%s8460_s20 + $0x200] sm:$0xff]  ;;  %3552 = vmatprep.subr.bf16.mxu0 %v6858_v7  ;;  %v6985_v16 = vcombine.low %v594_v3, %v598_v4 }
  0xb6   : > { %v462_v10 = vld [vmem:[%s8460_s20 + $0x220] sm:$0xff]  ;;  %3553 = vmatpush2.bf16.msra.mxu0 %v6857_v14 }
  0xb7   : > { %v586_v12 = vld [vmem:[%s8460_s20 + $0x600] sm:$0xff]  ;;  %v6850_v17 = vcombine.high %v458_v9, %v462_v10  ;;  %3593 = vmatprep.subr.bf16.mxu1 %v6986_v8  ;;  %v6849_v24 = vcombine.low %v458_v9, %v462_v10 }
  0xb8   : > { %v590_v13 = vld [vmem:[%s8460_s20 + $0x620] sm:$0xff]  ;;  %3594 = vmatpush2.bf16.msra.mxu1 %v6985_v16 }
  0xb9   : > { %v6978_v18 = vcombine.high %v586_v12, %v590_v13  ;;  %v706_v19 = vld [vmem:[%s8460_s20 + $0x9c0] sm:$0xff]  ;;  %3554 = vmatprep.subr.bf16.mxu0 %v6850_v17  ;;  %v6977_v26 = vcombine.low %v586_v12, %v590_v13 }
  0xba   : > { %v710_v20 = vld [vmem:[%s8460_s20 + $0x9e0] sm:$0xff]  ;;  %3555 = vmatpush2.bf16.msra.mxu0 %v6849_v24 }
  0xbb   : > { %v834_v21 = vld [vmem:[%s8460_s20 + $0xdc0] sm:$0xff]  ;;  %v7098_v27 = vcombine.high %v706_v19, %v710_v20  ;;  %3595 = vmatprep.subr.bf16.mxu1 %v6978_v18  ;;  %v7097_v35 = vcombine.low %v706_v19, %v710_v20 }
  0xbc   : > { %v838_v22 = vld [vmem:[%s8460_s20 + $0xde0] sm:$0xff]  ;;  %3596 = vmatpush2.bf16.msra.mxu1 %v6977_v26 }
  0xbd   : > { %v7226_v28 = vcombine.high %v834_v21, %v838_v22  ;;  %v698_v29 = vld [vmem:[%s8460_s20 + $0x980] sm:$0xff]  ;;  %3606 = vmatprep.subr.bf16.mxu0 %v7098_v27  ;;  %v7225_v36 = vcombine.low %v834_v21, %v838_v22  ;;  %3557 = vmatmul.mubr.bf16.vlgmr.msra.gmra.mxu0 %v8586_v25 }
  0xbe   : > { %v702_v31 = vld [vmem:[%s8460_s20 + $0x9a0] sm:$0xff]  ;;  %3607 = vmatpush1.bf16.msra.mxu0 %v7097_v35  ;;  %3638 = vmatprep.mubr.bf16.mxu0 %v8593_v33 }
  0xbf   : > { %v826_v32 = vld [vmem:[%s8460_s20 + $0xd80] sm:$0xff]  ;;  %v7090_v37 = vcombine.high %v698_v29, %v702_v31  ;;  %3647 = vmatprep.subr.bf16.mxu1 %v7226_v28  ;;  %3598 = vmatmul.mubr.bf16.vlgmr.msra.gmra.mxu1 %v8597_v1  ;;  %v7089_v43 = vcombine.low %v698_v29, %v702_v31 }
  0xc0   : > { %v830_v30 = vld [vmem:[%s8460_s20 + $0xda0] sm:$0xff]  ;;  %3648 = vmatpush1.bf16.msra.mxu1 %v7225_v36  ;;  %3679 = vmatprep.mubr.bf16.mxu1 %v8606_v42 }
  0xc1   : > { %v7218_v38 = vcombine.high %v826_v32, %v830_v30  ;;  %v690_v39 = vld [vmem:[%s8460_s20 + $0x940] sm:$0xff]  ;;  %3608 = vmatprep.subr.bf16.mxu0 %v7090_v37  ;;  %v7217_v44 = vcombine.low %v826_v32, %v830_v30 }
  0xc2   : > { %v694_v40 = vld [vmem:[%s8460_s20 + $0x960] sm:$0xff]  ;;  %3609 = vmatpush1.bf16.msra.mxu0 %v7089_v43 }
  0xc3   : > { %v818_v55 = vld [vmem:[%s8460_s20 + $0xd40] sm:$0xff]  ;;  %v7082_v45 = vcombine.high %v690_v39, %v694_v40  ;;  %3649 = vmatprep.subr.bf16.mxu1 %v7218_v38  ;;  %v7081_v52 = vcombine.low %v690_v39, %v694_v40 }
  0xc4   : > { %v822_v41 = vld [vmem:[%s8460_s20 + $0xd60] sm:$0xff]  ;;  %3650 = vmatpush1.bf16.msra.mxu1 %v7217_v44 }
  0xc5   : > { %v7210_v47 = vcombine.high %v818_v55, %v822_v41  ;;  %v682_v48 = vld [vmem:[%s8460_s20 + $0x900] sm:$0xff]  ;;  %3610 = vmatprep.subr.bf16.mxu0 %v7082_v45  ;;  %v7209_v53 = vcombine.low %v818_v55, %v822_v41 }
  0xc6   : > { %v686_v49 = vld [vmem:[%s8460_s20 + $0x920] sm:$0xff]  ;;  %3611 = vmatpush1.bf16.msra.mxu0 %v7081_v52 }
  0xc7   : > { %v810_v50 = vld [vmem:[%s8460_s20 + $0xd00] sm:$0xff]  ;;  %v7074_v54 = vcombine.high %v682_v48, %v686_v49  ;;  %3651 = vmatprep.subr.bf16.mxu1 %v7210_v47  ;;  %v7073_v61 = vcombine.low %v682_v48, %v686_v49 }
  0xc8   : > { %v814_v51 = vld [vmem:[%s8460_s20 + $0xd20] sm:$0xff]  ;;  %3652 = vmatpush1.bf16.msra.mxu1 %v7209_v53 }
  0xc9   : > { %v7202_v56 = vcombine.high %v810_v50, %v814_v51  ;;  %v674_v57 = vld [vmem:[%s8460_s20 + $0x8c0] sm:$0xff]  ;;  %3612 = vmatprep.subr.bf16.mxu0 %v7074_v54  ;;  %v7201_v62 = vcombine.low %v810_v50, %v814_v51 }
  0xca   : > { %v678_v58 = vld [vmem:[%s8460_s20 + $0x8e0] sm:$0xff]  ;;  %3613 = vmatpush1.bf16.msra.mxu0 %v7073_v61 }
  0xcb   : > { %v802_v59 = vld [vmem:[%s8460_s20 + $0xcc0] sm:$0xff]  ;;  %v7066_v63 = vcombine.high %v674_v57, %v678_v58  ;;  %3653 = vmatprep.subr.bf16.mxu1 %v7202_v56  ;;  %v7065_v6 = vcombine.low %v674_v57, %v678_v58 }
  0xcc   : > { %v806_v60 = vld [vmem:[%s8460_s20 + $0xce0] sm:$0xff]  ;;  %3654 = vmatpush1.bf16.msra.mxu1 %v7201_v62 }
  0xcd   : > { %v7194_v0 = vcombine.high %v802_v59, %v806_v60  ;;  %v666_v2 = vld [vmem:[%s8460_s20 + $0x880] sm:$0xff]  ;;  %3614 = vmatprep.subr.bf16.mxu0 %v7066_v63  ;;  %v7193_v7 = vcombine.low %v802_v59, %v806_v60 }
  0xce   : > { %v670_v3 = vld [vmem:[%s8460_s20 + $0x8a0] sm:$0xff]  ;;  %3615 = vmatpush1.bf16.msra.mxu0 %v7065_v6 }
  0xcf   : > { %v794_v4 = vld [vmem:[%s8460_s20 + $0xc80] sm:$0xff]  ;;  %v7058_v8 = vcombine.high %v666_v2, %v670_v3  ;;  %3655 = vmatprep.subr.bf16.mxu1 %v7194_v0  ;;  %v7057_v16 = vcombine.low %v666_v2, %v670_v3 }
  0xd0   : > { %v798_v5 = vld [vmem:[%s8460_s20 + $0xca0] sm:$0xff]  ;;  %3656 = vmatpush1.bf16.msra.mxu1 %v7193_v7 }
  0xd1   : > { %v7186_v9 = vcombine.high %v794_v4, %v798_v5  ;;  %v658_v10 = vld [vmem:[%s8460_s20 + $0x840] sm:$0xff]  ;;  %3616 = vmatprep.subr.bf16.mxu0 %v7058_v8  ;;  %v7185_v17 = vcombine.low %v794_v4, %v798_v5 }
  0xd2   : > { %v662_v12 = vld [vmem:[%s8460_s20 + $0x860] sm:$0xff]  ;;  %3617 = vmatpush1.bf16.msra.mxu0 %v7057_v16 }
  0xd3   : > { %v786_v13 = vld [vmem:[%s8460_s20 + $0xc40] sm:$0xff]  ;;  %v7050_v18 = vcombine.high %v658_v10, %v662_v12  ;;  %3657 = vmatprep.subr.bf16.mxu1 %v7186_v9  ;;  %v7049_v24 = vcombine.low %v658_v10, %v662_v12 }
  0xd4   : > { %v790_v14 = vld [vmem:[%s8460_s20 + $0xc60] sm:$0xff]  ;;  %3658 = vmatpush1.bf16.msra.mxu1 %v7185_v17 }
  0xd5   : > { %v7178_v19 = vcombine.high %v786_v13, %v790_v14  ;;  %v650_v20 = vld [vmem:[%s8460_s20 + $0x800] sm:$0xff]  ;;  %3618 = vmatprep.subr.bf16.mxu0 %v7050_v18  ;;  %v7177_v26 = vcombine.low %v786_v13, %v790_v14 }
  0xd6   : > { %v654_v21 = vld [vmem:[%s8460_s20 + $0x820] sm:$0xff]  ;;  %3619 = vmatpush1.bf16.msra.mxu0 %v7049_v24 }
  0xd7   : > { %v778_v22 = vld [vmem:[%s8460_s20 + $0xc00] sm:$0xff]  ;;  %v7042_v27 = vcombine.high %v650_v20, %v654_v21  ;;  %3659 = vmatprep.subr.bf16.mxu1 %v7178_v19  ;;  %v7041_v35 = vcombine.low %v650_v20, %v654_v21 }
  0xd8   : > { %v782_v23 = vld [vmem:[%s8460_s20 + $0xc20] sm:$0xff]  ;;  %3660 = vmatpush1.bf16.msra.mxu1 %v7177_v26 }
  0xd9   : > { %v7170_v28 = vcombine.high %v778_v22, %v782_v23  ;;  %v770_v29 = vld [vmem:[%s8460_s20 + $0xbc0] sm:$0xff]  ;;  %3620 = vmatprep.subr.bf16.mxu0 %v7042_v27  ;;  %v7169_v36 = vcombine.low %v778_v22, %v782_v23 }
  0xda   : > { %v774_v31 = vld [vmem:[%s8460_s20 + $0xbe0] sm:$0xff]  ;;  %3621 = vmatpush1.bf16.msra.mxu0 %v7041_v35 }
  0xdb   : > { %v898_v32 = vld [vmem:[%s8460_s20 + $0xfc0] sm:$0xff]  ;;  %v7162_v37 = vcombine.high %v770_v29, %v774_v31  ;;  %3661 = vmatprep.subr.bf16.mxu1 %v7170_v28  ;;  %v7161_v43 = vcombine.low %v770_v29, %v774_v31 }
  0xdc   : > { %v902_v30 = vld [vmem:[%s8460_s20 + $0xfe0] sm:$0xff]  ;;  %3662 = vmatpush1.bf16.msra.mxu1 %v7169_v36 }
  0xdd   : > { %v7290_v38 = vcombine.high %v898_v32, %v902_v30  ;;  %v762_v39 = vld [vmem:[%s8460_s20 + $0xb80] sm:$0xff]  ;;  %3622 = vmatprep.subr.bf16.mxu0 %v7162_v37  ;;  %v7289_v44 = vcombine.low %v898_v32, %v902_v30 }
  0xde   : > { %v766_v40 = vld [vmem:[%s8460_s20 + $0xba0] sm:$0xff]  ;;  %3623 = vmatpush2.bf16.msra.mxu0 %v7161_v43 }
  0xdf   : > { %v890_v55 = vld [vmem:[%s8460_s20 + $0xf80] sm:$0xff]  ;;  %v7154_v45 = vcombine.high %v762_v39, %v766_v40  ;;  %3663 = vmatprep.subr.bf16.mxu1 %v7290_v38  ;;  %v7153_v52 = vcombine.low %v762_v39, %v766_v40  ;;  %v451_v39 = vld [vmem:[%s8460_s20 + $0x1c8] sm:$0xff] }
  0xe0   : > { %v894_v41 = vld [vmem:[%s8460_s20 + $0xfa0] sm:$0xff]  ;;  %3664 = vmatpush2.bf16.msra.mxu1 %v7289_v44  ;;  %v455_v40 = vld [vmem:[%s8460_s20 + $0x1e8] sm:$0xff] }
  0xe1   : > { %v7282_v47 = vcombine.high %v890_v55, %v894_v41  ;;  %v754_v48 = vld [vmem:[%s8460_s20 + $0xb40] sm:$0xff]  ;;  %3624 = vmatprep.subr.bf16.mxu0 %v7154_v45  ;;  %v7281_v53 = vcombine.low %v890_v55, %v894_v41  ;;  %v579_v55 = vld [vmem:[%s8460_s20 + $0x5c8] sm:$0xff]  ;;  %v6844_v45 = vcombine.high %v451_v39, %v455_v40 }
  0xe2   : > { %v758_v49 = vld [vmem:[%s8460_s20 + $0xb60] sm:$0xff]  ;;  %3625 = vmatpush2.bf16.msra.mxu0 %v7153_v52  ;;  %v583_v41 = vld [vmem:[%s8460_s20 + $0x5e8] sm:$0xff]  ;;  %v8673_v52 = vcombine.high %v8556_v34, %v8556_v34 }
  0xe3   : > { %v882_v50 = vld [vmem:[%s8460_s20 + $0xf40] sm:$0xff]  ;;  %v7146_v54 = vcombine.high %v754_v48, %v758_v49  ;;  %3665 = vmatprep.subr.bf16.mxu1 %v7282_v47  ;;  %v7145_v61 = vcombine.low %v754_v48, %v758_v49  ;;  %v6972_v47 = vcombine.high %v579_v55, %v583_v41  ;;  %v443_v48 = vld [vmem:[%s8460_s20 + $0x188] sm:$0xff] }
  0xe4   : > { %v886_v51 = vld [vmem:[%s8460_s20 + $0xf60] sm:$0xff]  ;;  %3666 = vmatpush2.bf16.msra.mxu1 %v7281_v53  ;;  %v447_v49 = vld [vmem:[%s8460_s20 + $0x1a8] sm:$0xff]  ;;  %v6843_v53 = vcombine.low %v451_v39, %v455_v40 }
  0xe5   : > { %v7274_v56 = vcombine.high %v882_v50, %v886_v51  ;;  %v746_v57 = vld [vmem:[%s8460_s20 + $0xb00] sm:$0xff]  ;;  %3626 = vmatprep.subr.bf16.mxu0 %v7146_v54  ;;  %v7273_v62 = vcombine.low %v882_v50, %v886_v51  ;;  %v571_v50 = vld [vmem:[%s8460_s20 + $0x588] sm:$0xff]  ;;  %v6971_v54 = vcombine.low %v579_v55, %v583_v41 }
  0xe6   : > { %v750_v58 = vld [vmem:[%s8460_s20 + $0xb20] sm:$0xff]  ;;  %3627 = vmatpush2.bf16.msra.mxu0 %v7145_v61  ;;  %v575_v51 = vld [vmem:[%s8460_s20 + $0x5a8] sm:$0xff] }
  0xe7   : > { %v874_v59 = vld [vmem:[%s8460_s20 + $0xf00] sm:$0xff]  ;;  %v7138_v63 = vcombine.high %v746_v57, %v750_v58  ;;  %3667 = vmatprep.subr.bf16.mxu1 %v7274_v56  ;;  %v7137_v6 = vcombine.low %v746_v57, %v750_v58  ;;  %v6836_v56 = vcombine.high %v443_v48, %v447_v49  ;;  %v6964_v57 = vcombine.high %v571_v50, %v575_v51  ;;  %v435_v58 = vld [vmem:[%s8460_s20 + $0x148] sm:$0xff] }
  0xe8   : > { %v878_v60 = vld [vmem:[%s8460_s20 + $0xf20] sm:$0xff]  ;;  %3668 = vmatpush2.bf16.msra.mxu1 %v7273_v62  ;;  %v567_v61 = vld [vmem:[%s8460_s20 + $0x568] sm:$0xff]  ;;  %v6835_v62 = vcombine.low %v443_v48, %v447_v49 }
  0xe9   : > { %v7266_v0 = vcombine.high %v874_v59, %v878_v60  ;;  %v738_v2 = vld [vmem:[%s8460_s20 + $0xac0] sm:$0xff]  ;;  %3628 = vmatprep.subr.bf16.mxu0 %v7138_v63  ;;  %v7265_v7 = vcombine.low %v874_v59, %v878_v60  ;;  %v439_v59 = vld [vmem:[%s8460_s20 + $0x168] sm:$0xff]  ;;  %v6963_v63 = vcombine.low %v571_v50, %v575_v51 }
  0xea   : > { %v742_v3 = vld [vmem:[%s8460_s20 + $0xae0] sm:$0xff]  ;;  %3629 = vmatpush2.bf16.msra.mxu0 %v7137_v6  ;;  %v563_v60 = vld [vmem:[%s8460_s20 + $0x548] sm:$0xff] }
  0xeb   : > { %v866_v4 = vld [vmem:[%s8460_s20 + $0xec0] sm:$0xff]  ;;  %v7130_v8 = vcombine.high %v738_v2, %v742_v3  ;;  %3669 = vmatprep.subr.bf16.mxu1 %v7266_v0  ;;  %v7129_v16 = vcombine.low %v738_v2, %v742_v3  ;;  %v6828_v0 = vcombine.high %v435_v58, %v439_v59  ;;  %v6956_v2 = vcombine.high %v563_v60, %v567_v61  ;;  %v427_v3 = vld [vmem:[%s8460_s20 + $0x108] sm:$0xff] }
  0xec   : > { %v870_v5 = vld [vmem:[%s8460_s20 + $0xee0] sm:$0xff]  ;;  %3670 = vmatpush2.bf16.msra.mxu1 %v7265_v7  ;;  %v559_v6 = vld [vmem:[%s8460_s20 + $0x528] sm:$0xff]  ;;  %v6827_v7 = vcombine.low %v435_v58, %v439_v59 }
  0xed   : > { %v7258_v9 = vcombine.high %v866_v4, %v870_v5  ;;  %v730_v10 = vld [vmem:[%s8460_s20 + $0xa80] sm:$0xff]  ;;  %3630 = vmatprep.subr.bf16.mxu0 %v7130_v8  ;;  %v7257_v17 = vcombine.low %v866_v4, %v870_v5  ;;  %v431_v4 = vld [vmem:[%s8460_s20 + $0x128] sm:$0xff]  ;;  %v6955_v8 = vcombine.low %v563_v60, %v567_v61 }
  0xee   : > { %v734_v12 = vld [vmem:[%s8460_s20 + $0xaa0] sm:$0xff]  ;;  %3631 = vmatpush2.bf16.msra.mxu0 %v7129_v16  ;;  %v555_v5 = vld [vmem:[%s8460_s20 + $0x508] sm:$0xff] }
  0xef   : > { %v858_v13 = vld [vmem:[%s8460_s20 + $0xe80] sm:$0xff]  ;;  %v7122_v18 = vcombine.high %v730_v10, %v734_v12  ;;  %3671 = vmatprep.subr.bf16.mxu1 %v7258_v9  ;;  %v7121_v24 = vcombine.low %v730_v10, %v734_v12  ;;  %v6820_v9 = vcombine.high %v427_v3, %v431_v4  ;;  %v6948_v10 = vcombine.high %v555_v5, %v559_v6  ;;  %v419_v12 = vld [vmem:[%s8460_s20 + $0xc8] sm:$0xff] }
  0xf0   : > { %v862_v14 = vld [vmem:[%s8460_s20 + $0xea0] sm:$0xff]  ;;  %3672 = vmatpush2.bf16.msra.mxu1 %v7257_v17  ;;  %v551_v16 = vld [vmem:[%s8460_s20 + $0x4e8] sm:$0xff]  ;;  %v6819_v17 = vcombine.low %v427_v3, %v431_v4 }
  0xf1   : > { %v7250_v19 = vcombine.high %v858_v13, %v862_v14  ;;  %v722_v20 = vld [vmem:[%s8460_s20 + $0xa40] sm:$0xff]  ;;  %3632 = vmatprep.subr.bf16.mxu0 %v7122_v18  ;;  %v7249_v26 = vcombine.low %v858_v13, %v862_v14  ;;  %v423_v13 = vld [vmem:[%s8460_s20 + $0xe8] sm:$0xff]  ;;  %v6947_v18 = vcombine.low %v555_v5, %v559_v6 }
  0xf2   : > { %v726_v21 = vld [vmem:[%s8460_s20 + $0xa60] sm:$0xff]  ;;  %3633 = vmatpush2.bf16.msra.mxu0 %v7121_v24  ;;  %v547_v14 = vld [vmem:[%s8460_s20 + $0x4c8] sm:$0xff] }
  0xf3   : > { %v850_v22 = vld [vmem:[%s8460_s20 + $0xe40] sm:$0xff]  ;;  %v7114_v27 = vcombine.high %v722_v20, %v726_v21  ;;  %3673 = vmatprep.subr.bf16.mxu1 %v7250_v19  ;;  %v7113_v35 = vcombine.low %v722_v20, %v726_v21  ;;  %v6812_v19 = vcombine.high %v419_v12, %v423_v13  ;;  %v6940_v20 = vcombine.high %v547_v14, %v551_v16  ;;  %v411_v21 = vld [vmem:[%s8460_s20 + $0x88] sm:$0xff] }
  0xf4   : > { %v854_v23 = vld [vmem:[%s8460_s20 + $0xe60] sm:$0xff]  ;;  %3674 = vmatpush2.bf16.msra.mxu1 %v7249_v26  ;;  %v543_v24 = vld [vmem:[%s8460_s20 + $0x4a8] sm:$0xff]  ;;  %v6811_v26 = vcombine.low %v419_v12, %v423_v13 }
  0xf5   : > { %v7242_v28 = vcombine.high %v850_v22, %v854_v23  ;;  %v714_v29 = vld [vmem:[%s8460_s20 + $0xa00] sm:$0xff]  ;;  %3634 = vmatprep.subr.bf16.mxu0 %v7114_v27  ;;  %v7241_v36 = vcombine.low %v850_v22, %v854_v23  ;;  %v415_v22 = vld [vmem:[%s8460_s20 + $0xa8] sm:$0xff]  ;;  %v6939_v27 = vcombine.low %v547_v14, %v551_v16 }
  0xf6   : > { %v718_v31 = vld [vmem:[%s8460_s20 + $0xa20] sm:$0xff]  ;;  %3635 = vmatpush2.bf16.msra.mxu0 %v7113_v35  ;;  %v539_v23 = vld [vmem:[%s8460_s20 + $0x488] sm:$0xff] }
  0xf7   : > { %v842_v32 = vld [vmem:[%s8460_s20 + $0xe00] sm:$0xff]  ;;  %v7106_v37 = vcombine.high %v714_v29, %v718_v31  ;;  %3675 = vmatprep.subr.bf16.mxu1 %v7242_v28  ;;  %v7105_v43 = vcombine.low %v714_v29, %v718_v31  ;;  %v6804_v28 = vcombine.high %v411_v21, %v415_v22  ;;  %v6932_v29 = vcombine.high %v539_v23, %v543_v24  ;;  %v403_v31 = vld [vmem:[%s8460_s20 + $0x48] sm:$0xff] }
  0xf8   : > { %v846_v30 = vld [vmem:[%s8460_s20 + $0xe20] sm:$0xff]  ;;  %3676 = vmatpush2.bf16.msra.mxu1 %v7241_v36  ;;  %v535_v35 = vld [vmem:[%s8460_s20 + $0x468] sm:$0xff]  ;;  %v6803_v36 = vcombine.low %v411_v21, %v415_v22 }
  0xf9   : > { %v7234_v38 = vcombine.high %v842_v32, %v846_v30  ;;  %3636 = vmatprep.subr.bf16.mxu0 %v7106_v37  ;;  %v7233_v44 = vcombine.low %v842_v32, %v846_v30  ;;  %v407_v32 = vld [vmem:[%s8460_s20 + $0x68] sm:$0xff]  ;;  %v6931_v37 = vcombine.low %v539_v23, %v543_v24 }
  0xfa   : > { %3637 = vmatpush2.bf16.msra.mxu0 %v7105_v43  ;;  %v531_v30 = vld [vmem:[%s8460_s20 + $0x448] sm:$0xff] }
  0xfb   : > { %3677 = vmatprep.subr.bf16.mxu1 %v7234_v38  ;;  %3688 = vmatprep.subr.bf16.mxu0 %v6844_v45  ;;  %v6796_v38 = vcombine.high %v403_v31, %v407_v32  ;;  %v6924_v39 = vcombine.high %v531_v30, %v535_v35  ;;  %v395_v40 = vld [vmem:[%s8460_s20 + $0x8] sm:$0xff]  ;;  %v6923_v45 = vcombine.low %v531_v30, %v535_v35 }
  0xfc   : > { %3678 = vmatpush2.bf16.msra.mxu1 %v7233_v44  ;;  %v399_v55 = vld [vmem:[%s8460_s20 + $0x28] sm:$0xff]  ;;  %v6795_v44 = vcombine.low %v403_v31, %v407_v32 }
  0xfd   : > { %3729 = vmatprep.subr.bf16.mxu1 %v6972_v47  ;;  %3639 = vmatmul.mubr.bf16.vlgmr.msra.gmra.mxu0 %v8556_v34  ;;  %v523_v41 = vld [vmem:[%s8460_s20 + $0x408] sm:$0xff]  ;;  %v6788_v47 = vcombine.high %v395_v40, %v399_v55 }
  0xfe   : > { %3689 = vmatpush1.bf16.msra.mxu0 %v6843_v53  ;;  %3720 = vmatprep.mubr.bf16.mxu0 %v8533_v11  ;;  %v527_v43 = vld [vmem:[%s8460_s20 + $0x428] sm:$0xff] }
  0xff   : > { %3680 = vmatmul.mubr.bf16.vlgmr.msra.gmra.mxu1 %v8673_v52  ;;  %3690 = vmatprep.subr.bf16.mxu0 %v6836_v56  ;;  %v6916_v48 = vcombine.high %v523_v41, %v527_v43  ;;  %v515_v49 = vld [vmem:[%s8460_s20 + $0x3c8] sm:$0xff]  ;;  %v6915_v56 = vcombine.low %v523_v41, %v527_v43 }
 0x100   : > { %3730 = vmatpush1.bf16.msra.mxu1 %v6971_v54  ;;  %3761 = vmatprep.mubr.bf16.mxu1 %v8540_v15  ;;  %v519_v50 = vld [vmem:[%s8460_s20 + $0x3e8] sm:$0xff]  ;;  %v6787_v54 = vcombine.low %v395_v40, %v399_v55 }
 0x101   : > { %3731 = vmatprep.subr.bf16.mxu1 %v6964_v57  ;;  %v643_v51 = vld [vmem:[%s8460_s20 + $0x7c8] sm:$0xff]  ;;  %v6908_v57 = vcombine.high %v515_v49, %v519_v50 }
 0x102   : > { %3691 = vmatpush1.bf16.msra.mxu0 %v6835_v62  ;;  %v647_v53 = vld [vmem:[%s8460_s20 + $0x7e8] sm:$0xff] }
 0x103   : > { %3692 = vmatprep.subr.bf16.mxu0 %v6828_v0  ;;  %v7036_v58 = vcombine.high %v643_v51, %v647_v53  ;;  %v507_v59 = vld [vmem:[%s8460_s20 + $0x388] sm:$0xff]  ;;  %v7035_v0 = vcombine.low %v643_v51, %v647_v53 }
 0x104   : > { %3732 = vmatpush1.bf16.msra.mxu1 %v6963_v63  ;;  %v511_v60 = vld [vmem:[%s8460_s20 + $0x3a8] sm:$0xff]  ;;  %v6907_v63 = vcombine.low %v515_v49, %v519_v50 }
 0x105   : > { %3733 = vmatprep.subr.bf16.mxu1 %v6956_v2  ;;  %v635_v61 = vld [vmem:[%s8460_s20 + $0x788] sm:$0xff]  ;;  %v6900_v2 = vcombine.high %v507_v59, %v511_v60 }
 0x106   : > { %3693 = vmatpush1.bf16.msra.mxu0 %v6827_v7  ;;  %v639_v62 = vld [vmem:[%s8460_s20 + $0x7a8] sm:$0xff] }
 0x107   : > { %3694 = vmatprep.subr.bf16.mxu0 %v6820_v9  ;;  %v7028_v3 = vcombine.high %v635_v61, %v639_v62  ;;  %v499_v4 = vld [vmem:[%s8460_s20 + $0x348] sm:$0xff]  ;;  %v7027_v9 = vcombine.low %v635_v61, %v639_v62 }
 0x108   : > { %3734 = vmatpush1.bf16.msra.mxu1 %v6955_v8  ;;  %v503_v5 = vld [vmem:[%s8460_s20 + $0x368] sm:$0xff]  ;;  %v6899_v8 = vcombine.low %v507_v59, %v511_v60 }
 0x109   : > { %3735 = vmatprep.subr.bf16.mxu1 %v6948_v10  ;;  %v627_v6 = vld [vmem:[%s8460_s20 + $0x748] sm:$0xff]  ;;  %v6892_v10 = vcombine.high %v499_v4, %v503_v5 }
 0x10a   : > { %3695 = vmatpush1.bf16.msra.mxu0 %v6819_v17  ;;  %v631_v7 = vld [vmem:[%s8460_s20 + $0x768] sm:$0xff] }
 0x10b   : > { %3696 = vmatprep.subr.bf16.mxu0 %v6812_v19  ;;  %v7020_v12 = vcombine.high %v627_v6, %v631_v7  ;;  %v491_v13 = vld [vmem:[%s8460_s20 + $0x308] sm:$0xff]  ;;  %v7019_v19 = vcombine.low %v627_v6, %v631_v7 }
 0x10c   : > { %3736 = vmatpush1.bf16.msra.mxu1 %v6947_v18  ;;  %v495_v14 = vld [vmem:[%s8460_s20 + $0x328] sm:$0xff]  ;;  %v6891_v18 = vcombine.low %v499_v4, %v503_v5 }
 0x10d   : > { %3737 = vmatprep.subr.bf16.mxu1 %v6940_v20  ;;  %v619_v16 = vld [vmem:[%s8460_s20 + $0x708] sm:$0xff]  ;;  %v6884_v20 = vcombine.high %v491_v13, %v495_v14 }
 0x10e   : > { %3697 = vmatpush1.bf16.msra.mxu0 %v6811_v26  ;;  %v623_v17 = vld [vmem:[%s8460_s20 + $0x728] sm:$0xff] }
 0x10f   : > { %3698 = vmatprep.subr.bf16.mxu0 %v6804_v28  ;;  %v7012_v21 = vcombine.high %v619_v16, %v623_v17  ;;  %v483_v22 = vld [vmem:[%s8460_s20 + $0x2c8] sm:$0xff]  ;;  %v7011_v28 = vcombine.low %v619_v16, %v623_v17 }
 0x110   : > { %3738 = vmatpush1.bf16.msra.mxu1 %v6939_v27  ;;  %v487_v23 = vld [vmem:[%s8460_s20 + $0x2e8] sm:$0xff]  ;;  %v6883_v27 = vcombine.low %v491_v13, %v495_v14 }
 0x111   : > { %3739 = vmatprep.subr.bf16.mxu1 %v6932_v29  ;;  %v611_v24 = vld [vmem:[%s8460_s20 + $0x6c8] sm:$0xff]  ;;  %v6876_v29 = vcombine.high %v483_v22, %v487_v23 }
 0x112   : > { %3699 = vmatpush1.bf16.msra.mxu0 %v6803_v36  ;;  %v615_v26 = vld [vmem:[%s8460_s20 + $0x6e8] sm:$0xff] }
 0x113   : > { %3700 = vmatprep.subr.bf16.mxu0 %v6796_v38  ;;  %v7004_v31 = vcombine.high %v611_v24, %v615_v26  ;;  %v475_v32 = vld [vmem:[%s8460_s20 + $0x288] sm:$0xff]  ;;  %v7003_v38 = vcombine.low %v611_v24, %v615_v26 }
 0x114   : > { %3740 = vmatpush1.bf16.msra.mxu1 %v6931_v37  ;;  %v479_v30 = vld [vmem:[%s8460_s20 + $0x2a8] sm:$0xff]  ;;  %v6875_v37 = vcombine.low %v483_v22, %v487_v23 }
 0x115   : > { %3741 = vmatprep.subr.bf16.mxu1 %v6924_v39  ;;  %v603_v35 = vld [vmem:[%s8460_s20 + $0x688] sm:$0xff]  ;;  %v6868_v39 = vcombine.high %v475_v32, %v479_v30 }
 0x116   : > { %3701 = vmatpush1.bf16.msra.mxu0 %v6795_v44  ;;  %v607_v36 = vld [vmem:[%s8460_s20 + $0x6a8] sm:$0xff] }
 0x117   : > { %3702 = vmatprep.subr.bf16.mxu0 %v6788_v47  ;;  %v6996_v40 = vcombine.high %v603_v35, %v607_v36  ;;  %v467_v55 = vld [vmem:[%s8460_s20 + $0x248] sm:$0xff]  ;;  %v6995_v47 = vcombine.low %v603_v35, %v607_v36 }
 0x118   : > { %3742 = vmatpush1.bf16.msra.mxu1 %v6923_v45  ;;  %v471_v41 = vld [vmem:[%s8460_s20 + $0x268] sm:$0xff]  ;;  %v6867_v45 = vcombine.low %v475_v32, %v479_v30 }
 0x119   : > { %3743 = vmatprep.subr.bf16.mxu1 %v6916_v48  ;;  %v595_v43 = vld [vmem:[%s8460_s20 + $0x648] sm:$0xff]  ;;  %v6860_v48 = vcombine.high %v467_v55, %v471_v41 }
 0x11a   : > { %3703 = vmatpush1.bf16.msra.mxu0 %v6787_v54  ;;  %v599_v44 = vld [vmem:[%s8460_s20 + $0x668] sm:$0xff] }
 0x11b   : > { %3704 = vmatprep.subr.bf16.mxu0 %v6908_v57  ;;  %v6988_v49 = vcombine.high %v595_v43, %v599_v44  ;;  %v459_v50 = vld [vmem:[%s8460_s20 + $0x208] sm:$0xff]  ;;  %v6987_v57 = vcombine.low %v595_v43, %v599_v44 }
 0x11c   : > { %3744 = vmatpush1.bf16.msra.mxu1 %v6915_v56  ;;  %v463_v51 = vld [vmem:[%s8460_s20 + $0x228] sm:$0xff]  ;;  %v6859_v56 = vcombine.low %v467_v55, %v471_v41 }
 0x11d   : > { %3745 = vmatprep.subr.bf16.mxu1 %v7036_v58  ;;  %v587_v53 = vld [vmem:[%s8460_s20 + $0x608] sm:$0xff]  ;;  %v6852_v58 = vcombine.high %v459_v50, %v463_v51 }
 0x11e   : > { %3705 = vmatpush2.bf16.msra.mxu0 %v6907_v63  ;;  %v591_v54 = vld [vmem:[%s8460_s20 + $0x628] sm:$0xff] }
 0x11f   : > { %3706 = vmatprep.subr.bf16.mxu0 %v6900_v2  ;;  %v6980_v59 = vcombine.high %v587_v53, %v591_v54  ;;  %v707_v60 = vld [vmem:[%s8460_s20 + $0x9c8] sm:$0xff]  ;;  %v6979_v2 = vcombine.low %v587_v53, %v591_v54 }
 0x120   : > { %3746 = vmatpush2.bf16.msra.mxu1 %v7035_v0  ;;  %v711_v61 = vld [vmem:[%s8460_s20 + $0x9e8] sm:$0xff]  ;;  %v6851_v0 = vcombine.low %v459_v50, %v463_v51 }
 0x121   : > { %3747 = vmatprep.subr.bf16.mxu1 %v7028_v3  ;;  %v835_v62 = vld [vmem:[%s8460_s20 + $0xdc8] sm:$0xff]  ;;  %v7100_v3 = vcombine.high %v707_v60, %v711_v61 }
 0x122   : > { %3707 = vmatpush2.bf16.msra.mxu0 %v6899_v8  ;;  %v839_v63 = vld [vmem:[%s8460_s20 + $0xde8] sm:$0xff] }
 0x123   : > { %3708 = vmatprep.subr.bf16.mxu0 %v6892_v10  ;;  %v7228_v4 = vcombine.high %v835_v62, %v839_v63  ;;  %v699_v5 = vld [vmem:[%s8460_s20 + $0x988] sm:$0xff]  ;;  %v7227_v10 = vcombine.low %v835_v62, %v839_v63 }
 0x124   : > { %3748 = vmatpush2.bf16.msra.mxu1 %v7027_v9  ;;  %v703_v6 = vld [vmem:[%s8460_s20 + $0x9a8] sm:$0xff]  ;;  %v7099_v9 = vcombine.low %v707_v60, %v711_v61 }
 0x125   : > { %3749 = vmatprep.subr.bf16.mxu1 %v7020_v12  ;;  %v827_v7 = vld [vmem:[%s8460_s20 + $0xd88] sm:$0xff]  ;;  %v7092_v12 = vcombine.high %v699_v5, %v703_v6 }
 0x126   : > { %3709 = vmatpush2.bf16.msra.mxu0 %v6891_v18  ;;  %v831_v8 = vld [vmem:[%s8460_s20 + $0xda8] sm:$0xff] }
 0x127   : > { %3710 = vmatprep.subr.bf16.mxu0 %v6884_v20  ;;  %v7220_v13 = vcombine.high %v827_v7, %v831_v8  ;;  %v691_v14 = vld [vmem:[%s8460_s20 + $0x948] sm:$0xff]  ;;  %v7219_v20 = vcombine.low %v827_v7, %v831_v8 }
 0x128   : > { %3750 = vmatpush2.bf16.msra.mxu1 %v7019_v19  ;;  %v695_v16 = vld [vmem:[%s8460_s20 + $0x968] sm:$0xff]  ;;  %v7091_v19 = vcombine.low %v699_v5, %v703_v6 }
 0x129   : > { %3751 = vmatprep.subr.bf16.mxu1 %v7012_v21  ;;  %v819_v17 = vld [vmem:[%s8460_s20 + $0xd48] sm:$0xff]  ;;  %v7084_v21 = vcombine.high %v691_v14, %v695_v16 }
 0x12a   : > { %3711 = vmatpush2.bf16.msra.mxu0 %v6883_v27  ;;  %v823_v18 = vld [vmem:[%s8460_s20 + $0xd68] sm:$0xff] }
 0x12b   : > { %3712 = vmatprep.subr.bf16.mxu0 %v6876_v29  ;;  %v7212_v22 = vcombine.high %v819_v17, %v823_v18  ;;  %v683_v23 = vld [vmem:[%s8460_s20 + $0x908] sm:$0xff]  ;;  %v7211_v29 = vcombine.low %v819_v17, %v823_v18 }
 0x12c   : > { %3752 = vmatpush2.bf16.msra.mxu1 %v7011_v28  ;;  %v687_v24 = vld [vmem:[%s8460_s20 + $0x928] sm:$0xff]  ;;  %v7083_v28 = vcombine.low %v691_v14, %v695_v16 }
 0x12d   : > { %3753 = vmatprep.subr.bf16.mxu1 %v7004_v31  ;;  %v811_v26 = vld [vmem:[%s8460_s20 + $0xd08] sm:$0xff]  ;;  %v7076_v31 = vcombine.high %v683_v23, %v687_v24 }
 0x12e   : > { %3713 = vmatpush2.bf16.msra.mxu0 %v6875_v37  ;;  %v815_v27 = vld [vmem:[%s8460_s20 + $0xd28] sm:$0xff] }
 0x12f   : > { %3714 = vmatprep.subr.bf16.mxu0 %v6868_v39  ;;  %v7204_v32 = vcombine.high %v811_v26, %v815_v27  ;;  %v675_v30 = vld [vmem:[%s8460_s20 + $0x8c8] sm:$0xff]  ;;  %v7203_v39 = vcombine.low %v811_v26, %v815_v27 }
 0x130   : > { %3754 = vmatpush2.bf16.msra.mxu1 %v7003_v38  ;;  %v679_v35 = vld [vmem:[%s8460_s20 + $0x8e8] sm:$0xff]  ;;  %v7075_v38 = vcombine.low %v683_v23, %v687_v24 }
 0x131   : > { %3755 = vmatprep.subr.bf16.mxu1 %v6996_v40  ;;  %v803_v36 = vld [vmem:[%s8460_s20 + $0xcc8] sm:$0xff]  ;;  %v7068_v40 = vcombine.high %v675_v30, %v679_v35 }
 0x132   : > { %3715 = vmatpush2.bf16.msra.mxu0 %v6867_v45  ;;  %v807_v37 = vld [vmem:[%s8460_s20 + $0xce8] sm:$0xff] }
 0x133   : > { %3716 = vmatprep.subr.bf16.mxu0 %v6860_v48  ;;  %v7196_v55 = vcombine.high %v803_v36, %v807_v37  ;;  %v667_v41 = vld [vmem:[%s8460_s20 + $0x888] sm:$0xff]  ;;  %v7195_v48 = vcombine.low %v803_v36, %v807_v37 }
 0x134   : > { %3756 = vmatpush2.bf16.msra.mxu1 %v6995_v47  ;;  %v671_v43 = vld [vmem:[%s8460_s20 + $0x8a8] sm:$0xff]  ;;  %v7067_v47 = vcombine.low %v675_v30, %v679_v35 }
 0x135   : > { %3757 = vmatprep.subr.bf16.mxu1 %v6988_v49  ;;  %v795_v44 = vld [vmem:[%s8460_s20 + $0xc88] sm:$0xff]  ;;  %v7060_v49 = vcombine.high %v667_v41, %v671_v43 }
 0x136   : > { %3717 = vmatpush2.bf16.msra.mxu0 %v6859_v56  ;;  %v799_v45 = vld [vmem:[%s8460_s20 + $0xca8] sm:$0xff] }
 0x137   : > { %3718 = vmatprep.subr.bf16.mxu0 %v6852_v58  ;;  %v7188_v50 = vcombine.high %v795_v44, %v799_v45  ;;  %v659_v51 = vld [vmem:[%s8460_s20 + $0x848] sm:$0xff]  ;;  %v7187_v58 = vcombine.low %v795_v44, %v799_v45 }
 0x138   : > { %3758 = vmatpush2.bf16.msra.mxu1 %v6987_v57  ;;  %v663_v53 = vld [vmem:[%s8460_s20 + $0x868] sm:$0xff]  ;;  %v7059_v57 = vcombine.low %v667_v41, %v671_v43 }
 0x139   : > { %3759 = vmatprep.subr.bf16.mxu1 %v6980_v59  ;;  %v787_v54 = vld [vmem:[%s8460_s20 + $0xc48] sm:$0xff]  ;;  %v7052_v59 = vcombine.high %v659_v51, %v663_v53 }
 0x13a   : > { %3719 = vmatpush2.bf16.msra.mxu0 %v6851_v0  ;;  %v791_v56 = vld [vmem:[%s8460_s20 + $0xc68] sm:$0xff] }
 0x13b   : > { %3770 = vmatprep.subr.bf16.mxu0 %v7100_v3  ;;  %v7180_v60 = vcombine.high %v787_v54, %v791_v56  ;;  %v651_v61 = vld [vmem:[%s8460_s20 + $0x808] sm:$0xff]  ;;  %v7179_v3 = vcombine.low %v787_v54, %v791_v56 }
 0x13c   : > { %3760 = vmatpush2.bf16.msra.mxu1 %v6979_v2  ;;  %v655_v62 = vld [vmem:[%s8460_s20 + $0x828] sm:$0xff]  ;;  %v7051_v2 = vcombine.low %v659_v51, %v663_v53 }
 0x13d   : > { %3811 = vmatprep.subr.bf16.mxu1 %v7228_v4  ;;  %3721 = vmatmul.mubr.bf16.vlgmr.msra.gmra.mxu0 %v8586_v25  ;;  %v779_v63 = vld [vmem:[%s8460_s20 + $0xc08] sm:$0xff]  ;;  %v7044_v4 = vcombine.high %v651_v61, %v655_v62 }
 0x13e   : > { %3771 = vmatpush1.bf16.msra.mxu0 %v7099_v9  ;;  %3802 = vmatprep.mubr.bf16.mxu0 %v8593_v33  ;;  %v783_v0 = vld [vmem:[%s8460_s20 + $0xc28] sm:$0xff] }
 0x13f   : > { %3762 = vmatmul.mubr.bf16.vlgmr.msra.gmra.mxu1 %v8597_v1  ;;  %3772 = vmatprep.subr.bf16.mxu0 %v7092_v12  ;;  %v7172_v5 = vcombine.high %v779_v63, %v783_v0  ;;  %v771_v6 = vld [vmem:[%s8460_s20 + $0xbc8] sm:$0xff]  ;;  %v7171_v12 = vcombine.low %v779_v63, %v783_v0 }
 0x140   : > { %3812 = vmatpush1.bf16.msra.mxu1 %v7227_v10  ;;  %3843 = vmatprep.mubr.bf16.mxu1 %v8606_v42  ;;  %v775_v7 = vld [vmem:[%s8460_s20 + $0xbe8] sm:$0xff]  ;;  %v7043_v10 = vcombine.low %v651_v61, %v655_v62 }
 0x141   : > { %3813 = vmatprep.subr.bf16.mxu1 %v7220_v13  ;;  %v899_v8 = vld [vmem:[%s8460_s20 + $0xfc8] sm:$0xff]  ;;  %v7164_v13 = vcombine.high %v771_v6, %v775_v7 }
 0x142   : > { %3773 = vmatpush1.bf16.msra.mxu0 %v7091_v19  ;;  %v903_v9 = vld [vmem:[%s8460_s20 + $0xfe8] sm:$0xff] }
 0x143   : > { %3774 = vmatprep.subr.bf16.mxu0 %v7084_v21  ;;  %v7292_v14 = vcombine.high %v899_v8, %v903_v9  ;;  %v763_v16 = vld [vmem:[%s8460_s20 + $0xb88] sm:$0xff]  ;;  %v7291_v21 = vcombine.low %v899_v8, %v903_v9 }
 0x144   : > { %3814 = vmatpush1.bf16.msra.mxu1 %v7219_v20  ;;  %v767_v17 = vld [vmem:[%s8460_s20 + $0xba8] sm:$0xff]  ;;  %v7163_v20 = vcombine.low %v771_v6, %v775_v7 }
 0x145   : > { %3815 = vmatprep.subr.bf16.mxu1 %v7212_v22  ;;  %v891_v18 = vld [vmem:[%s8460_s20 + $0xf88] sm:$0xff]  ;;  %v7156_v22 = vcombine.high %v763_v16, %v767_v17 }
 0x146   : > { %3775 = vmatpush1.bf16.msra.mxu0 %v7083_v28  ;;  %v895_v19 = vld [vmem:[%s8460_s20 + $0xfa8] sm:$0xff] }
 0x147   : > { %3776 = vmatprep.subr.bf16.mxu0 %v7076_v31  ;;  %v7284_v23 = vcombine.high %v891_v18, %v895_v19  ;;  %v755_v24 = vld [vmem:[%s8460_s20 + $0xb48] sm:$0xff]  ;;  %v7283_v31 = vcombine.low %v891_v18, %v895_v19  ;;  %v456_v18 = vld [vmem:[%s8460_s20 + $0x1f0] sm:$0xff] }
 0x148   : > { %3816 = vmatpush1.bf16.msra.mxu1 %v7211_v29  ;;  %v759_v26 = vld [vmem:[%s8460_s20 + $0xb68] sm:$0xff]  ;;  %v7155_v29 = vcombine.low %v763_v16, %v767_v17  ;;  %v452_v17 = vld [vmem:[%s8460_s20 + $0x1d0] sm:$0xff] }
 0x149   : > { %3817 = vmatprep.subr.bf16.mxu1 %v7204_v32  ;;  %v883_v27 = vld [vmem:[%s8460_s20 + $0xf48] sm:$0xff]  ;;  %v7148_v32 = vcombine.high %v755_v24, %v759_v26  ;;  %v580_v19 = vld [vmem:[%s8460_s20 + $0x5d0] sm:$0xff] }
 0x14a   : > { %3777 = vmatpush1.bf16.msra.mxu0 %v7075_v38  ;;  %v887_v28 = vld [vmem:[%s8460_s20 + $0xf68] sm:$0xff] }
 0x14b   : > { %3778 = vmatprep.subr.bf16.mxu0 %v7068_v40  ;;  %v7276_v30 = vcombine.high %v883_v27, %v887_v28  ;;  %v747_v35 = vld [vmem:[%s8460_s20 + $0xb08] sm:$0xff]  ;;  %v7275_v40 = vcombine.low %v883_v27, %v887_v28  ;;  %v448_v27 = vld [vmem:[%s8460_s20 + $0x1b0] sm:$0xff] }
 0x14c   : > { %3818 = vmatpush1.bf16.msra.mxu1 %v7203_v39  ;;  %v751_v36 = vld [vmem:[%s8460_s20 + $0xb28] sm:$0xff]  ;;  %v7147_v39 = vcombine.low %v755_v24, %v759_v26  ;;  %v444_v26 = vld [vmem:[%s8460_s20 + $0x190] sm:$0xff] }
 0x14d   : > { %3819 = vmatprep.subr.bf16.mxu1 %v7196_v55  ;;  %v875_v37 = vld [vmem:[%s8460_s20 + $0xf08] sm:$0xff]  ;;  %v7140_v55 = vcombine.high %v747_v35, %v751_v36  ;;  %v572_v28 = vld [vmem:[%s8460_s20 + $0x590] sm:$0xff] }
 0x14e   : > { %3779 = vmatpush1.bf16.msra.mxu0 %v7067_v47  ;;  %v879_v38 = vld [vmem:[%s8460_s20 + $0xf28] sm:$0xff] }
 0x14f   : > { %3780 = vmatprep.subr.bf16.mxu0 %v7060_v49  ;;  %v7268_v41 = vcombine.high %v875_v37, %v879_v38  ;;  %v739_v43 = vld [vmem:[%s8460_s20 + $0xac8] sm:$0xff]  ;;  %v7267_v49 = vcombine.low %v875_v37, %v879_v38  ;;  %v440_v37 = vld [vmem:[%s8460_s20 + $0x170] sm:$0xff] }
 0x150   : > { %3820 = vmatpush1.bf16.msra.mxu1 %v7195_v48  ;;  %v743_v44 = vld [vmem:[%s8460_s20 + $0xae8] sm:$0xff]  ;;  %v7139_v48 = vcombine.low %v747_v35, %v751_v36  ;;  %v436_v36 = vld [vmem:[%s8460_s20 + $0x150] sm:$0xff] }
 0x151   : > { %3821 = vmatprep.subr.bf16.mxu1 %v7188_v50  ;;  %v867_v45 = vld [vmem:[%s8460_s20 + $0xec8] sm:$0xff]  ;;  %v7132_v50 = vcombine.high %v739_v43, %v743_v44 }
 0x152   : > { %3781 = vmatpush1.bf16.msra.mxu0 %v7059_v57  ;;  %v871_v47 = vld [vmem:[%s8460_s20 + $0xee8] sm:$0xff] }
 0x153   : > { %3782 = vmatprep.subr.bf16.mxu0 %v7052_v59  ;;  %v7260_v51 = vcombine.high %v867_v45, %v871_v47  ;;  %v731_v53 = vld [vmem:[%s8460_s20 + $0xa88] sm:$0xff]  ;;  %v7259_v59 = vcombine.low %v867_v45, %v871_v47  ;;  %v6830_v47 = vcombine.high %v436_v36, %v440_v37 }
 0x154   : > { %3822 = vmatpush1.bf16.msra.mxu1 %v7187_v58  ;;  %v735_v54 = vld [vmem:[%s8460_s20 + $0xaa8] sm:$0xff]  ;;  %v7131_v58 = vcombine.low %v739_v43, %v743_v44 }
 0x155   : > { %3823 = vmatprep.subr.bf16.mxu1 %v7180_v60  ;;  %v859_v56 = vld [vmem:[%s8460_s20 + $0xe88] sm:$0xff]  ;;  %v7124_v60 = vcombine.high %v731_v53, %v735_v54 }
 0x156   : > { %3783 = vmatpush1.bf16.msra.mxu0 %v7051_v2  ;;  %v863_v57 = vld [vmem:[%s8460_s20 + $0xea8] sm:$0xff] }
 0x157   : > { %3784 = vmatprep.subr.bf16.mxu0 %v7044_v4  ;;  %v7252_v61 = vcombine.high %v859_v56, %v863_v57  ;;  %v723_v62 = vld [vmem:[%s8460_s20 + $0xa48] sm:$0xff]  ;;  %v7251_v4 = vcombine.low %v859_v56, %v863_v57  ;;  %v556_v56 = vld [vmem:[%s8460_s20 + $0x510] sm:$0xff] }
 0x158   : > { %3824 = vmatpush1.bf16.msra.mxu1 %v7179_v3  ;;  %v727_v63 = vld [vmem:[%s8460_s20 + $0xa68] sm:$0xff]  ;;  %v7123_v3 = vcombine.low %v731_v53, %v735_v54  ;;  %v560_v57 = vld [vmem:[%s8460_s20 + $0x530] sm:$0xff] }
 0x159   : > { %3825 = vmatprep.subr.bf16.mxu1 %v7172_v5  ;;  %v851_v0 = vld [vmem:[%s8460_s20 + $0xe48] sm:$0xff]  ;;  %v7116_v5 = vcombine.high %v723_v62, %v727_v63 }
 0x15a   : > { %3785 = vmatpush1.bf16.msra.mxu0 %v7043_v10  ;;  %v855_v2 = vld [vmem:[%s8460_s20 + $0xe68] sm:$0xff] }
 0x15b   : > { %3786 = vmatprep.subr.bf16.mxu0 %v7164_v13  ;;  %v7244_v6 = vcombine.high %v851_v0, %v855_v2  ;;  %v715_v7 = vld [vmem:[%s8460_s20 + $0xa08] sm:$0xff]  ;;  %v7243_v13 = vcombine.low %v851_v0, %v855_v2  ;;  %v6950_v0 = vcombine.high %v556_v56, %v560_v57  ;;  %v420_v2 = vld [vmem:[%s8460_s20 + $0xd0] sm:$0xff] }
 0x15c   : > { %3826 = vmatpush1.bf16.msra.mxu1 %v7171_v12  ;;  %v719_v8 = vld [vmem:[%s8460_s20 + $0xa28] sm:$0xff]  ;;  %v7115_v12 = vcombine.low %v723_v62, %v727_v63 }
 0x15d   : > { %3827 = vmatprep.subr.bf16.mxu1 %v7292_v14  ;;  %v843_v9 = vld [vmem:[%s8460_s20 + $0xe08] sm:$0xff]  ;;  %v7108_v14 = vcombine.high %v715_v7, %v719_v8 }
 0x15e   : > { %3787 = vmatpush2.bf16.msra.mxu0 %v7163_v20  ;;  %v847_v10 = vld [vmem:[%s8460_s20 + $0xe28] sm:$0xff]  ;;  %v584_v20 = vld [vmem:[%s8460_s20 + $0x5f0] sm:$0xff] }
 0x15f   : > { %3788 = vmatprep.subr.bf16.mxu0 %v7156_v22  ;;  %v7236_v16 = vcombine.high %v843_v9, %v847_v10  ;;  %v7235_v22 = vcombine.low %v843_v9, %v847_v10  ;;  %v6974_v24 = vcombine.high %v580_v19, %v584_v20  ;;  %v412_v10 = vld [vmem:[%s8460_s20 + $0x90] sm:$0xff] }
 0x160   : > { %3828 = vmatpush2.bf16.msra.mxu1 %v7291_v21  ;;  %v7107_v21 = vcombine.low %v715_v7, %v719_v8  ;;  %v6949_v7 = vcombine.low %v556_v56, %v560_v57 }
 0x161   : > { %3829 = vmatprep.subr.bf16.mxu1 %v7284_v23  ;;  %v6846_v23 = vcombine.high %v452_v17, %v456_v18 }
 0x162   : > { %3789 = vmatpush2.bf16.msra.mxu0 %v7155_v29  ;;  %v576_v29 = vld [vmem:[%s8460_s20 + $0x5b0] sm:$0xff] }
 0x163   : > { %3790 = vmatprep.subr.bf16.mxu0 %v7148_v32  ;;  %v6973_v32 = vcombine.low %v580_v19, %v584_v20  ;;  %v6966_v35 = vcombine.high %v572_v28, %v576_v29  ;;  %v6965_v45 = vcombine.low %v572_v28, %v576_v29  ;;  %v404_v20 = vld [vmem:[%s8460_s20 + $0x50] sm:$0xff] }
 0x164   : > { %3830 = vmatpush2.bf16.msra.mxu1 %v7283_v31  ;;  %v6845_v31 = vcombine.low %v452_v17, %v456_v18  ;;  %v396_v29 = vld [vmem:[%s8460_s20 + $0x10] sm:$0xff] }
 0x165   : > { %3831 = vmatprep.subr.bf16.mxu1 %v7276_v30  ;;  %v6838_v30 = vcombine.high %v444_v26, %v448_v27 }
 0x166   : > { %3791 = vmatpush2.bf16.msra.mxu0 %v7147_v39  ;;  %v564_v39 = vld [vmem:[%s8460_s20 + $0x550] sm:$0xff] }
 0x167   : > { %3792 = vmatprep.subr.bf16.mxu0 %v7140_v55 }
 0x168   : > { %3832 = vmatpush2.bf16.msra.mxu1 %v7275_v40  ;;  %v568_v40 = vld [vmem:[%s8460_s20 + $0x570] sm:$0xff] }
 0x169   : > { %3833 = vmatprep.subr.bf16.mxu1 %v7268_v41  ;;  %v6837_v41 = vcombine.low %v444_v26, %v448_v27 }
 0x16a   : > { %3793 = vmatpush2.bf16.msra.mxu0 %v7139_v48 }
 0x16b   : > { %3794 = vmatprep.subr.bf16.mxu0 %v7132_v50  ;;  %v428_v50 = vld [vmem:[%s8460_s20 + $0x110] sm:$0xff] }
 0x16c   : > { %3834 = vmatpush2.bf16.msra.mxu1 %v7267_v49  ;;  %v6958_v49 = vcombine.high %v564_v39, %v568_v40 }
 0x16d   : > { %3835 = vmatprep.subr.bf16.mxu1 %v7260_v51  ;;  %v432_v51 = vld [vmem:[%s8460_s20 + $0x130] sm:$0xff] }
 0x16e   : > { %3795 = vmatpush2.bf16.msra.mxu0 %v7131_v58  ;;  %v6822_v62 = vcombine.high %v428_v50, %v432_v51 }
 0x16f   : > { %3796 = vmatprep.subr.bf16.mxu0 %v7124_v60 }
 0x170   : > { %3836 = vmatpush2.bf16.msra.mxu1 %v7259_v59  ;;  %v6829_v59 = vcombine.low %v436_v36, %v440_v37 }
 0x171   : > { %3837 = vmatprep.subr.bf16.mxu1 %v7252_v61  ;;  %v6957_v61 = vcombine.low %v564_v39, %v568_v40  ;;  %v516_v39 = vld [vmem:[%s8460_s20 + $0x3d0] sm:$0xff] }
 0x172   : > { %3797 = vmatpush2.bf16.msra.mxu0 %v7123_v3  ;;  %v424_v3 = vld [vmem:[%s8460_s20 + $0xf0] sm:$0xff] }
 0x173   : > { %3798 = vmatprep.subr.bf16.mxu0 %v7116_v5  ;;  %v552_v5 = vld [vmem:[%s8460_s20 + $0x4f0] sm:$0xff]  ;;  %v6814_v8 = vcombine.high %v420_v2, %v424_v3 }
 0x174   : > { %3838 = vmatpush2.bf16.msra.mxu1 %v7251_v4  ;;  %v548_v4 = vld [vmem:[%s8460_s20 + $0x4d0] sm:$0xff] }
 0x175   : > { %3839 = vmatprep.subr.bf16.mxu1 %v7244_v6  ;;  %v6821_v6 = vcombine.low %v428_v50, %v432_v51  ;;  %v6942_v9 = vcombine.high %v548_v4, %v552_v5  ;;  %v6941_v17 = vcombine.low %v548_v4, %v552_v5  ;;  %v520_v40 = vld [vmem:[%s8460_s20 + $0x3f0] sm:$0xff] }
 0x176   : > { %3799 = vmatpush2.bf16.msra.mxu0 %v7115_v12  ;;  %v416_v12 = vld [vmem:[%s8460_s20 + $0xb0] sm:$0xff]  ;;  %v6909_v56 = vcombine.low %v516_v39, %v520_v40 }
 0x177   : > { %3800 = vmatprep.subr.bf16.mxu0 %v7108_v14  ;;  %v544_v14 = vld [vmem:[%s8460_s20 + $0x4b0] sm:$0xff]  ;;  %v6806_v18 = vcombine.high %v412_v10, %v416_v12 }
 0x178   : > { %3840 = vmatpush2.bf16.msra.mxu1 %v7243_v13  ;;  %v540_v13 = vld [vmem:[%s8460_s20 + $0x490] sm:$0xff] }
 0x179   : > { %3841 = vmatprep.subr.bf16.mxu1 %v7236_v16  ;;  %v6813_v16 = vcombine.low %v420_v2, %v424_v3  ;;  %v6934_v19 = vcombine.high %v540_v13, %v544_v14  ;;  %v6933_v26 = vcombine.low %v540_v13, %v544_v14  ;;  %v512_v50 = vld [vmem:[%s8460_s20 + $0x3b0] sm:$0xff] }
 0x17a   : > { %3801 = vmatpush2.bf16.msra.mxu0 %v7107_v21  ;;  %v408_v21 = vld [vmem:[%s8460_s20 + $0x70] sm:$0xff] }
 0x17b   : > { %3852 = vmatprep.subr.bf16.mxu0 %v6846_v23  ;;  %v536_v23 = vld [vmem:[%s8460_s20 + $0x470] sm:$0xff]  ;;  %v6798_v27 = vcombine.high %v404_v20, %v408_v21 }
 0x17c   : > { %3842 = vmatpush2.bf16.msra.mxu1 %v7235_v22  ;;  %v532_v22 = vld [vmem:[%s8460_s20 + $0x450] sm:$0xff] }
 0x17d   : > { %3893 = vmatprep.subr.bf16.mxu1 %v6974_v24  ;;  %v3558_v38 = vpop.f32.mrf.mxu0  ;;  %3803 = vmatmul.mubr.bf16.vlgmr.msra.gmra.mxu0 %v8556_v34  ;;  %v6805_v24 = vcombine.low %v412_v10, %v416_v12  ;;  %v6926_v28 = vcombine.high %v532_v22, %v536_v23  ;;  %v6925_v36 = vcombine.low %v532_v22, %v536_v23  ;;  %v636_v51 = vld [vmem:[%s8460_s20 + $0x790] sm:$0xff] }
 0x17e   : > { %3853 = vmatpush1.bf16.msra.mxu0 %v6845_v31  ;;  %3884 = vmatprep.mubr.bf16.mxu0 %v8533_v11  ;;  %v400_v31 = vld [vmem:[%s8460_s20 + $0x30] sm:$0xff] }
 0x17f   : > { %v3599_v55 = vpop.f32.mrf.mxu1  ;;  %3844 = vmatmul.mubr.bf16.vlgmr.msra.gmra.mxu1 %v8673_v52  ;;  %v3560_v44 = vpop.f32.mrf.mxu0  ;;  %3854 = vmatprep.subr.bf16.mxu0 %v6838_v30  ;;  %v528_v30 = vld [vmem:[%s8460_s20 + $0x430] sm:$0xff]  ;;  %v6790_v37 = vcombine.high %v396_v29, %v400_v31 }
 0x180   : > { %v8817_v43 = vadd.f32 %v3599_v55, %v3558_v38  ;;  %3894 = vmatpush1.bf16.msra.mxu1 %v6973_v32  ;;  %3925 = vmatprep.mubr.bf16.mxu1 %v8540_v15  ;;  %v524_v32 = vld [vmem:[%s8460_s20 + $0x410] sm:$0xff] }
 0x181   : > { %v3601_v48 = vpop.f32.mrf.mxu1  ;;  %3895 = vmatprep.subr.bf16.mxu1 %v6966_v35  ;;  %v3562_v54 = vpop.f32.mrf.mxu0  ;;  %v6797_v35 = vcombine.low %v404_v20, %v408_v21  ;;  %v6918_v38 = vcombine.high %v524_v32, %v528_v30  ;;  %v644_v55 = vld [vmem:[%s8460_s20 + $0x7d0] sm:$0xff] }
 0x182   : > { %v8822_v53 = vadd.f32 %v3601_v48, %v3560_v44  ;;  %3855 = vmatpush1.bf16.msra.mxu0 %v6837_v41  ;;  %v648_v41 = vld [vmem:[%s8460_s20 + $0x7f0] sm:$0xff]  ;;  %v6789_v44 = vcombine.low %v396_v29, %v400_v31 }
 0x183   : > { %v3603_v58 = vpop.f32.mrf.mxu1  ;;  %v3563_v60 = vpop.f32.mrf.mxu0  ;;  %3856 = vmatprep.subr.bf16.mxu0 %v6830_v47  ;;  %v6910_v47 = vcombine.high %v516_v39, %v520_v40  ;;  %v7038_v48 = vcombine.high %v644_v55, %v648_v41  ;;  %v640_v54 = vld [vmem:[%s8460_s20 + $0x7b0] sm:$0xff]  ;;  %v7037_v57 = vcombine.low %v644_v55, %v648_v41 }
 0x184   : > { %3896 = vmatpush1.bf16.msra.mxu1 %v6965_v45  ;;  %v6917_v45 = vcombine.low %v524_v32, %v528_v30  ;;  %v500_v60 = vld [vmem:[%s8460_s20 + $0x350] sm:$0xff]  ;;  %v7029_v2 = vcombine.low %v636_v51, %v640_v54 }
 0x185   : > { %v3604_v63 = vpop.f32.mrf.mxu1  ;;  %3897 = vmatprep.subr.bf16.mxu1 %v6958_v49  ;;  %v508_v49 = vld [vmem:[%s8460_s20 + $0x390] sm:$0xff] }
 0x186   : > { %3857 = vmatpush1.bf16.msra.mxu0 %v6829_v59  ;;  %v6902_v58 = vcombine.high %v508_v49, %v512_v50  ;;  %v7030_v59 = vcombine.high %v636_v51, %v640_v54  ;;  %v632_v63 = vld [vmem:[%s8460_s20 + $0x770] sm:$0xff] }
 0x187   : > { %3858 = vmatprep.subr.bf16.mxu0 %v6822_v62  ;;  %v628_v62 = vld [vmem:[%s8460_s20 + $0x750] sm:$0xff] }
 0x188   : > { %3898 = vmatpush1.bf16.msra.mxu1 %v6957_v61  ;;  %v504_v61 = vld [vmem:[%s8460_s20 + $0x370] sm:$0xff]  ;;  %v7022_v4 = vcombine.high %v628_v62, %v632_v63  ;;  %v7021_v10 = vcombine.low %v628_v62, %v632_v63 }
 0x189   : > { %3899 = vmatprep.subr.bf16.mxu1 %v6950_v0  ;;  %v6901_v0 = vcombine.low %v508_v49, %v512_v50  ;;  %v6894_v3 = vcombine.high %v500_v60, %v504_v61  ;;  %v492_v5 = vld [vmem:[%s8460_s20 + $0x310] sm:$0xff] }
 0x18a   : > { %3859 = vmatpush1.bf16.msra.mxu0 %v6821_v6  ;;  %v496_v6 = vld [vmem:[%s8460_s20 + $0x330] sm:$0xff] }
 0x18b   : > { %3860 = vmatprep.subr.bf16.mxu0 %v6814_v8  ;;  %v624_v8 = vld [vmem:[%s8460_s20 + $0x730] sm:$0xff]  ;;  %v6886_v12 = vcombine.high %v492_v5, %v496_v6 }
 0x18c   : > { %3900 = vmatpush1.bf16.msra.mxu1 %v6949_v7  ;;  %v620_v7 = vld [vmem:[%s8460_s20 + $0x710] sm:$0xff] }
 0x18d   : > { %3901 = vmatprep.subr.bf16.mxu1 %v6942_v9  ;;  %v6893_v9 = vcombine.low %v500_v60, %v504_v61  ;;  %v7014_v13 = vcombine.high %v620_v7, %v624_v8  ;;  %v484_v14 = vld [vmem:[%s8460_s20 + $0x2d0] sm:$0xff]  ;;  %v7013_v20 = vcombine.low %v620_v7, %v624_v8 }
 0x18e   : > { %3861 = vmatpush1.bf16.msra.mxu0 %v6813_v16  ;;  %v488_v16 = vld [vmem:[%s8460_s20 + $0x2f0] sm:$0xff] }
 0x18f   : > { %3862 = vmatprep.subr.bf16.mxu0 %v6806_v18  ;;  %v616_v18 = vld [vmem:[%s8460_s20 + $0x6f0] sm:$0xff]  ;;  %v6878_v21 = vcombine.high %v484_v14, %v488_v16 }
 0x190   : > { %3902 = vmatpush1.bf16.msra.mxu1 %v6941_v17  ;;  %v612_v17 = vld [vmem:[%s8460_s20 + $0x6d0] sm:$0xff] }
 0x191   : > { %3903 = vmatprep.subr.bf16.mxu1 %v6934_v19  ;;  %v6885_v19 = vcombine.low %v492_v5, %v496_v6  ;;  %v7006_v22 = vcombine.high %v612_v17, %v616_v18  ;;  %v476_v23 = vld [vmem:[%s8460_s20 + $0x290] sm:$0xff]  ;;  %v7005_v29 = vcombine.low %v612_v17, %v616_v18 }
 0x192   : > { %3863 = vmatpush1.bf16.msra.mxu0 %v6805_v24  ;;  %v480_v24 = vld [vmem:[%s8460_s20 + $0x2b0] sm:$0xff] }
 0x193   : > { %3864 = vmatprep.subr.bf16.mxu0 %v6798_v27  ;;  %v608_v27 = vld [vmem:[%s8460_s20 + $0x6b0] sm:$0xff]  ;;  %v6870_v31 = vcombine.high %v476_v23, %v480_v24 }
 0x194   : > { %3904 = vmatpush1.bf16.msra.mxu1 %v6933_v26  ;;  %v604_v26 = vld [vmem:[%s8460_s20 + $0x690] sm:$0xff] }
 0x195   : > { %3905 = vmatprep.subr.bf16.mxu1 %v6926_v28  ;;  %v6877_v28 = vcombine.low %v484_v14, %v488_v16  ;;  %v6998_v32 = vcombine.high %v604_v26, %v608_v27  ;;  %v468_v30 = vld [vmem:[%s8460_s20 + $0x250] sm:$0xff]  ;;  %v6997_v39 = vcombine.low %v604_v26, %v608_v27 }
 0x196   : > { %3865 = vmatpush1.bf16.msra.mxu0 %v6797_v35  ;;  %v472_v35 = vld [vmem:[%s8460_s20 + $0x270] sm:$0xff] }
 0x197   : > { %3866 = vmatprep.subr.bf16.mxu0 %v6790_v37  ;;  %v600_v37 = vld [vmem:[%s8460_s20 + $0x670] sm:$0xff]  ;;  %v6862_v40 = vcombine.high %v468_v30, %v472_v35 }
 0x198   : > { %3906 = vmatpush1.bf16.msra.mxu1 %v6925_v36  ;;  %v596_v36 = vld [vmem:[%s8460_s20 + $0x650] sm:$0xff] }
 0x199   : > { %3907 = vmatprep.subr.bf16.mxu1 %v6918_v38  ;;  %v6869_v38 = vcombine.low %v476_v23, %v480_v24  ;;  %v6990_v55 = vcombine.high %v596_v36, %v600_v37  ;;  %v460_v41 = vld [vmem:[%s8460_s20 + $0x210] sm:$0xff]  ;;  %v6989_v49 = vcombine.low %v596_v36, %v600_v37 }
 0x19a   : > { %3867 = vmatpush1.bf16.msra.mxu0 %v6789_v44  ;;  %v464_v44 = vld [vmem:[%s8460_s20 + $0x230] sm:$0xff] }
 0x19b   : > { %3868 = vmatprep.subr.bf16.mxu0 %v6910_v47  ;;  %v592_v47 = vld [vmem:[%s8460_s20 + $0x630] sm:$0xff]  ;;  %v6854_v50 = vcombine.high %v460_v41, %v464_v44 }
 0x19c   : > { %3908 = vmatpush1.bf16.msra.mxu1 %v6917_v45  ;;  %v588_v45 = vld [vmem:[%s8460_s20 + $0x610] sm:$0xff] }
 0x19d   : > { %3909 = vmatprep.subr.bf16.mxu1 %v7038_v48  ;;  %v6861_v48 = vcombine.low %v468_v30, %v472_v35  ;;  %v6982_v51 = vcombine.high %v588_v45, %v592_v47  ;;  %v708_v54 = vld [vmem:[%s8460_s20 + $0x9d0] sm:$0xff]  ;;  %v6981_v60 = vcombine.low %v588_v45, %v592_v47 }
 0x19e   : > { %3869 = vmatpush2.bf16.msra.mxu0 %v6909_v56  ;;  %v712_v56 = vld [vmem:[%s8460_s20 + $0x9f0] sm:$0xff] }
 0x19f   : > { %3870 = vmatprep.subr.bf16.mxu0 %v6902_v58  ;;  %v840_v58 = vld [vmem:[%s8460_s20 + $0xdf0] sm:$0xff]  ;;  %v7102_v61 = vcombine.high %v708_v54, %v712_v56 }
 0x1a0   : > { %3910 = vmatpush2.bf16.msra.mxu1 %v7037_v57  ;;  %v836_v57 = vld [vmem:[%s8460_s20 + $0xdd0] sm:$0xff] }
 0x1a1   : > { %3911 = vmatprep.subr.bf16.mxu1 %v7030_v59  ;;  %v6853_v59 = vcombine.low %v460_v41, %v464_v44  ;;  %v7230_v62 = vcombine.high %v836_v57, %v840_v58  ;;  %v700_v63 = vld [vmem:[%s8460_s20 + $0x990] sm:$0xff]  ;;  %v7229_v5 = vcombine.low %v836_v57, %v840_v58 }
 0x1a2   : > { %3871 = vmatpush2.bf16.msra.mxu0 %v6901_v0  ;;  %v704_v0 = vld [vmem:[%s8460_s20 + $0x9b0] sm:$0xff] }
 0x1a3   : > { %3872 = vmatprep.subr.bf16.mxu0 %v6894_v3  ;;  %v832_v3 = vld [vmem:[%s8460_s20 + $0xdb0] sm:$0xff]  ;;  %v7094_v6 = vcombine.high %v700_v63, %v704_v0  ;;  %v7093_v17 = vcombine.low %v700_v63, %v704_v0 }
 0x1a4   : > { %3912 = vmatpush2.bf16.msra.mxu1 %v7029_v2  ;;  %v828_v2 = vld [vmem:[%s8460_s20 + $0xd90] sm:$0xff] }
 0x1a5   : > { %3913 = vmatprep.subr.bf16.mxu1 %v7022_v4  ;;  %v7101_v4 = vcombine.low %v708_v54, %v712_v56  ;;  %v7222_v7 = vcombine.high %v828_v2, %v832_v3  ;;  %v692_v8 = vld [vmem:[%s8460_s20 + $0x950] sm:$0xff] }
 0x1a6   : > { %3873 = vmatpush2.bf16.msra.mxu0 %v6893_v9  ;;  %v696_v9 = vld [vmem:[%s8460_s20 + $0x970] sm:$0xff] }
 0x1a7   : > { %3874 = vmatprep.subr.bf16.mxu0 %v6886_v12  ;;  %v820_v12 = vld [vmem:[%s8460_s20 + $0xd50] sm:$0xff] }
 0x1a8   : > { %3914 = vmatpush2.bf16.msra.mxu1 %v7021_v10  ;;  %v684_v24 = vld [vmem:[%s8460_s20 + $0x910] sm:$0xff] }
 0x1a9   : > { %3915 = vmatprep.subr.bf16.mxu1 %v7014_v13  ;;  %v824_v13 = vld [vmem:[%s8460_s20 + $0xd70] sm:$0xff] }
 0x1aa   : > { %3875 = vmatpush2.bf16.msra.mxu0 %v6885_v19  ;;  %v7221_v19 = vcombine.low %v828_v2, %v832_v3  ;;  %v688_v26 = vld [vmem:[%s8460_s20 + $0x930] sm:$0xff]  ;;  %v7213_v35 = vcombine.low %v820_v12, %v824_v13 }
 0x1ab   : > { %3876 = vmatprep.subr.bf16.mxu0 %v6878_v21  ;;  %v7078_v36 = vcombine.high %v684_v24, %v688_v26  ;;  %v804_v41 = vld [vmem:[%s8460_s20 + $0xcd0] sm:$0xff]  ;;  %v7077_v45 = vcombine.low %v684_v24, %v688_v26 }
 0x1ac   : > { %3916 = vmatpush2.bf16.msra.mxu1 %v7013_v20  ;;  %v7086_v20 = vcombine.high %v692_v8, %v696_v9  ;;  %v808_v44 = vld [vmem:[%s8460_s20 + $0xcf0] sm:$0xff] }
 0x1ad   : > { %3917 = vmatprep.subr.bf16.mxu1 %v7006_v22  ;;  %v796_v54 = vld [vmem:[%s8460_s20 + $0xc90] sm:$0xff]  ;;  %v7197_v58 = vcombine.low %v804_v41, %v808_v44 }
 0x1ae   : > { %3877 = vmatpush2.bf16.msra.mxu0 %v6877_v28  ;;  %v812_v28 = vld [vmem:[%s8460_s20 + $0xd10] sm:$0xff] }
 0x1af   : > { %3878 = vmatprep.subr.bf16.mxu0 %v6870_v31  ;;  %v800_v56 = vld [vmem:[%s8460_s20 + $0xcb0] sm:$0xff] }
 0x1b0   : > { %3918 = vmatpush2.bf16.msra.mxu1 %v7005_v29  ;;  %v816_v29 = vld [vmem:[%s8460_s20 + $0xd30] sm:$0xff]  ;;  %v7189_v3 = vcombine.low %v796_v54, %v800_v56 }
 0x1b1   : > { %3919 = vmatprep.subr.bf16.mxu1 %v6998_v32  ;;  %v7205_v47 = vcombine.low %v812_v28, %v816_v29  ;;  %v788_v63 = vld [vmem:[%s8460_s20 + $0xc50] sm:$0xff] }
 0x1b2   : > { %3879 = vmatpush2.bf16.msra.mxu0 %v6869_v38  ;;  %v792_v0 = vld [vmem:[%s8460_s20 + $0xc70] sm:$0xff] }
 0x1b3   : > { %3880 = vmatprep.subr.bf16.mxu0 %v6862_v40  ;;  %v676_v40 = vld [vmem:[%s8460_s20 + $0x8d0] sm:$0xff] }
 0x1b4   : > { %3920 = vmatpush2.bf16.msra.mxu1 %v6997_v39  ;;  %v7206_v39 = vcombine.high %v812_v28, %v816_v29  ;;  %v764_v24 = vld [vmem:[%s8460_s20 + $0xb90] sm:$0xff] }
 0x1b5   : > { %3921 = vmatprep.subr.bf16.mxu1 %v6990_v55  ;;  %v680_v55 = vld [vmem:[%s8460_s20 + $0x8f0] sm:$0xff] }
 0x1b6   : > { %3881 = vmatpush2.bf16.msra.mxu0 %v6861_v48  ;;  %v7070_v48 = vcombine.high %v676_v40, %v680_v55  ;;  %v7069_v57 = vcombine.low %v676_v40, %v680_v55  ;;  %v768_v26 = vld [vmem:[%s8460_s20 + $0xbb0] sm:$0xff] }
 0x1b7   : > { %3882 = vmatprep.subr.bf16.mxu0 %v6854_v50  ;;  %v668_v50 = vld [vmem:[%s8460_s20 + $0x890] sm:$0xff]  ;;  %v7157_v40 = vcombine.low %v764_v24, %v768_v26 }
 0x1b8   : > { %3922 = vmatpush2.bf16.msra.mxu1 %v6989_v49  ;;  %v7198_v49 = vcombine.high %v804_v41, %v808_v44  ;;  %v896_v28 = vld [vmem:[%s8460_s20 + $0xfb0] sm:$0xff] }
 0x1b9   : > { %3923 = vmatprep.subr.bf16.mxu1 %v6982_v51  ;;  %v672_v51 = vld [vmem:[%s8460_s20 + $0x8b0] sm:$0xff] }
 0x1ba   : > { %3883 = vmatpush2.bf16.msra.mxu0 %v6853_v59  ;;  %v7062_v59 = vcombine.high %v668_v50, %v672_v51  ;;  %v7061_v2 = vcombine.low %v668_v50, %v672_v51 }
 0x1bb   : > { %3934 = vmatprep.subr.bf16.mxu0 %v7102_v61  ;;  %v660_v61 = vld [vmem:[%s8460_s20 + $0x850] sm:$0xff] }
 0x1bc   : > { %3924 = vmatpush2.bf16.msra.mxu1 %v6981_v60  ;;  %v7190_v60 = vcombine.high %v796_v54, %v800_v56 }
 0x1bd   : > { %3975 = vmatprep.subr.bf16.mxu1 %v7230_v62  ;;  %v3640_v10 = vpop.f32.mrf.mxu0  ;;  %3885 = vmatmul.mubr.bf16.vlgmr.msra.gmra.mxu0 %v8586_v25  ;;  %v664_v62 = vld [vmem:[%s8460_s20 + $0x870] sm:$0xff] }
 0x1be   : > { %v3641_v14 = vadd.f32 %v3640_v10, %v8817_v43  ;;  %3935 = vmatpush1.bf16.msra.mxu0 %v7101_v4  ;;  %v7214_v43 = vcombine.high %v820_v12, %v824_v13  ;;  %3966 = vmatprep.mubr.bf16.mxu0 %v8593_v33  ;;  %v7054_v4 = vcombine.high %v660_v61, %v664_v62 }
 0x1bf   : > { %v3681_v16 = vpop.f32.mrf.mxu1  ;;  %3926 = vmatmul.mubr.bf16.vlgmr.msra.gmra.mxu1 %v8597_v1  ;;  %v3642_v18 = vpop.f32.mrf.mxu0  ;;  %3936 = vmatprep.subr.bf16.mxu0 %v7094_v6  ;;  %v652_v6 = vld [vmem:[%s8460_s20 + $0x810] sm:$0xff]  ;;  %v7053_v10 = vcombine.low %v660_v61, %v664_v62  ;;  %v7181_v12 = vcombine.low %v788_v63, %v792_v0 }
 0x1c0   : > { %3976 = vmatpush1.bf16.msra.mxu1 %v7229_v5  ;;  %v8890_v21 = vadd.f32 %v3681_v16, %v3641_v14  ;;  %v3643_v22 = vadd.f32 %v3642_v18, %v8822_v53  ;;  %4007 = vmatprep.mubr.bf16.mxu1 %v8606_v42  ;;  %v7085_v53 = vcombine.low %v692_v8, %v696_v9  ;;  %v780_v8 = vld [vmem:[%s8460_s20 + $0xc10] sm:$0xff] }
 0x1c1   : > { %v3683_v23 = vpop.f32.mrf.mxu1  ;;  %3977 = vmatprep.subr.bf16.mxu1 %v7222_v7  ;;  %v3644_v27 = vpop.f32.mrf.mxu0  ;;  %v7182_v5 = vcombine.high %v788_v63, %v792_v0  ;;  %v656_v7 = vld [vmem:[%s8460_s20 + $0x830] sm:$0xff] }
 0x1c2   : > { %v8899_v31 = vadd.f32 %v3683_v23, %v3643_v22  ;;  %3937 = vmatpush1.bf16.msra.mxu0 %v7093_v17  ;;  %v784_v9 = vld [vmem:[%s8460_s20 + $0xc30] sm:$0xff]  ;;  %v7046_v13 = vcombine.high %v652_v6, %v656_v7 }
 0x1c3   : > { %v3685_v32 = vpop.f32.mrf.mxu1  ;;  %v3645_v30 = vpop.f32.mrf.mxu0  ;;  %3938 = vmatprep.subr.bf16.mxu0 %v7086_v20  ;;  %v7174_v14 = vcombine.high %v780_v8, %v784_v9  ;;  %v772_v16 = vld [vmem:[%s8460_s20 + $0xbd0] sm:$0xff]  ;;  %v7045_v20 = vcombine.low %v652_v6, %v656_v7  ;;  %v7173_v22 = vcombine.low %v780_v8, %v784_v9 }
 0x1c4   : > { %3978 = vmatpush1.bf16.msra.mxu1 %v7221_v19  ;;  %v4188_v37 = vcombine.low %v8890_v21, %v8899_v31  ;;  %v776_v17 = vld [vmem:[%s8460_s20 + $0xbf0] sm:$0xff]  ;;  %v797_v21 = vld [vmem:[%s8460_s20 + $0xc98] sm:$0xff] }
 0x1c5   : > { %v3686_v38 = vpop.f32.mrf.mxu1  ;;  %3979 = vmatprep.subr.bf16.mxu1 %v7214_v43  ;;  %v900_v18 = vld [vmem:[%s8460_s20 + $0xfd0] sm:$0xff]  ;;  %v7166_v23 = vcombine.high %v772_v16, %v776_v17  ;;  %v7165_v29 = vcombine.low %v772_v16, %v776_v17  ;;  %v801_v31 = vld [vmem:[%s8460_s20 + $0xcb8] sm:$0xff] }
 0x1c6   : > { %3939 = vmatpush1.bf16.msra.mxu0 %v7085_v53  ;;  %v904_v19 = vld [vmem:[%s8460_s20 + $0xff0] sm:$0xff]  ;;  %v7158_v53 = vcombine.high %v764_v24, %v768_v26 }
 0x1c7   : > { %3940 = vmatprep.subr.bf16.mxu0 %v7078_v36  ;;  %v7294_v43 = vcombine.high %v900_v18, %v904_v19  ;;  %v892_v27 = vld [vmem:[%s8460_s20 + $0xf90] sm:$0xff]  ;;  %v7293_v32 = vcombine.low %v900_v18, %v904_v19 }
 0x1c8   : > { %3980 = vmatpush1.bf16.msra.mxu1 %v7213_v35  ;;  %v7286_v30 = vcombine.high %v892_v27, %v896_v28  ;;  %v756_v35 = vld [vmem:[%s8460_s20 + $0xb50] sm:$0xff]  ;;  %v7285_v55 = vcombine.low %v892_v27, %v896_v28 }
 0x1c9   : > { %3981 = vmatprep.subr.bf16.mxu1 %v7206_v39  ;;  %v760_v36 = vld [vmem:[%s8460_s20 + $0xb70] sm:$0xff] }
 0x1ca   : > { %3941 = vmatpush1.bf16.msra.mxu0 %v7077_v45  ;;  %v884_v38 = vld [vmem:[%s8460_s20 + $0xf50] sm:$0xff]  ;;  %v7150_v41 = vcombine.high %v756_v35, %v760_v36  ;;  %v7149_v50 = vcombine.low %v756_v35, %v760_v36 }
 0x1cb   : > { %3942 = vmatprep.subr.bf16.mxu0 %v7070_v48  ;;  %v888_v39 = vld [vmem:[%s8460_s20 + $0xf70] sm:$0xff] }
 0x1cc   : > { %3982 = vmatpush1.bf16.msra.mxu1 %v7205_v47  ;;  %v7278_v44 = vcombine.high %v884_v38, %v888_v39  ;;  %v748_v45 = vld [vmem:[%s8460_s20 + $0xb10] sm:$0xff]  ;;  %v7277_v51 = vcombine.low %v884_v38, %v888_v39 }
 0x1cd   : > { %3983 = vmatprep.subr.bf16.mxu1 %v7198_v49  ;;  %v752_v47 = vld [vmem:[%s8460_s20 + $0xb30] sm:$0xff] }
 0x1ce   : > { %3943 = vmatpush1.bf16.msra.mxu0 %v7069_v57  ;;  %v876_v48 = vld [vmem:[%s8460_s20 + $0xf10] sm:$0xff]  ;;  %v7142_v54 = vcombine.high %v748_v45, %v752_v47  ;;  %v7141_v61 = vcombine.low %v748_v45, %v752_v47 }
 0x1cf   : > { %3944 = vmatprep.subr.bf16.mxu0 %v7062_v59  ;;  %v880_v49 = vld [vmem:[%s8460_s20 + $0xf30] sm:$0xff] }
 0x1d0   : > { %3984 = vmatpush1.bf16.msra.mxu1 %v7197_v58  ;;  %v7270_v56 = vcombine.high %v876_v48, %v880_v49  ;;  %v740_v57 = vld [vmem:[%s8460_s20 + $0xad0] sm:$0xff]  ;;  %v7269_v62 = vcombine.low %v876_v48, %v880_v49 }
 0x1d1   : > { %3985 = vmatprep.subr.bf16.mxu1 %v7190_v60  ;;  %v744_v58 = vld [vmem:[%s8460_s20 + $0xaf0] sm:$0xff] }
 0x1d2   : > { %3945 = vmatpush1.bf16.msra.mxu0 %v7061_v2  ;;  %v868_v59 = vld [vmem:[%s8460_s20 + $0xed0] sm:$0xff]  ;;  %v7134_v63 = vcombine.high %v740_v57, %v744_v58  ;;  %v7133_v6 = vcombine.low %v740_v57, %v744_v58  ;;  %v569_v57 = vld [vmem:[%s8460_s20 + $0x578] sm:$0xff] }
 0x1d3   : > { %3946 = vmatprep.subr.bf16.mxu0 %v7054_v4  ;;  %v872_v60 = vld [vmem:[%s8460_s20 + $0xef0] sm:$0xff] }
 0x1d4   : > { %3986 = vmatpush1.bf16.msra.mxu1 %v7189_v3  ;;  %v7262_v0 = vcombine.high %v868_v59, %v872_v60  ;;  %v732_v2 = vld [vmem:[%s8460_s20 + $0xa90] sm:$0xff]  ;;  %v7261_v7 = vcombine.low %v868_v59, %v872_v60 }
 0x1d5   : > { %3987 = vmatprep.subr.bf16.mxu1 %v7182_v5  ;;  %v736_v3 = vld [vmem:[%s8460_s20 + $0xab0] sm:$0xff] }
 0x1d6   : > { %3947 = vmatpush1.bf16.msra.mxu0 %v7053_v10  ;;  %v860_v4 = vld [vmem:[%s8460_s20 + $0xe90] sm:$0xff]  ;;  %v7126_v8 = vcombine.high %v732_v2, %v736_v3  ;;  %v7125_v16 = vcombine.low %v732_v2, %v736_v3  ;;  %v429_v2 = vld [vmem:[%s8460_s20 + $0x118] sm:$0xff] }
 0x1d7   : > { %3948 = vmatprep.subr.bf16.mxu0 %v7046_v13  ;;  %v864_v5 = vld [vmem:[%s8460_s20 + $0xeb0] sm:$0xff]  ;;  %v433_v3 = vld [vmem:[%s8460_s20 + $0x138] sm:$0xff] }
 0x1d8   : > { %3988 = vmatpush1.bf16.msra.mxu1 %v7181_v12  ;;  %v7254_v9 = vcombine.high %v860_v4, %v864_v5  ;;  %v724_v10 = vld [vmem:[%s8460_s20 + $0xa50] sm:$0xff]  ;;  %v7253_v17 = vcombine.low %v860_v4, %v864_v5  ;;  %v557_v5 = vld [vmem:[%s8460_s20 + $0x518] sm:$0xff] }
 0x1d9   : > { %3989 = vmatprep.subr.bf16.mxu1 %v7174_v14  ;;  %v728_v12 = vld [vmem:[%s8460_s20 + $0xa70] sm:$0xff] }
 0x1da   : > { %3949 = vmatpush1.bf16.msra.mxu0 %v7045_v20  ;;  %v852_v13 = vld [vmem:[%s8460_s20 + $0xe50] sm:$0xff]  ;;  %v7118_v18 = vcombine.high %v724_v10, %v728_v12  ;;  %v7117_v24 = vcombine.low %v724_v10, %v728_v12  ;;  %v6824_v12 = vcombine.high %v429_v2, %v433_v3 }
 0x1db   : > { %3950 = vmatprep.subr.bf16.mxu0 %v7166_v23  ;;  %v856_v14 = vld [vmem:[%s8460_s20 + $0xe70] sm:$0xff] }
 0x1dc   : > { %3990 = vmatpush1.bf16.msra.mxu1 %v7173_v22  ;;  %v7246_v19 = vcombine.high %v852_v13, %v856_v14  ;;  %v716_v20 = vld [vmem:[%s8460_s20 + $0xa10] sm:$0xff]  ;;  %v7245_v26 = vcombine.low %v852_v13, %v856_v14  ;;  %v421_v14 = vld [vmem:[%s8460_s20 + $0xd8] sm:$0xff] }
 0x1dd   : > { %3991 = vmatprep.subr.bf16.mxu1 %v7294_v43  ;;  %v720_v22 = vld [vmem:[%s8460_s20 + $0xa30] sm:$0xff] }
 0x1de   : > { %3951 = vmatpush2.bf16.msra.mxu0 %v7165_v29  ;;  %v844_v23 = vld [vmem:[%s8460_s20 + $0xe10] sm:$0xff]  ;;  %v7110_v27 = vcombine.high %v716_v20, %v720_v22  ;;  %v453_v29 = vld [vmem:[%s8460_s20 + $0x1d8] sm:$0xff]  ;;  %v7109_v35 = vcombine.low %v716_v20, %v720_v22 }
 0x1df   : > { %3952 = vmatprep.subr.bf16.mxu0 %v7158_v53  ;;  %v848_v43 = vld [vmem:[%s8460_s20 + $0xe30] sm:$0xff]  ;;  %v581_v53 = vld [vmem:[%s8460_s20 + $0x5d8] sm:$0xff] }
 0x1e0   : > { %3992 = vmatpush2.bf16.msra.mxu1 %v7293_v32  ;;  %v7238_v28 = vcombine.high %v844_v23, %v848_v43  ;;  %v457_v32 = vld [vmem:[%s8460_s20 + $0x1f8] sm:$0xff]  ;;  %v7237_v36 = vcombine.low %v844_v23, %v848_v43 }
 0x1e1   : > { %3993 = vmatprep.subr.bf16.mxu1 %v7286_v30  ;;  %v585_v30 = vld [vmem:[%s8460_s20 + $0x5f8] sm:$0xff]  ;;  %v6848_v38 = vcombine.high %v453_v29, %v457_v32  ;;  %v6847_v45 = vcombine.low %v453_v29, %v457_v32 }
 0x1e2   : > { %3953 = vmatpush2.bf16.msra.mxu0 %v7157_v40  ;;  %v6976_v39 = vcombine.high %v581_v53, %v585_v30  ;;  %v445_v40 = vld [vmem:[%s8460_s20 + $0x198] sm:$0xff]  ;;  %v6975_v47 = vcombine.low %v581_v53, %v585_v30 }
 0x1e3   : > { %3954 = vmatprep.subr.bf16.mxu0 %v7150_v41  ;;  %v573_v41 = vld [vmem:[%s8460_s20 + $0x598] sm:$0xff] }
 0x1e4   : > { %3994 = vmatpush2.bf16.msra.mxu1 %v7285_v55  ;;  %v449_v55 = vld [vmem:[%s8460_s20 + $0x1b8] sm:$0xff] }
 0x1e5   : > { %3995 = vmatprep.subr.bf16.mxu1 %v7278_v44  ;;  %v577_v44 = vld [vmem:[%s8460_s20 + $0x5b8] sm:$0xff]  ;;  %v6840_v48 = vcombine.high %v445_v40, %v449_v55  ;;  %v6839_v59 = vcombine.low %v445_v40, %v449_v55 }
 0x1e6   : > { %3955 = vmatpush2.bf16.msra.mxu0 %v7149_v50  ;;  %v6968_v49 = vcombine.high %v573_v41, %v577_v44  ;;  %v437_v50 = vld [vmem:[%s8460_s20 + $0x158] sm:$0xff] }
 0x1e7   : > { %3956 = vmatprep.subr.bf16.mxu0 %v7142_v54  ;;  %v413_v23 = vld [vmem:[%s8460_s20 + $0x98] sm:$0xff] }
 0x1e8   : > { %3996 = vmatpush2.bf16.msra.mxu1 %v7277_v51  ;;  %v441_v51 = vld [vmem:[%s8460_s20 + $0x178] sm:$0xff] }
 0x1e9   : > { %3997 = vmatprep.subr.bf16.mxu1 %v7270_v56  ;;  %v565_v56 = vld [vmem:[%s8460_s20 + $0x558] sm:$0xff] }
 0x1ea   : > { %3957 = vmatpush2.bf16.msra.mxu0 %v7141_v61  ;;  %v6967_v61 = vcombine.low %v573_v41, %v577_v44  ;;  %v6959_v10 = vcombine.low %v565_v56, %v569_v57  ;;  %v417_v43 = vld [vmem:[%s8460_s20 + $0xb8] sm:$0xff] }
 0x1eb   : > { %3958 = vmatprep.subr.bf16.mxu0 %v7134_v63  ;;  %v6808_v29 = vcombine.high %v413_v23, %v417_v43  ;;  %v405_v53 = vld [vmem:[%s8460_s20 + $0x58] sm:$0xff] }
 0x1ec   : > { %3998 = vmatpush2.bf16.msra.mxu1 %v7269_v62  ;;  %v6832_v62 = vcombine.high %v437_v50, %v441_v51  ;;  %v409_v30 = vld [vmem:[%s8460_s20 + $0x78] sm:$0xff] }
 0x1ed   : > { %3999 = vmatprep.subr.bf16.mxu1 %v7262_v0  ;;  %v6960_v0 = vcombine.high %v565_v56, %v569_v57  ;;  %v6800_v40 = vcombine.high %v405_v53, %v409_v30  ;;  %v397_v41 = vld [vmem:[%s8460_s20 + $0x18] sm:$0xff] }
 0x1ee   : > { %3959 = vmatpush2.bf16.msra.mxu0 %v7133_v6  ;;  %v561_v6 = vld [vmem:[%s8460_s20 + $0x538] sm:$0xff] }
 0x1ef   : > { %3960 = vmatprep.subr.bf16.mxu0 %v7126_v8  ;;  %v6831_v8 = vcombine.low %v437_v50, %v441_v51  ;;  %v401_v44 = vld [vmem:[%s8460_s20 + $0x38] sm:$0xff] }
 0x1f0   : > { %4000 = vmatpush2.bf16.msra.mxu1 %v7261_v7  ;;  %v6792_v50 = vcombine.high %v397_v41, %v401_v44  ;;  %v517_v56 = vld [vmem:[%s8460_s20 + $0x3d8] sm:$0xff] }
 0x1f1   : > { %4001 = vmatprep.subr.bf16.mxu1 %v7254_v9  ;;  %v521_v57 = vld [vmem:[%s8460_s20 + $0x3f8] sm:$0xff] }
 0x1f2   : > { %3961 = vmatpush2.bf16.msra.mxu0 %v7125_v16  ;;  %v425_v16 = vld [vmem:[%s8460_s20 + $0xf8] sm:$0xff] }
 0x1f3   : > { %3962 = vmatprep.subr.bf16.mxu0 %v7118_v18  ;;  %v553_v18 = vld [vmem:[%s8460_s20 + $0x4f8] sm:$0xff]  ;;  %v6816_v20 = vcombine.high %v421_v14, %v425_v16 }
 0x1f4   : > { %4002 = vmatpush2.bf16.msra.mxu1 %v7253_v17  ;;  %v549_v17 = vld [vmem:[%s8460_s20 + $0x4d8] sm:$0xff] }
 0x1f5   : > { %4003 = vmatprep.subr.bf16.mxu1 %v7246_v19  ;;  %v6951_v19 = vcombine.low %v557_v5, %v561_v6  ;;  %v6944_v22 = vcombine.high %v549_v17, %v553_v18 }
 0x1f6   : > { %3963 = vmatpush2.bf16.msra.mxu0 %v7117_v24  ;;  %v541_v24 = vld [vmem:[%s8460_s20 + $0x498] sm:$0xff] }
 0x1f7   : > { %3964 = vmatprep.subr.bf16.mxu0 %v7110_v27  ;;  %v6815_v27 = vcombine.low %v421_v14, %v425_v16  ;;  %v629_v14 = vld [vmem:[%s8460_s20 + $0x758] sm:$0xff] }
 0x1f8   : > { %4004 = vmatpush2.bf16.msra.mxu1 %v7245_v26  ;;  %v545_v26 = vld [vmem:[%s8460_s20 + $0x4b8] sm:$0xff] }
 0x1f9   : > { %4005 = vmatprep.subr.bf16.mxu1 %v7238_v28  ;;  %v6943_v28 = vcombine.low %v549_v17, %v553_v18  ;;  %v6936_v32 = vcombine.high %v541_v24, %v545_v26  ;;  %v633_v16 = vld [vmem:[%s8460_s20 + $0x778] sm:$0xff] }
 0x1fa   : > { %3965 = vmatpush2.bf16.msra.mxu0 %v7109_v35  ;;  %v533_v35 = vld [vmem:[%s8460_s20 + $0x458] sm:$0xff] }
 0x1fb   : > { %4016 = vmatprep.subr.bf16.mxu0 %v6848_v38  ;;  %v6807_v38 = vcombine.low %v413_v23, %v417_v43  ;;  %v621_v23 = vld [vmem:[%s8460_s20 + $0x718] sm:$0xff] }
 0x1fc   : > { %4006 = vmatpush2.bf16.msra.mxu1 %v7237_v36  ;;  %v537_v36 = vld [vmem:[%s8460_s20 + $0x478] sm:$0xff] }
 0x1fd   : > { %4057 = vmatprep.subr.bf16.mxu1 %v6976_v39  ;;  %v8961_v54 = vpop.f32.mrf.mxu0  ;;  %3967 = vmatmul.mubr.bf16.vlgmr.msra.gmra.mxu0 %v8556_v34  ;;  %v6935_v39 = vcombine.low %v541_v24, %v545_v26  ;;  %v6928_v55 = vcombine.high %v533_v35, %v537_v36  ;;  %v625_v43 = vld [vmem:[%s8460_s20 + $0x738] sm:$0xff]  ;;  %v7023_v26 = vcombine.low %v629_v14, %v633_v16 }
 0x1fe   : > { %4017 = vmatpush1.bf16.msra.mxu0 %v6847_v45  ;;  %4048 = vmatprep.mubr.bf16.mxu0 %v8533_v11  ;;  %v6952_v11 = vcombine.high %v557_v5, %v561_v6  ;;  %v525_v45 = vld [vmem:[%s8460_s20 + $0x418] sm:$0xff] }
 0x1ff   : > { %v8966_v58 = vpop.f32.mrf.mxu1  ;;  %4008 = vmatmul.mubr.bf16.vlgmr.msra.gmra.mxu1 %v8673_v52  ;;  %v8969_v60 = vpop.f32.mrf.mxu0  ;;  %4018 = vmatprep.subr.bf16.mxu0 %v6840_v48  ;;  %v6799_v48 = vcombine.low %v405_v53, %v409_v30  ;;  %v513_v5 = vld [vmem:[%s8460_s20 + $0x3b8] sm:$0xff] }
 0x200   : > { %4058 = vmatpush1.bf16.msra.mxu1 %v6975_v47  ;;  %4089 = vmatprep.mubr.bf16.mxu1 %v8540_v15  ;;  %v6823_v15 = vcombine.low %v429_v2, %v433_v3  ;;  %v529_v47 = vld [vmem:[%s8460_s20 + $0x438] sm:$0xff]  ;;  %v6912_v2 = vcombine.high %v517_v56, %v521_v57 }
 0x201   : > { %v8971_v63 = vpop.f32.mrf.mxu1  ;;  %4059 = vmatprep.subr.bf16.mxu1 %v6968_v49  ;;  %v3726_v4 = vpop.f32.mrf.mxu0  ;;  %v6927_v49 = vcombine.low %v533_v35, %v537_v36  ;;  %v6920_v51 = vcombine.high %v525_v45, %v529_v47  ;;  %v637_v6 = vld [vmem:[%s8460_s20 + $0x798] sm:$0xff]  ;;  %v7015_v36 = vcombine.low %v621_v23, %v625_v43 }
 0x202   : > { %4019 = vmatpush1.bf16.msra.mxu0 %v6839_v59  ;;  %v645_v59 = vld [vmem:[%s8460_s20 + $0x7d8] sm:$0xff] }
 0x203   : > { %v3767_v7 = vpop.f32.mrf.mxu1  ;;  %v3727_v9 = vpop.f32.mrf.mxu0  ;;  %4020 = vmatprep.subr.bf16.mxu0 %v6832_v62  ;;  %v6791_v62 = vcombine.low %v397_v41, %v401_v44  ;;  %v509_v4 = vld [vmem:[%s8460_s20 + $0x398] sm:$0xff] }
 0x204   : > { %4060 = vmatpush1.bf16.msra.mxu1 %v6967_v61  ;;  %v649_v61 = vld [vmem:[%s8460_s20 + $0x7f8] sm:$0xff]  ;;  %v6903_v17 = vcombine.low %v509_v4, %v513_v5 }
 0x205   : > { %v3768_v13 = vpop.f32.mrf.mxu1  ;;  %4061 = vmatprep.subr.bf16.mxu1 %v6960_v0  ;;  %v6919_v0 = vcombine.low %v525_v45, %v529_v47  ;;  %v7040_v3 = vcombine.high %v645_v59, %v649_v61  ;;  %v641_v7 = vld [vmem:[%s8460_s20 + $0x7b8] sm:$0xff]  ;;  %v7039_v9 = vcombine.low %v645_v59, %v649_v61 }
 0x206   : > { %4021 = vmatpush1.bf16.msra.mxu0 %v6831_v8  ;;  %v6911_v8 = vcombine.low %v517_v56, %v521_v57  ;;  %v501_v13 = vld [vmem:[%s8460_s20 + $0x358] sm:$0xff]  ;;  %v7031_v18 = vcombine.low %v637_v6, %v641_v7 }
 0x207   : > { %4022 = vmatprep.subr.bf16.mxu0 %v6824_v12  ;;  %v7032_v12 = vcombine.high %v637_v6, %v641_v7  ;;  %v613_v53 = vld [vmem:[%s8460_s20 + $0x6d8] sm:$0xff] }
 0x208   : > { %4062 = vmatpush1.bf16.msra.mxu1 %v6959_v10  ;;  %v6904_v10 = vcombine.high %v509_v4, %v513_v5  ;;  %v617_v30 = vld [vmem:[%s8460_s20 + $0x6f8] sm:$0xff] }
 0x209   : > { %4063 = vmatprep.subr.bf16.mxu1 %v6952_v11  ;;  %v505_v11 = vld [vmem:[%s8460_s20 + $0x378] sm:$0xff]  ;;  %v7007_v47 = vcombine.low %v613_v53, %v617_v30 }
 0x20a   : > { %4023 = vmatpush1.bf16.msra.mxu0 %v6823_v15  ;;  %v6896_v15 = vcombine.high %v501_v13, %v505_v11  ;;  %v6895_v24 = vcombine.low %v501_v13, %v505_v11  ;;  %v605_v41 = vld [vmem:[%s8460_s20 + $0x698] sm:$0xff] }
 0x20b   : > { %4024 = vmatprep.subr.bf16.mxu0 %v6816_v20  ;;  %v493_v20 = vld [vmem:[%s8460_s20 + $0x318] sm:$0xff] }
 0x20c   : > { %4064 = vmatpush1.bf16.msra.mxu1 %v6951_v19  ;;  %v7024_v19 = vcombine.high %v629_v14, %v633_v16  ;;  %v609_v44 = vld [vmem:[%s8460_s20 + $0x6b8] sm:$0xff] }
 0x20d   : > { %4065 = vmatprep.subr.bf16.mxu1 %v6944_v22  ;;  %v497_v22 = vld [vmem:[%s8460_s20 + $0x338] sm:$0xff]  ;;  %v6999_v61 = vcombine.low %v605_v41, %v609_v44 }
 0x20e   : > { %4025 = vmatpush1.bf16.msra.mxu0 %v6815_v27  ;;  %v6888_v27 = vcombine.high %v493_v20, %v497_v22  ;;  %v6887_v35 = vcombine.low %v493_v20, %v497_v22  ;;  %v597_v56 = vld [vmem:[%s8460_s20 + $0x658] sm:$0xff] }
 0x20f   : > { %4026 = vmatprep.subr.bf16.mxu0 %v6808_v29  ;;  %v485_v29 = vld [vmem:[%s8460_s20 + $0x2d8] sm:$0xff] }
 0x210   : > { %4066 = vmatpush1.bf16.msra.mxu1 %v6943_v28  ;;  %v7016_v28 = vcombine.high %v621_v23, %v625_v43  ;;  %v601_v57 = vld [vmem:[%s8460_s20 + $0x678] sm:$0xff]  ;;  %v8275_v23 = vmov 1983009808  }
 0x211   : > { %4067 = vmatprep.subr.bf16.mxu1 %v6936_v32  ;;  %v489_v32 = vld [vmem:[%s8460_s20 + $0x2f8] sm:$0xff]  ;;  %v6991_v7 = vcombine.low %v597_v56, %v601_v57  ;;  %v4191_v43 = vunpack.c.l.s4 %v8275_v23 }
 0x212   : > { %4027 = vmatpush1.bf16.msra.mxu0 %v6807_v38  ;;  %v6880_v38 = vcombine.high %v485_v29, %v489_v32  ;;  %v6879_v45 = vcombine.low %v485_v29, %v489_v32  ;;  %v589_v4 = vld [vmem:[%s8460_s20 + $0x618] sm:$0xff] }
 0x213   : > { %4028 = vmatprep.subr.bf16.mxu0 %v6800_v40  ;;  %v477_v40 = vld [vmem:[%s8460_s20 + $0x298] sm:$0xff] }
 0x214   : > { %4068 = vmatpush1.bf16.msra.mxu1 %v6935_v39  ;;  %v7008_v39 = vcombine.high %v613_v53, %v617_v30  ;;  %v593_v5 = vld [vmem:[%s8460_s20 + $0x638] sm:$0xff] }
 0x215   : > { %4069 = vmatprep.subr.bf16.mxu1 %v6928_v55  ;;  %v481_v55 = vld [vmem:[%s8460_s20 + $0x2b8] sm:$0xff]  ;;  %v6983_v16 = vcombine.low %v589_v4, %v593_v5 }
 0x216   : > { %4029 = vmatpush1.bf16.msra.mxu0 %v6799_v48  ;;  %v6872_v48 = vcombine.high %v477_v40, %v481_v55  ;;  %v6871_v59 = vcombine.low %v477_v40, %v481_v55  ;;  %v837_v13 = vld [vmem:[%s8460_s20 + $0xdd8] sm:$0xff] }
 0x217   : > { %4030 = vmatprep.subr.bf16.mxu0 %v6792_v50  ;;  %v469_v50 = vld [vmem:[%s8460_s20 + $0x258] sm:$0xff] }
 0x218   : > { %4070 = vmatpush1.bf16.msra.mxu1 %v6927_v49  ;;  %v7000_v49 = vcombine.high %v605_v41, %v609_v44  ;;  %v841_v11 = vld [vmem:[%s8460_s20 + $0xdf8] sm:$0xff] }
 0x219   : > { %4071 = vmatprep.subr.bf16.mxu1 %v6920_v51  ;;  %v473_v51 = vld [vmem:[%s8460_s20 + $0x278] sm:$0xff] }
 0x21a   : > { %4031 = vmatpush1.bf16.msra.mxu0 %v6791_v62  ;;  %v6864_v62 = vcombine.high %v469_v50, %v473_v51  ;;  %v6863_v6 = vcombine.low %v469_v50, %v473_v51  ;;  %v829_v20 = vld [vmem:[%s8460_s20 + $0xd98] sm:$0xff] }
 0x21b   : > { %4032 = vmatprep.subr.bf16.mxu0 %v6912_v2  ;;  %v461_v2 = vld [vmem:[%s8460_s20 + $0x218] sm:$0xff] }
 0x21c   : > { %4072 = vmatpush1.bf16.msra.mxu1 %v6919_v0  ;;  %v6992_v0 = vcombine.high %v597_v56, %v601_v57  ;;  %v833_v22 = vld [vmem:[%s8460_s20 + $0xdb8] sm:$0xff] }
 0x21d   : > { %4073 = vmatprep.subr.bf16.mxu1 %v7040_v3  ;;  %v465_v3 = vld [vmem:[%s8460_s20 + $0x238] sm:$0xff]  ;;  %v7224_v29 = vcombine.high %v829_v20, %v833_v22 }
 0x21e   : > { %4033 = vmatpush2.bf16.msra.mxu0 %v6911_v8  ;;  %v6856_v8 = vcombine.high %v461_v2, %v465_v3  ;;  %v6855_v14 = vcombine.low %v461_v2, %v465_v3  ;;  %v693_v32 = vld [vmem:[%s8460_s20 + $0x958] sm:$0xff] }
 0x21f   : > { %4034 = vmatprep.subr.bf16.mxu0 %v6904_v10  ;;  %v709_v10 = vld [vmem:[%s8460_s20 + $0x9d8] sm:$0xff] }
 0x220   : > { %4074 = vmatpush2.bf16.msra.mxu1 %v7039_v9  ;;  %v6984_v9 = vcombine.high %v589_v4, %v593_v5  ;;  %v697_v53 = vld [vmem:[%s8460_s20 + $0x978] sm:$0xff] }
 0x221   : > { %4075 = vmatprep.subr.bf16.mxu1 %v7032_v12  ;;  %v713_v12 = vld [vmem:[%s8460_s20 + $0x9f8] sm:$0xff]  ;;  %v7088_v41 = vcombine.high %v693_v32, %v697_v53 }
 0x222   : > { %4035 = vmatpush2.bf16.msra.mxu0 %v6903_v17  ;;  %v7104_v17 = vcombine.high %v709_v10, %v713_v12  ;;  %v677_v3 = vld [vmem:[%s8460_s20 + $0x8d8] sm:$0xff] }
 0x223   : > { %4036 = vmatprep.subr.bf16.mxu0 %v6896_v15  ;;  %v701_v15 = vld [vmem:[%s8460_s20 + $0x998] sm:$0xff] }
 0x224   : > { %4076 = vmatpush2.bf16.msra.mxu1 %v7031_v18  ;;  %v7232_v18 = vcombine.high %v837_v13, %v841_v11  ;;  %v681_v4 = vld [vmem:[%s8460_s20 + $0x8f8] sm:$0xff] }
 0x225   : > { %4077 = vmatprep.subr.bf16.mxu1 %v7024_v19  ;;  %v705_v19 = vld [vmem:[%s8460_s20 + $0x9b8] sm:$0xff] }
 0x226   : > { %4037 = vmatpush2.bf16.msra.mxu0 %v6895_v24  ;;  %v7103_v24 = vcombine.low %v709_v10, %v713_v12  ;;  %v805_v5 = vld [vmem:[%s8460_s20 + $0xcd8] sm:$0xff]  ;;  %v391_v10 = vld [vmem:[#allocation2] sm:$0xff] }
 0x227   : > { %4038 = vmatprep.subr.bf16.mxu0 %v6888_v27  ;;  %v7096_v27 = vcombine.high %v701_v15, %v705_v19  ;;  %v665_v23 = vld [vmem:[%s8460_s20 + $0x878] sm:$0xff] }
 0x228   : > { %4078 = vmatpush2.bf16.msra.mxu1 %v7023_v26  ;;  %v7231_v26 = vcombine.low %v837_v13, %v841_v11  ;;  %v7072_v13 = vcombine.high %v677_v3, %v681_v4 }
 0x229   : > { %4079 = vmatprep.subr.bf16.mxu1 %v7016_v28  ;;  %v3764_v28 = vadd.f32 %v8966_v58, %v8961_v54  ;;  %v7095_v54 = vcombine.low %v701_v15, %v705_v19 }
 0x22a   : > { %4039 = vmatpush2.bf16.msra.mxu0 %v6887_v35  ;;  %v821_v35 = vld [vmem:[%s8460_s20 + $0xd58] sm:$0xff] }
 0x22b   : > { %4040 = vmatprep.subr.bf16.mxu0 %v6880_v38  ;;  %v4192_v38 = vunpack.c.0.s8 %v4191_v43  ;;  %v789_v43 = vld [vmem:[%s8460_s20 + $0xc58] sm:$0xff] }
 0x22c   : > { %4080 = vmatpush2.bf16.msra.mxu1 %v7015_v36  ;;  %v825_v36 = vld [vmem:[%s8460_s20 + $0xd78] sm:$0xff] }
 0x22d   : > { %4081 = vmatprep.subr.bf16.mxu1 %v7008_v39  ;;  %v3766_v39 = vadd.f32 %v8971_v63, %v8969_v60  ;;  %v689_v60 = vld [vmem:[%s8460_s20 + $0x938] sm:$0xff]  ;;  %v9052_v50 = vsub.s32 %v4192_v38, %v8505_v46 }
 0x22e   : > { %4041 = vmatpush2.bf16.msra.mxu0 %v6879_v45 }
 0x22f   : > { %4042 = vmatprep.subr.bf16.mxu0 %v6872_v48  ;;  %v685_v48 = vld [vmem:[%s8460_s20 + $0x918] sm:$0xff] }
 0x230   : > { %4082 = vmatpush2.bf16.msra.mxu1 %v7007_v47  ;;  %v7216_v47 = vcombine.high %v821_v35, %v825_v36 }
 0x231   : > { %4083 = vmatprep.subr.bf16.mxu1 %v7000_v49  ;;  %v813_v49 = vld [vmem:[%s8460_s20 + $0xd18] sm:$0xff] }
 0x232   : > { %4043 = vmatpush2.bf16.msra.mxu0 %v6871_v59  ;;  %v7087_v59 = vcombine.low %v693_v32, %v697_v53  ;;  %v653_v32 = vld [vmem:[%s8460_s20 + $0x818] sm:$0xff] }
 0x233   : > { %4044 = vmatprep.subr.bf16.mxu0 %v6864_v62  ;;  %v7080_v62 = vcombine.high %v685_v48, %v689_v60  ;;  %v657_v53 = vld [vmem:[%s8460_s20 + $0x838] sm:$0xff] }
 0x234   : > { %4084 = vmatpush2.bf16.msra.mxu1 %v6999_v61 }
 0x235   : > { %4085 = vmatprep.subr.bf16.mxu1 %v6992_v0 }
 0x236   : > { %4045 = vmatpush2.bf16.msra.mxu0 %v6863_v6  ;;  %v809_v6 = vld [vmem:[%s8460_s20 + $0xcf8] sm:$0xff] }
 0x237   : > { %4046 = vmatprep.subr.bf16.mxu0 %v6856_v8  ;;  %v7199_v15 = vcombine.low %v805_v5, %v809_v6 }
 0x238   : > { %4086 = vmatpush2.bf16.msra.mxu1 %v6991_v7  ;;  %v4196_v7 = vrot.slane %v4188_v37, %v9052_v50 }
 0x239   : > { %4087 = vmatprep.subr.bf16.mxu1 %v6984_v9  ;;  %v7079_v9 = vcombine.low %v685_v48, %v689_v60  ;;  %v765_v48 = vld [vmem:[%s8460_s20 + $0xb98] sm:$0xff] }
 0x23a   : > { %4047 = vmatpush2.bf16.msra.mxu0 %v6855_v14  ;;  %v7200_v14 = vcombine.high %v805_v5, %v809_v6  ;;  %v769_v60 = vld [vmem:[%s8460_s20 + $0xbb8] sm:$0xff] }
 0x23b   : > { %4098 = vmatprep.subr.bf16.mxu0 %v7104_v17  ;;  %v673_v17 = vld [vmem:[%s8460_s20 + $0x8b8] sm:$0xff] }
 0x23c   : > { %4088 = vmatpush2.bf16.msra.mxu1 %v6983_v16  ;;  %v669_v16 = vld [vmem:[%s8460_s20 + $0x898] sm:$0xff] }
 0x23d   : > { %4139 = vmatprep.subr.bf16.mxu1 %v7232_v18  ;;  %v3804_v30 = vpop.f32.mrf.mxu0  ;;  %4049 = vmatmul.mubr.bf16.vlgmr.msra.gmra.mxu0 %v8586_v25  ;;  %v7223_v25 = vcombine.low %v829_v20, %v833_v22  ;;  %v7071_v18 = vcombine.low %v677_v3, %v681_v4  ;;  %v7064_v19 = vcombine.high %v669_v16, %v673_v17  ;;  %v661_v22 = vld [vmem:[%s8460_s20 + $0x858] sm:$0xff] }
 0x23e   : > { %v3805_v40 = vadd.f32 %v3804_v30, %v3764_v28  ;;  %4099 = vmatpush1.bf16.msra.mxu0 %v7103_v24  ;;  %4130 = vmatprep.mubr.bf16.mxu0 %v8593_v33  ;;  %v7215_v33 = vcombine.low %v821_v35, %v825_v36  ;;  %v7192_v20 = vcombine.high %v797_v21, %v801_v31  ;;  %v793_v24 = vld [vmem:[%s8460_s20 + $0xc78] sm:$0xff] }
 0x23f   : > { %v3845_v55 = vpop.f32.mrf.mxu1  ;;  %4090 = vmatmul.mubr.bf16.vlgmr.msra.gmra.mxu1 %v8597_v1  ;;  %v3806_v58 = vpop.f32.mrf.mxu0  ;;  %4100 = vmatprep.subr.bf16.mxu0 %v7096_v27  ;;  %v817_v1 = vld [vmem:[%s8460_s20 + $0xd38] sm:$0xff]  ;;  %v7191_v27 = vcombine.low %v797_v21, %v801_v31  ;;  %v7056_v28 = vcombine.high %v661_v22, %v665_v23  ;;  %v7055_v36 = vcombine.low %v661_v22, %v665_v23 }
 0x240   : > { %4140 = vmatpush1.bf16.msra.mxu1 %v7231_v26  ;;  %v3807_v44 = vadd.f32 %v3806_v58, %v3766_v39  ;;  %4171 = vmatprep.mubr.bf16.mxu1 %v8606_v42  ;;  %v3846_v51 = vadd.f32 %v3845_v55, %v3805_v40  ;;  %v7208_v42 = vcombine.high %v813_v49, %v817_v1  ;;  %v781_v30 = vld [vmem:[%s8460_s20 + $0xc18] sm:$0xff] }
 0x241   : > { %v3847_v45 = vpop.f32.mrf.mxu1  ;;  %4141 = vmatprep.subr.bf16.mxu1 %v7224_v29  ;;  %v3808_v63 = vpop.f32.mrf.mxu0  ;;  %v7207_v12 = vcombine.low %v813_v49, %v817_v1  ;;  %v7063_v26 = vcombine.low %v669_v16, %v673_v17  ;;  %v7184_v29 = vcombine.high %v789_v43, %v793_v24  ;;  %v785_v35 = vld [vmem:[%s8460_s20 + $0xc38] sm:$0xff]  ;;  %v7183_v38 = vcombine.low %v789_v43, %v793_v24 }
 0x242   : > { %v3848_v56 = vadd.f32 %v3847_v45, %v3807_v44  ;;  %4101 = vmatpush1.bf16.msra.mxu0 %v7095_v54  ;;  %v7048_v39 = vcombine.high %v653_v32, %v657_v53  ;;  %v7176_v40 = vcombine.high %v781_v30, %v785_v35  ;;  %v773_v55 = vld [vmem:[%s8460_s20 + $0xbd8] sm:$0xff]  ;;  %v7175_v44 = vcombine.low %v781_v30, %v785_v35 }
 0x243   : > { %v3849_v57 = vpop.f32.mrf.mxu1  ;;  %v3809_v61 = vpop.f32.mrf.mxu0  ;;  %4102 = vmatprep.subr.bf16.mxu0 %v7088_v41  ;;  %v777_v54 = vld [vmem:[%s8460_s20 + $0xbf8] sm:$0xff]  ;;  %v7047_v41 = vcombine.low %v653_v32, %v657_v53 }
 0x244   : > { %4142 = vmatpush1.bf16.msra.mxu1 %v7223_v25  ;;  %v4189_v0 = vcombine.low %v3846_v51, %v3848_v56  ;;  %v901_v58 = vld [vmem:[%s8460_s20 + $0xfd8] sm:$0xff]  ;;  %v7168_v45 = vcombine.high %v773_v55, %v777_v54  ;;  %v7167_v1 = vcombine.low %v773_v55, %v777_v54  ;;  %v7160_v56 = vcombine.high %v765_v48, %v769_v60 }
 0x245   : > { %v3850_v2 = vpop.f32.mrf.mxu1  ;;  %4143 = vmatprep.subr.bf16.mxu1 %v7216_v47  ;;  %v905_v25 = vld [vmem:[%s8460_s20 + $0xff8] sm:$0xff] }
 0x246   : > { %v4203_v8 = vrot.slane %v4189_v0, %v9052_v50  ;;  %4103 = vmatpush1.bf16.msra.mxu0 %v7087_v59  ;;  %v7296_v47 = vcombine.high %v901_v58, %v905_v25  ;;  %v893_v63 = vld [vmem:[%s8460_s20 + $0xf98] sm:$0xff]  ;;  %v7295_v51 = vcombine.low %v901_v58, %v905_v25  ;;  %v7159_v0 = vcombine.low %v765_v48, %v769_v60 }
 0x247   : > { %4104 = vmatprep.subr.bf16.mxu0 %v7080_v62  ;;  %v897_v49 = vld [vmem:[%s8460_s20 + $0xfb8] sm:$0xff] }
 0x248   : > { %4144 = vmatpush1.bf16.msra.mxu1 %v7215_v33  ;;  %v4204_v11 = vcombine.low %v4196_v7, %v4203_v8  ;;  %v7288_v57 = vcombine.high %v893_v63, %v897_v49  ;;  %v757_v59 = vld [vmem:[%s8460_s20 + $0xb58] sm:$0xff]  ;;  %v7287_v2 = vcombine.low %v893_v63, %v897_v49 }
 0x249   : > { %4145 = vmatprep.subr.bf16.mxu1 %v7208_v42  ;;  %v761_v61 = vld [vmem:[%s8460_s20 + $0xb78] sm:$0xff] }
 0x24a   : > { %v4224_v37 = vadd.f32 %v4204_v11, %v391_v10  ;;  %4105 = vmatpush1.bf16.msra.mxu0 %v7079_v9  ;;  %v885_v33 = vld [vmem:[%s8460_s20 + $0xf58] sm:$0xff]  ;;  %v7152_v42 = vcombine.high %v757_v59, %v761_v61  ;;  %v7151_v8 = vcombine.low %v757_v59, %v761_v61 }
 0x24b   : > { %4106 = vmatprep.subr.bf16.mxu0 %v7072_v13  ;;  %v889_v62 = vld [vmem:[%s8460_s20 + $0xf78] sm:$0xff] }
 0x24c   : > { %4146 = vmatpush1.bf16.msra.mxu1 %v7207_v12  ;;  %4226 = vst [vmem:[#allocation2] sm:$0xff] %v4224_v37  ;;  %v7280_v3 = vcombine.high %v885_v33, %v889_v62  ;;  %v749_v4 = vld [vmem:[%s8460_s20 + $0xb18] sm:$0xff]  ;;  %v7279_v9 = vcombine.low %v885_v33, %v889_v62 }
 0x24d   : > { %4147 = vmatprep.subr.bf16.mxu1 %v7200_v14  ;;  %v753_v5 = vld [vmem:[%s8460_s20 + $0xb38] sm:$0xff] }
 0x24e   : > { %4107 = vmatpush1.bf16.msra.mxu0 %v7071_v18  ;;  %v877_v6 = vld [vmem:[%s8460_s20 + $0xf18] sm:$0xff]  ;;  %v7144_v10 = vcombine.high %v749_v4, %v753_v5  ;;  %v7143_v17 = vcombine.low %v749_v4, %v753_v5 }
 0x24f   : > { %4108 = vmatprep.subr.bf16.mxu0 %v7064_v19  ;;  %v881_v7 = vld [vmem:[%s8460_s20 + $0xf38] sm:$0xff] }
 0x250   : > { %4148 = vmatpush1.bf16.msra.mxu1 %v7199_v15  ;;  %v7272_v12 = vcombine.high %v877_v6, %v881_v7  ;;  %v741_v13 = vld [vmem:[%s8460_s20 + $0xad8] sm:$0xff]  ;;  %v7271_v21 = vcombine.low %v877_v6, %v881_v7 }
 0x251   : > { %4149 = vmatprep.subr.bf16.mxu1 %v7192_v20  ;;  %v745_v11 = vld [vmem:[%s8460_s20 + $0xaf8] sm:$0xff] }
 0x252   : > { %4109 = vmatpush1.bf16.msra.mxu0 %v7063_v26  ;;  %v869_v14 = vld [vmem:[%s8460_s20 + $0xed8] sm:$0xff]  ;;  %v7136_v31 = vcombine.high %v741_v13, %v745_v11  ;;  %v7135_v22 = vcombine.low %v741_v13, %v745_v11 }
 0x253   : > { %4110 = vmatprep.subr.bf16.mxu0 %v7056_v28  ;;  %v873_v16 = vld [vmem:[%s8460_s20 + $0xef8] sm:$0xff] }
 0x254   : > { %4150 = vmatpush1.bf16.msra.mxu1 %v7191_v27  ;;  %v7264_v37 = vcombine.high %v869_v14, %v873_v16  ;;  %v733_v18 = vld [vmem:[%s8460_s20 + $0xa98] sm:$0xff]  ;;  %v7263_v23 = vcombine.low %v869_v14, %v873_v16 }
 0x255   : > { %4151 = vmatprep.subr.bf16.mxu1 %v7184_v29  ;;  %v737_v15 = vld [vmem:[%s8460_s20 + $0xab8] sm:$0xff] }
 0x256   : > { %4111 = vmatpush1.bf16.msra.mxu0 %v7055_v36  ;;  %v861_v19 = vld [vmem:[%s8460_s20 + $0xe98] sm:$0xff]  ;;  %v7128_v43 = vcombine.high %v733_v18, %v737_v15  ;;  %v7127_v32 = vcombine.low %v733_v18, %v737_v15 }
 0x257   : > { %4112 = vmatprep.subr.bf16.mxu0 %v7048_v39  ;;  %v865_v20 = vld [vmem:[%s8460_s20 + $0xeb8] sm:$0xff] }
 0x258   : > { %4152 = vmatpush1.bf16.msra.mxu1 %v7183_v38  ;;  %v7256_v24 = vcombine.high %v861_v19, %v865_v20  ;;  %v725_v26 = vld [vmem:[%s8460_s20 + $0xa58] sm:$0xff]  ;;  %v7255_v53 = vcombine.low %v861_v19, %v865_v20 }
 0x259   : > { %4153 = vmatprep.subr.bf16.mxu1 %v7176_v40  ;;  %v729_v27 = vld [vmem:[%s8460_s20 + $0xa78] sm:$0xff] }
 0x25a   : > { %4113 = vmatpush1.bf16.msra.mxu0 %v7047_v41  ;;  %v853_v28 = vld [vmem:[%s8460_s20 + $0xe58] sm:$0xff]  ;;  %v7120_v30 = vcombine.high %v725_v26, %v729_v27  ;;  %v7119_v55 = vcombine.low %v725_v26, %v729_v27 }
 0x25b   : > { %4114 = vmatprep.subr.bf16.mxu0 %v7168_v45  ;;  %v857_v29 = vld [vmem:[%s8460_s20 + $0xe78] sm:$0xff] }
 0x25c   : > { %4154 = vmatpush1.bf16.msra.mxu1 %v7175_v44  ;;  %v7248_v35 = vcombine.high %v853_v28, %v857_v29  ;;  %v717_v36 = vld [vmem:[%s8460_s20 + $0xa18] sm:$0xff]  ;;  %v7247_v54 = vcombine.low %v853_v28, %v857_v29 }
 0x25d   : > { %4155 = vmatprep.subr.bf16.mxu1 %v7296_v47  ;;  %v721_v38 = vld [vmem:[%s8460_s20 + $0xa38] sm:$0xff] }
 0x25e   : > { %4115 = vmatpush2.bf16.msra.mxu0 %v7167_v1  ;;  %v845_v39 = vld [vmem:[%s8460_s20 + $0xe18] sm:$0xff]  ;;  %v7112_v58 = vcombine.high %v717_v36, %v721_v38  ;;  %v7111_v41 = vcombine.low %v717_v36, %v721_v38 }
 0x25f   : > { %4116 = vmatprep.subr.bf16.mxu0 %v7160_v56  ;;  %v849_v40 = vld [vmem:[%s8460_s20 + $0xe38] sm:$0xff] }
 0x260   : > { %4156 = vmatpush2.bf16.msra.mxu1 %v7295_v51  ;;  %v7240_v25 = vcombine.high %v845_v39, %v849_v40  ;;  %v7239_v44 = vcombine.low %v845_v39, %v849_v40 }
 0x261   : > { %4157 = vmatprep.subr.bf16.mxu1 %v7288_v57 }
 0x262   : > { %4117 = vmatpush2.bf16.msra.mxu0 %v7159_v0 }
 0x263   : > { %4118 = vmatprep.subr.bf16.mxu0 %v7152_v42 }
 0x264   : > { %4158 = vmatpush2.bf16.msra.mxu1 %v7287_v2 }
 0x265   : > { %4159 = vmatprep.subr.bf16.mxu1 %v7280_v3 }
 0x266   : > { %4119 = vmatpush2.bf16.msra.mxu0 %v7151_v8 }
 0x267   : > { %4120 = vmatprep.subr.bf16.mxu0 %v7144_v10 }
 0x268   : > { %4160 = vmatpush2.bf16.msra.mxu1 %v7279_v9 }
 0x269   : > { %4161 = vmatprep.subr.bf16.mxu1 %v7272_v12 }
 0x26a   : > { %4121 = vmatpush2.bf16.msra.mxu0 %v7143_v17 }
 0x26b   : > { %4122 = vmatprep.subr.bf16.mxu0 %v7136_v31 }
 0x26c   : > { %4162 = vmatpush2.bf16.msra.mxu1 %v7271_v21 }
 0x26d   : > { %4163 = vmatprep.subr.bf16.mxu1 %v7264_v37 }
 0x26e   : > { %4123 = vmatpush2.bf16.msra.mxu0 %v7135_v22 }
 0x26f   : > { %4124 = vmatprep.subr.bf16.mxu0 %v7128_v43 }
 0x270   : > { %4164 = vmatpush2.bf16.msra.mxu1 %v7263_v23 }
 0x271   : > { %4165 = vmatprep.subr.bf16.mxu1 %v7256_v24 }
 0x272   : > { %4125 = vmatpush2.bf16.msra.mxu0 %v7127_v32  ;;  %v392_v32 = vld [vmem:[#allocation2 + $0x8] sm:$0xff] }
 0x273   : > { %4126 = vmatprep.subr.bf16.mxu0 %v7120_v30 }
 0x274   : > { %4166 = vmatpush2.bf16.msra.mxu1 %v7255_v53 }
 0x275   : > { %4167 = vmatprep.subr.bf16.mxu1 %v7248_v35 }
 0x276   : > { %4127 = vmatpush2.bf16.msra.mxu0 %v7119_v55 }
 0x277   : > { %4128 = vmatprep.subr.bf16.mxu0 %v7112_v58 }
 0x278   : > { %4168 = vmatpush2.bf16.msra.mxu1 %v7247_v54 }
 0x279   : > { %4169 = vmatprep.subr.bf16.mxu1 %v7240_v25 }
 0x27a   : > { %4129 = vmatpush2.bf16.msra.mxu0 %v7111_v41 }
 0x27c   : > { %4170 = vmatpush2.bf16.msra.mxu1 %v7239_v44 }
 0x27d   : > { %v3886_v45 = vpop.f32.mrf.mxu0  ;;  %4131 = vmatmul.mubr.bf16.vlgmr.msra.gmra.mxu0 %v8556_v34 }
 0x27f   : > { %v3927_v47 = vpop.f32.mrf.mxu1  ;;  %4172 = vmatmul.mubr.bf16.vlgmr.msra.gmra.mxu1 %v8673_v52  ;;  %v3888_v60 = vpop.f32.mrf.mxu0 }
 0x280   : > { %v3928_v48 = vadd.f32 %v3927_v47, %v3886_v45 }
 0x281   : > { %v3929_v63 = vpop.f32.mrf.mxu1  ;;  %v3890_v1 = vpop.f32.mrf.mxu0 }
 0x282   : > { %v3930_v49 = vadd.f32 %v3929_v63, %v3888_v60 }
 0x283   : > { %v3931_v51 = vpop.f32.mrf.mxu1  ;;  %v3891_v56 = vpop.f32.mrf.mxu0 }
 0x285   : > { %v3932_v57 = vpop.f32.mrf.mxu1 }
 0x2bd   : > { %v3968_v59 = vpop.f32.mrf.mxu0 }
 0x2be   : > { %v3969_v61 = vadd.f32 %v3968_v59, %v3928_v48 }
 0x2bf   : > { %v4009_v33 = vpop.f32.mrf.mxu1  ;;  %v3970_v62 = vpop.f32.mrf.mxu0 }
 0x2c0   : > { %v4010_v0 = vadd.f32 %v4009_v33, %v3969_v61  ;;  %v3971_v2 = vadd.f32 %v3970_v62, %v3930_v49 }
 0x2c1   : > { %v4011_v42 = vpop.f32.mrf.mxu1  ;;  %v3972_v3 = vpop.f32.mrf.mxu0 }
 0x2c2   : > { %v4012_v34 = vadd.f32 %v4011_v42, %v3971_v2 }
 0x2c3   : > { %v4013_v4 = vpop.f32.mrf.mxu1  ;;  %v3973_v5 = vpop.f32.mrf.mxu0 }
 0x2c4   : > { %v4205_v52 = vcombine.low %v4010_v0, %v4012_v34 }
 0x2c5   : > { %v4014_v6 = vpop.f32.mrf.mxu1 }
 0x2c6   : > { %v4213_v28 = vrot.slane %v4205_v52, %v9052_v50 }
 0x2fd   : > { %v4050_v7 = vpop.f32.mrf.mxu0 }
 0x2ff   : > { %v4091_v8 = vpop.f32.mrf.mxu1  ;;  %v4052_v9 = vpop.f32.mrf.mxu0 }
 0x300   : > { %v4092_v16 = vadd.f32 %v4091_v8, %v4050_v7 }
 0x301   : > { %v4093_v10 = vpop.f32.mrf.mxu1  ;;  %v4054_v12 = vpop.f32.mrf.mxu0 }
 0x302   : > { %v4094_v21 = vadd.f32 %v4093_v10, %v4052_v9 }
 0x303   : > { %v4095_v13 = vpop.f32.mrf.mxu1  ;;  %v4055_v11 = vpop.f32.mrf.mxu0 }
 0x305   : > { %v4096_v14 = vpop.f32.mrf.mxu1 }
 0x33d   : > { %v4132_v17 = vpop.f32.mrf.mxu0 }
 0x33e   : > { %v4133_v31 = vadd.f32 %v4132_v17, %v4092_v16 }
 0x33f   : > { %v4173_v37 = vpop.f32.mrf.mxu1  ;;  %v4134_v18 = vpop.f32.mrf.mxu0 }
 0x340   : > { %v4135_v15 = vadd.f32 %v4134_v18, %v4094_v21  ;;  %v4174_v22 = vadd.f32 %v4173_v37, %v4133_v31 }
 0x341   : > { %v4175_v19 = vpop.f32.mrf.mxu1  ;;  %v4136_v20 = vpop.f32.mrf.mxu0 }
 0x342   : > { %v4176_v23 = vadd.f32 %v4175_v19, %v4135_v15 }
 0x343   : > { %v4177_v43 = vpop.f32.mrf.mxu1  ;;  %v4137_v24 = vpop.f32.mrf.mxu0 }
 0x344   : > { %v4206_v26 = vcombine.low %v4174_v22, %v4176_v23 }
 0x345   : > { %v4178_v27 = vpop.f32.mrf.mxu1 }
 0x346   : > { %v4220_v29 = vrot.slane %v4206_v26, %v9052_v50 }
 0x348   : > { %v4221_v53 = vcombine.low %v4213_v28, %v4220_v29  ;;  %4231 = sbr.rel (%p7297_p13) target bundleno = 1541 (0x605), region = 76 }
 0x34a   : > { %v4225_v30 = vadd.f32 %v4221_v53, %v392_v32 }
 0x34c   : > { %4227 = vst [vmem:[#allocation2 + $0x8] sm:$0xff] %v4225_v30 }
 0x34d   : > { %v7656_v35 = vld [vmem:[#allocation9 + $0xe4] ss:$16 sps:$4 sm:$0xff]   ;;  %v7658_v36 = vld [vmem:[#allocation9 + $0xe0] ss:$16 sps:$4 sm:$0xff]   ;;  %v9113_v17 = vsub.s32 0, %v8505_v46  ;;  %v9116_v21 = vsub.s32 1, %v8505_v46 }
 0x34e   : > { %6250 = vmatprep.subr.bf16.mxu0 %v7656_v35  ;;  %v7659_v38 = vld [vmem:[#allocation9 + $0x2e4] ss:$16 sps:$4 sm:$0xff]   ;;  %v7661_v39 = vld [vmem:[#allocation9 + $0x2e0] ss:$16 sps:$4 sm:$0xff]   ;;  %v9119_v37 = vsub.s32 2, %v8505_v46  ;;  %v9122_v18 = vsub.s32 3, %v8505_v46 }
 0x34f   : > { %6251 = vmatpush1.bf16.msra.mxu0 %v7658_v36  ;;  %v7662_v40 = vld [vmem:[#allocation9 + $0xc4] ss:$16 sps:$4 sm:$0xff]   ;;  %v7664_v55 = vld [vmem:[#allocation9 + $0xc0] ss:$16 sps:$4 sm:$0xff]   ;;  %6291 = vmatprep.subr.bf16.mxu1 %v7659_v38  ;;  %v9124_v22 = vld [vmem:[#allocation7] sm:$0xff]  ;;  %vm4350_vm0 = vcmask 1041408  }
 0x350   : > { %v7665_v54 = vld [vmem:[#allocation9 + $0x2c4] ss:$16 sps:$4 sm:$0xff]   ;;  %6292 = vmatpush1.bf16.msra.mxu1 %v7661_v39  ;;  %6252 = vmatprep.subr.bf16.mxu0 %v7662_v40  ;;  %v7667_v58 = vld [vmem:[#allocation9 + $0x2c0] ss:$16 sps:$4 sm:$0xff]   ;;  %v4239_v43 = vrot.slane %v9124_v22, %v9113_v17  ;;  %v4243_v24 = vrot.slane %v9124_v22, %v9116_v21  ;;  %v4247_v26 = vrot.slane %v9124_v22, %v9119_v37  ;;  %vm6654_vm3 = vcmask 1024  }
 0x351   : > { %6293 = vmatprep.subr.bf16.mxu1 %v7665_v54  ;;  %v7668_v25 = vld [vmem:[#allocation9 + $0xa4] ss:$16 sps:$4 sm:$0xff]   ;;  %v7670_v41 = vld [vmem:[#allocation9 + $0xa0] ss:$16 sps:$4 sm:$0xff]   ;;  %v4251_v27 = vrot.slane %v9124_v22, %v9122_v18 }
 0x352   : > { %v7671_v44 = vld [vmem:[#allocation9 + $0x2a4] ss:$16 sps:$4 sm:$0xff]   ;;  %v7673_v47 = vld [vmem:[#allocation9 + $0x2a0] ss:$16 sps:$4 sm:$0xff]   ;;  %v4268_v32 = vcombine.low %v4239_v43, %v4243_v24  ;;  %v4266_v43 = vsub.s32 7, %v8505_v46 }
 0x353   : > { %6253 = vmatpush1.bf16.msra.mxu0 %v7664_v55  ;;  %v7674_v45 = vld [vmem:[#allocation9 + $0x84] ss:$16 sps:$4 sm:$0xff]   ;;  %v7676_v60 = vld [vmem:[#allocation9 + $0x80] ss:$16 sps:$4 sm:$0xff]   ;;  %v4269_v53 = vcombine.low %v4247_v26, %v4251_v27 }
 0x354   : > { %6254 = vmatprep.subr.bf16.mxu0 %v7668_v25  ;;  %6294 = vmatpush1.bf16.msra.mxu1 %v7667_v58  ;;  %v7677_v48 = vld [vmem:[#allocation9 + $0x284] ss:$16 sps:$4 sm:$0xff]   ;;  %v7679_v49 = vld [vmem:[#allocation9 + $0x280] ss:$16 sps:$4 sm:$0xff]   ;;  %v4276_v36 = vrot.slane %v4268_v32, %v9052_v50 }
 0x355   : > { %6295 = vmatprep.subr.bf16.mxu1 %v7671_v44  ;;  %v7680_v63 = vld [vmem:[#allocation9 + $0x64] ss:$16 sps:$4 sm:$0xff]   ;;  %v7682_v51 = vld [vmem:[#allocation9 + $0x60] ss:$16 sps:$4 sm:$0xff]   ;;  %v4283_v38 = vrot.slane %v4269_v53, %v9052_v50 }
 0x356   : > { %v7683_v1 = vld [vmem:[#allocation9 + $0x264] ss:$16 sps:$4 sm:$0xff]   ;;  %v7685_v57 = vld [vmem:[#allocation9 + $0x260] ss:$16 sps:$4 sm:$0xff]  }
 0x357   : > { %6255 = vmatpush1.bf16.msra.mxu0 %v7670_v41  ;;  %v7686_v56 = vld [vmem:[#allocation9 + $0x44] ss:$16 sps:$4 sm:$0xff]   ;;  %v7688_v61 = vld [vmem:[#allocation9 + $0x40] ss:$16 sps:$4 sm:$0xff]   ;;  %v4284_v54 = vcombine.low %v4276_v36, %v4283_v38 }
 0x358   : > { %6256 = vmatprep.subr.bf16.mxu0 %v7674_v45  ;;  %6296 = vmatpush1.bf16.msra.mxu1 %v7673_v47  ;;  %v7689_v59 = vld [vmem:[#allocation9 + $0x244] ss:$16 sps:$4 sm:$0xff]   ;;  %v7691_v62 = vld [vmem:[#allocation9 + $0x240] ss:$16 sps:$4 sm:$0xff]  }
 0x359   : > { %6297 = vmatprep.subr.bf16.mxu1 %v7677_v48  ;;  %v7692_v33 = vld [vmem:[#allocation9 + $0x24] ss:$16 sps:$4 sm:$0xff]   ;;  %v7694_v2 = vld [vmem:[#allocation9 + $0x20] ss:$16 sps:$4 sm:$0xff]  }
 0x35a   : > { %v7695_v0 = vld [vmem:[#allocation9 + $0x224] ss:$16 sps:$4 sm:$0xff]   ;;  %v7697_v3 = vld [vmem:[#allocation9 + $0x220] ss:$16 sps:$4 sm:$0xff]  }
 0x35b   : > { %6257 = vmatpush1.bf16.msra.mxu0 %v7676_v60  ;;  %v7698_v42 = vld [vmem:[#allocation9 + $0x4] ss:$16 sps:$4 sm:$0xff]   ;;  %v7700_v4 = vld [vmem:[#allocation9] ss:$16 sps:$4 sm:$0xff]  }
 0x35c   : > { %6258 = vmatprep.subr.bf16.mxu0 %v7680_v63  ;;  %6298 = vmatpush1.bf16.msra.mxu1 %v7679_v49  ;;  %v7701_v34 = vld [vmem:[#allocation9 + $0x204] ss:$16 sps:$4 sm:$0xff]   ;;  %v7703_v52 = vld [vmem:[#allocation9 + $0x200] ss:$16 sps:$4 sm:$0xff]  }
 0x35d   : > { %6299 = vmatprep.subr.bf16.mxu1 %v7683_v1  ;;  %v7704_v5 = vld [vmem:[#allocation9 + $0x1e4] ss:$16 sps:$4 sm:$0xff]   ;;  %v7706_v7 = vld [vmem:[#allocation9 + $0x1e0] ss:$16 sps:$4 sm:$0xff]  }
 0x35e   : > { %v7707_v6 = vld [vmem:[#allocation9 + $0x3e4] ss:$16 sps:$4 sm:$0xff]   ;;  %v7709_v9 = vld [vmem:[#allocation9 + $0x3e0] ss:$16 sps:$4 sm:$0xff]  }
 0x35f   : > { %6259 = vmatpush1.bf16.msra.mxu0 %v7682_v51  ;;  %v7710_v8 = vld [vmem:[#allocation9 + $0x1c4] ss:$16 sps:$4 sm:$0xff]   ;;  %v7712_v12 = vld [vmem:[#allocation9 + $0x1c0] ss:$16 sps:$4 sm:$0xff]  }
 0x360   : > { %6260 = vmatprep.subr.bf16.mxu0 %v7686_v56  ;;  %6300 = vmatpush1.bf16.msra.mxu1 %v7685_v57  ;;  %v7713_v10 = vld [vmem:[#allocation9 + $0x3c4] ss:$16 sps:$4 sm:$0xff]   ;;  %v7715_v11 = vld [vmem:[#allocation9 + $0x3c0] ss:$16 sps:$4 sm:$0xff]  }
 0x361   : > { %6301 = vmatprep.subr.bf16.mxu1 %v7689_v59  ;;  %v7716_v13 = vld [vmem:[#allocation9 + $0x1a4] ss:$16 sps:$4 sm:$0xff]   ;;  %v7718_v16 = vld [vmem:[#allocation9 + $0x1a0] ss:$16 sps:$4 sm:$0xff]  }
 0x362   : > { %v7719_v14 = vld [vmem:[#allocation9 + $0x3a4] ss:$16 sps:$4 sm:$0xff]   ;;  %v7721_v15 = vld [vmem:[#allocation9 + $0x3a0] ss:$16 sps:$4 sm:$0xff]  }
 0x363   : > { %6261 = vmatpush1.bf16.msra.mxu0 %v7688_v61  ;;  %v7722_v31 = vld [vmem:[#allocation9 + $0x184] ss:$16 sps:$4 sm:$0xff]   ;;  %v7724_v19 = vld [vmem:[#allocation9 + $0x180] ss:$16 sps:$4 sm:$0xff]  }
 0x364   : > { %6262 = vmatprep.subr.bf16.mxu0 %v7692_v33  ;;  %6302 = vmatpush1.bf16.msra.mxu1 %v7691_v62  ;;  %v7725_v20 = vld [vmem:[#allocation9 + $0x384] ss:$16 sps:$4 sm:$0xff]   ;;  %v7727_v28 = vld [vmem:[#allocation9 + $0x380] ss:$16 sps:$4 sm:$0xff]  }
 0x365   : > { %6303 = vmatprep.subr.bf16.mxu1 %v7695_v0  ;;  %v7728_v23 = vld [vmem:[#allocation9 + $0x164] ss:$16 sps:$4 sm:$0xff]   ;;  %v7730_v30 = vld [vmem:[#allocation9 + $0x160] ss:$16 sps:$4 sm:$0xff]  }
 0x366   : > { %v7731_v29 = vld [vmem:[#allocation9 + $0x364] ss:$16 sps:$4 sm:$0xff]   ;;  %v7733_v39 = vld [vmem:[#allocation9 + $0x360] ss:$16 sps:$4 sm:$0xff]  }
 0x367   : > { %6263 = vmatpush1.bf16.msra.mxu0 %v7694_v2  ;;  %v7734_v35 = vld [vmem:[#allocation9 + $0x144] ss:$16 sps:$4 sm:$0xff]   ;;  %v7736_v58 = vld [vmem:[#allocation9 + $0x140] ss:$16 sps:$4 sm:$0xff]  }
 0x368   : > { %6264 = vmatprep.subr.bf16.mxu0 %v7698_v42  ;;  %6304 = vmatpush1.bf16.msra.mxu1 %v7697_v3  ;;  %v4232_v40 = vld [vmem:[#allocation2] sm:$0xff]  ;;  %v7739_v44 = vld [vmem:[#allocation9 + $0x340] ss:$16 sps:$4 sm:$0xff]  }
 0x369   : > { %6305 = vmatprep.subr.bf16.mxu1 %v7701_v34  ;;  %v7737_v55 = vld [vmem:[#allocation9 + $0x344] ss:$16 sps:$4 sm:$0xff]   ;;  %v9136_v41 = vadd.f32 %v4284_v54, %v4232_v40  ;;  %v7742_v60 = vld [vmem:[#allocation9 + $0x120] ss:$16 sps:$4 sm:$0xff]   ;;  %v4267_v54 = vrot.slane %v9124_v22, %v4266_v43 }
 0x36a   : > { %v7740_v25 = vld [vmem:[#allocation9 + $0x124] ss:$16 sps:$4 sm:$0xff]   ;;  %v7745_v56 = vld [vmem:[#allocation9 + $0x320] ss:$16 sps:$4 sm:$0xff]  }
 0x36b   : > { %6265 = vmatpush1.bf16.msra.mxu0 %v7700_v4  ;;  %v7743_v45 = vld [vmem:[#allocation9 + $0x324] ss:$16 sps:$4 sm:$0xff]   ;;  %v4308_v47 = vcombine.high %v9136_v41, %v9136_v41  ;;  %v4315_v48 = vrot.slane %v9136_v41, %v9052_v50  ;;  %v7748_v0 = vld [vmem:[#allocation9 + $0x100] ss:$16 sps:$4 sm:$0xff]  }
 0x36c   : > { %6266 = vmatprep.subr.bf16.mxu0 %v7704_v5  ;;  %6306 = vmatpush1.bf16.msra.mxu1 %v7703_v52  ;;  %v7746_v63 = vld [vmem:[#allocation9 + $0x104] ss:$16 sps:$4 sm:$0xff]   ;;  %v7751_v5 = vld [vmem:[#allocation9 + $0x300] ss:$16 sps:$4 sm:$0xff]  }
 0x36d   : > { %6307 = vmatprep.subr.bf16.mxu1 %v7707_v6  ;;  %v4322_v49 = vrot.slane %v4308_v47, %v9052_v50  ;;  %v4323_v1 = vcombine.high %v4315_v48, %v4315_v48  ;;  %v4351_v51 = vsel %vm4350_vm0, %v4315_v48, 0.0  ;;  %v7749_v59 = vld [vmem:[#allocation9 + $0x304] ss:$16 sps:$4 sm:$0xff]  }
 0x36e   : > { %v4352_v57 = vrot.slane %v4351_v51, 4  ;;  %v7754_v4 = vld [vmem:[#allocation9 + $0x4e4] ss:$16 sps:$4 sm:$0xff]  }
 0x36f   : > { %6267 = vmatpush2.bf16.msra.mxu0 %v7706_v7  ;;  %v4324_v61 = vcombine.high %v4322_v49, %v4322_v49  ;;  %v4358_v33 = vsel %vm4350_vm0, %v4323_v1, 0.0  ;;  %v4365_v62 = vsel %vm4350_vm0, %v4322_v49, 0.0 }
 0x370   : > { %6268 = vmatprep.subr.bf16.mxu0 %v7710_v8  ;;  %6308 = vmatpush2.bf16.msra.mxu1 %v7709_v9  ;;  %v4353_v2 = vadd.f32 %v4352_v57, %v4351_v51  ;;  %v4359_v42 = vrot.slane %v4358_v33, 4  ;;  %v4366_v3 = vrot.slane %v4365_v62, 4  ;;  %v7757_v9 = vld [vmem:[#allocation9 + $0x6e4] ss:$16 sps:$4 sm:$0xff]  }
 0x371   : > { %6309 = vmatprep.subr.bf16.mxu1 %v7713_v10  ;;  %v4372_v34 = vsel %vm4350_vm0, %v4324_v61, 0.0 }
 0x372   : > { %v4354_v52 = vrot.slane %v4353_v2, 2  ;;  %v4360_v6 = vadd.f32 %v4359_v42, %v4358_v33  ;;  %v4367_v7 = vadd.f32 %v4366_v3, %v4365_v62  ;;  %v4373_v8 = vrot.slane %v4372_v34, 4 }
 0x373   : > { %6269 = vmatpush2.bf16.msra.mxu0 %v7712_v12 }
 0x374   : > { %6270 = vmatprep.subr.bf16.mxu0 %v7716_v13  ;;  %6310 = vmatpush2.bf16.msra.mxu1 %v7715_v11  ;;  %v4355_v10 = vadd.f32 %v4354_v52, %v4353_v2  ;;  %v4361_v12 = vrot.slane %v4360_v6, 2  ;;  %v4368_v13 = vrot.slane %v4367_v7, 2  ;;  %v4374_v11 = vadd.f32 %v4373_v8, %v4372_v34 }
 0x375   : > { %6311 = vmatprep.subr.bf16.mxu1 %v7719_v14 }
 0x376   : > { %v4356_v14 = vrot.slane %v4355_v10, 1 }
 0x377   : > { %6271 = vmatpush2.bf16.msra.mxu0 %v7718_v16  ;;  %v4362_v16 = vadd.f32 %v4361_v12, %v4360_v6 }
 0x378   : > { %6272 = vmatprep.subr.bf16.mxu0 %v7722_v31  ;;  %6312 = vmatpush2.bf16.msra.mxu1 %v7721_v15  ;;  %v4369_v31 = vadd.f32 %v4368_v13, %v4367_v7  ;;  %v4375_v15 = vrot.slane %v4374_v11, 2  ;;  %v4357_v24 = vadd.f32 %v4356_v14, %v4355_v10 }
 0x379   : > { %6313 = vmatprep.subr.bf16.mxu1 %v7725_v20  ;;  %v4258_v20 = vsub.s32 5, %v8505_v46  ;;  %v4363_v26 = vrot.slane %v4362_v16, 1 }
 0x37a   : > { %v4370_v27 = vrot.slane %v4369_v31, 1 }
 0x37b   : > { %6273 = vmatpush2.bf16.msra.mxu0 %v7724_v19  ;;  %v4254_v19 = vsub.s32 4, %v8505_v46  ;;  %v4259_v36 = vrot.slane %v9124_v22, %v4258_v20 }
 0x37c   : > { %6274 = vmatprep.subr.bf16.mxu0 %v7728_v23  ;;  %6314 = vmatpush2.bf16.msra.mxu1 %v7727_v28  ;;  %v4262_v23 = vsub.s32 6, %v8505_v46  ;;  %v4376_v28 = vadd.f32 %v4375_v15, %v4374_v11  ;;  %v4371_v32 = vadd.f32 %v4370_v27, %v4369_v31 }
 0x37d   : > { %6315 = vmatprep.subr.bf16.mxu1 %v7731_v29  ;;  %v4364_v29 = vadd.f32 %v4363_v26, %v4362_v16 }
 0x37e   : > { %v4377_v53 = vrot.slane %v4376_v28, 1  ;;  %v4263_v38 = vrot.slane %v9124_v22, %v4262_v23 }
 0x37f   : > { %6275 = vmatpush2.bf16.msra.mxu0 %v7730_v30  ;;  %v4408_v30 = vmul.f32 0.5, %v4357_v24  ;;  %v4409_v40 = vmul.f32 0.5, %v4364_v29 }
 0x380   : > { %6276 = vmatprep.subr.bf16.mxu0 %v7734_v35  ;;  %6316 = vmatpush2.bf16.msra.mxu1 %v7733_v39  ;;  %v4255_v35 = vrot.slane %v9124_v22, %v4254_v19  ;;  %v4378_v39 = vadd.f32 %v4377_v53, %v4376_v28  ;;  %v4286_v47 = vcombine.low %v4263_v38, %v4267_v54 }
 0x381   : > { %6317 = vmatprep.subr.bf16.mxu1 %v7737_v55  ;;  %v4410_v55 = vmul.f32 0.5, %v4371_v32 }
 0x382   : > { %v4411_v46 = vmul.f32 0.5, %v4378_v39  ;;  %v4300_v49 = vrot.slane %v4286_v47, %v9052_v50 }
 0x383   : > { %6277 = vmatpush2.bf16.msra.mxu0 %v7736_v58  ;;  %v4424_v58 = vcombine.low %v4408_v30, %v4409_v40 }
 0x384   : > { %6278 = vmatprep.subr.bf16.mxu0 %v7740_v25  ;;  %6318 = vmatpush2.bf16.msra.mxu1 %v7739_v44  ;;  %v4425_v25 = vcombine.low %v4410_v55, %v4411_v46 }
 0x385   : > { %6319 = vmatprep.subr.bf16.mxu1 %v7743_v45  ;;  %v4432_v44 = vrot.slane %v4424_v58, %v9052_v50  ;;  %v4285_v45 = vcombine.low %v4255_v35, %v4259_v36 }
 0x386   : > { %v4439_v48 = vrot.slane %v4425_v25, %v9052_v50 }
 0x387   : > { %6279 = vmatpush2.bf16.msra.mxu0 %v7742_v60 }
 0x388   : > { %6280 = vmatprep.subr.bf16.mxu0 %v7746_v63  ;;  %6320 = vmatpush2.bf16.msra.mxu1 %v7745_v56  ;;  %v4440_v60 = vcombine.low %v4432_v44, %v4439_v48  ;;  %v4293_v63 = vrot.slane %v4285_v45, %v9052_v50 }
 0x389   : > { %6321 = vmatprep.subr.bf16.mxu1 %v7749_v59  ;;  %v4233_v59 = vld [vmem:[#allocation2 + $0x8] sm:$0xff] }
 0x38a   : > { %v9160_v1 = vsub.f32 %v9136_v41, %v4440_v60  ;;  %v4301_v51 = vcombine.low %v4293_v63, %v4300_v49 }
 0x38b   : > { %6281 = vmatpush2.bf16.msra.mxu0 %v7748_v0 }
 0x38c   : > { %6332 = vmatprep.subr.bf16.mxu0 %v7754_v4  ;;  %6322 = vmatpush2.bf16.msra.mxu1 %v7751_v5  ;;  %v4462_v22 = vmul.f32 %v9160_v1, %v9160_v1  ;;  %v9167_v0 = vadd.f32 %v4301_v51, %v4233_v59 }
 0x38d   : > { %6373 = vmatprep.subr.bf16.mxu1 %v7757_v9 }
 0x38e   : > { %v4466_v56 = vcombine.high %v4462_v22, %v4462_v22  ;;  %v4473_v57 = vrot.slane %v4462_v22, %v9052_v50  ;;  %v4325_v34 = vcombine.high %v9167_v0, %v9167_v0  ;;  %v4332_v6 = vrot.slane %v9167_v0, %v9052_v50 }
 0x390   : > { %v4480_v61 = vrot.slane %v4466_v56, %v9052_v50  ;;  %v4481_v33 = vcombine.high %v4473_v57, %v4473_v57  ;;  %v4508_v62 = vsel %vm4350_vm0, %v4473_v57, 0.0  ;;  %v4339_v8 = vrot.slane %v4325_v34, %v9052_v50 }
 0x391   : > { %v4509_v2 = vrot.slane %v4508_v62, 4  ;;  %v4340_v11 = vcombine.high %v4332_v6, %v4332_v6  ;;  %v4379_v16 = vsel %vm4350_vm0, %v4332_v6, 0.0 }
 0x392   : > { %v4482_v42 = vcombine.high %v4480_v61, %v4480_v61  ;;  %v4515_v41 = vsel %vm4350_vm0, %v4481_v33, 0.0  ;;  %v4522_v3 = vsel %vm4350_vm0, %v4480_v61, 0.0  ;;  %v4341_v14 = vcombine.high %v4339_v8, %v4339_v8 }
 0x393   : > { %v4510_v4 = vadd.f32 %v4509_v2, %v4508_v62  ;;  %v4516_v5 = vrot.slane %v4515_v41, 4  ;;  %v4523_v52 = vrot.slane %v4522_v3, 4  ;;  %v4393_v31 = vsel %vm4350_vm0, %v4339_v8, 0.0 }
 0x394   : > { %v4529_v7 = vsel %vm4350_vm0, %v4482_v42, 0.0  ;;  %v4380_v43 = vrot.slane %v4379_v16, 4  ;;  %v4386_v24 = vsel %vm4350_vm0, %v4340_v11, 0.0  ;;  %v4394_v26 = vrot.slane %v4393_v31, 4 }
 0x395   : > { %v4511_v9 = vrot.slane %v4510_v4, 2  ;;  %v4517_v10 = vadd.f32 %v4516_v5, %v4515_v41  ;;  %v4524_v12 = vadd.f32 %v4523_v52, %v4522_v3  ;;  %v4530_v13 = vrot.slane %v4529_v7, 4 }
 0x396   : > { %v4400_v27 = vsel %vm4350_vm0, %v4341_v14, 0.0  ;;  %v4381_v30 = vadd.f32 %v4380_v43, %v4379_v16  ;;  %v4387_v35 = vrot.slane %v4386_v24, 4  ;;  %v4395_v36 = vadd.f32 %v4394_v26, %v4393_v31 }
 0x397   : > { %v4512_v15 = vadd.f32 %v4511_v9, %v4510_v4  ;;  %v4518_v19 = vrot.slane %v4517_v10, 2  ;;  %v4525_v20 = vrot.slane %v4524_v12, 2  ;;  %v4531_v23 = vadd.f32 %v4530_v13, %v4529_v7 }
 0x398   : > { %v4401_v38 = vrot.slane %v4400_v27, 4  ;;  %v4382_v46 = vrot.slane %v4381_v30, 2  ;;  %v4388_v58 = vadd.f32 %v4387_v35, %v4386_v24  ;;  %v4396_v25 = vrot.slane %v4395_v36, 2 }
 0x399   : > { %v4513_v28 = vrot.slane %v4512_v15, 1  ;;  %v4519_v29 = vadd.f32 %v4518_v19, %v4517_v10  ;;  %v4526_v32 = vadd.f32 %v4525_v20, %v4524_v12  ;;  %v4532_v53 = vrot.slane %v4531_v23, 2 }
 0x39a   : > { %v4402_v44 = vadd.f32 %v4401_v38, %v4400_v27  ;;  %v4383_v63 = vadd.f32 %v4382_v46, %v4381_v30  ;;  %v4389_v49 = vrot.slane %v4388_v58, 2  ;;  %v4397_v22 = vadd.f32 %v4396_v25, %v4395_v36 }
 0x39b   : > { %v4514_v39 = vadd.f32 %v4513_v28, %v4512_v15  ;;  %v4520_v40 = vrot.slane %v4519_v29, 1  ;;  %v4527_v55 = vrot.slane %v4526_v32, 1  ;;  %v4533_v54 = vadd.f32 %v4532_v53, %v4531_v23 }
 0x39c   : > { %v4403_v51 = vrot.slane %v4402_v44, 2  ;;  %v4384_v33 = vrot.slane %v4383_v63, 1  ;;  %v4390_v62 = vadd.f32 %v4389_v49, %v4388_v58  ;;  %v4398_v2 = vrot.slane %v4397_v22, 1 }
 0x39d   : > { %v4521_v45 = vadd.f32 %v4520_v40, %v4519_v29  ;;  %v4528_v47 = vadd.f32 %v4527_v55, %v4526_v32  ;;  %v4534_v48 = vrot.slane %v4533_v54, 1  ;;  %v4564_v60 = vmul.f32 0.5, %v4514_v39 }
 0x39e   : > { %v4404_v42 = vadd.f32 %v4403_v51, %v4402_v44  ;;  %v4385_v4 = vadd.f32 %v4384_v33, %v4383_v63  ;;  %v4391_v5 = vrot.slane %v4390_v62, 1  ;;  %v4399_v52 = vadd.f32 %v4398_v2, %v4397_v22 }
 0x39f   : > { %v4535_v56 = vadd.f32 %v4534_v48, %v4533_v54  ;;  %v4565_v57 = vmul.f32 0.5, %v4521_v45  ;;  %v4566_v59 = vmul.f32 0.5, %v4528_v47  ;;  %v4572_v61 = vadd.f32 1e-05, %v4564_v60 }
 0x3a0   : > { %v4405_v6 = vrot.slane %v4404_v42, 1  ;;  %v4392_v8 = vadd.f32 %v4391_v5, %v4390_v62  ;;  %v4412_v10 = vmul.f32 0.5, %v4385_v4  ;;  %v4414_v12 = vmul.f32 0.5, %v4399_v52 }
 0x3a1   : > { %v4567_v41 = vmul.f32 0.5, %v4535_v56  ;;  %v4573_v3 = vadd.f32 1e-05, %v4565_v57  ;;  %v4574_v34 = vadd.f32 1e-05, %v4566_v59  ;;  %8040 = vrsqrt.f32 %v4572_v61 }
 0x3a2   : > { %v4406_v9 = vadd.f32 %v4405_v6, %v4404_v42  ;;  %v4413_v13 = vmul.f32 0.5, %v4392_v8 }
 0x3a3   : > { %v4575_v7 = vadd.f32 1e-05, %v4567_v41  ;;  %8042 = vrsqrt.f32 %v4573_v3 }
 0x3a4   : > { %8044 = vrsqrt.f32 %v4574_v34  ;;  %v4415_v11 = vmul.f32 0.5, %v4406_v9  ;;  %v4441_v14 = vcombine.low %v4412_v10, %v4413_v13 }
 0x3a5   : > { %8046 = vrsqrt.f32 %v4575_v7 }
 0x3a6   : > { %v4442_v16 = vcombine.low %v4414_v12, %v4415_v11  ;;  %v4449_v31 = vrot.slane %v4441_v14, %v9052_v50  ;;  %v7752_v12 = vld [vmem:[#allocation9 + $0x4e0] ss:$16 sps:$4 sm:$0xff]  }
 0x3a8   : > { %v4456_v15 = vrot.slane %v4442_v16, %v9052_v50  ;;  %v7760_v16 = vld [vmem:[#allocation9 + $0x4c4] ss:$16 sps:$4 sm:$0xff]  }
 0x3aa   : > { %v4457_v19 = vcombine.low %v4449_v31, %v4456_v15 }
 0x3ac   : > { %v9184_v23 = vsub.f32 %v9167_v0, %v4457_v19 }
 0x3ae   : > { %v8041_v20 = vpop.eup %8040  ;;  %v4463_v24 = vmul.f32 %v9184_v23, %v9184_v23 }
 0x3b0   : > { %v8043_v43 = vpop.eup %8042  ;;  %v4483_v29 = vcombine.high %v4463_v24, %v4463_v24  ;;  %v4490_v32 = vrot.slane %v4463_v24, %v9052_v50 }
 0x3b1   : > { %v8045_v26 = vpop.eup %8044  ;;  %v4596_v27 = vcombine.low %v8041_v20, %v8043_v43  ;;  %v7755_v43 = vld [vmem:[#allocation9 + $0x6e0] ss:$16 sps:$4 sm:$0xff]  }
 0x3b2   : > { %v8047_v28 = vpop.eup %8046  ;;  %v4497_v35 = vrot.slane %v4483_v29, %v9052_v50  ;;  %v4498_v36 = vcombine.high %v4490_v32, %v4490_v32  ;;  %v4536_v38 = vsel %vm4350_vm0, %v4490_v32, 0.0  ;;  %v7758_v29 = vld [vmem:[#allocation9 + $0x4c0] ss:$16 sps:$4 sm:$0xff]  }
 0x3b3   : > { %v4597_v53 = vcombine.low %v8045_v26, %v8047_v28  ;;  %v4604_v30 = vrot.slane %v4596_v27, %v9052_v50  ;;  %v4537_v39 = vrot.slane %v4536_v38, 4  ;;  %v7763_v26 = vld [vmem:[#allocation9 + $0x6c4] ss:$16 sps:$4 sm:$0xff]  }
 0x3b4   : > { %v4499_v40 = vcombine.high %v4497_v35, %v4497_v35  ;;  %v4543_v55 = vsel %vm4350_vm0, %v4498_v36, 0.0  ;;  %v4550_v54 = vsel %vm4350_vm0, %v4497_v35, 0.0  ;;  %v7761_v35 = vld [vmem:[#allocation9 + $0x6c0] ss:$16 sps:$4 sm:$0xff]   ;;  %v7769_v36 = vld [vmem:[#allocation9 + $0x6a4] ss:$16 sps:$4 sm:$0xff]  }
 0x3b5   : > { %v4611_v0 = vrot.slane %v4597_v53, %v9052_v50  ;;  %v4538_v58 = vadd.f32 %v4537_v39, %v4536_v38  ;;  %v4544_v25 = vrot.slane %v4543_v55, 4  ;;  %v4551_v44 = vrot.slane %v4550_v54, 4  ;;  %v7766_v53 = vld [vmem:[#allocation9 + $0x4a4] ss:$16 sps:$4 sm:$0xff]  }
 0x3b6   : > { %v4557_v45 = vsel %vm4350_vm0, %v4499_v40, 0.0  ;;  %v7772_v39 = vld [vmem:[#allocation9 + $0x484] ss:$16 sps:$4 sm:$0xff]   ;;  %v7767_v40 = vld [vmem:[#allocation9 + $0x6a0] ss:$16 sps:$4 sm:$0xff]  }
 0x3b7   : > { %v4612_v46 = vcombine.low %v4604_v30, %v4611_v0  ;;  %v4539_v48 = vrot.slane %v4538_v58, 2  ;;  %v4545_v60 = vadd.f32 %v4544_v25, %v4543_v55  ;;  %v4552_v63 = vadd.f32 %v4551_v44, %v4550_v54  ;;  %v7764_v0 = vld [vmem:[#allocation9 + $0x4a0] ss:$16 sps:$4 sm:$0xff]   ;;  %v7775_v55 = vld [vmem:[#allocation9 + $0x684] ss:$16 sps:$4 sm:$0xff]  }
 0x3b8   : > { %v4558_v49 = vrot.slane %v4557_v45, 4  ;;  %v7770_v54 = vld [vmem:[#allocation9 + $0x480] ss:$16 sps:$4 sm:$0xff]   ;;  %v7781_v25 = vld [vmem:[#allocation9 + $0x664] ss:$16 sps:$4 sm:$0xff]  }
 0x3b9   : > { %v4632_v47 = vmul.f32 %v4612_v46, %v9160_v1  ;;  %v4540_v51 = vadd.f32 %v4539_v48, %v4538_v58  ;;  %v4546_v56 = vrot.slane %v4545_v60, 2  ;;  %v4553_v57 = vrot.slane %v4552_v63, 2  ;;  %v7778_v46 = vld [vmem:[#allocation9 + $0x464] ss:$16 sps:$4 sm:$0xff]   ;;  %v7773_v58 = vld [vmem:[#allocation9 + $0x680] ss:$16 sps:$4 sm:$0xff]  }
 0x3ba   : > { %v4559_v59 = vadd.f32 %v4558_v49, %v4557_v45  ;;  %v7776_v45 = vld [vmem:[#allocation9 + $0x460] ss:$16 sps:$4 sm:$0xff]  }
 0x3bb   : > { %vm4634_vm1 = vcmp.ge.f32.partialorder %v4632_v47, 0.0  ;;  %v4636_v22 = vmul.f32 0.2, %v4632_v47  ;;  %v4541_v33 = vrot.slane %v4540_v51, 1  ;;  %v4547_v62 = vadd.f32 %v4546_v56, %v4545_v60  ;;  %v7779_v60 = vld [vmem:[#allocation9 + $0x660] ss:$16 sps:$4 sm:$0xff]  }
 0x3bc   : > { %v4554_v41 = vadd.f32 %v4553_v57, %v4552_v63  ;;  %v4560_v3 = vrot.slane %v4559_v59, 2  ;;  %v7787_v63 = vld [vmem:[#allocation9 + $0x644] ss:$16 sps:$4 sm:$0xff]  }
 0x3bd   : > { %v4638_v61 = vsel %vm4634_vm1, %v4632_v47, %v4636_v22  ;;  %v4542_v34 = vadd.f32 %v4541_v33, %v4540_v51  ;;  %v4548_v1 = vrot.slane %v4547_v62, 1  ;;  %v7784_v47 = vld [vmem:[#allocation9 + $0x444] ss:$16 sps:$4 sm:$0xff]   ;;  %v7782_v51 = vld [vmem:[#allocation9 + $0x440] ss:$16 sps:$4 sm:$0xff]  }
 0x3be   : > { %v4649_v2 = vrot.slane %v4638_v61, %v9052_v50  ;;  %v4642_v42 = vcombine.high %v4638_v61, %v4638_v61  ;;  %v4555_v52 = vrot.slane %v4554_v41, 1  ;;  %v4561_v8 = vadd.f32 %v4560_v3, %v4559_v59  ;;  %v7790_v56 = vld [vmem:[#allocation9 + $0x424] ss:$16 sps:$4 sm:$0xff]   ;;  %v7785_v59 = vld [vmem:[#allocation9 + $0x640] ss:$16 sps:$4 sm:$0xff]  }
 0x3bf   : > { %v4549_v7 = vadd.f32 %v4548_v1, %v4547_v62  ;;  %v4568_v9 = vmul.f32 0.5, %v4542_v34  ;;  %v7793_v61 = vld [vmem:[#allocation9 + $0x624] ss:$16 sps:$4 sm:$0xff]   ;;  %v7791_v3 = vld [vmem:[#allocation9 + $0x620] ss:$16 sps:$4 sm:$0xff]  }
 0x3c0   : > { %v4657_v4 = vcombine.high %v4649_v2, %v4649_v2  ;;  %v4656_v5 = vrot.slane %v4642_v42, %v9052_v50  ;;  %v9199_v6 = vpack.c.bf16 %v4649_v2, %v4649_v2  ;;  %v4556_v11 = vadd.f32 %v4555_v52, %v4554_v41  ;;  %v7788_v2 = vld [vmem:[#allocation9 + $0x420] ss:$16 sps:$4 sm:$0xff]   ;;  %v7796_v42 = vld [vmem:[#allocation9 + $0x404] ss:$16 sps:$4 sm:$0xff]  }
 0x3c1   : > { %v4562_v31 = vrot.slane %v4561_v8, 1  ;;  %v4569_v15 = vmul.f32 0.5, %v4549_v7  ;;  %v4576_v19 = vadd.f32 1e-05, %v4568_v9  ;;  %v7799_v34 = vld [vmem:[#allocation9 + $0x604] ss:$16 sps:$4 sm:$0xff]  }
 0x3c2   : > { %v9201_v10 = vpack.c.bf16 %v4657_v4, %v4657_v4  ;;  %v4658_v13 = vcombine.high %v4656_v5, %v4656_v5  ;;  %v9203_v14 = vpack.c.bf16 %v4656_v5, %v4656_v5  ;;  %v4570_v24 = vmul.f32 0.5, %v4556_v11  ;;  %v7794_v4 = vld [vmem:[#allocation9 + $0x400] ss:$16 sps:$4 sm:$0xff]   ;;  %v7802_v5 = vld [vmem:[#allocation9 + $0x5e4] ss:$16 sps:$4 sm:$0xff]  }
 0x3c3   : > { %v4563_v27 = vadd.f32 %v4562_v31, %v4561_v8  ;;  %v4577_v28 = vadd.f32 1e-05, %v4569_v15  ;;  %8048 = vrsqrt.f32 %v4576_v19  ;;  %v7797_v7 = vld [vmem:[#allocation9 + $0x600] ss:$16 sps:$4 sm:$0xff]   ;;  %v7805_v8 = vld [vmem:[#allocation9 + $0x7e4] ss:$16 sps:$4 sm:$0xff]  }
 0x3c4   : > { %6282 = vmatprep.mubr.bf16.mxu0 %v9201_v10  ;;  %v9206_v20 = vpack.c.bf16 %v4658_v13, %v4658_v13  ;;  %v4578_v32 = vadd.f32 1e-05, %v4570_v24  ;;  %v7808_v13 = vld [vmem:[#allocation9 + $0x5c4] ss:$16 sps:$4 sm:$0xff]  }
 0x3c5   : > { %6283 = vmatmul.mubr.bf16.vlgmr.msra.gmra.mxu0 %v9199_v6  ;;  %v4571_v30 = vmul.f32 0.5, %v4563_v27  ;;  %8050 = vrsqrt.f32 %v4577_v28  ;;  %v7811_v19 = vld [vmem:[#allocation9 + $0x7c4] ss:$16 sps:$4 sm:$0xff]   ;;  %v7809_v27 = vld [vmem:[#allocation9 + $0x7c0] ss:$16 sps:$4 sm:$0xff]  }
 0x3c6   : > { %6333 = vmatpush1.bf16.msra.mxu0 %v7752_v12  ;;  %6323 = vmatprep.mubr.bf16.mxu1 %v9206_v20  ;;  %8052 = vrsqrt.f32 %v4578_v32  ;;  %v7800_v12 = vld [vmem:[#allocation9 + $0x5e0] ss:$16 sps:$4 sm:$0xff]   ;;  %v7817_v32 = vld [vmem:[#allocation9 + $0x7a4] ss:$16 sps:$4 sm:$0xff]  }
 0x3c7   : > { %6324 = vmatmul.mubr.bf16.vlgmr.msra.gmra.mxu1 %v9203_v14  ;;  %6334 = vmatprep.subr.bf16.mxu0 %v7760_v16  ;;  %v4579_v38 = vadd.f32 1e-05, %v4571_v30  ;;  %v7803_v16 = vld [vmem:[#allocation9 + $0x7e0] ss:$16 sps:$4 sm:$0xff]  }
 0x3c8   : > { %6374 = vmatpush1.bf16.msra.mxu1 %v7755_v43 }
 0x3c9   : > { %6375 = vmatprep.subr.bf16.mxu1 %v7763_v26  ;;  %8054 = vrsqrt.f32 %v4579_v38  ;;  %v7814_v26 = vld [vmem:[#allocation9 + $0x5a4] ss:$16 sps:$4 sm:$0xff]  }
 0x3ca   : > { %6335 = vmatpush1.bf16.msra.mxu0 %v7758_v29  ;;  %v7823_v38 = vld [vmem:[#allocation9 + $0x784] ss:$16 sps:$4 sm:$0xff]  }
 0x3cb   : > { %6336 = vmatprep.subr.bf16.mxu0 %v7766_v53  ;;  %v7812_v53 = vld [vmem:[#allocation9 + $0x5a0] ss:$16 sps:$4 sm:$0xff]  }
 0x3cc   : > { %6376 = vmatpush1.bf16.msra.mxu1 %v7761_v35  ;;  %v7820_v35 = vld [vmem:[#allocation9 + $0x584] ss:$16 sps:$4 sm:$0xff]  }
 0x3cd   : > { %6377 = vmatprep.subr.bf16.mxu1 %v7769_v36  ;;  %v7815_v36 = vld [vmem:[#allocation9 + $0x7a0] ss:$16 sps:$4 sm:$0xff]  }
 0x3ce   : > { %6337 = vmatpush1.bf16.msra.mxu0 %v7764_v0  ;;  %v7818_v0 = vld [vmem:[#allocation9 + $0x580] ss:$16 sps:$4 sm:$0xff]  }
 0x3cf   : > { %6338 = vmatprep.subr.bf16.mxu0 %v7772_v39  ;;  %v7826_v39 = vld [vmem:[#allocation9 + $0x564] ss:$16 sps:$4 sm:$0xff]  }
 0x3d0   : > { %6378 = vmatpush1.bf16.msra.mxu1 %v7767_v40  ;;  %v8049_v44 = vpop.eup %8048  ;;  %v7821_v40 = vld [vmem:[#allocation9 + $0x780] ss:$16 sps:$4 sm:$0xff]  }
 0x3d1   : > { %6379 = vmatprep.subr.bf16.mxu1 %v7775_v55  ;;  %v7829_v55 = vld [vmem:[#allocation9 + $0x764] ss:$16 sps:$4 sm:$0xff]  }
 0x3d2   : > { %6339 = vmatpush1.bf16.msra.mxu0 %v7770_v54  ;;  %v8051_v48 = vpop.eup %8050  ;;  %v7824_v54 = vld [vmem:[#allocation9 + $0x560] ss:$16 sps:$4 sm:$0xff]  }
 0x3d3   : > { %6340 = vmatprep.subr.bf16.mxu0 %v7778_v46  ;;  %v4613_v49 = vcombine.low %v8049_v44, %v8051_v48  ;;  %v8053_v22 = vpop.eup %8052  ;;  %v7832_v46 = vld [vmem:[#allocation9 + $0x544] ss:$16 sps:$4 sm:$0xff]   ;;  %v7830_v44 = vld [vmem:[#allocation9 + $0x540] ss:$16 sps:$4 sm:$0xff]  }
 0x3d4   : > { %6380 = vmatpush1.bf16.msra.mxu1 %v7773_v58  ;;  %v7827_v58 = vld [vmem:[#allocation9 + $0x760] ss:$16 sps:$4 sm:$0xff]   ;;  %v7841_v48 = vld [vmem:[#allocation9 + $0x724] ss:$16 sps:$4 sm:$0xff]  }
 0x3d5   : > { %6381 = vmatprep.subr.bf16.mxu1 %v7781_v25  ;;  %v4621_v62 = vrot.slane %v4613_v49, %v9052_v50  ;;  %v7835_v25 = vld [vmem:[#allocation9 + $0x744] ss:$16 sps:$4 sm:$0xff]   ;;  %v7839_v49 = vld [vmem:[#allocation9 + $0x720] ss:$16 sps:$4 sm:$0xff]  }
 0x3d6   : > { %6341 = vmatpush1.bf16.msra.mxu0 %v7776_v45  ;;  %v8055_v57 = vpop.eup %8054  ;;  %v7838_v45 = vld [vmem:[#allocation9 + $0x524] ss:$16 sps:$4 sm:$0xff]  }
 0x3d7   : > { %6342 = vmatprep.subr.bf16.mxu0 %v7784_v47  ;;  %v4614_v33 = vcombine.low %v8053_v22, %v8055_v57  ;;  %v7833_v47 = vld [vmem:[#allocation9 + $0x740] ss:$16 sps:$4 sm:$0xff]   ;;  %v7847_v22 = vld [vmem:[#allocation9 + $0x704] ss:$16 sps:$4 sm:$0xff]  }
 0x3d8   : > { %6382 = vmatpush1.bf16.msra.mxu1 %v7779_v60  ;;  %v7836_v60 = vld [vmem:[#allocation9 + $0x520] ss:$16 sps:$4 sm:$0xff]  }
 0x3d9   : > { %6383 = vmatprep.subr.bf16.mxu1 %v7787_v63  ;;  %v4628_v41 = vrot.slane %v4614_v33, %v9052_v50  ;;  %v7844_v63 = vld [vmem:[#allocation9 + $0x504] ss:$16 sps:$4 sm:$0xff]   ;;  %v7845_v57 = vld [vmem:[#allocation9 + $0x700] ss:$16 sps:$4 sm:$0xff]   ;;  %v7848_v33 = vld [vmem:[#allocation9 + $0xe8] ss:$16 sps:$4 sm:$0xff]  }
 0x3da   : > { %6343 = vmatpush1.bf16.msra.mxu0 %v7782_v51  ;;  %v7842_v51 = vld [vmem:[#allocation9 + $0x500] ss:$16 sps:$4 sm:$0xff]  }
 0x3db   : > { %6344 = vmatprep.subr.bf16.mxu0 %v7790_v56  ;;  %v4629_v1 = vcombine.low %v4621_v62, %v4628_v41  ;;  %v7850_v56 = vld [vmem:[#allocation9 + $0xec] ss:$16 sps:$4 sm:$0xff]  }
 0x3dc   : > { %6384 = vmatpush1.bf16.msra.mxu1 %v7785_v59  ;;  %v7859_v41 = vld [vmem:[#allocation9 + $0x2cc] ss:$16 sps:$4 sm:$0xff]  }
 0x3dd   : > { %6385 = vmatprep.subr.bf16.mxu1 %v7793_v61  ;;  %v4633_v52 = vmul.f32 %v4629_v1, %v9184_v23  ;;  %v7806_v23 = vld [vmem:[#allocation9 + $0x5c0] ss:$16 sps:$4 sm:$0xff]   ;;  %v7853_v61 = vld [vmem:[#allocation9 + $0x2ec] ss:$16 sps:$4 sm:$0xff]   ;;  %v7857_v1 = vld [vmem:[#allocation9 + $0x2c8] ss:$16 sps:$4 sm:$0xff]  }
 0x3de   : > { %6345 = vmatpush1.bf16.msra.mxu0 %v7788_v2  ;;  %v7856_v2 = vld [vmem:[#allocation9 + $0xcc] ss:$16 sps:$4 sm:$0xff]  }
 0x3df   : > { %6346 = vmatprep.subr.bf16.mxu0 %v7796_v42  ;;  %vm4635_vm2 = vcmp.ge.f32.partialorder %v4633_v52, 0.0  ;;  %v4637_v9 = vmul.f32 0.2, %v4633_v52  ;;  %v7851_v42 = vld [vmem:[#allocation9 + $0x2e8] ss:$16 sps:$4 sm:$0xff]  }
 0x3e0   : > { %6386 = vmatpush1.bf16.msra.mxu1 %v7791_v3  ;;  %v7854_v3 = vld [vmem:[#allocation9 + $0xc8] ss:$16 sps:$4 sm:$0xff]  }
 0x3e1   : > { %6387 = vmatprep.subr.bf16.mxu1 %v7799_v34  ;;  %v4639_v11 = vsel %vm4635_vm2, %v4633_v52, %v4637_v9  ;;  %v7862_v34 = vld [vmem:[#allocation9 + $0xac] ss:$16 sps:$4 sm:$0xff]  }
 0x3e2   : > { %6347 = vmatpush1.bf16.msra.mxu0 %v7794_v4  ;;  %v9215_v31 = vrot.slane %v4639_v11, %v9052_v50  ;;  %v4659_v15 = vcombine.high %v4639_v11, %v4639_v11  ;;  %v7865_v4 = vld [vmem:[#allocation9 + $0x2ac] ss:$16 sps:$4 sm:$0xff]  }
 0x3e3   : > { %6348 = vmatprep.subr.bf16.mxu0 %v7802_v5  ;;  %v7860_v5 = vld [vmem:[#allocation9 + $0xa8] ss:$16 sps:$4 sm:$0xff]   ;;  %v7868_v52 = vld [vmem:[#allocation9 + $0x8c] ss:$16 sps:$4 sm:$0xff]  }
 0x3e4   : > { %6388 = vmatpush1.bf16.msra.mxu1 %v7797_v7  ;;  %v4674_v43 = vcombine.high %v9215_v31, %v9215_v31  ;;  %v9220_v24 = vrot.slane %v4659_v15, %v9052_v50  ;;  %v9232_v59 = vpack.c.bf16 %v9215_v31, %v9215_v31  ;;  %v7863_v7 = vld [vmem:[#allocation9 + $0x2a8] ss:$16 sps:$4 sm:$0xff]   ;;  %v7874_v9 = vld [vmem:[#allocation9 + $0x6c] ss:$16 sps:$4 sm:$0xff]  }
 0x3e5   : > { %6389 = vmatprep.subr.bf16.mxu1 %v7805_v8  ;;  %v7871_v8 = vld [vmem:[#allocation9 + $0x28c] ss:$16 sps:$4 sm:$0xff]   ;;  %v7878_v15 = vld [vmem:[#allocation9 + $0x48] ss:$16 sps:$4 sm:$0xff]  }
 0x3e6   : > { %6349 = vmatpush2.bf16.msra.mxu0 %v7800_v12  ;;  %v9222_v28 = vpack.c.bf16 %v4674_v43, %v4674_v43  ;;  %v4675_v29 = vcombine.high %v9220_v24, %v9220_v24  ;;  %v9236_v62 = vpack.c.bf16 %v9220_v24, %v9220_v24  ;;  %v7869_v12 = vld [vmem:[#allocation9 + $0x288] ss:$16 sps:$4 sm:$0xff]   ;;  %v7880_v11 = vld [vmem:[#allocation9 + $0x4c] ss:$16 sps:$4 sm:$0xff]  }
 0x3e7   : > { %6350 = vmatprep.subr.bf16.mxu0 %v7808_v13  ;;  %v7877_v13 = vld [vmem:[#allocation9 + $0x26c] ss:$16 sps:$4 sm:$0xff]   ;;  %v7884_v24 = vld [vmem:[#allocation9 + $0x28] ss:$16 sps:$4 sm:$0xff]  }
 0x3e8   : > { %6390 = vmatpush2.bf16.msra.mxu1 %v7803_v16  ;;  %6364 = vmatprep.mubr.bf16.mxu0 %v9222_v28  ;;  %v9227_v30 = vpack.c.bf16 %v4675_v29, %v4675_v29  ;;  %v7875_v16 = vld [vmem:[#allocation9 + $0x268] ss:$16 sps:$4 sm:$0xff]   ;;  %v7883_v31 = vld [vmem:[#allocation9 + $0x24c] ss:$16 sps:$4 sm:$0xff]  }
 0x3e9   : > { %6391 = vmatprep.subr.bf16.mxu1 %v7811_v19  ;;  %v7886_v19 = vld [vmem:[#allocation9 + $0x2c] ss:$16 sps:$4 sm:$0xff]  }
 0x3ea   : > { %6351 = vmatpush2.bf16.msra.mxu0 %v7806_v23  ;;  %6405 = vmatprep.mubr.bf16.mxu1 %v9227_v30  ;;  %v7881_v23 = vld [vmem:[#allocation9 + $0x248] ss:$16 sps:$4 sm:$0xff]   ;;  %v7889_v43 = vld [vmem:[#allocation9 + $0x22c] ss:$16 sps:$4 sm:$0xff]  }
 0x3eb   : > { %6352 = vmatprep.subr.bf16.mxu0 %v7814_v26  ;;  %v7892_v26 = vld [vmem:[#allocation9 + $0xc] ss:$16 sps:$4 sm:$0xff]  }
 0x3ec   : > { %6392 = vmatpush2.bf16.msra.mxu1 %v7809_v27  ;;  %v7887_v27 = vld [vmem:[#allocation9 + $0x228] ss:$16 sps:$4 sm:$0xff]   ;;  %v7895_v29 = vld [vmem:[#allocation9 + $0x20c] ss:$16 sps:$4 sm:$0xff]  }
 0x3ed   : > { %6393 = vmatprep.subr.bf16.mxu1 %v7817_v32  ;;  %v7890_v32 = vld [vmem:[#allocation9 + $0x8] ss:$16 sps:$4 sm:$0xff]  }
 0x3ee   : > { %6353 = vmatpush2.bf16.msra.mxu0 %v7812_v53  ;;  %v7898_v53 = vld [vmem:[#allocation9 + $0x1ec] ss:$16 sps:$4 sm:$0xff]  }
 0x3ef   : > { %6354 = vmatprep.subr.bf16.mxu0 %v7820_v35  ;;  %v7893_v35 = vld [vmem:[#allocation9 + $0x208] ss:$16 sps:$4 sm:$0xff]  }
 0x3f0   : > { %6394 = vmatpush2.bf16.msra.mxu1 %v7815_v36  ;;  %v7901_v36 = vld [vmem:[#allocation9 + $0x3ec] ss:$16 sps:$4 sm:$0xff]  }
 0x3f1   : > { %6395 = vmatprep.subr.bf16.mxu1 %v7823_v38  ;;  %v7896_v38 = vld [vmem:[#allocation9 + $0x1e8] ss:$16 sps:$4 sm:$0xff]  }
 0x3f2   : > { %6355 = vmatpush2.bf16.msra.mxu0 %v7818_v0  ;;  %v7904_v0 = vld [vmem:[#allocation9 + $0x1cc] ss:$16 sps:$4 sm:$0xff]  }
 0x3f3   : > { %6356 = vmatprep.subr.bf16.mxu0 %v7826_v39  ;;  %v7899_v39 = vld [vmem:[#allocation9 + $0x3e8] ss:$16 sps:$4 sm:$0xff]  }
 0x3f4   : > { %6396 = vmatpush2.bf16.msra.mxu1 %v7821_v40  ;;  %v7907_v40 = vld [vmem:[#allocation9 + $0x3cc] ss:$16 sps:$4 sm:$0xff]  }
 0x3f5   : > { %6397 = vmatprep.subr.bf16.mxu1 %v7829_v55  ;;  %v7902_v55 = vld [vmem:[#allocation9 + $0x1c8] ss:$16 sps:$4 sm:$0xff]  }
 0x3f6   : > { %6357 = vmatpush2.bf16.msra.mxu0 %v7824_v54  ;;  %v7910_v54 = vld [vmem:[#allocation9 + $0x1ac] ss:$16 sps:$4 sm:$0xff]  }
 0x3f7   : > { %6358 = vmatprep.subr.bf16.mxu0 %v7832_v46  ;;  %v7905_v46 = vld [vmem:[#allocation9 + $0x3c8] ss:$16 sps:$4 sm:$0xff]  }
 0x3f8   : > { %6398 = vmatpush2.bf16.msra.mxu1 %v7827_v58  ;;  %v7913_v58 = vld [vmem:[#allocation9 + $0x3ac] ss:$16 sps:$4 sm:$0xff]  }
 0x3f9   : > { %6399 = vmatprep.subr.bf16.mxu1 %v7835_v25  ;;  %v7908_v25 = vld [vmem:[#allocation9 + $0x1a8] ss:$16 sps:$4 sm:$0xff]  }
 0x3fa   : > { %6359 = vmatpush2.bf16.msra.mxu0 %v7830_v44  ;;  %v7916_v44 = vld [vmem:[#allocation9 + $0x18c] ss:$16 sps:$4 sm:$0xff]  }
 0x3fb   : > { %6360 = vmatprep.subr.bf16.mxu0 %v7838_v45  ;;  %v7911_v45 = vld [vmem:[#allocation9 + $0x3a8] ss:$16 sps:$4 sm:$0xff]  }
 0x3fc   : > { %6400 = vmatpush2.bf16.msra.mxu1 %v7833_v47  ;;  %v7919_v47 = vld [vmem:[#allocation9 + $0x38c] ss:$16 sps:$4 sm:$0xff]  }
 0x3fd   : > { %6401 = vmatprep.subr.bf16.mxu1 %v7841_v48  ;;  %v7914_v48 = vld [vmem:[#allocation9 + $0x188] ss:$16 sps:$4 sm:$0xff]  }
 0x3fe   : > { %6361 = vmatpush2.bf16.msra.mxu0 %v7836_v60  ;;  %v7922_v60 = vld [vmem:[#allocation9 + $0x16c] ss:$16 sps:$4 sm:$0xff]  }
 0x3ff   : > { %6362 = vmatprep.subr.bf16.mxu0 %v7844_v63  ;;  %v7917_v63 = vld [vmem:[#allocation9 + $0x388] ss:$16 sps:$4 sm:$0xff]  }
 0x400   : > { %6402 = vmatpush2.bf16.msra.mxu1 %v7839_v49  ;;  %v7925_v49 = vld [vmem:[#allocation9 + $0x36c] ss:$16 sps:$4 sm:$0xff]  }
 0x401   : > { %6403 = vmatprep.subr.bf16.mxu1 %v7847_v22  ;;  %v7920_v22 = vld [vmem:[#allocation9 + $0x168] ss:$16 sps:$4 sm:$0xff]  }
 0x402   : > { %6363 = vmatpush2.bf16.msra.mxu0 %v7842_v51  ;;  %v7928_v51 = vld [vmem:[#allocation9 + $0x14c] ss:$16 sps:$4 sm:$0xff]  }
 0x403   : > { %6414 = vmatprep.subr.bf16.mxu0 %v7850_v56  ;;  %v7923_v56 = vld [vmem:[#allocation9 + $0x368] ss:$16 sps:$4 sm:$0xff]  }
 0x404   : > { %6404 = vmatpush2.bf16.msra.mxu1 %v7845_v57  ;;  %v7931_v57 = vld [vmem:[#allocation9 + $0x34c] ss:$16 sps:$4 sm:$0xff]  }
 0x405   : > { %6365 = vmatmul.mubr.bf16.vlgmr.msra.gmra.mxu0 %v9232_v59  ;;  %6455 = vmatprep.subr.bf16.mxu1 %v7853_v61  ;;  %v7926_v61 = vld [vmem:[#allocation9 + $0x148] ss:$16 sps:$4 sm:$0xff]  }
 0x406   : > { %6415 = vmatpush1.bf16.msra.mxu0 %v7848_v33  ;;  %6446 = vmatprep.mubr.bf16.mxu0 %v9201_v10  ;;  %v7866_v10 = vld [vmem:[#allocation9 + $0x88] ss:$16 sps:$4 sm:$0xff]   ;;  %v7934_v33 = vld [vmem:[#allocation9 + $0x12c] ss:$16 sps:$4 sm:$0xff]  }
 0x407   : > { %6406 = vmatmul.mubr.bf16.vlgmr.msra.gmra.mxu1 %v9236_v62  ;;  %6416 = vmatprep.subr.bf16.mxu0 %v7856_v2  ;;  %v7929_v2 = vld [vmem:[#allocation9 + $0x348] ss:$16 sps:$4 sm:$0xff]  }
 0x408   : > { %6456 = vmatpush1.bf16.msra.mxu1 %v7851_v42  ;;  %6487 = vmatprep.mubr.bf16.mxu1 %v9206_v20  ;;  %v7872_v20 = vld [vmem:[#allocation9 + $0x68] ss:$16 sps:$4 sm:$0xff]   ;;  %v7937_v42 = vld [vmem:[#allocation9 + $0x32c] ss:$16 sps:$4 sm:$0xff]  }
 0x409   : > { %6457 = vmatprep.subr.bf16.mxu1 %v7859_v41  ;;  %v7932_v41 = vld [vmem:[#allocation9 + $0x128] ss:$16 sps:$4 sm:$0xff]  }
 0x40a   : > { %6417 = vmatpush1.bf16.msra.mxu0 %v7854_v3  ;;  %v7940_v3 = vld [vmem:[#allocation9 + $0x10c] ss:$16 sps:$4 sm:$0xff]  }
 0x40b   : > { %6418 = vmatprep.subr.bf16.mxu0 %v7862_v34  ;;  %v7935_v34 = vld [vmem:[#allocation9 + $0x328] ss:$16 sps:$4 sm:$0xff]  }
 0x40c   : > { %6458 = vmatpush1.bf16.msra.mxu1 %v7857_v1  ;;  %v7943_v1 = vld [vmem:[#allocation9 + $0x30c] ss:$16 sps:$4 sm:$0xff]  }
 0x40d   : > { %6459 = vmatprep.subr.bf16.mxu1 %v7865_v4  ;;  %v7938_v4 = vld [vmem:[#allocation9 + $0x108] ss:$16 sps:$4 sm:$0xff]  }
 0x40e   : > { %6419 = vmatpush1.bf16.msra.mxu0 %v7860_v5  ;;  %v7946_v5 = vld [vmem:[#allocation9 + $0x4ec] ss:$16 sps:$4 sm:$0xff]  }
 0x40f   : > { %6420 = vmatprep.subr.bf16.mxu0 %v7868_v52  ;;  %v7941_v52 = vld [vmem:[#allocation9 + $0x308] ss:$16 sps:$4 sm:$0xff]  }
 0x410   : > { %6460 = vmatpush1.bf16.msra.mxu1 %v7863_v7  ;;  %v7949_v7 = vld [vmem:[#allocation9 + $0x6ec] ss:$16 sps:$4 sm:$0xff]  }
 0x411   : > { %6461 = vmatprep.subr.bf16.mxu1 %v7871_v8  ;;  %v7944_v8 = vld [vmem:[#allocation9 + $0x4e8] ss:$16 sps:$4 sm:$0xff]  }
 0x412   : > { %6421 = vmatpush1.bf16.msra.mxu0 %v7866_v10  ;;  %v7952_v10 = vld [vmem:[#allocation9 + $0x4cc] ss:$16 sps:$4 sm:$0xff]  }
 0x413   : > { %6422 = vmatprep.subr.bf16.mxu0 %v7874_v9  ;;  %v7947_v9 = vld [vmem:[#allocation9 + $0x6e8] ss:$16 sps:$4 sm:$0xff]  }
 0x414   : > { %6462 = vmatpush1.bf16.msra.mxu1 %v7869_v12  ;;  %v7955_v12 = vld [vmem:[#allocation9 + $0x6cc] ss:$16 sps:$4 sm:$0xff]  }
 0x415   : > { %6463 = vmatprep.subr.bf16.mxu1 %v7877_v13  ;;  %v7950_v13 = vld [vmem:[#allocation9 + $0x4c8] ss:$16 sps:$4 sm:$0xff]  }
 0x416   : > { %6423 = vmatpush1.bf16.msra.mxu0 %v7872_v20  ;;  %v7958_v20 = vld [vmem:[#allocation9 + $0x4ac] ss:$16 sps:$4 sm:$0xff]  }
 0x417   : > { %6424 = vmatprep.subr.bf16.mxu0 %v7880_v11  ;;  %v7953_v11 = vld [vmem:[#allocation9 + $0x6c8] ss:$16 sps:$4 sm:$0xff]  }
 0x418   : > { %6464 = vmatpush1.bf16.msra.mxu1 %v7875_v16  ;;  %v7961_v16 = vld [vmem:[#allocation9 + $0x6ac] ss:$16 sps:$4 sm:$0xff]  }
 0x419   : > { %6465 = vmatprep.subr.bf16.mxu1 %v7883_v31  ;;  %v7956_v31 = vld [vmem:[#allocation9 + $0x4a8] ss:$16 sps:$4 sm:$0xff]  }
 0x41a   : > { %6425 = vmatpush1.bf16.msra.mxu0 %v7878_v15  ;;  %v7959_v15 = vld [vmem:[#allocation9 + $0x6a8] ss:$16 sps:$4 sm:$0xff]  }
 0x41b   : > { %6426 = vmatprep.subr.bf16.mxu0 %v7886_v19  ;;  %v7967_v19 = vld [vmem:[#allocation9 + $0x68c] ss:$16 sps:$4 sm:$0xff]  }
 0x41c   : > { %6466 = vmatpush1.bf16.msra.mxu1 %v7881_v23  ;;  %v7965_v23 = vld [vmem:[#allocation9 + $0x688] ss:$16 sps:$4 sm:$0xff]  }
 0x41d   : > { %6467 = vmatprep.subr.bf16.mxu1 %v7889_v43  ;;  %v7973_v43 = vld [vmem:[#allocation9 + $0x66c] ss:$16 sps:$4 sm:$0xff]  }
 0x41e   : > { %6427 = vmatpush1.bf16.msra.mxu0 %v7884_v24  ;;  %v7976_v24 = vld [vmem:[#allocation9 + $0x44c] ss:$16 sps:$4 sm:$0xff]  }
 0x41f   : > { %6428 = vmatprep.subr.bf16.mxu0 %v7892_v26  ;;  %v7971_v26 = vld [vmem:[#allocation9 + $0x668] ss:$16 sps:$4 sm:$0xff]  }
 0x420   : > { %6468 = vmatpush1.bf16.msra.mxu1 %v7887_v27  ;;  %v7979_v27 = vld [vmem:[#allocation9 + $0x64c] ss:$16 sps:$4 sm:$0xff]  }
 0x421   : > { %6469 = vmatprep.subr.bf16.mxu1 %v7895_v29  ;;  %v7974_v29 = vld [vmem:[#allocation9 + $0x448] ss:$16 sps:$4 sm:$0xff]  }
 0x422   : > { %6429 = vmatpush1.bf16.msra.mxu0 %v7890_v32  ;;  %v7982_v32 = vld [vmem:[#allocation9 + $0x42c] ss:$16 sps:$4 sm:$0xff]  }
 0x423   : > { %6430 = vmatprep.subr.bf16.mxu0 %v7898_v53  ;;  %v7977_v53 = vld [vmem:[#allocation9 + $0x648] ss:$16 sps:$4 sm:$0xff]  }
 0x424   : > { %6470 = vmatpush1.bf16.msra.mxu1 %v7893_v35  ;;  %v7985_v35 = vld [vmem:[#allocation9 + $0x62c] ss:$16 sps:$4 sm:$0xff]  }
 0x425   : > { %6471 = vmatprep.subr.bf16.mxu1 %v7901_v36  ;;  %v7980_v36 = vld [vmem:[#allocation9 + $0x428] ss:$16 sps:$4 sm:$0xff]  }
 0x426   : > { %6431 = vmatpush2.bf16.msra.mxu0 %v7896_v38  ;;  %v7988_v38 = vld [vmem:[#allocation9 + $0x40c] ss:$16 sps:$4 sm:$0xff]  }
 0x427   : > { %6432 = vmatprep.subr.bf16.mxu0 %v7904_v0  ;;  %v7983_v0 = vld [vmem:[#allocation9 + $0x628] ss:$16 sps:$4 sm:$0xff]  }
 0x428   : > { %6472 = vmatpush2.bf16.msra.mxu1 %v7899_v39  ;;  %v7991_v39 = vld [vmem:[#allocation9 + $0x60c] ss:$16 sps:$4 sm:$0xff]  }
 0x429   : > { %6473 = vmatprep.subr.bf16.mxu1 %v7907_v40  ;;  %v7986_v40 = vld [vmem:[#allocation9 + $0x408] ss:$16 sps:$4 sm:$0xff]  }
 0x42a   : > { %6433 = vmatpush2.bf16.msra.mxu0 %v7902_v55  ;;  %v7994_v55 = vld [vmem:[#allocation9 + $0x5ec] ss:$16 sps:$4 sm:$0xff]  }
 0x42b   : > { %6434 = vmatprep.subr.bf16.mxu0 %v7910_v54  ;;  %v7989_v54 = vld [vmem:[#allocation9 + $0x608] ss:$16 sps:$4 sm:$0xff]  }
 0x42c   : > { %6474 = vmatpush2.bf16.msra.mxu1 %v7905_v46  ;;  %v7997_v46 = vld [vmem:[#allocation9 + $0x7ec] ss:$16 sps:$4 sm:$0xff]  }
 0x42d   : > { %6475 = vmatprep.subr.bf16.mxu1 %v7913_v58  ;;  %v7992_v58 = vld [vmem:[#allocation9 + $0x5e8] ss:$16 sps:$4 sm:$0xff]  }
 0x42e   : > { %6435 = vmatpush2.bf16.msra.mxu0 %v7908_v25  ;;  %v8000_v25 = vld [vmem:[#allocation9 + $0x5cc] ss:$16 sps:$4 sm:$0xff]  }
 0x42f   : > { %6436 = vmatprep.subr.bf16.mxu0 %v7916_v44  ;;  %v7995_v44 = vld [vmem:[#allocation9 + $0x7e8] ss:$16 sps:$4 sm:$0xff]  }
 0x430   : > { %6476 = vmatpush2.bf16.msra.mxu1 %v7911_v45  ;;  %v8003_v45 = vld [vmem:[#allocation9 + $0x7cc] ss:$16 sps:$4 sm:$0xff]  }
 0x431   : > { %6477 = vmatprep.subr.bf16.mxu1 %v7919_v47  ;;  %v7998_v47 = vld [vmem:[#allocation9 + $0x5c8] ss:$16 sps:$4 sm:$0xff]  }
 0x432   : > { %6437 = vmatpush2.bf16.msra.mxu0 %v7914_v48  ;;  %v8006_v48 = vld [vmem:[#allocation9 + $0x5ac] ss:$16 sps:$4 sm:$0xff]  }
 0x433   : > { %6438 = vmatprep.subr.bf16.mxu0 %v7922_v60  ;;  %v8001_v60 = vld [vmem:[#allocation9 + $0x7c8] ss:$16 sps:$4 sm:$0xff]  }
 0x434   : > { %6478 = vmatpush2.bf16.msra.mxu1 %v7917_v63  ;;  %v8009_v63 = vld [vmem:[#allocation9 + $0x7ac] ss:$16 sps:$4 sm:$0xff]  }
 0x435   : > { %6479 = vmatprep.subr.bf16.mxu1 %v7925_v49  ;;  %v8004_v49 = vld [vmem:[#allocation9 + $0x5a8] ss:$16 sps:$4 sm:$0xff]  }
 0x436   : > { %6439 = vmatpush2.bf16.msra.mxu0 %v7920_v22  ;;  %v8012_v22 = vld [vmem:[#allocation9 + $0x58c] ss:$16 sps:$4 sm:$0xff]  }
 0x437   : > { %6440 = vmatprep.subr.bf16.mxu0 %v7928_v51  ;;  %v8007_v51 = vld [vmem:[#allocation9 + $0x7a8] ss:$16 sps:$4 sm:$0xff]  }
 0x438   : > { %6480 = vmatpush2.bf16.msra.mxu1 %v7923_v56  ;;  %v8015_v56 = vld [vmem:[#allocation9 + $0x78c] ss:$16 sps:$4 sm:$0xff]  }
 0x439   : > { %6481 = vmatprep.subr.bf16.mxu1 %v7931_v57  ;;  %v8010_v57 = vld [vmem:[#allocation9 + $0x588] ss:$16 sps:$4 sm:$0xff]  }
 0x43a   : > { %6441 = vmatpush2.bf16.msra.mxu0 %v7926_v61  ;;  %v8018_v61 = vld [vmem:[#allocation9 + $0x56c] ss:$16 sps:$4 sm:$0xff]  }
 0x43b   : > { %6442 = vmatprep.subr.bf16.mxu0 %v7934_v33  ;;  %v8013_v33 = vld [vmem:[#allocation9 + $0x788] ss:$16 sps:$4 sm:$0xff]  }
 0x43c   : > { %6482 = vmatpush2.bf16.msra.mxu1 %v7929_v2  ;;  %v8021_v2 = vld [vmem:[#allocation9 + $0x76c] ss:$16 sps:$4 sm:$0xff]  }
 0x43d   : > { %6483 = vmatprep.subr.bf16.mxu1 %v7937_v42  ;;  %v8016_v42 = vld [vmem:[#allocation9 + $0x568] ss:$16 sps:$4 sm:$0xff]  }
 0x43e   : > { %6443 = vmatpush2.bf16.msra.mxu0 %v7932_v41  ;;  %v8024_v41 = vld [vmem:[#allocation9 + $0x54c] ss:$16 sps:$4 sm:$0xff]  }
 0x43f   : > { %6444 = vmatprep.subr.bf16.mxu0 %v7940_v3  ;;  %v8019_v3 = vld [vmem:[#allocation9 + $0x768] ss:$16 sps:$4 sm:$0xff]  }
 0x440   : > { %6484 = vmatpush2.bf16.msra.mxu1 %v7935_v34  ;;  %v8027_v34 = vld [vmem:[#allocation9 + $0x74c] ss:$16 sps:$4 sm:$0xff]  }
 0x441   : > { %6485 = vmatprep.subr.bf16.mxu1 %v7943_v1  ;;  %v8022_v1 = vld [vmem:[#allocation9 + $0x548] ss:$16 sps:$4 sm:$0xff]  }
 0x442   : > { %6445 = vmatpush2.bf16.msra.mxu0 %v7938_v4  ;;  %v8030_v4 = vld [vmem:[#allocation9 + $0x52c] ss:$16 sps:$4 sm:$0xff]  }
 0x443   : > { %6496 = vmatprep.subr.bf16.mxu0 %v7946_v5  ;;  %v8025_v5 = vld [vmem:[#allocation9 + $0x748] ss:$16 sps:$4 sm:$0xff]  }
 0x444   : > { %6486 = vmatpush2.bf16.msra.mxu1 %v7941_v52  ;;  %v8033_v52 = vld [vmem:[#allocation9 + $0x72c] ss:$16 sps:$4 sm:$0xff]  }
 0x445   : > { %6447 = vmatmul.mubr.bf16.vlgmr.msra.gmra.mxu0 %v9199_v6  ;;  %6537 = vmatprep.subr.bf16.mxu1 %v7949_v7  ;;  %v7964_v6 = vld [vmem:[#allocation9 + $0x48c] ss:$16 sps:$4 sm:$0xff]   ;;  %v8028_v7 = vld [vmem:[#allocation9 + $0x528] ss:$16 sps:$4 sm:$0xff]  }
 0x446   : > { %6497 = vmatpush1.bf16.msra.mxu0 %v7944_v8  ;;  %6528 = vmatprep.mubr.bf16.mxu0 %v9222_v28  ;;  %v7962_v28 = vld [vmem:[#allocation9 + $0x488] ss:$16 sps:$4 sm:$0xff]   ;;  %v8036_v8 = vld [vmem:[#allocation9 + $0x50c] ss:$16 sps:$4 sm:$0xff]  }
 0x447   : > { %6488 = vmatmul.mubr.bf16.vlgmr.msra.gmra.mxu1 %v9203_v14  ;;  %6498 = vmatprep.subr.bf16.mxu0 %v7952_v10  ;;  %v7970_v14 = vld [vmem:[#allocation9 + $0x46c] ss:$16 sps:$4 sm:$0xff]   ;;  %v8031_v10 = vld [vmem:[#allocation9 + $0x728] ss:$16 sps:$4 sm:$0xff]  }
 0x448   : > { %6538 = vmatpush1.bf16.msra.mxu1 %v7947_v9  ;;  %6569 = vmatprep.mubr.bf16.mxu1 %v9227_v30  ;;  %v7968_v30 = vld [vmem:[#allocation9 + $0x468] ss:$16 sps:$4 sm:$0xff]   ;;  %v8039_v9 = vld [vmem:[#allocation9 + $0x70c] ss:$16 sps:$4 sm:$0xff]  }
 0x449   : > { %6539 = vmatprep.subr.bf16.mxu1 %v7955_v12  ;;  %v8034_v12 = vld [vmem:[#allocation9 + $0x508] ss:$16 sps:$4 sm:$0xff]  }
 0x44a   : > { %6499 = vmatpush1.bf16.msra.mxu0 %v7950_v13  ;;  %v4948_v13 = vld [vmem:[#allocation10] sm:$0xf] }
 0x44b   : > { %6500 = vmatprep.subr.bf16.mxu0 %v7958_v20  ;;  %v8037_v20 = vld [vmem:[#allocation9 + $0x708] ss:$16 sps:$4 sm:$0xff]  }
 0x44c   : > { %6540 = vmatpush1.bf16.msra.mxu1 %v7953_v11  ;;  %v4953_v11 = vrot.slane %v4948_v13, %v9113_v17 }
 0x44d   : > { %6541 = vmatprep.subr.bf16.mxu1 %v7961_v16  ;;  %v4957_v16 = vrot.slane %v4948_v13, %v9116_v21 }
 0x44e   : > { %6501 = vmatpush1.bf16.msra.mxu0 %v7956_v31 }
 0x44f   : > { %6502 = vmatprep.subr.bf16.mxu0 %v7964_v6 }
 0x450   : > { %6542 = vmatpush1.bf16.msra.mxu1 %v7959_v15 }
 0x451   : > { %6543 = vmatprep.subr.bf16.mxu1 %v7967_v19 }
 0x452   : > { %6503 = vmatpush1.bf16.msra.mxu0 %v7962_v28 }
 0x453   : > { %6504 = vmatprep.subr.bf16.mxu0 %v7970_v14 }
 0x454   : > { %6544 = vmatpush1.bf16.msra.mxu1 %v7965_v23 }
 0x455   : > { %6545 = vmatprep.subr.bf16.mxu1 %v7973_v43 }
 0x456   : > { %6505 = vmatpush1.bf16.msra.mxu0 %v7968_v30 }
 0x457   : > { %6506 = vmatprep.subr.bf16.mxu0 %v7976_v24 }
 0x458   : > { %6546 = vmatpush1.bf16.msra.mxu1 %v7971_v26 }
 0x459   : > { %6547 = vmatprep.subr.bf16.mxu1 %v7979_v27 }
 0x45a   : > { %6507 = vmatpush1.bf16.msra.mxu0 %v7974_v29  ;;  %v6601_v29 = vld [vmem:[#allocation12] sm:$0xf] }
 0x45b   : > { %6508 = vmatprep.subr.bf16.mxu0 %v7982_v32 }
 0x45c   : > { %6548 = vmatpush1.bf16.msra.mxu1 %v7977_v53 }
 0x45d   : > { %6549 = vmatprep.subr.bf16.mxu1 %v7985_v35  ;;  %v6606_v35 = vrot.slane %v6601_v29, %v9113_v17 }
 0x45e   : > { %6509 = vmatpush1.bf16.msra.mxu0 %v7980_v36 }
 0x45f   : > { %6510 = vmatprep.subr.bf16.mxu0 %v7988_v38 }
 0x460   : > { %6550 = vmatpush1.bf16.msra.mxu1 %v7983_v0 }
 0x461   : > { %6551 = vmatprep.subr.bf16.mxu1 %v7991_v39 }
 0x462   : > { %6511 = vmatpush1.bf16.msra.mxu0 %v7986_v40 }
 0x463   : > { %6512 = vmatprep.subr.bf16.mxu0 %v7994_v55 }
 0x464   : > { %6552 = vmatpush1.bf16.msra.mxu1 %v7989_v54 }
 0x465   : > { %6553 = vmatprep.subr.bf16.mxu1 %v7997_v46 }
 0x466   : > { %6513 = vmatpush2.bf16.msra.mxu0 %v7992_v58 }
 0x467   : > { %6514 = vmatprep.subr.bf16.mxu0 %v8000_v25 }
 0x468   : > { %6554 = vmatpush2.bf16.msra.mxu1 %v7995_v44 }
 0x469   : > { %6555 = vmatprep.subr.bf16.mxu1 %v8003_v45 }
 0x46a   : > { %6515 = vmatpush2.bf16.msra.mxu0 %v7998_v47 }
 0x46b   : > { %6516 = vmatprep.subr.bf16.mxu0 %v8006_v48 }
 0x46c   : > { %6556 = vmatpush2.bf16.msra.mxu1 %v8001_v60 }
 0x46d   : > { %6557 = vmatprep.subr.bf16.mxu1 %v8009_v63 }
 0x46e   : > { %6517 = vmatpush2.bf16.msra.mxu0 %v8004_v49 }
 0x46f   : > { %6518 = vmatprep.subr.bf16.mxu0 %v8012_v22 }
 0x470   : > { %6558 = vmatpush2.bf16.msra.mxu1 %v8007_v51 }
 0x471   : > { %6559 = vmatprep.subr.bf16.mxu1 %v8015_v56 }
 0x472   : > { %6519 = vmatpush2.bf16.msra.mxu0 %v8010_v57 }
 0x473   : > { %6520 = vmatprep.subr.bf16.mxu0 %v8018_v61  ;;  %v4961_v61 = vrot.slane %v4948_v13, %v9119_v37 }
 0x474   : > { %6560 = vmatpush2.bf16.msra.mxu1 %v8013_v33  ;;  %v4965_v33 = vrot.slane %v4948_v13, %v9122_v18 }
 0x475   : > { %6561 = vmatprep.subr.bf16.mxu1 %v8021_v2 }
 0x476   : > { %6521 = vmatpush2.bf16.msra.mxu0 %v8016_v42 }
 0x477   : > { %6522 = vmatprep.subr.bf16.mxu0 %v8024_v41 }
 0x478   : > { %6562 = vmatpush2.bf16.msra.mxu1 %v8019_v3 }
 0x479   : > { %6563 = vmatprep.subr.bf16.mxu1 %v8027_v34 }
 0x47a   : > { %6523 = vmatpush2.bf16.msra.mxu0 %v8022_v1 }
 0x47b   : > { %6524 = vmatprep.subr.bf16.mxu0 %v8030_v4  ;;  %v6614_v4 = vrot.slane %v6601_v29, %v9119_v37 }
 0x47c   : > { %6564 = vmatpush2.bf16.msra.mxu1 %v8025_v5 }
 0x47d   : > { %6565 = vmatprep.subr.bf16.mxu1 %v8033_v52 }
 0x47e   : > { %6525 = vmatpush2.bf16.msra.mxu0 %v8028_v7 }
 0x47f   : > { %6526 = vmatprep.subr.bf16.mxu0 %v8036_v8 }
 0x480   : > { %6566 = vmatpush2.bf16.msra.mxu1 %v8031_v10  ;;  %v6618_v10 = vrot.slane %v6601_v29, %v9122_v18 }
 0x481   : > { %6567 = vmatprep.subr.bf16.mxu1 %v8039_v9 }
 0x482   : > { %6527 = vmatpush2.bf16.msra.mxu0 %v8034_v12 }
 0x484   : > { %6568 = vmatpush2.bf16.msra.mxu1 %v8037_v20 }
 0x485   : > { %6529 = vmatmul.mubr.bf16.vlgmr.msra.gmra.mxu0 %v9232_v59  ;;  %v6284_v31 = vpop.f32.mrf.mxu0 }
 0x486   : > { %v6285_v6 = vadd.f32 %v6284_v31, %v4953_v11 }
 0x487   : > { %6570 = vmatmul.mubr.bf16.vlgmr.msra.gmra.mxu1 %v9236_v62  ;;  %v6286_v15 = vpop.f32.mrf.mxu0  ;;  %v6325_v19 = vpop.f32.mrf.mxu1  ;;  %v6610_v62 = vrot.slane %v6601_v29, %v9116_v21 }
 0x488   : > { %v6287_v28 = vadd.f32 %v6286_v15, %v4957_v16  ;;  %v6326_v14 = vadd.f32 %v6325_v19, %v6285_v6 }
 0x489   : > { %v6288_v23 = vpop.f32.mrf.mxu0  ;;  %v6327_v43 = vpop.f32.mrf.mxu1 }
 0x48a   : > { %v6328_v30 = vadd.f32 %v6327_v43, %v6287_v28 }
 0x48b   : > { %v6289_v24 = vpop.f32.mrf.mxu0  ;;  %v6329_v26 = vpop.f32.mrf.mxu1 }
 0x48d   : > { %v6330_v27 = vpop.f32.mrf.mxu1 }
 0x4c5   : > { %v6366_v32 = vpop.f32.mrf.mxu0 }
 0x4c6   : > { %v6367_v53 = vadd.f32 %v6366_v32, %v6326_v14 }
 0x4c7   : > { %v6368_v59 = vpop.f32.mrf.mxu0  ;;  %v6407_v36 = vpop.f32.mrf.mxu1 }
 0x4c8   : > { %v6369_v38 = vadd.f32 %v6368_v59, %v6328_v30  ;;  %v6408_v0 = vadd.f32 %v6407_v36, %v6367_v53  ;;  %v7554_v30 = vld [vmem:[#allocation3] ss:$0 sm:$0xff] }
 0x4c9   : > { %v6370_v39 = vpop.f32.mrf.mxu0  ;;  %v6409_v40 = vpop.f32.mrf.mxu1 }
 0x4ca   : > { %v6623_v55 = vmul.f32 %v6606_v35, %v6408_v0  ;;  %v6410_v54 = vadd.f32 %v6409_v40, %v6369_v38 }
 0x4cb   : > { %v6371_v46 = vpop.f32.mrf.mxu0  ;;  %v6411_v58 = vpop.f32.mrf.mxu1 }
 0x4cc   : > { %v6582_v25 = vcombine.low %v6408_v0, %v6410_v54  ;;  %v6624_v44 = vmul.f32 %v6610_v62, %v6410_v54  ;;  %v6627_v47 = vsel %vm4350_vm0, %v6623_v55, 0.0 }
 0x4cd   : > { %v6412_v45 = vpop.f32.mrf.mxu1 }
 0x4ce   : > { %v6628_v48 = vsel %vm4350_vm0, %v6624_v44, 0.0  ;;  %v6590_v37 = vrot.slane %v6582_v25, %v9052_v50 }
 0x4cf   : > { %v6629_v17 = vadd.f32 %v6628_v48, %v6627_v47 }
 0x505   : > { %v6448_v60 = vpop.f32.mrf.mxu0 }
 0x506   : > { %v6449_v2 = vadd.f32 %v6448_v60, %v4961_v61 }
 0x507   : > { %v6450_v63 = vpop.f32.mrf.mxu0  ;;  %v6489_v49 = vpop.f32.mrf.mxu1 }
 0x508   : > { %v6451_v42 = vadd.f32 %v6450_v63, %v4965_v33  ;;  %v6490_v41 = vadd.f32 %v6489_v49, %v6449_v2 }
 0x509   : > { %v6452_v22 = vpop.f32.mrf.mxu0  ;;  %v6491_v51 = vpop.f32.mrf.mxu1 }
 0x50a   : > { %v6492_v34 = vadd.f32 %v6491_v51, %v6451_v42 }
 0x50b   : > { %v6453_v21 = vpop.f32.mrf.mxu0  ;;  %v6493_v56 = vpop.f32.mrf.mxu1 }
 0x50d   : > { %v6494_v57 = vpop.f32.mrf.mxu1 }
 0x545   : > { %v6530_v3 = vpop.f32.mrf.mxu0 }
 0x546   : > { %v6531_v1 = vadd.f32 %v6530_v3, %v6490_v41 }
 0x547   : > { %v6532_v5 = vpop.f32.mrf.mxu0  ;;  %v6571_v52 = vpop.f32.mrf.mxu1 }
 0x548   : > { %v6533_v7 = vadd.f32 %v6532_v5, %v6492_v34  ;;  %v6572_v8 = vadd.f32 %v6571_v52, %v6531_v1 }
 0x549   : > { %v6534_v9 = vpop.f32.mrf.mxu0  ;;  %v6573_v12 = vpop.f32.mrf.mxu1 }
 0x54a   : > { %v6625_v20 = vmul.f32 %v6614_v4, %v6572_v8  ;;  %v6574_v11 = vadd.f32 %v6573_v12, %v6533_v7 }
 0x54b   : > { %v6535_v16 = vpop.f32.mrf.mxu0  ;;  %v6575_v13 = vpop.f32.mrf.mxu1 }
 0x54c   : > { %v6583_v31 = vcombine.low %v6572_v8, %v6574_v11  ;;  %v6626_v6 = vmul.f32 %v6618_v10, %v6574_v11  ;;  %v6630_v15 = vsel %vm4350_vm0, %v6625_v20, 0.0 }
 0x54d   : > { %v6576_v19 = vpop.f32.mrf.mxu1  ;;  %v6631_v28 = vadd.f32 %v6630_v15, %v6629_v17 }
 0x54e   : > { %v6597_v14 = vrot.slane %v6583_v31, %v9052_v50  ;;  %v6632_v23 = vsel %vm4350_vm0, %v6626_v6, 0.0 }
 0x54f   : > { %v6633_v43 = vadd.f32 %v6632_v23, %v6631_v28 }
 0x550   : > { %v6598_v18 = vcombine.low %v6590_v37, %v6597_v14 }
 0x551   : > { %6634 = vadd.xlane.f32.xlu0 %v6633_v43 }
 0x552   : > { %6600 = vst [vmem:[#allocation13] sm:$0xff] %v6598_v18 }
 0x5da   : > { %v6635_v24 = vpop.xlane.xlu0 %6634 }
 0x5db   : > { %v6643_v26 = vadd.f32 %v7554_v30, %v6635_v24 }
 0x5dd   : > { %v6644_v27 = vand.u32 2147483647, %v6643_v26  ;;  %vm6648_vm4 = vcmp.ge.f32.partialorder %v6643_v26, 0.0 }
 0x5df   : > { %v6645_v29 = vsub.f32 0.0, %v6644_v27 }
 0x5e1   : > { %v6646_v32 = vmul.f32 1.442695, %v6645_v29 }
 0x5e3   : > { %8056 = vpow2.f32 %v6646_v32 }
 0x5f0   : > { %v8057_v53 = vpop.eup %8056 }
 0x5f1   : > { %v6649_v35 = vadd.f32 1.0, %v8057_v53 }
 0x5f3   : > { %8058 = vrcp.f32 %v6649_v35 }
 0x600   : > { %v8059_v59 = vpop.eup %8058 }
 0x601   : > { %v6652_v36 = vmul.f32 %v8059_v59, %v8057_v53 }
 0x603   : > { %v6653_v50 = vsel %vm6648_vm4, %v8059_v59, %v6652_v36 }
 0x604   : > { %6655 = vst.msk [vmem:[%s9298_s8] sm:$0x3] %vm6654_vm3, %v6653_v50 }
 0x605 PF: > { %p7609_p0 = scmp.eq.s32.totalorder %s8344_s6, 7  ;;  %s8276_s17 = smov [#allocation13]  }
 0x606   : > { %s6663_s24 = sshll.u32 %s8276_s17, 4  ;;  %s6664_s24 = int_to_ptr.vmem [resolvable:$true] %s6663_s24 }
 0x607   : > { %s8192_s25 = scalar_lea.vmem %s6664_s24, 128  ;;  %p8199_p3 = scmp.lt.s32.totalorder %s6664_s24, %s6664_s24 }
 0x608   : > { %p8193_p1 = scmp.ne.s32.totalorder %s6664_s24, %s8192_s25  ;;  %p8200_p2 = scmp.lt.s32.totalorder %s8192_s25, %s8192_s25 }
 0x60a   : > { %p8194_p5 = pnand %p8193_p1, %p7609_p0  ;;  %p8201_p7 = por %p8200_p2, %p8199_p3 }
 0x60c   : > { %p8195_p6 = pneg %p8194_p5 }
 0x60e   : > { %p8202_p10 = pnand %p8201_p7, %p8195_p6 }
 0x610   : > { %8205 = shalt.err (!%p8202_p10)
}
 0x611   : > { %7580 = dma.vmem_to_hbm [thread:$0]  (%p7609_p0), %s6664_s24, 128, %s9297_s7, [#allocation6]  }
 0x612   : > { %8245 = dma.done.wait (%p7609_p0), [#allocation6], 128  }
 0x613   : > { %8247 = vsyncadd (%p7609_p0), [#allocation6], 4294967168 }
 0x614 PF: > { %p24_p8 = scmp.ge.s32.totalorder %s8411_s19, 10   ;;  %s9313_s29 = smov %s8254_s30 }
 0x615   : > { %s9314_s30 = smov %s8258_s9  ;;  %s9315_s9 = smov %s8422_s23 }
 0x616   : > { %s9316_s10 = smov %s8411_s19  ;;  %26 = sbr.rel (!%p24_p8) target bundleno = 9 (0x9), region = 120 }
 0x61b   :  { %6682 = vsyncpa [#allocation5], 1 }
 0x61c   :  { %6684 = vsyncpa [#allocation5 + $0x1], 1 }
 0x61d   :  { %6685 = vsyncpa [#allocation8], 1 }
 0x61e   :  { %6686 = vsyncpa [#allocation11], 1 }
 0x61f   :  { %6687 = vsyncpa [#allocation6], 1 }
 0x620   :  { %6689 = vsyncpa [#allocation6 + $0x1], 1 }

</bundles_post_ra>
